<compile_context>
chip_gen: v7x
topology: tpu7x:2x2x1
jax: 0.10.0
libtpu: 0.0.40
codegen_flags: <defaults>
</compile_context>

<pallas_src>
import jax
import jax.numpy as jnp
from jax.experimental import pallas as pl
from jax.experimental.pallas import tpu as pltpu

EPS = 1e-5


def fused_add_relu_conv_bn_kernel(x1_ref, x2_ref, w_ref, gamma_ref, beta_ref,
                                  out_ref, acc_ref):
    # x1_ref, x2_ref     : (tk,  R)   f32   (R = N*H*W on the lane axis)
    # w_ref              : (Cout, tk) f32   (cast to bf16 in-kernel for the MXU)
    # gamma_ref/beta_ref : (Cout, 1)  f32
    # out_ref            : (Cout, R)  f32   (constant block index -> resident)
    # acc_ref            : (Cout, R)  f32   VMEM scratch accumulator
    k = pl.program_id(0)

    @pl.when(k == 0)
    def _():
        acc_ref[...] = jnp.zeros_like(acc_ref)

    # add + ReLU in f32 (VPU), cast to bf16 only for the MXU operands.
    x = jnp.maximum(x1_ref[...] + x2_ref[...], 0.0).astype(jnp.bfloat16)
    w = w_ref[...].astype(jnp.bfloat16)

    # 1x1 conv as W @ X (MXU), f32 accumulation over the K grid axis.
    acc_ref[...] += jnp.dot(w, x, preferred_element_type=jnp.float32)

    @pl.when(k == pl.num_programs(0) - 1)
    def _():
        y = acc_ref[...]                                     # (Cout, R)
        inv_r = 1.0 / y.shape[1]

        # BatchNorm2d batch statistics (biased variance), one pass; clamp the
        # variance at 0 against f32 cancellation, fold gamma into the scale.
        s1 = jnp.sum(y, axis=1, keepdims=True)               # (Cout, 1)
        s2 = jnp.sum(y * y, axis=1, keepdims=True)           # (Cout, 1)
        mean = s1 * inv_r
        var = jnp.maximum(s2 * inv_r - mean * mean, 0.0)
        scale = jax.lax.rsqrt(var + EPS) * gamma_ref[...]    # (Cout, 1)
        shift = beta_ref[...] - mean * scale                 # (Cout, 1)

        out_ref[...] = y * scale + shift


def fused_forward(x478, x470, weight, gamma, beta):
    """x478, x470: (N, Cin, H, W); weight: (Cout, Cin, 1, 1); gamma/beta: (Cout,)."""
    N, Cin, H, W = x478.shape
    Cout = weight.shape[0]
    R = N * H * W

    # NCHW -> (Cin, R). Free reshape for N == 1 (no transpose); generic fallback
    # otherwise (perf hazard, but keeps correctness for N > 1).
    def to_cin_r(x):
        x = x.astype(jnp.float32)
        if N == 1:
            return x.reshape(Cin, R)
        return jnp.moveaxis(x, 1, 0).reshape(Cin, R)

    x1 = to_cin_r(x478)
    x2 = to_cin_r(x470)
    w = weight.reshape(Cout, Cin).astype(jnp.float32)   # stays f32: no wrapper convert
    g = gamma.reshape(Cout, 1).astype(jnp.float32)
    b = beta.reshape(Cout, 1).astype(jnp.float32)

    # K-axis tiling: 512-wide chunks (2 steps for Cin=1024); fall back to gridless
    # if Cin does not divide cleanly.
    TK = 512 if (Cin % 512 == 0) else Cin
    kt = Cin // TK

    cost = pl.CostEstimate(
        flops=2 * R * Cin * Cout + 8 * R * (Cin + Cout),     # matmul + add/relu/BN epilogue
        transcendentals=Cout,                                # rsqrt per channel
        bytes_accessed=(x1.size + x2.size + w.size) * 4
                       + (g.size + b.size) * 4 + R * Cout * 4,
    )

    out = pl.pallas_call(
        fused_add_relu_conv_bn_kernel,
        out_shape=jax.ShapeDtypeStruct((Cout, R), jnp.float32),
        grid_spec=pltpu.PrefetchScalarGridSpec(
            num_scalar_prefetch=0,
            grid=(kt,),
            in_specs=[
                pl.BlockSpec((TK, R), lambda k: (k, 0)),      # x1 block
                pl.BlockSpec((TK, R), lambda k: (k, 0)),      # x2 block
                pl.BlockSpec((Cout, TK), lambda k: (0, k)),   # weight block (f32)
                pl.BlockSpec((Cout, 1), lambda k: (0, 0)),    # gamma (fetched once)
                pl.BlockSpec((Cout, 1), lambda k: (0, 0)),    # beta  (fetched once)
            ],
            out_specs=pl.BlockSpec((Cout, R), lambda k: (0, 0)),
            scratch_shapes=[pltpu.VMEM((Cout, R), jnp.float32)],
        ),
        compiler_params=pltpu.CompilerParams(
            dimension_semantics=("arbitrary",)),
        cost_estimate=cost,
    )(x1, x2, w, g, b)

    # (Cout, R) -> NCHW. Free reshape for N == 1.
    if N == 1:
        return out.reshape(1, Cout, H, W)
    return jnp.moveaxis(out.reshape(Cout, N, H, W), 0, 1)


if __name__ == "__main__":
    # Shapes implied by the module: Conv2d(1024, 512, 1x1) on (1, 1024, 14, 14) inputs.
    N, Cin, Cout, H, W = 1, 1024, 512, 14, 14

    key = jax.random.PRNGKey(0)
    k1, k2, k3 = jax.random.split(key, 3)

    x478 = jax.random.normal(k1, (N, Cin, H, W), dtype=jnp.float32)
    x470 = jax.random.normal(k2, (N, Cin, H, W), dtype=jnp.float32)

    weight = 0.05 * jax.random.normal(k3, (Cout, Cin, 1, 1), dtype=jnp.float32)
    gamma = jnp.ones((Cout,), dtype=jnp.float32)   # BatchNorm affine weight init
    beta = jnp.zeros((Cout,), dtype=jnp.float32)   # BatchNorm affine bias init

    out = jax.block_until_ready(fused_forward(x478, x470, weight, gamma, beta))
    assert out.shape == (N, Cout, H, W)

    # Reference 1: same numerics as the kernel (bf16 matmul operands, f32 accumulate).
    x = jnp.maximum(x478 + x470, 0.0)
    xm = x.reshape(Cin, H * W).astype(jnp.bfloat16)
    wm = weight.reshape(Cout, Cin).astype(jnp.bfloat16)
    y = jnp.dot(wm, xm, preferred_element_type=jnp.float32)
    mean = jnp.mean(y, axis=1, keepdims=True)
    var = jnp.mean((y - mean) ** 2, axis=1, keepdims=True)
    ref = ((y - mean) * jax.lax.rsqrt(var + EPS) * gamma[:, None] + beta[:, None])
    ref = ref.reshape(N, Cout, H, W)
    assert jnp.allclose(out, ref, atol=2e-3, rtol=2e-3)

    # Reference 2: full-f32 module semantics (loose tolerance; the only difference is
    # the bf16 cast of the matmul operands, BN normalization bounds the deviation).
    yf = jnp.einsum("nchw,oc->nohw", x, weight.reshape(Cout, Cin))
    mf = jnp.mean(yf, axis=(0, 2, 3), keepdims=True)
    vf = jnp.mean((yf - mf) ** 2, axis=(0, 2, 3), keepdims=True)
    reff = (yf - mf) * jax.lax.rsqrt(vf + EPS) * gamma.reshape(1, Cout, 1, 1) \
           + beta.reshape(1, Cout, 1, 1)
    assert jnp.allclose(out, reff, atol=5e-2, rtol=5e-2)

    print("KERNEL_OK")
</pallas_src>

<mosaic_0001>
module attributes {stable_mosaic.version = 11 : i64} {
  func.func @fused_add_relu_conv_bn_kernel(%arg0: i32, %arg1: memref<512x196xf32, #tpu.memory_space<vmem>>, %arg2: memref<512x196xf32, #tpu.memory_space<vmem>>, %arg3: memref<512x512xf32, #tpu.memory_space<vmem>>, %arg4: memref<512x1xf32, #tpu.memory_space<vmem>>, %arg5: memref<512x1xf32, #tpu.memory_space<vmem>>, %arg6: memref<512x196xf32, #tpu.memory_space<vmem>>, %arg7: memref<512x196xf32, #tpu.memory_space<vmem>>) attributes {dimension_semantics = [#tpu.dimension_semantics<arbitrary>], iteration_bounds = array<i64: 2>, scalar_prefetch = 0 : i64, scratch_operands = 1 : i64, tpu.core_type = #tpu.core_type<tc>, window_params = [{transform_indices = @transform_0, window_bounds = array<i64: 512, 196>}, {transform_indices = @transform_1, window_bounds = array<i64: 512, 196>}, {transform_indices = @transform_2, window_bounds = array<i64: 512, 512>}, {pipeline_mode = #tpu.pipeline_mode<synchronous>, transform_indices = @transform_3, window_bounds = array<i64: 512, 1>}, {pipeline_mode = #tpu.pipeline_mode<synchronous>, transform_indices = @transform_4, window_bounds = array<i64: 512, 1>}, {pipeline_mode = #tpu.pipeline_mode<synchronous>, transform_indices = @transform_5, window_bounds = array<i64: 512, 196>}]} {
    %c0_i32 = arith.constant 0 : i32
    %0 = arith.cmpi eq, %arg0, %c0_i32 : i32
    %1 = arith.extui %0 : i1 to i32
    %c0_i32_0 = arith.constant 0 : i32
    %2 = arith.cmpi ne, %1, %c0_i32_0 : i32
    scf.if %2 {
      %cst_12 = arith.constant 0.000000e+00 : f32
      %18 = vector.broadcast %cst_12 : f32 to vector<512x196xf32>
      %c0_13 = arith.constant 0 : index
      %c0_14 = arith.constant 0 : index
      %19 = vector.load %arg7[%c0_13, %c0_14] : memref<512x196xf32, #tpu.memory_space<vmem>>, vector<512x196xf32>
      tpu.vector_store %arg7[%c0_13, %c0_14], %18 {strides = array<i32>} : memref<512x196xf32, #tpu.memory_space<vmem>>, vector<512x196xf32>,
    } else {
    }
    %c0 = arith.constant 0 : index
    %c0_1 = arith.constant 0 : index
    %3 = vector.load %arg1[%c0, %c0_1] : memref<512x196xf32, #tpu.memory_space<vmem>>, vector<512x196xf32>
    %c0_2 = arith.constant 0 : index
    %c0_3 = arith.constant 0 : index
    %4 = vector.load %arg2[%c0_2, %c0_3] : memref<512x196xf32, #tpu.memory_space<vmem>>, vector<512x196xf32>
    %5 = arith.addf %3, %4 : vector<512x196xf32>
    %cst = arith.constant 0.000000e+00 : f32
    %6 = vector.broadcast %cst : f32 to vector<512x196xf32>
    %7 = arith.maximumf %5, %6 : vector<512x196xf32>
    %8 = arith.truncf %7 : vector<512x196xf32> to vector<512x196xbf16>
    %c0_4 = arith.constant 0 : index
    %c0_5 = arith.constant 0 : index
    %9 = vector.load %arg3[%c0_4, %c0_5] : memref<512x512xf32, #tpu.memory_space<vmem>>, vector<512x512xf32>
    %10 = arith.truncf %9 : vector<512x512xf32> to vector<512x512xbf16>
    %c0_6 = arith.constant 0 : index
    %c0_7 = arith.constant 0 : index
    %11 = vector.load %arg7[%c0_6, %c0_7] : memref<512x196xf32, #tpu.memory_space<vmem>>, vector<512x196xf32>
    %cst_8 = arith.constant dense<0.000000e+00> : vector<512x196xf32>
    %12 = tpu.matmul %10, %8, %cst_8 {dimension_numbers = #tpu.dot_dimension_numbers<[1], [0], [0], [1], [0, 0, 1, 1], [], []>} : vector<512x512xbf16>, vector<512x196xbf16>, vector<512x196xf32> -> vector<512x196xf32>
    %13 = arith.addf %11, %12 : vector<512x196xf32>
    %c0_9 = arith.constant 0 : index
    %c0_10 = arith.constant 0 : index
    %14 = vector.load %arg7[%c0_9, %c0_10] : memref<512x196xf32, #tpu.memory_space<vmem>>, vector<512x196xf32>
    tpu.vector_store %arg7[%c0_9, %c0_10], %13 {strides = array<i32>} : memref<512x196xf32, #tpu.memory_space<vmem>>, vector<512x196xf32>,
    %c1_i32 = arith.constant 1 : i32
    %15 = arith.cmpi eq, %arg0, %c1_i32 : i32
    %16 = arith.extui %15 : i1 to i32
    %c0_i32_11 = arith.constant 0 : i32
    %17 = arith.cmpi ne, %16, %c0_i32_11 : i32
    scf.if %17 {
      %c0_12 = arith.constant 0 : index
      %c0_13 = arith.constant 0 : index
      %18 = vector.load %arg7[%c0_12, %c0_13] : memref<512x196xf32, #tpu.memory_space<vmem>>, vector<512x196xf32>
      %cst_14 = arith.constant dense<0.000000e+00> : vector<512xf32>
      %19 = vector.multi_reduction <add>, %18, %cst_14 [1] : vector<512x196xf32> to vector<512xf32>
      %20 = vector.shape_cast %19 : vector<512xf32> to vector<512x1xf32>
      %21 = arith.mulf %18, %18 : vector<512x196xf32>
      %cst_15 = arith.constant dense<0.000000e+00> : vector<512xf32>
      %22 = vector.multi_reduction <add>, %21, %cst_15 [1] : vector<512x196xf32> to vector<512xf32>
      %23 = vector.shape_cast %22 : vector<512xf32> to vector<512x1xf32>
      %cst_16 = arith.constant 0.00510204071 : f32
      %24 = vector.broadcast %cst_16 : f32 to vector<512x1xf32>
      %25 = arith.mulf %20, %24 : vector<512x1xf32>
      %cst_17 = arith.constant 0.00510204071 : f32
      %26 = vector.broadcast %cst_17 : f32 to vector<512x1xf32>
      %27 = arith.mulf %23, %26 : vector<512x1xf32>
      %28 = arith.mulf %25, %25 : vector<512x1xf32>
      %29 = arith.subf %27, %28 : vector<512x1xf32>
      %cst_18 = arith.constant 0.000000e+00 : f32
      %30 = vector.broadcast %cst_18 : f32 to vector<512x1xf32>
      %31 = arith.maximumf %29, %30 : vector<512x1xf32>
      %cst_19 = arith.constant 9.99999974E-6 : f32
      %32 = vector.broadcast %cst_19 : f32 to vector<512x1xf32>
      %33 = arith.addf %31, %32 : vector<512x1xf32>
      %34 = math.rsqrt %33 : vector<512x1xf32>
      %c0_20 = arith.constant 0 : index
      %c0_21 = arith.constant 0 : index
      %35 = vector.load %arg4[%c0_20, %c0_21] : memref<512x1xf32, #tpu.memory_space<vmem>>, vector<512x1xf32>
      %36 = arith.mulf %34, %35 : vector<512x1xf32>
      %c0_22 = arith.constant 0 : index
      %c0_23 = arith.constant 0 : index
      %37 = vector.load %arg5[%c0_22, %c0_23] : memref<512x1xf32, #tpu.memory_space<vmem>>, vector<512x1xf32>
      %38 = arith.mulf %25, %36 : vector<512x1xf32>
      %39 = arith.subf %37, %38 : vector<512x1xf32>
      %40 = vector.broadcast %36 : vector<512x1xf32> to vector<512x196xf32>
      %41 = arith.mulf %18, %40 : vector<512x196xf32>
      %42 = vector.broadcast %39 : vector<512x1xf32> to vector<512x196xf32>
      %43 = arith.addf %41, %42 : vector<512x196xf32>
      %c0_24 = arith.constant 0 : index
      %c0_25 = arith.constant 0 : index
      %44 = vector.load %arg6[%c0_24, %c0_25] : memref<512x196xf32, #tpu.memory_space<vmem>>, vector<512x196xf32>
      tpu.vector_store %arg6[%c0_24, %c0_25], %43 {strides = array<i32>} : memref<512x196xf32, #tpu.memory_space<vmem>>, vector<512x196xf32>,
    } else {
    }
    return
  }
  func.func @transform_0(%arg0: i32) -> (i32, i32) {
    %c0_i32 = arith.constant 0 : i32
    %c0_i32_0 = arith.constant 0 : i32
    return %arg0, %c0_i32 : i32, i32
  }
  func.func @transform_1(%arg0: i32) -> (i32, i32) {
    %c0_i32 = arith.constant 0 : i32
    %c0_i32_0 = arith.constant 0 : i32
    return %arg0, %c0_i32 : i32, i32
  }
  func.func @transform_2(%arg0: i32) -> (i32, i32) {
    %c0_i32 = arith.constant 0 : i32
    %c0_i32_0 = arith.constant 0 : i32
    return %c0_i32, %arg0 : i32, i32
  }
  func.func @transform_3(%arg0: i32) -> (i32, i32) {
    %c0_i32 = arith.constant 0 : i32
    %c0_i32_0 = arith.constant 0 : i32
    %c0_i32_1 = arith.constant 0 : i32
    return %c0_i32, %c0_i32_0 : i32, i32
  }
  func.func @transform_4(%arg0: i32) -> (i32, i32) {
    %c0_i32 = arith.constant 0 : i32
    %c0_i32_0 = arith.constant 0 : i32
    %c0_i32_1 = arith.constant 0 : i32
    return %c0_i32, %c0_i32_0 : i32, i32
  }
  func.func @transform_5(%arg0: i32) -> (i32, i32) {
    %c0_i32 = arith.constant 0 : i32
    %c0_i32_0 = arith.constant 0 : i32
    %c0_i32_1 = arith.constant 0 : i32
    return %c0_i32, %c0_i32_0 : i32, i32
  }
}

</mosaic_0001>

<bundles_post_ra>
// kernel: tpu_custom_call.1
= control target key start
LH: loop header
LB: loop body
LE: loop exit
PB: predicated region body
PF: predicated region fallthrough
CT: control target
= control target key end

     0   :  { %s6086_s18 = smov 0   ;;  %s6088_s19 = smov 0   ;;  %s10058_s0 = inlined_call_operand.vmem [shape: f32[1024,196], index: 0, kind: input, shape index: {}]   ;;  %s10059_s1 = inlined_call_operand.vmem [shape: f32[1024,196], index: 1, kind: input, shape index: {}]   ;;  %s10060_s2 = inlined_call_operand.vmem [shape: f32[512,1024], index: 2, kind: input, shape index: {}]   ;;  %s10061_s3 = inlined_call_operand.vmem [shape: f32[512,1], index: 3, kind: input, shape index: {}]   ;;  %s10062_s4 = inlined_call_operand.vmem [shape: f32[512,1], index: 4, kind: input, shape index: {}]   ;;  %s10063_s5 = inlined_call_operand.vmem [shape: f32[512,196], index: 5, kind: output, shape index: {}]  }
   0x1   :  { %s6090_s20 = smov 0  }
   0x2 LB: > { %s6102_s21 = sadd.s32 4294967295, %s6052_s20   ;;  %s6105_s22 = sadd.s32 1, %s6052_s20   ;;  %s6052_s20 = sphi %s6090_s20, %s10599_s20   ;;  %s6048_s19 = sphi %s6088_s19, %s10598_s19   ;;  %s6044_s18 = sphi %s6086_s18, %s10597_s18  }
   0x3   : > { %s71_s23 = ssub.s32 %s6052_s20, %s6105_s22  ;;  %s74_s24 = sadd.s32 1, %s6048_s19 }
   0x4   : > { %p72_p0 = scmp.eq.s32.totalorder %s71_s23, 0  ;;  %p81_p1 = scmp.ne.s32.totalorder %s6048_s19, %s6044_s18 }
   0x5   : > { %p82_p2 = scmp.eq.s32.totalorder %s6052_s20, 0  ;;  %p5599_p4 = scmp.ge.s32.totalorder %s6052_s20, 2 }
   0x6   : > { %s6114_s25 = scalar_select %p72_p0, %s6048_s19, %s74_s24  }
   0x7   : > { %p83_p3 = por %p82_p2, %p81_p1  ;;  %176 = sbr.rel (%p5599_p4) target bundleno = 146 (0x92), region = 24 }
   0xe   : > { %199 = sbr.rel (!%p83_p3) target bundleno = 146 (0x92), region = 36  ;;  %s201_s26 = sand.u32 (%p83_p3), 1, %s6048_s19  }
   0xf   : > { %s5615_s27 = sshll.u32 (%p83_p3), %s6052_s20, 5  ;;  %s5600_s28 = sshll.u32 (%p83_p3), %s201_s26, 11 }
  0x10   : > { %s6122_s6 = scalar_lea.vmem (%p83_p3), %s10060_s2, %s5615_s27  ;;  %s6127_s7 = scalar_lea.vmem (%p83_p3), [#allocation3], %s5600_s28 }
  0x11   : > { %v219_v0 = vld [vmem:[%s6122_s6] sm:$0xff] (%p83_p3)  ;;  %v221_v1 = vld [vmem:[%s6122_s6 + $0x8] sm:$0xff] (%p83_p3)  ;;  %v223_v2 = vld [vmem:[%s6122_s6 + $0x10] sm:$0xff] (%p83_p3) }
  0x12   : > { %220 = vst [vmem:[%s6127_s7] sm:$0xff] (%p83_p3), %v219_v0  ;;  %222 = vst [vmem:[%s6127_s7 + $0x8] sm:$0xff] (%p83_p3), %v221_v1  ;;  %v225_v3 = vld [vmem:[%s6122_s6 + $0x18] sm:$0xff] (%p83_p3)  ;;  %v227_v4 = vld [vmem:[%s6122_s6 + $0x40] sm:$0xff] (%p83_p3) }
  0x13   : > { %224 = vst [vmem:[%s6127_s7 + $0x10] sm:$0xff] (%p83_p3), %v223_v2  ;;  %v229_v5 = vld [vmem:[%s6122_s6 + $0x48] sm:$0xff] (%p83_p3)  ;;  %226 = vst [vmem:[%s6127_s7 + $0x18] sm:$0xff] (%p83_p3), %v225_v3  ;;  %v231_v6 = vld [vmem:[%s6122_s6 + $0x50] sm:$0xff] (%p83_p3) }
  0x14   : > { %228 = vst [vmem:[%s6127_s7 + $0x20] sm:$0xff] (%p83_p3), %v227_v4  ;;  %230 = vst [vmem:[%s6127_s7 + $0x28] sm:$0xff] (%p83_p3), %v229_v5  ;;  %v233_v7 = vld [vmem:[%s6122_s6 + $0x58] sm:$0xff] (%p83_p3)  ;;  %v235_v8 = vld [vmem:[%s6122_s6 + $0x80] sm:$0xff] (%p83_p3) }
  0x15   : > { %232 = vst [vmem:[%s6127_s7 + $0x30] sm:$0xff] %v231_v6  ;;  %234 = vst [vmem:[%s6127_s7 + $0x38] sm:$0xff] %v233_v7  ;;  %v237_v9 = vld [vmem:[%s6122_s6 + $0x88] sm:$0xff]  ;;  %v239_v10 = vld [vmem:[%s6122_s6 + $0x90] sm:$0xff] }
  0x16   : > { %236 = vst [vmem:[%s6127_s7 + $0x40] sm:$0xff] %v235_v8  ;;  %v241_v11 = vld [vmem:[%s6122_s6 + $0x98] sm:$0xff]  ;;  %238 = vst [vmem:[%s6127_s7 + $0x48] sm:$0xff] %v237_v9  ;;  %v243_v12 = vld [vmem:[%s6122_s6 + $0xc0] sm:$0xff] }
  0x17   : > { %240 = vst [vmem:[%s6127_s7 + $0x50] sm:$0xff] %v239_v10  ;;  %242 = vst [vmem:[%s6127_s7 + $0x58] sm:$0xff] %v241_v11  ;;  %v245_v13 = vld [vmem:[%s6122_s6 + $0xc8] sm:$0xff]  ;;  %v247_v14 = vld [vmem:[%s6122_s6 + $0xd0] sm:$0xff] }
  0x18   : > { %244 = vst [vmem:[%s6127_s7 + $0x60] sm:$0xff] %v243_v12  ;;  %246 = vst [vmem:[%s6127_s7 + $0x68] sm:$0xff] %v245_v13  ;;  %v249_v15 = vld [vmem:[%s6122_s6 + $0xd8] sm:$0xff]  ;;  %v251_v16 = vld [vmem:[%s6122_s6 + $0x100] sm:$0xff] }
  0x19   : > { %248 = vst [vmem:[%s6127_s7 + $0x70] sm:$0xff] %v247_v14  ;;  %v253_v17 = vld [vmem:[%s6122_s6 + $0x108] sm:$0xff]  ;;  %250 = vst [vmem:[%s6127_s7 + $0x78] sm:$0xff] %v249_v15  ;;  %v255_v18 = vld [vmem:[%s6122_s6 + $0x110] sm:$0xff] }
  0x1a   : > { %252 = vst [vmem:[%s6127_s7 + $0x80] sm:$0xff] %v251_v16  ;;  %254 = vst [vmem:[%s6127_s7 + $0x88] sm:$0xff] %v253_v17  ;;  %v257_v19 = vld [vmem:[%s6122_s6 + $0x118] sm:$0xff]  ;;  %v259_v20 = vld [vmem:[%s6122_s6 + $0x140] sm:$0xff] }
  0x1b   : > { %256 = vst [vmem:[%s6127_s7 + $0x90] sm:$0xff] %v255_v18  ;;  %258 = vst [vmem:[%s6127_s7 + $0x98] sm:$0xff] %v257_v19  ;;  %v261_v21 = vld [vmem:[%s6122_s6 + $0x148] sm:$0xff]  ;;  %v263_v22 = vld [vmem:[%s6122_s6 + $0x150] sm:$0xff] }
  0x1c   : > { %260 = vst [vmem:[%s6127_s7 + $0xa0] sm:$0xff] %v259_v20  ;;  %v265_v23 = vld [vmem:[%s6122_s6 + $0x158] sm:$0xff]  ;;  %262 = vst [vmem:[%s6127_s7 + $0xa8] sm:$0xff] %v261_v21  ;;  %v267_v24 = vld [vmem:[%s6122_s6 + $0x180] sm:$0xff] }
  0x1d   : > { %264 = vst [vmem:[%s6127_s7 + $0xb0] sm:$0xff] %v263_v22  ;;  %266 = vst [vmem:[%s6127_s7 + $0xb8] sm:$0xff] %v265_v23  ;;  %v269_v25 = vld [vmem:[%s6122_s6 + $0x188] sm:$0xff]  ;;  %v271_v26 = vld [vmem:[%s6122_s6 + $0x190] sm:$0xff] }
  0x1e   : > { %268 = vst [vmem:[%s6127_s7 + $0xc0] sm:$0xff] %v267_v24  ;;  %270 = vst [vmem:[%s6127_s7 + $0xc8] sm:$0xff] %v269_v25  ;;  %v273_v27 = vld [vmem:[%s6122_s6 + $0x198] sm:$0xff]  ;;  %v275_v28 = vld [vmem:[%s6122_s6 + $0x1c0] sm:$0xff] }
  0x1f   : > { %272 = vst [vmem:[%s6127_s7 + $0xd0] sm:$0xff] %v271_v26  ;;  %v277_v29 = vld [vmem:[%s6122_s6 + $0x1c8] sm:$0xff]  ;;  %274 = vst [vmem:[%s6127_s7 + $0xd8] sm:$0xff] %v273_v27  ;;  %v279_v30 = vld [vmem:[%s6122_s6 + $0x1d0] sm:$0xff] }
  0x20   : > { %276 = vst [vmem:[%s6127_s7 + $0xe0] sm:$0xff] %v275_v28  ;;  %278 = vst [vmem:[%s6127_s7 + $0xe8] sm:$0xff] %v277_v29  ;;  %v281_v31 = vld [vmem:[%s6122_s6 + $0x1d8] sm:$0xff]  ;;  %v283_v32 = vld [vmem:[%s6122_s6 + $0x200] sm:$0xff] }
  0x21   : > { %280 = vst [vmem:[%s6127_s7 + $0xf0] sm:$0xff] %v279_v30  ;;  %282 = vst [vmem:[%s6127_s7 + $0xf8] sm:$0xff] %v281_v31  ;;  %v285_v33 = vld [vmem:[%s6122_s6 + $0x208] sm:$0xff]  ;;  %v287_v34 = vld [vmem:[%s6122_s6 + $0x210] sm:$0xff] }
  0x22   : > { %284 = vst [vmem:[%s6127_s7 + $0x100] sm:$0xff] %v283_v32  ;;  %v289_v35 = vld [vmem:[%s6122_s6 + $0x218] sm:$0xff]  ;;  %286 = vst [vmem:[%s6127_s7 + $0x108] sm:$0xff] %v285_v33  ;;  %v291_v36 = vld [vmem:[%s6122_s6 + $0x240] sm:$0xff] }
  0x23   : > { %288 = vst [vmem:[%s6127_s7 + $0x110] sm:$0xff] %v287_v34  ;;  %290 = vst [vmem:[%s6127_s7 + $0x118] sm:$0xff] %v289_v35  ;;  %v293_v37 = vld [vmem:[%s6122_s6 + $0x248] sm:$0xff]  ;;  %v295_v38 = vld [vmem:[%s6122_s6 + $0x250] sm:$0xff] }
  0x24   : > { %292 = vst [vmem:[%s6127_s7 + $0x120] sm:$0xff] %v291_v36  ;;  %294 = vst [vmem:[%s6127_s7 + $0x128] sm:$0xff] %v293_v37  ;;  %v297_v39 = vld [vmem:[%s6122_s6 + $0x258] sm:$0xff]  ;;  %v299_v40 = vld [vmem:[%s6122_s6 + $0x280] sm:$0xff] }
  0x25   : > { %296 = vst [vmem:[%s6127_s7 + $0x130] sm:$0xff] %v295_v38  ;;  %v301_v41 = vld [vmem:[%s6122_s6 + $0x288] sm:$0xff]  ;;  %298 = vst [vmem:[%s6127_s7 + $0x138] sm:$0xff] %v297_v39  ;;  %v303_v42 = vld [vmem:[%s6122_s6 + $0x290] sm:$0xff] }
  0x26   : > { %300 = vst [vmem:[%s6127_s7 + $0x140] sm:$0xff] %v299_v40  ;;  %302 = vst [vmem:[%s6127_s7 + $0x148] sm:$0xff] %v301_v41  ;;  %v305_v43 = vld [vmem:[%s6122_s6 + $0x298] sm:$0xff]  ;;  %v307_v44 = vld [vmem:[%s6122_s6 + $0x2c0] sm:$0xff] }
  0x27   : > { %304 = vst [vmem:[%s6127_s7 + $0x150] sm:$0xff] %v303_v42  ;;  %306 = vst [vmem:[%s6127_s7 + $0x158] sm:$0xff] %v305_v43  ;;  %v309_v45 = vld [vmem:[%s6122_s6 + $0x2c8] sm:$0xff]  ;;  %v311_v46 = vld [vmem:[%s6122_s6 + $0x2d0] sm:$0xff] }
  0x28   : > { %308 = vst [vmem:[%s6127_s7 + $0x160] sm:$0xff] %v307_v44  ;;  %v313_v47 = vld [vmem:[%s6122_s6 + $0x2d8] sm:$0xff]  ;;  %310 = vst [vmem:[%s6127_s7 + $0x168] sm:$0xff] %v309_v45  ;;  %v315_v48 = vld [vmem:[%s6122_s6 + $0x300] sm:$0xff] }
  0x29   : > { %312 = vst [vmem:[%s6127_s7 + $0x170] sm:$0xff] %v311_v46  ;;  %314 = vst [vmem:[%s6127_s7 + $0x178] sm:$0xff] %v313_v47  ;;  %v317_v49 = vld [vmem:[%s6122_s6 + $0x308] sm:$0xff]  ;;  %v319_v50 = vld [vmem:[%s6122_s6 + $0x310] sm:$0xff] }
  0x2a   : > { %316 = vst [vmem:[%s6127_s7 + $0x180] sm:$0xff] %v315_v48  ;;  %318 = vst [vmem:[%s6127_s7 + $0x188] sm:$0xff] %v317_v49  ;;  %v321_v51 = vld [vmem:[%s6122_s6 + $0x318] sm:$0xff]  ;;  %v323_v52 = vld [vmem:[%s6122_s6 + $0x340] sm:$0xff] }
  0x2b   : > { %320 = vst [vmem:[%s6127_s7 + $0x190] sm:$0xff] %v319_v50  ;;  %v325_v53 = vld [vmem:[%s6122_s6 + $0x348] sm:$0xff]  ;;  %322 = vst [vmem:[%s6127_s7 + $0x198] sm:$0xff] %v321_v51  ;;  %v327_v54 = vld [vmem:[%s6122_s6 + $0x350] sm:$0xff] }
  0x2c   : > { %324 = vst [vmem:[%s6127_s7 + $0x1a0] sm:$0xff] %v323_v52  ;;  %326 = vst [vmem:[%s6127_s7 + $0x1a8] sm:$0xff] %v325_v53  ;;  %v329_v55 = vld [vmem:[%s6122_s6 + $0x358] sm:$0xff]  ;;  %v331_v56 = vld [vmem:[%s6122_s6 + $0x380] sm:$0xff] }
  0x2d   : > { %328 = vst [vmem:[%s6127_s7 + $0x1b0] sm:$0xff] %v327_v54  ;;  %330 = vst [vmem:[%s6127_s7 + $0x1b8] sm:$0xff] %v329_v55  ;;  %v333_v57 = vld [vmem:[%s6122_s6 + $0x388] sm:$0xff]  ;;  %v335_v58 = vld [vmem:[%s6122_s6 + $0x390] sm:$0xff] }
  0x2e   : > { %332 = vst [vmem:[%s6127_s7 + $0x1c0] sm:$0xff] %v331_v56  ;;  %v337_v59 = vld [vmem:[%s6122_s6 + $0x398] sm:$0xff]  ;;  %334 = vst [vmem:[%s6127_s7 + $0x1c8] sm:$0xff] %v333_v57  ;;  %v339_v60 = vld [vmem:[%s6122_s6 + $0x3c0] sm:$0xff] }
  0x2f   : > { %336 = vst [vmem:[%s6127_s7 + $0x1d0] sm:$0xff] %v335_v58  ;;  %338 = vst [vmem:[%s6127_s7 + $0x1d8] sm:$0xff] %v337_v59  ;;  %v341_v61 = vld [vmem:[%s6122_s6 + $0x3c8] sm:$0xff]  ;;  %v343_v62 = vld [vmem:[%s6122_s6 + $0x3d0] sm:$0xff] }
  0x30   : > { %340 = vst [vmem:[%s6127_s7 + $0x1e0] sm:$0xff] %v339_v60  ;;  %342 = vst [vmem:[%s6127_s7 + $0x1e8] sm:$0xff] %v341_v61  ;;  %v345_v63 = vld [vmem:[%s6122_s6 + $0x3d8] sm:$0xff]  ;;  %v347_v0 = vld [vmem:[%s6122_s6 + $0x400] sm:$0xff] }
  0x31   : > { %344 = vst [vmem:[%s6127_s7 + $0x1f0] sm:$0xff] %v343_v62  ;;  %v349_v1 = vld [vmem:[%s6122_s6 + $0x408] sm:$0xff]  ;;  %346 = vst [vmem:[%s6127_s7 + $0x1f8] sm:$0xff] %v345_v63  ;;  %v351_v2 = vld [vmem:[%s6122_s6 + $0x410] sm:$0xff] }
  0x32   : > { %348 = vst [vmem:[%s6127_s7 + $0x200] sm:$0xff] %v347_v0  ;;  %350 = vst [vmem:[%s6127_s7 + $0x208] sm:$0xff] %v349_v1  ;;  %v353_v3 = vld [vmem:[%s6122_s6 + $0x418] sm:$0xff]  ;;  %v355_v4 = vld [vmem:[%s6122_s6 + $0x440] sm:$0xff] }
  0x33   : > { %352 = vst [vmem:[%s6127_s7 + $0x210] sm:$0xff] %v351_v2  ;;  %354 = vst [vmem:[%s6127_s7 + $0x218] sm:$0xff] %v353_v3  ;;  %v357_v5 = vld [vmem:[%s6122_s6 + $0x448] sm:$0xff]  ;;  %v359_v6 = vld [vmem:[%s6122_s6 + $0x450] sm:$0xff] }
  0x34   : > { %356 = vst [vmem:[%s6127_s7 + $0x220] sm:$0xff] %v355_v4  ;;  %v361_v7 = vld [vmem:[%s6122_s6 + $0x458] sm:$0xff]  ;;  %358 = vst [vmem:[%s6127_s7 + $0x228] sm:$0xff] %v357_v5  ;;  %v363_v8 = vld [vmem:[%s6122_s6 + $0x480] sm:$0xff] }
  0x35   : > { %360 = vst [vmem:[%s6127_s7 + $0x230] sm:$0xff] %v359_v6  ;;  %362 = vst [vmem:[%s6127_s7 + $0x238] sm:$0xff] %v361_v7  ;;  %v365_v9 = vld [vmem:[%s6122_s6 + $0x488] sm:$0xff]  ;;  %v367_v10 = vld [vmem:[%s6122_s6 + $0x490] sm:$0xff] }
  0x36   : > { %364 = vst [vmem:[%s6127_s7 + $0x240] sm:$0xff] %v363_v8  ;;  %366 = vst [vmem:[%s6127_s7 + $0x248] sm:$0xff] %v365_v9  ;;  %v369_v11 = vld [vmem:[%s6122_s6 + $0x498] sm:$0xff]  ;;  %v371_v12 = vld [vmem:[%s6122_s6 + $0x4c0] sm:$0xff] }
  0x37   : > { %368 = vst [vmem:[%s6127_s7 + $0x250] sm:$0xff] %v367_v10  ;;  %v373_v13 = vld [vmem:[%s6122_s6 + $0x4c8] sm:$0xff]  ;;  %370 = vst [vmem:[%s6127_s7 + $0x258] sm:$0xff] %v369_v11  ;;  %v375_v14 = vld [vmem:[%s6122_s6 + $0x4d0] sm:$0xff] }
  0x38   : > { %372 = vst [vmem:[%s6127_s7 + $0x260] sm:$0xff] %v371_v12  ;;  %374 = vst [vmem:[%s6127_s7 + $0x268] sm:$0xff] %v373_v13  ;;  %v377_v15 = vld [vmem:[%s6122_s6 + $0x4d8] sm:$0xff]  ;;  %v379_v16 = vld [vmem:[%s6122_s6 + $0x500] sm:$0xff] }
  0x39   : > { %376 = vst [vmem:[%s6127_s7 + $0x270] sm:$0xff] %v375_v14  ;;  %378 = vst [vmem:[%s6127_s7 + $0x278] sm:$0xff] %v377_v15  ;;  %v381_v17 = vld [vmem:[%s6122_s6 + $0x508] sm:$0xff]  ;;  %v383_v18 = vld [vmem:[%s6122_s6 + $0x510] sm:$0xff] }
  0x3a   : > { %380 = vst [vmem:[%s6127_s7 + $0x280] sm:$0xff] %v379_v16  ;;  %v385_v19 = vld [vmem:[%s6122_s6 + $0x518] sm:$0xff]  ;;  %382 = vst [vmem:[%s6127_s7 + $0x288] sm:$0xff] %v381_v17  ;;  %v387_v20 = vld [vmem:[%s6122_s6 + $0x540] sm:$0xff] }
  0x3b   : > { %384 = vst [vmem:[%s6127_s7 + $0x290] sm:$0xff] %v383_v18  ;;  %386 = vst [vmem:[%s6127_s7 + $0x298] sm:$0xff] %v385_v19  ;;  %v389_v21 = vld [vmem:[%s6122_s6 + $0x548] sm:$0xff]  ;;  %v391_v22 = vld [vmem:[%s6122_s6 + $0x550] sm:$0xff] }
  0x3c   : > { %388 = vst [vmem:[%s6127_s7 + $0x2a0] sm:$0xff] %v387_v20  ;;  %390 = vst [vmem:[%s6127_s7 + $0x2a8] sm:$0xff] %v389_v21  ;;  %v393_v23 = vld [vmem:[%s6122_s6 + $0x558] sm:$0xff]  ;;  %v395_v24 = vld [vmem:[%s6122_s6 + $0x580] sm:$0xff] }
  0x3d   : > { %392 = vst [vmem:[%s6127_s7 + $0x2b0] sm:$0xff] %v391_v22  ;;  %v397_v25 = vld [vmem:[%s6122_s6 + $0x588] sm:$0xff]  ;;  %394 = vst [vmem:[%s6127_s7 + $0x2b8] sm:$0xff] %v393_v23  ;;  %v399_v26 = vld [vmem:[%s6122_s6 + $0x590] sm:$0xff] }
  0x3e   : > { %396 = vst [vmem:[%s6127_s7 + $0x2c0] sm:$0xff] %v395_v24  ;;  %398 = vst [vmem:[%s6127_s7 + $0x2c8] sm:$0xff] %v397_v25  ;;  %v401_v27 = vld [vmem:[%s6122_s6 + $0x598] sm:$0xff]  ;;  %v403_v28 = vld [vmem:[%s6122_s6 + $0x5c0] sm:$0xff] }
  0x3f   : > { %400 = vst [vmem:[%s6127_s7 + $0x2d0] sm:$0xff] %v399_v26  ;;  %402 = vst [vmem:[%s6127_s7 + $0x2d8] sm:$0xff] %v401_v27  ;;  %v405_v29 = vld [vmem:[%s6122_s6 + $0x5c8] sm:$0xff]  ;;  %v407_v30 = vld [vmem:[%s6122_s6 + $0x5d0] sm:$0xff] }
  0x40   : > { %404 = vst [vmem:[%s6127_s7 + $0x2e0] sm:$0xff] %v403_v28  ;;  %v409_v31 = vld [vmem:[%s6122_s6 + $0x5d8] sm:$0xff]  ;;  %406 = vst [vmem:[%s6127_s7 + $0x2e8] sm:$0xff] %v405_v29  ;;  %v411_v32 = vld [vmem:[%s6122_s6 + $0x600] sm:$0xff] }
  0x41   : > { %408 = vst [vmem:[%s6127_s7 + $0x2f0] sm:$0xff] %v407_v30  ;;  %410 = vst [vmem:[%s6127_s7 + $0x2f8] sm:$0xff] %v409_v31  ;;  %v413_v33 = vld [vmem:[%s6122_s6 + $0x608] sm:$0xff]  ;;  %v415_v34 = vld [vmem:[%s6122_s6 + $0x610] sm:$0xff] }
  0x42   : > { %412 = vst [vmem:[%s6127_s7 + $0x300] sm:$0xff] %v411_v32  ;;  %414 = vst [vmem:[%s6127_s7 + $0x308] sm:$0xff] %v413_v33  ;;  %v417_v35 = vld [vmem:[%s6122_s6 + $0x618] sm:$0xff]  ;;  %v419_v36 = vld [vmem:[%s6122_s6 + $0x640] sm:$0xff] }
  0x43   : > { %416 = vst [vmem:[%s6127_s7 + $0x310] sm:$0xff] %v415_v34  ;;  %v421_v37 = vld [vmem:[%s6122_s6 + $0x648] sm:$0xff]  ;;  %418 = vst [vmem:[%s6127_s7 + $0x318] sm:$0xff] %v417_v35  ;;  %v423_v38 = vld [vmem:[%s6122_s6 + $0x650] sm:$0xff] }
  0x44   : > { %420 = vst [vmem:[%s6127_s7 + $0x320] sm:$0xff] %v419_v36  ;;  %422 = vst [vmem:[%s6127_s7 + $0x328] sm:$0xff] %v421_v37  ;;  %v425_v39 = vld [vmem:[%s6122_s6 + $0x658] sm:$0xff]  ;;  %v427_v40 = vld [vmem:[%s6122_s6 + $0x680] sm:$0xff] }
  0x45   : > { %424 = vst [vmem:[%s6127_s7 + $0x330] sm:$0xff] %v423_v38  ;;  %426 = vst [vmem:[%s6127_s7 + $0x338] sm:$0xff] %v425_v39  ;;  %v429_v41 = vld [vmem:[%s6122_s6 + $0x688] sm:$0xff]  ;;  %v431_v42 = vld [vmem:[%s6122_s6 + $0x690] sm:$0xff] }
  0x46   : > { %428 = vst [vmem:[%s6127_s7 + $0x340] sm:$0xff] %v427_v40  ;;  %v433_v43 = vld [vmem:[%s6122_s6 + $0x698] sm:$0xff]  ;;  %430 = vst [vmem:[%s6127_s7 + $0x348] sm:$0xff] %v429_v41  ;;  %v435_v44 = vld [vmem:[%s6122_s6 + $0x6c0] sm:$0xff] }
  0x47   : > { %432 = vst [vmem:[%s6127_s7 + $0x350] sm:$0xff] %v431_v42  ;;  %434 = vst [vmem:[%s6127_s7 + $0x358] sm:$0xff] %v433_v43  ;;  %v437_v45 = vld [vmem:[%s6122_s6 + $0x6c8] sm:$0xff]  ;;  %v439_v46 = vld [vmem:[%s6122_s6 + $0x6d0] sm:$0xff] }
  0x48   : > { %436 = vst [vmem:[%s6127_s7 + $0x360] sm:$0xff] %v435_v44  ;;  %438 = vst [vmem:[%s6127_s7 + $0x368] sm:$0xff] %v437_v45  ;;  %v441_v47 = vld [vmem:[%s6122_s6 + $0x6d8] sm:$0xff]  ;;  %v443_v48 = vld [vmem:[%s6122_s6 + $0x700] sm:$0xff] }
  0x49   : > { %440 = vst [vmem:[%s6127_s7 + $0x370] sm:$0xff] %v439_v46  ;;  %v445_v49 = vld [vmem:[%s6122_s6 + $0x708] sm:$0xff]  ;;  %442 = vst [vmem:[%s6127_s7 + $0x378] sm:$0xff] %v441_v47  ;;  %v447_v50 = vld [vmem:[%s6122_s6 + $0x710] sm:$0xff] }
  0x4a   : > { %444 = vst [vmem:[%s6127_s7 + $0x380] sm:$0xff] %v443_v48  ;;  %446 = vst [vmem:[%s6127_s7 + $0x388] sm:$0xff] %v445_v49  ;;  %v449_v51 = vld [vmem:[%s6122_s6 + $0x718] sm:$0xff]  ;;  %v451_v52 = vld [vmem:[%s6122_s6 + $0x740] sm:$0xff] }
  0x4b   : > { %448 = vst [vmem:[%s6127_s7 + $0x390] sm:$0xff] %v447_v50  ;;  %450 = vst [vmem:[%s6127_s7 + $0x398] sm:$0xff] %v449_v51  ;;  %v453_v53 = vld [vmem:[%s6122_s6 + $0x748] sm:$0xff]  ;;  %v455_v54 = vld [vmem:[%s6122_s6 + $0x750] sm:$0xff] }
  0x4c   : > { %452 = vst [vmem:[%s6127_s7 + $0x3a0] sm:$0xff] %v451_v52  ;;  %v457_v55 = vld [vmem:[%s6122_s6 + $0x758] sm:$0xff]  ;;  %454 = vst [vmem:[%s6127_s7 + $0x3a8] sm:$0xff] %v453_v53  ;;  %v459_v56 = vld [vmem:[%s6122_s6 + $0x780] sm:$0xff] }
  0x4d   : > { %456 = vst [vmem:[%s6127_s7 + $0x3b0] sm:$0xff] %v455_v54  ;;  %458 = vst [vmem:[%s6127_s7 + $0x3b8] sm:$0xff] %v457_v55  ;;  %v461_v57 = vld [vmem:[%s6122_s6 + $0x788] sm:$0xff]  ;;  %v463_v58 = vld [vmem:[%s6122_s6 + $0x790] sm:$0xff] }
  0x4e   : > { %460 = vst [vmem:[%s6127_s7 + $0x3c0] sm:$0xff] %v459_v56  ;;  %462 = vst [vmem:[%s6127_s7 + $0x3c8] sm:$0xff] %v461_v57  ;;  %v465_v59 = vld [vmem:[%s6122_s6 + $0x798] sm:$0xff]  ;;  %v467_v60 = vld [vmem:[%s6122_s6 + $0x7c0] sm:$0xff] }
  0x4f   : > { %464 = vst [vmem:[%s6127_s7 + $0x3d0] sm:$0xff] %v463_v58  ;;  %v469_v61 = vld [vmem:[%s6122_s6 + $0x7c8] sm:$0xff]  ;;  %466 = vst [vmem:[%s6127_s7 + $0x3d8] sm:$0xff] %v465_v59  ;;  %v471_v62 = vld [vmem:[%s6122_s6 + $0x7d0] sm:$0xff] }
  0x50   : > { %468 = vst [vmem:[%s6127_s7 + $0x3e0] sm:$0xff] %v467_v60  ;;  %470 = vst [vmem:[%s6127_s7 + $0x3e8] sm:$0xff] %v469_v61  ;;  %v473_v63 = vld [vmem:[%s6122_s6 + $0x7d8] sm:$0xff]  ;;  %v475_v0 = vld [vmem:[%s6122_s6 + $0x800] sm:$0xff] }
  0x51   : > { %472 = vst [vmem:[%s6127_s7 + $0x3f0] sm:$0xff] %v471_v62  ;;  %474 = vst [vmem:[%s6127_s7 + $0x3f8] sm:$0xff] %v473_v63  ;;  %v477_v1 = vld [vmem:[%s6122_s6 + $0x808] sm:$0xff]  ;;  %v479_v2 = vld [vmem:[%s6122_s6 + $0x810] sm:$0xff] }
  0x52   : > { %476 = vst [vmem:[%s6127_s7 + $0x400] sm:$0xff] %v475_v0  ;;  %v481_v3 = vld [vmem:[%s6122_s6 + $0x818] sm:$0xff]  ;;  %478 = vst [vmem:[%s6127_s7 + $0x408] sm:$0xff] %v477_v1  ;;  %v483_v4 = vld [vmem:[%s6122_s6 + $0x840] sm:$0xff] }
  0x53   : > { %480 = vst [vmem:[%s6127_s7 + $0x410] sm:$0xff] %v479_v2  ;;  %482 = vst [vmem:[%s6127_s7 + $0x418] sm:$0xff] %v481_v3  ;;  %v485_v5 = vld [vmem:[%s6122_s6 + $0x848] sm:$0xff]  ;;  %v487_v6 = vld [vmem:[%s6122_s6 + $0x850] sm:$0xff] }
  0x54   : > { %484 = vst [vmem:[%s6127_s7 + $0x420] sm:$0xff] %v483_v4  ;;  %486 = vst [vmem:[%s6127_s7 + $0x428] sm:$0xff] %v485_v5  ;;  %v489_v7 = vld [vmem:[%s6122_s6 + $0x858] sm:$0xff]  ;;  %v491_v8 = vld [vmem:[%s6122_s6 + $0x880] sm:$0xff] }
  0x55   : > { %488 = vst [vmem:[%s6127_s7 + $0x430] sm:$0xff] %v487_v6  ;;  %v493_v9 = vld [vmem:[%s6122_s6 + $0x888] sm:$0xff]  ;;  %490 = vst [vmem:[%s6127_s7 + $0x438] sm:$0xff] %v489_v7  ;;  %v495_v10 = vld [vmem:[%s6122_s6 + $0x890] sm:$0xff] }
  0x56   : > { %492 = vst [vmem:[%s6127_s7 + $0x440] sm:$0xff] %v491_v8  ;;  %494 = vst [vmem:[%s6127_s7 + $0x448] sm:$0xff] %v493_v9  ;;  %v497_v11 = vld [vmem:[%s6122_s6 + $0x898] sm:$0xff]  ;;  %v499_v12 = vld [vmem:[%s6122_s6 + $0x8c0] sm:$0xff] }
  0x57   : > { %496 = vst [vmem:[%s6127_s7 + $0x450] sm:$0xff] %v495_v10  ;;  %498 = vst [vmem:[%s6127_s7 + $0x458] sm:$0xff] %v497_v11  ;;  %v501_v13 = vld [vmem:[%s6122_s6 + $0x8c8] sm:$0xff]  ;;  %v503_v14 = vld [vmem:[%s6122_s6 + $0x8d0] sm:$0xff] }
  0x58   : > { %500 = vst [vmem:[%s6127_s7 + $0x460] sm:$0xff] %v499_v12  ;;  %v505_v15 = vld [vmem:[%s6122_s6 + $0x8d8] sm:$0xff]  ;;  %502 = vst [vmem:[%s6127_s7 + $0x468] sm:$0xff] %v501_v13  ;;  %v507_v16 = vld [vmem:[%s6122_s6 + $0x900] sm:$0xff] }
  0x59   : > { %504 = vst [vmem:[%s6127_s7 + $0x470] sm:$0xff] %v503_v14  ;;  %506 = vst [vmem:[%s6127_s7 + $0x478] sm:$0xff] %v505_v15  ;;  %v509_v17 = vld [vmem:[%s6122_s6 + $0x908] sm:$0xff]  ;;  %v511_v18 = vld [vmem:[%s6122_s6 + $0x910] sm:$0xff] }
  0x5a   : > { %508 = vst [vmem:[%s6127_s7 + $0x480] sm:$0xff] %v507_v16  ;;  %510 = vst [vmem:[%s6127_s7 + $0x488] sm:$0xff] %v509_v17  ;;  %v513_v19 = vld [vmem:[%s6122_s6 + $0x918] sm:$0xff]  ;;  %v515_v20 = vld [vmem:[%s6122_s6 + $0x940] sm:$0xff] }
  0x5b   : > { %512 = vst [vmem:[%s6127_s7 + $0x490] sm:$0xff] %v511_v18  ;;  %v517_v21 = vld [vmem:[%s6122_s6 + $0x948] sm:$0xff]  ;;  %514 = vst [vmem:[%s6127_s7 + $0x498] sm:$0xff] %v513_v19  ;;  %v519_v22 = vld [vmem:[%s6122_s6 + $0x950] sm:$0xff] }
  0x5c   : > { %516 = vst [vmem:[%s6127_s7 + $0x4a0] sm:$0xff] %v515_v20  ;;  %518 = vst [vmem:[%s6127_s7 + $0x4a8] sm:$0xff] %v517_v21  ;;  %v521_v23 = vld [vmem:[%s6122_s6 + $0x958] sm:$0xff]  ;;  %v523_v24 = vld [vmem:[%s6122_s6 + $0x980] sm:$0xff] }
  0x5d   : > { %520 = vst [vmem:[%s6127_s7 + $0x4b0] sm:$0xff] %v519_v22  ;;  %522 = vst [vmem:[%s6127_s7 + $0x4b8] sm:$0xff] %v521_v23  ;;  %v525_v25 = vld [vmem:[%s6122_s6 + $0x988] sm:$0xff]  ;;  %v527_v26 = vld [vmem:[%s6122_s6 + $0x990] sm:$0xff] }
  0x5e   : > { %524 = vst [vmem:[%s6127_s7 + $0x4c0] sm:$0xff] %v523_v24  ;;  %v529_v27 = vld [vmem:[%s6122_s6 + $0x998] sm:$0xff]  ;;  %526 = vst [vmem:[%s6127_s7 + $0x4c8] sm:$0xff] %v525_v25  ;;  %v531_v28 = vld [vmem:[%s6122_s6 + $0x9c0] sm:$0xff] }
  0x5f   : > { %528 = vst [vmem:[%s6127_s7 + $0x4d0] sm:$0xff] %v527_v26  ;;  %530 = vst [vmem:[%s6127_s7 + $0x4d8] sm:$0xff] %v529_v27  ;;  %v533_v29 = vld [vmem:[%s6122_s6 + $0x9c8] sm:$0xff]  ;;  %v535_v30 = vld [vmem:[%s6122_s6 + $0x9d0] sm:$0xff] }
  0x60   : > { %532 = vst [vmem:[%s6127_s7 + $0x4e0] sm:$0xff] %v531_v28  ;;  %534 = vst [vmem:[%s6127_s7 + $0x4e8] sm:$0xff] %v533_v29  ;;  %v537_v31 = vld [vmem:[%s6122_s6 + $0x9d8] sm:$0xff]  ;;  %v539_v32 = vld [vmem:[%s6122_s6 + $0xa00] sm:$0xff] }
  0x61   : > { %536 = vst [vmem:[%s6127_s7 + $0x4f0] sm:$0xff] %v535_v30  ;;  %v541_v33 = vld [vmem:[%s6122_s6 + $0xa08] sm:$0xff]  ;;  %538 = vst [vmem:[%s6127_s7 + $0x4f8] sm:$0xff] %v537_v31  ;;  %v543_v34 = vld [vmem:[%s6122_s6 + $0xa10] sm:$0xff] }
  0x62   : > { %540 = vst [vmem:[%s6127_s7 + $0x500] sm:$0xff] %v539_v32  ;;  %542 = vst [vmem:[%s6127_s7 + $0x508] sm:$0xff] %v541_v33  ;;  %v545_v35 = vld [vmem:[%s6122_s6 + $0xa18] sm:$0xff]  ;;  %v547_v36 = vld [vmem:[%s6122_s6 + $0xa40] sm:$0xff] }
  0x63   : > { %544 = vst [vmem:[%s6127_s7 + $0x510] sm:$0xff] %v543_v34  ;;  %546 = vst [vmem:[%s6127_s7 + $0x518] sm:$0xff] %v545_v35  ;;  %v549_v37 = vld [vmem:[%s6122_s6 + $0xa48] sm:$0xff]  ;;  %v551_v38 = vld [vmem:[%s6122_s6 + $0xa50] sm:$0xff] }
  0x64   : > { %548 = vst [vmem:[%s6127_s7 + $0x520] sm:$0xff] %v547_v36  ;;  %v553_v39 = vld [vmem:[%s6122_s6 + $0xa58] sm:$0xff]  ;;  %550 = vst [vmem:[%s6127_s7 + $0x528] sm:$0xff] %v549_v37  ;;  %v555_v40 = vld [vmem:[%s6122_s6 + $0xa80] sm:$0xff] }
  0x65   : > { %552 = vst [vmem:[%s6127_s7 + $0x530] sm:$0xff] %v551_v38  ;;  %554 = vst [vmem:[%s6127_s7 + $0x538] sm:$0xff] %v553_v39  ;;  %v557_v41 = vld [vmem:[%s6122_s6 + $0xa88] sm:$0xff]  ;;  %v559_v42 = vld [vmem:[%s6122_s6 + $0xa90] sm:$0xff] }
  0x66   : > { %556 = vst [vmem:[%s6127_s7 + $0x540] sm:$0xff] %v555_v40  ;;  %558 = vst [vmem:[%s6127_s7 + $0x548] sm:$0xff] %v557_v41  ;;  %v561_v43 = vld [vmem:[%s6122_s6 + $0xa98] sm:$0xff]  ;;  %v563_v44 = vld [vmem:[%s6122_s6 + $0xac0] sm:$0xff] }
  0x67   : > { %560 = vst [vmem:[%s6127_s7 + $0x550] sm:$0xff] %v559_v42  ;;  %v565_v45 = vld [vmem:[%s6122_s6 + $0xac8] sm:$0xff]  ;;  %562 = vst [vmem:[%s6127_s7 + $0x558] sm:$0xff] %v561_v43  ;;  %v567_v46 = vld [vmem:[%s6122_s6 + $0xad0] sm:$0xff] }
  0x68   : > { %564 = vst [vmem:[%s6127_s7 + $0x560] sm:$0xff] %v563_v44  ;;  %566 = vst [vmem:[%s6127_s7 + $0x568] sm:$0xff] %v565_v45  ;;  %v569_v47 = vld [vmem:[%s6122_s6 + $0xad8] sm:$0xff]  ;;  %v571_v48 = vld [vmem:[%s6122_s6 + $0xb00] sm:$0xff] }
  0x69   : > { %568 = vst [vmem:[%s6127_s7 + $0x570] sm:$0xff] %v567_v46  ;;  %570 = vst [vmem:[%s6127_s7 + $0x578] sm:$0xff] %v569_v47  ;;  %v573_v49 = vld [vmem:[%s6122_s6 + $0xb08] sm:$0xff]  ;;  %v575_v50 = vld [vmem:[%s6122_s6 + $0xb10] sm:$0xff] }
  0x6a   : > { %572 = vst [vmem:[%s6127_s7 + $0x580] sm:$0xff] %v571_v48  ;;  %v577_v51 = vld [vmem:[%s6122_s6 + $0xb18] sm:$0xff]  ;;  %574 = vst [vmem:[%s6127_s7 + $0x588] sm:$0xff] %v573_v49  ;;  %v579_v52 = vld [vmem:[%s6122_s6 + $0xb40] sm:$0xff] }
  0x6b   : > { %576 = vst [vmem:[%s6127_s7 + $0x590] sm:$0xff] %v575_v50  ;;  %578 = vst [vmem:[%s6127_s7 + $0x598] sm:$0xff] %v577_v51  ;;  %v581_v53 = vld [vmem:[%s6122_s6 + $0xb48] sm:$0xff]  ;;  %v583_v54 = vld [vmem:[%s6122_s6 + $0xb50] sm:$0xff] }
  0x6c   : > { %580 = vst [vmem:[%s6127_s7 + $0x5a0] sm:$0xff] %v579_v52  ;;  %582 = vst [vmem:[%s6127_s7 + $0x5a8] sm:$0xff] %v581_v53  ;;  %v585_v55 = vld [vmem:[%s6122_s6 + $0xb58] sm:$0xff]  ;;  %v587_v56 = vld [vmem:[%s6122_s6 + $0xb80] sm:$0xff] }
  0x6d   : > { %584 = vst [vmem:[%s6127_s7 + $0x5b0] sm:$0xff] %v583_v54  ;;  %v589_v57 = vld [vmem:[%s6122_s6 + $0xb88] sm:$0xff]  ;;  %586 = vst [vmem:[%s6127_s7 + $0x5b8] sm:$0xff] %v585_v55  ;;  %v591_v58 = vld [vmem:[%s6122_s6 + $0xb90] sm:$0xff] }
  0x6e   : > { %588 = vst [vmem:[%s6127_s7 + $0x5c0] sm:$0xff] %v587_v56  ;;  %590 = vst [vmem:[%s6127_s7 + $0x5c8] sm:$0xff] %v589_v57  ;;  %v593_v59 = vld [vmem:[%s6122_s6 + $0xb98] sm:$0xff]  ;;  %v595_v60 = vld [vmem:[%s6122_s6 + $0xbc0] sm:$0xff] }
  0x6f   : > { %592 = vst [vmem:[%s6127_s7 + $0x5d0] sm:$0xff] %v591_v58  ;;  %594 = vst [vmem:[%s6127_s7 + $0x5d8] sm:$0xff] %v593_v59  ;;  %v597_v61 = vld [vmem:[%s6122_s6 + $0xbc8] sm:$0xff]  ;;  %v599_v62 = vld [vmem:[%s6122_s6 + $0xbd0] sm:$0xff] }
  0x70   : > { %596 = vst [vmem:[%s6127_s7 + $0x5e0] sm:$0xff] %v595_v60  ;;  %v601_v63 = vld [vmem:[%s6122_s6 + $0xbd8] sm:$0xff]  ;;  %598 = vst [vmem:[%s6127_s7 + $0x5e8] sm:$0xff] %v597_v61  ;;  %v603_v0 = vld [vmem:[%s6122_s6 + $0xc00] sm:$0xff] }
  0x71   : > { %600 = vst [vmem:[%s6127_s7 + $0x5f0] sm:$0xff] %v599_v62  ;;  %602 = vst [vmem:[%s6127_s7 + $0x5f8] sm:$0xff] %v601_v63  ;;  %v605_v1 = vld [vmem:[%s6122_s6 + $0xc08] sm:$0xff]  ;;  %v607_v2 = vld [vmem:[%s6122_s6 + $0xc10] sm:$0xff] }
  0x72   : > { %604 = vst [vmem:[%s6127_s7 + $0x600] sm:$0xff] %v603_v0  ;;  %606 = vst [vmem:[%s6127_s7 + $0x608] sm:$0xff] %v605_v1  ;;  %v609_v3 = vld [vmem:[%s6122_s6 + $0xc18] sm:$0xff]  ;;  %v611_v4 = vld [vmem:[%s6122_s6 + $0xc40] sm:$0xff] }
  0x73   : > { %608 = vst [vmem:[%s6127_s7 + $0x610] sm:$0xff] %v607_v2  ;;  %v613_v5 = vld [vmem:[%s6122_s6 + $0xc48] sm:$0xff]  ;;  %610 = vst [vmem:[%s6127_s7 + $0x618] sm:$0xff] %v609_v3  ;;  %v615_v6 = vld [vmem:[%s6122_s6 + $0xc50] sm:$0xff] }
  0x74   : > { %612 = vst [vmem:[%s6127_s7 + $0x620] sm:$0xff] %v611_v4  ;;  %614 = vst [vmem:[%s6127_s7 + $0x628] sm:$0xff] %v613_v5  ;;  %v617_v7 = vld [vmem:[%s6122_s6 + $0xc58] sm:$0xff]  ;;  %v619_v8 = vld [vmem:[%s6122_s6 + $0xc80] sm:$0xff] }
  0x75   : > { %616 = vst [vmem:[%s6127_s7 + $0x630] sm:$0xff] %v615_v6  ;;  %618 = vst [vmem:[%s6127_s7 + $0x638] sm:$0xff] %v617_v7  ;;  %v621_v9 = vld [vmem:[%s6122_s6 + $0xc88] sm:$0xff]  ;;  %v623_v10 = vld [vmem:[%s6122_s6 + $0xc90] sm:$0xff] }
  0x76   : > { %620 = vst [vmem:[%s6127_s7 + $0x640] sm:$0xff] %v619_v8  ;;  %v625_v11 = vld [vmem:[%s6122_s6 + $0xc98] sm:$0xff]  ;;  %622 = vst [vmem:[%s6127_s7 + $0x648] sm:$0xff] %v621_v9  ;;  %v627_v12 = vld [vmem:[%s6122_s6 + $0xcc0] sm:$0xff] }
  0x77   : > { %624 = vst [vmem:[%s6127_s7 + $0x650] sm:$0xff] %v623_v10  ;;  %626 = vst [vmem:[%s6127_s7 + $0x658] sm:$0xff] %v625_v11  ;;  %v629_v13 = vld [vmem:[%s6122_s6 + $0xcc8] sm:$0xff]  ;;  %v631_v14 = vld [vmem:[%s6122_s6 + $0xcd0] sm:$0xff] }
  0x78   : > { %628 = vst [vmem:[%s6127_s7 + $0x660] sm:$0xff] %v627_v12  ;;  %630 = vst [vmem:[%s6127_s7 + $0x668] sm:$0xff] %v629_v13  ;;  %v633_v15 = vld [vmem:[%s6122_s6 + $0xcd8] sm:$0xff]  ;;  %v635_v16 = vld [vmem:[%s6122_s6 + $0xd00] sm:$0xff] }
  0x79   : > { %632 = vst [vmem:[%s6127_s7 + $0x670] sm:$0xff] %v631_v14  ;;  %v637_v17 = vld [vmem:[%s6122_s6 + $0xd08] sm:$0xff]  ;;  %634 = vst [vmem:[%s6127_s7 + $0x678] sm:$0xff] %v633_v15  ;;  %v639_v18 = vld [vmem:[%s6122_s6 + $0xd10] sm:$0xff] }
  0x7a   : > { %636 = vst [vmem:[%s6127_s7 + $0x680] sm:$0xff] %v635_v16  ;;  %638 = vst [vmem:[%s6127_s7 + $0x688] sm:$0xff] %v637_v17  ;;  %v641_v19 = vld [vmem:[%s6122_s6 + $0xd18] sm:$0xff]  ;;  %v643_v20 = vld [vmem:[%s6122_s6 + $0xd40] sm:$0xff] }
  0x7b   : > { %640 = vst [vmem:[%s6127_s7 + $0x690] sm:$0xff] %v639_v18  ;;  %642 = vst [vmem:[%s6127_s7 + $0x698] sm:$0xff] %v641_v19  ;;  %v645_v21 = vld [vmem:[%s6122_s6 + $0xd48] sm:$0xff]  ;;  %v647_v22 = vld [vmem:[%s6122_s6 + $0xd50] sm:$0xff] }
  0x7c   : > { %644 = vst [vmem:[%s6127_s7 + $0x6a0] sm:$0xff] %v643_v20  ;;  %v649_v23 = vld [vmem:[%s6122_s6 + $0xd58] sm:$0xff]  ;;  %646 = vst [vmem:[%s6127_s7 + $0x6a8] sm:$0xff] %v645_v21  ;;  %v651_v24 = vld [vmem:[%s6122_s6 + $0xd80] sm:$0xff] }
  0x7d   : > { %648 = vst [vmem:[%s6127_s7 + $0x6b0] sm:$0xff] %v647_v22  ;;  %650 = vst [vmem:[%s6127_s7 + $0x6b8] sm:$0xff] %v649_v23  ;;  %v653_v25 = vld [vmem:[%s6122_s6 + $0xd88] sm:$0xff]  ;;  %v655_v26 = vld [vmem:[%s6122_s6 + $0xd90] sm:$0xff] }
  0x7e   : > { %652 = vst [vmem:[%s6127_s7 + $0x6c0] sm:$0xff] %v651_v24  ;;  %654 = vst [vmem:[%s6127_s7 + $0x6c8] sm:$0xff] %v653_v25  ;;  %v657_v27 = vld [vmem:[%s6122_s6 + $0xd98] sm:$0xff]  ;;  %v659_v28 = vld [vmem:[%s6122_s6 + $0xdc0] sm:$0xff] }
  0x7f   : > { %656 = vst [vmem:[%s6127_s7 + $0x6d0] sm:$0xff] %v655_v26  ;;  %v661_v29 = vld [vmem:[%s6122_s6 + $0xdc8] sm:$0xff]  ;;  %658 = vst [vmem:[%s6127_s7 + $0x6d8] sm:$0xff] %v657_v27  ;;  %v663_v30 = vld [vmem:[%s6122_s6 + $0xdd0] sm:$0xff] }
  0x80   : > { %660 = vst [vmem:[%s6127_s7 + $0x6e0] sm:$0xff] %v659_v28  ;;  %662 = vst [vmem:[%s6127_s7 + $0x6e8] sm:$0xff] %v661_v29  ;;  %v665_v31 = vld [vmem:[%s6122_s6 + $0xdd8] sm:$0xff]  ;;  %v667_v32 = vld [vmem:[%s6122_s6 + $0xe00] sm:$0xff] }
  0x81   : > { %664 = vst [vmem:[%s6127_s7 + $0x6f0] sm:$0xff] %v663_v30  ;;  %666 = vst [vmem:[%s6127_s7 + $0x6f8] sm:$0xff] %v665_v31  ;;  %v669_v33 = vld [vmem:[%s6122_s6 + $0xe08] sm:$0xff]  ;;  %v671_v34 = vld [vmem:[%s6122_s6 + $0xe10] sm:$0xff] }
  0x82   : > { %668 = vst [vmem:[%s6127_s7 + $0x700] sm:$0xff] %v667_v32  ;;  %v673_v35 = vld [vmem:[%s6122_s6 + $0xe18] sm:$0xff]  ;;  %670 = vst [vmem:[%s6127_s7 + $0x708] sm:$0xff] %v669_v33  ;;  %v675_v36 = vld [vmem:[%s6122_s6 + $0xe40] sm:$0xff] }
  0x83   : > { %672 = vst [vmem:[%s6127_s7 + $0x710] sm:$0xff] %v671_v34  ;;  %674 = vst [vmem:[%s6127_s7 + $0x718] sm:$0xff] %v673_v35  ;;  %v677_v37 = vld [vmem:[%s6122_s6 + $0xe48] sm:$0xff]  ;;  %v679_v38 = vld [vmem:[%s6122_s6 + $0xe50] sm:$0xff] }
  0x84   : > { %676 = vst [vmem:[%s6127_s7 + $0x720] sm:$0xff] %v675_v36  ;;  %678 = vst [vmem:[%s6127_s7 + $0x728] sm:$0xff] %v677_v37  ;;  %v681_v39 = vld [vmem:[%s6122_s6 + $0xe58] sm:$0xff]  ;;  %v683_v40 = vld [vmem:[%s6122_s6 + $0xe80] sm:$0xff] }
  0x85   : > { %680 = vst [vmem:[%s6127_s7 + $0x730] sm:$0xff] %v679_v38  ;;  %v685_v41 = vld [vmem:[%s6122_s6 + $0xe88] sm:$0xff]  ;;  %682 = vst [vmem:[%s6127_s7 + $0x738] sm:$0xff] %v681_v39  ;;  %v687_v42 = vld [vmem:[%s6122_s6 + $0xe90] sm:$0xff] }
  0x86   : > { %684 = vst [vmem:[%s6127_s7 + $0x740] sm:$0xff] %v683_v40  ;;  %686 = vst [vmem:[%s6127_s7 + $0x748] sm:$0xff] %v685_v41  ;;  %v689_v43 = vld [vmem:[%s6122_s6 + $0xe98] sm:$0xff]  ;;  %v691_v44 = vld [vmem:[%s6122_s6 + $0xec0] sm:$0xff] }
  0x87   : > { %688 = vst [vmem:[%s6127_s7 + $0x750] sm:$0xff] %v687_v42  ;;  %690 = vst [vmem:[%s6127_s7 + $0x758] sm:$0xff] %v689_v43  ;;  %v693_v45 = vld [vmem:[%s6122_s6 + $0xec8] sm:$0xff]  ;;  %v695_v46 = vld [vmem:[%s6122_s6 + $0xed0] sm:$0xff] }
  0x88   : > { %692 = vst [vmem:[%s6127_s7 + $0x760] sm:$0xff] %v691_v44  ;;  %v697_v47 = vld [vmem:[%s6122_s6 + $0xed8] sm:$0xff]  ;;  %694 = vst [vmem:[%s6127_s7 + $0x768] sm:$0xff] %v693_v45  ;;  %v699_v48 = vld [vmem:[%s6122_s6 + $0xf00] sm:$0xff] }
  0x89   : > { %696 = vst [vmem:[%s6127_s7 + $0x770] sm:$0xff] %v695_v46  ;;  %698 = vst [vmem:[%s6127_s7 + $0x778] sm:$0xff] %v697_v47  ;;  %v701_v49 = vld [vmem:[%s6122_s6 + $0xf08] sm:$0xff]  ;;  %v703_v50 = vld [vmem:[%s6122_s6 + $0xf10] sm:$0xff] }
  0x8a   : > { %700 = vst [vmem:[%s6127_s7 + $0x780] sm:$0xff] %v699_v48  ;;  %702 = vst [vmem:[%s6127_s7 + $0x788] sm:$0xff] %v701_v49  ;;  %v705_v51 = vld [vmem:[%s6122_s6 + $0xf18] sm:$0xff]  ;;  %v707_v52 = vld [vmem:[%s6122_s6 + $0xf40] sm:$0xff] }
  0x8b   : > { %704 = vst [vmem:[%s6127_s7 + $0x790] sm:$0xff] %v703_v50  ;;  %v709_v53 = vld [vmem:[%s6122_s6 + $0xf48] sm:$0xff]  ;;  %706 = vst [vmem:[%s6127_s7 + $0x798] sm:$0xff] %v705_v51  ;;  %v711_v54 = vld [vmem:[%s6122_s6 + $0xf50] sm:$0xff] }
  0x8c   : > { %708 = vst [vmem:[%s6127_s7 + $0x7a0] sm:$0xff] %v707_v52  ;;  %710 = vst [vmem:[%s6127_s7 + $0x7a8] sm:$0xff] %v709_v53  ;;  %v713_v55 = vld [vmem:[%s6122_s6 + $0xf58] sm:$0xff]  ;;  %v715_v56 = vld [vmem:[%s6122_s6 + $0xf80] sm:$0xff] }
  0x8d   : > { %712 = vst [vmem:[%s6127_s7 + $0x7b0] sm:$0xff] %v711_v54  ;;  %714 = vst [vmem:[%s6127_s7 + $0x7b8] sm:$0xff] %v713_v55  ;;  %v717_v57 = vld [vmem:[%s6122_s6 + $0xf88] sm:$0xff]  ;;  %v719_v58 = vld [vmem:[%s6122_s6 + $0xf90] sm:$0xff] }
  0x8e   : > { %716 = vst [vmem:[%s6127_s7 + $0x7c0] sm:$0xff] %v715_v56  ;;  %v721_v59 = vld [vmem:[%s6122_s6 + $0xf98] sm:$0xff]  ;;  %718 = vst [vmem:[%s6127_s7 + $0x7c8] sm:$0xff] %v717_v57  ;;  %v723_v60 = vld [vmem:[%s6122_s6 + $0xfc0] sm:$0xff] }
  0x8f   : > { %720 = vst [vmem:[%s6127_s7 + $0x7d0] sm:$0xff] %v719_v58  ;;  %722 = vst [vmem:[%s6127_s7 + $0x7d8] sm:$0xff] %v721_v59  ;;  %v725_v61 = vld [vmem:[%s6122_s6 + $0xfc8] sm:$0xff]  ;;  %v727_v62 = vld [vmem:[%s6122_s6 + $0xfd0] sm:$0xff] }
  0x90   : > { %724 = vst [vmem:[%s6127_s7 + $0x7e0] sm:$0xff] %v723_v60  ;;  %726 = vst [vmem:[%s6127_s7 + $0x7e8] sm:$0xff] %v725_v61  ;;  %v729_v63 = vld [vmem:[%s6122_s6 + $0xfd8] sm:$0xff] }
  0x91   : > { %728 = vst [vmem:[%s6127_s7 + $0x7f0] sm:$0xff] %v727_v62  ;;  %730 = vst [vmem:[%s6127_s7 + $0x7f8] sm:$0xff] %v729_v63 }
  0x92 PF: > { %p5603_p5 = scmp.ge.s32.totalorder %s6052_s20, 1  ;;  %p735_p6 = scmp.lt.s32.totalorder %s6052_s20, 3 }
  0x94   : > { %p736_p7 = pnand %p5603_p5, %p735_p6 }
  0x95   : > { %s742_s8 = sand.u32 (!%p736_p7), 1, %s6044_s18   ;;  %s5605_s9 = sshll.u32 (!%p736_p7), %s6102_s21, 6 }
  0x96   : > { %739 = sbr.rel (%p736_p7) target bundleno = 1477 (0x5c5), region = 59  ;;  %s5604_s10 = sshll.u32 (!%p736_p7), %s742_s8, 11 }
  0x97   : > { %p777_p8 = scmp.lt.s32.totalorder (!%p736_p7), %s5605_s9, 127  ;;  %s6652_s20 = scalar_lea.vmem (!%p736_p7), [#allocation3], %s5604_s10 }
  0x98   : > { %p5611_p9 = scmp.ne.s32.totalorder (!%p736_p7), %s6102_s21, 0 }
  0x9d   : > { %s10601_s9 = smov (!%p777_p8, %s5605_s9), 127  ;;  %794 = sbr.rel (%p5611_p9) target bundleno = 223 (0xdf), region = 67 }
  0x9e   : > { %s5616_s11 = sshll.u32 %s10601_s9, 4  ;;  %vm796_vm0 = vcmask (!%p5611_p9), 556032   ;;  %v6054_v0 = vmov (!%p5611_p9), 0.0  }
  0x9f   : > { %s6645_s14 = scalar_lea.vmem %s10058_s0, %s5616_s11  ;;  %s6650_s17 = scalar_lea.vmem %s10059_s1, %s5616_s11  ;;  %795 = vst [vmem:[#allocation2] sm:$0xff] (!%p5611_p9), %v6054_v0  ;;  %798 = vst [vmem:[#allocation2 + $0x10] sm:$0xff] (!%p5611_p9), %v6054_v0 }
  0xa0   : > { %800 = vst [vmem:[#allocation2 + $0x20] sm:$0xff] (!%p5611_p9), %v6054_v0  ;;  %802 = vst [vmem:[#allocation2 + $0x30] sm:$0xff] (!%p5611_p9), %v6054_v0 }
  0xa1   : > { %804 = vst [vmem:[#allocation2 + $0x40] sm:$0xff] (!%p5611_p9), %v6054_v0  ;;  %806 = vst [vmem:[#allocation2 + $0x50] sm:$0xff] (!%p5611_p9), %v6054_v0 }
  0xa2   : > { %808 = vst [vmem:[#allocation2 + $0x60] sm:$0xff] (!%p5611_p9), %v6054_v0  ;;  %810 = vst [vmem:[#allocation2 + $0x70] sm:$0xff] (!%p5611_p9), %v6054_v0 }
  0xa3   : > { %812 = vst [vmem:[#allocation2 + $0x80] sm:$0xff] (!%p5611_p9), %v6054_v0  ;;  %814 = vst [vmem:[#allocation2 + $0x90] sm:$0xff] (!%p5611_p9), %v6054_v0 }
  0xa4   : > { %816 = vst [vmem:[#allocation2 + $0xa0] sm:$0xff] %v6054_v0  ;;  %818 = vst [vmem:[#allocation2 + $0xb0] sm:$0xff] %v6054_v0 }
  0xa5   : > { %820 = vst [vmem:[#allocation2 + $0xc0] sm:$0xff] %v6054_v0  ;;  %822 = vst [vmem:[#allocation2 + $0xd0] sm:$0xff] %v6054_v0 }
  0xa6   : > { %824 = vst [vmem:[#allocation2 + $0xe0] sm:$0xff] %v6054_v0  ;;  %826 = vst [vmem:[#allocation2 + $0xf0] sm:$0xff] %v6054_v0 }
  0xa7   : > { %828 = vst [vmem:[#allocation2 + $0x100] sm:$0xff] %v6054_v0  ;;  %830 = vst [vmem:[#allocation2 + $0x110] sm:$0xff] %v6054_v0 }
  0xa8   : > { %832 = vst [vmem:[#allocation2 + $0x120] sm:$0xff] %v6054_v0  ;;  %834 = vst [vmem:[#allocation2 + $0x130] sm:$0xff] %v6054_v0 }
  0xa9   : > { %836 = vst [vmem:[#allocation2 + $0x140] sm:$0xff] %v6054_v0  ;;  %838 = vst [vmem:[#allocation2 + $0x150] sm:$0xff] %v6054_v0 }
  0xaa   : > { %840 = vst [vmem:[#allocation2 + $0x160] sm:$0xff] %v6054_v0  ;;  %842 = vst [vmem:[#allocation2 + $0x170] sm:$0xff] %v6054_v0 }
  0xab   : > { %844 = vst [vmem:[#allocation2 + $0x180] sm:$0xff] %v6054_v0  ;;  %846 = vst [vmem:[#allocation2 + $0x190] sm:$0xff] %v6054_v0 }
  0xac   : > { %848 = vst [vmem:[#allocation2 + $0x1a0] sm:$0xff] %v6054_v0  ;;  %850 = vst [vmem:[#allocation2 + $0x1b0] sm:$0xff] %v6054_v0 }
  0xad   : > { %852 = vst [vmem:[#allocation2 + $0x1c0] sm:$0xff] %v6054_v0  ;;  %854 = vst [vmem:[#allocation2 + $0x1d0] sm:$0xff] %v6054_v0 }
  0xae   : > { %856 = vst [vmem:[#allocation2 + $0x1e0] sm:$0xff] %v6054_v0  ;;  %858 = vst [vmem:[#allocation2 + $0x1f0] sm:$0xff] %v6054_v0 }
  0xaf   : > { %860 = vst [vmem:[#allocation2 + $0x200] sm:$0xff] %v6054_v0  ;;  %862 = vst [vmem:[#allocation2 + $0x210] sm:$0xff] %v6054_v0 }
  0xb0   : > { %864 = vst [vmem:[#allocation2 + $0x220] sm:$0xff] %v6054_v0  ;;  %866 = vst [vmem:[#allocation2 + $0x230] sm:$0xff] %v6054_v0 }
  0xb1   : > { %868 = vst [vmem:[#allocation2 + $0x240] sm:$0xff] %v6054_v0  ;;  %870 = vst [vmem:[#allocation2 + $0x250] sm:$0xff] %v6054_v0 }
  0xb2   : > { %872 = vst [vmem:[#allocation2 + $0x260] sm:$0xff] %v6054_v0  ;;  %874 = vst [vmem:[#allocation2 + $0x270] sm:$0xff] %v6054_v0 }
  0xb3   : > { %876 = vst [vmem:[#allocation2 + $0x280] sm:$0xff] %v6054_v0  ;;  %878 = vst [vmem:[#allocation2 + $0x290] sm:$0xff] %v6054_v0 }
  0xb4   : > { %880 = vst [vmem:[#allocation2 + $0x2a0] sm:$0xff] %v6054_v0  ;;  %882 = vst [vmem:[#allocation2 + $0x2b0] sm:$0xff] %v6054_v0 }
  0xb5   : > { %884 = vst [vmem:[#allocation2 + $0x2c0] sm:$0xff] %v6054_v0  ;;  %886 = vst [vmem:[#allocation2 + $0x2d0] sm:$0xff] %v6054_v0 }
  0xb6   : > { %888 = vst [vmem:[#allocation2 + $0x2e0] sm:$0xff] %v6054_v0  ;;  %890 = vst [vmem:[#allocation2 + $0x2f0] sm:$0xff] %v6054_v0 }
  0xb7   : > { %892 = vst [vmem:[#allocation2 + $0x300] sm:$0xff] %v6054_v0  ;;  %894 = vst [vmem:[#allocation2 + $0x310] sm:$0xff] %v6054_v0 }
  0xb8   : > { %896 = vst [vmem:[#allocation2 + $0x320] sm:$0xff] %v6054_v0  ;;  %898 = vst [vmem:[#allocation2 + $0x330] sm:$0xff] %v6054_v0 }
  0xb9   : > { %900 = vst [vmem:[#allocation2 + $0x340] sm:$0xff] %v6054_v0  ;;  %902 = vst [vmem:[#allocation2 + $0x350] sm:$0xff] %v6054_v0 }
  0xba   : > { %904 = vst [vmem:[#allocation2 + $0x360] sm:$0xff] %v6054_v0  ;;  %906 = vst [vmem:[#allocation2 + $0x370] sm:$0xff] %v6054_v0 }
  0xbb   : > { %908 = vst [vmem:[#allocation2 + $0x380] sm:$0xff] %v6054_v0  ;;  %910 = vst [vmem:[#allocation2 + $0x390] sm:$0xff] %v6054_v0 }
  0xbc   : > { %912 = vst [vmem:[#allocation2 + $0x3a0] sm:$0xff] %v6054_v0  ;;  %914 = vst [vmem:[#allocation2 + $0x3b0] sm:$0xff] %v6054_v0 }
  0xbd   : > { %916 = vst [vmem:[#allocation2 + $0x3c0] sm:$0xff] %v6054_v0  ;;  %918 = vst [vmem:[#allocation2 + $0x3d0] sm:$0xff] %v6054_v0 }
  0xbe   : > { %920 = vst [vmem:[#allocation2 + $0x3e0] sm:$0xff] %v6054_v0  ;;  %922 = vst [vmem:[#allocation2 + $0x3f0] sm:$0xff] %v6054_v0 }
  0xbf   : > { %797 = vst.msk [vmem:[#allocation2 + $0x8] sm:$0xff] %vm796_vm0, %v6054_v0  ;;  %799 = vst.msk [vmem:[#allocation2 + $0x18] sm:$0xff] %vm796_vm0, %v6054_v0 }
  0xc0   : > { %801 = vst.msk [vmem:[#allocation2 + $0x28] sm:$0xff] %vm796_vm0, %v6054_v0  ;;  %803 = vst.msk [vmem:[#allocation2 + $0x38] sm:$0xff] %vm796_vm0, %v6054_v0 }
  0xc1   : > { %805 = vst.msk [vmem:[#allocation2 + $0x48] sm:$0xff] %vm796_vm0, %v6054_v0  ;;  %807 = vst.msk [vmem:[#allocation2 + $0x58] sm:$0xff] %vm796_vm0, %v6054_v0 }
  0xc2   : > { %809 = vst.msk [vmem:[#allocation2 + $0x68] sm:$0xff] %vm796_vm0, %v6054_v0  ;;  %811 = vst.msk [vmem:[#allocation2 + $0x78] sm:$0xff] %vm796_vm0, %v6054_v0 }
  0xc3   : > { %813 = vst.msk [vmem:[#allocation2 + $0x88] sm:$0xff] %vm796_vm0, %v6054_v0  ;;  %815 = vst.msk [vmem:[#allocation2 + $0x98] sm:$0xff] %vm796_vm0, %v6054_v0 }
  0xc4   : > { %817 = vst.msk [vmem:[#allocation2 + $0xa8] sm:$0xff] %vm796_vm0, %v6054_v0  ;;  %819 = vst.msk [vmem:[#allocation2 + $0xb8] sm:$0xff] %vm796_vm0, %v6054_v0 }
  0xc5   : > { %821 = vst.msk [vmem:[#allocation2 + $0xc8] sm:$0xff] %vm796_vm0, %v6054_v0  ;;  %823 = vst.msk [vmem:[#allocation2 + $0xd8] sm:$0xff] %vm796_vm0, %v6054_v0 }
  0xc6   : > { %825 = vst.msk [vmem:[#allocation2 + $0xe8] sm:$0xff] %vm796_vm0, %v6054_v0  ;;  %827 = vst.msk [vmem:[#allocation2 + $0xf8] sm:$0xff] %vm796_vm0, %v6054_v0 }
  0xc7   : > { %829 = vst.msk [vmem:[#allocation2 + $0x108] sm:$0xff] %vm796_vm0, %v6054_v0  ;;  %831 = vst.msk [vmem:[#allocation2 + $0x118] sm:$0xff] %vm796_vm0, %v6054_v0 }
  0xc8   : > { %833 = vst.msk [vmem:[#allocation2 + $0x128] sm:$0xff] %vm796_vm0, %v6054_v0  ;;  %835 = vst.msk [vmem:[#allocation2 + $0x138] sm:$0xff] %vm796_vm0, %v6054_v0 }
  0xc9   : > { %837 = vst.msk [vmem:[#allocation2 + $0x148] sm:$0xff] %vm796_vm0, %v6054_v0  ;;  %839 = vst.msk [vmem:[#allocation2 + $0x158] sm:$0xff] %vm796_vm0, %v6054_v0 }
  0xca   : > { %841 = vst.msk [vmem:[#allocation2 + $0x168] sm:$0xff] %vm796_vm0, %v6054_v0  ;;  %843 = vst.msk [vmem:[#allocation2 + $0x178] sm:$0xff] %vm796_vm0, %v6054_v0 }
  0xcb   : > { %845 = vst.msk [vmem:[#allocation2 + $0x188] sm:$0xff] %vm796_vm0, %v6054_v0  ;;  %847 = vst.msk [vmem:[#allocation2 + $0x198] sm:$0xff] %vm796_vm0, %v6054_v0 }
  0xcc   : > { %849 = vst.msk [vmem:[#allocation2 + $0x1a8] sm:$0xff] %vm796_vm0, %v6054_v0  ;;  %851 = vst.msk [vmem:[#allocation2 + $0x1b8] sm:$0xff] %vm796_vm0, %v6054_v0 }
  0xcd   : > { %853 = vst.msk [vmem:[#allocation2 + $0x1c8] sm:$0xff] %vm796_vm0, %v6054_v0  ;;  %855 = vst.msk [vmem:[#allocation2 + $0x1d8] sm:$0xff] %vm796_vm0, %v6054_v0 }
  0xce   : > { %857 = vst.msk [vmem:[#allocation2 + $0x1e8] sm:$0xff] %vm796_vm0, %v6054_v0  ;;  %859 = vst.msk [vmem:[#allocation2 + $0x1f8] sm:$0xff] %vm796_vm0, %v6054_v0 }
  0xcf   : > { %861 = vst.msk [vmem:[#allocation2 + $0x208] sm:$0xff] %vm796_vm0, %v6054_v0  ;;  %863 = vst.msk [vmem:[#allocation2 + $0x218] sm:$0xff] %vm796_vm0, %v6054_v0 }
  0xd0   : > { %865 = vst.msk [vmem:[#allocation2 + $0x228] sm:$0xff] %vm796_vm0, %v6054_v0  ;;  %867 = vst.msk [vmem:[#allocation2 + $0x238] sm:$0xff] %vm796_vm0, %v6054_v0 }
  0xd1   : > { %869 = vst.msk [vmem:[#allocation2 + $0x248] sm:$0xff] %vm796_vm0, %v6054_v0  ;;  %871 = vst.msk [vmem:[#allocation2 + $0x258] sm:$0xff] %vm796_vm0, %v6054_v0 }
  0xd2   : > { %873 = vst.msk [vmem:[#allocation2 + $0x268] sm:$0xff] %vm796_vm0, %v6054_v0  ;;  %875 = vst.msk [vmem:[#allocation2 + $0x278] sm:$0xff] %vm796_vm0, %v6054_v0 }
  0xd3   : > { %877 = vst.msk [vmem:[#allocation2 + $0x288] sm:$0xff] %vm796_vm0, %v6054_v0  ;;  %879 = vst.msk [vmem:[#allocation2 + $0x298] sm:$0xff] %vm796_vm0, %v6054_v0 }
  0xd4   : > { %881 = vst.msk [vmem:[#allocation2 + $0x2a8] sm:$0xff] %vm796_vm0, %v6054_v0  ;;  %883 = vst.msk [vmem:[#allocation2 + $0x2b8] sm:$0xff] %vm796_vm0, %v6054_v0 }
  0xd5   : > { %885 = vst.msk [vmem:[#allocation2 + $0x2c8] sm:$0xff] %vm796_vm0, %v6054_v0  ;;  %887 = vst.msk [vmem:[#allocation2 + $0x2d8] sm:$0xff] %vm796_vm0, %v6054_v0 }
  0xd6   : > { %889 = vst.msk [vmem:[#allocation2 + $0x2e8] sm:$0xff] %vm796_vm0, %v6054_v0  ;;  %891 = vst.msk [vmem:[#allocation2 + $0x2f8] sm:$0xff] %vm796_vm0, %v6054_v0 }
  0xd7   : > { %893 = vst.msk [vmem:[#allocation2 + $0x308] sm:$0xff] %vm796_vm0, %v6054_v0  ;;  %895 = vst.msk [vmem:[#allocation2 + $0x318] sm:$0xff] %vm796_vm0, %v6054_v0 }
  0xd8   : > { %897 = vst.msk [vmem:[#allocation2 + $0x328] sm:$0xff] %vm796_vm0, %v6054_v0  ;;  %899 = vst.msk [vmem:[#allocation2 + $0x338] sm:$0xff] %vm796_vm0, %v6054_v0 }
  0xd9   : > { %901 = vst.msk [vmem:[#allocation2 + $0x348] sm:$0xff] %vm796_vm0, %v6054_v0  ;;  %903 = vst.msk [vmem:[#allocation2 + $0x358] sm:$0xff] %vm796_vm0, %v6054_v0 }
  0xda   : > { %905 = vst.msk [vmem:[#allocation2 + $0x368] sm:$0xff] %vm796_vm0, %v6054_v0  ;;  %907 = vst.msk [vmem:[#allocation2 + $0x378] sm:$0xff] %vm796_vm0, %v6054_v0 }
  0xdb   : > { %909 = vst.msk [vmem:[#allocation2 + $0x388] sm:$0xff] %vm796_vm0, %v6054_v0  ;;  %911 = vst.msk [vmem:[#allocation2 + $0x398] sm:$0xff] %vm796_vm0, %v6054_v0 }
  0xdc   : > { %913 = vst.msk [vmem:[#allocation2 + $0x3a8] sm:$0xff] %vm796_vm0, %v6054_v0  ;;  %915 = vst.msk [vmem:[#allocation2 + $0x3b8] sm:$0xff] %vm796_vm0, %v6054_v0 }
  0xdd   : > { %917 = vst.msk [vmem:[#allocation2 + $0x3c8] sm:$0xff] %vm796_vm0, %v6054_v0  ;;  %919 = vst.msk [vmem:[#allocation2 + $0x3d8] sm:$0xff] %vm796_vm0, %v6054_v0 }
  0xde   : > { %921 = vst.msk [vmem:[#allocation2 + $0x3e8] sm:$0xff] %vm796_vm0, %v6054_v0  ;;  %923 = vst.msk [vmem:[#allocation2 + $0x3f8] sm:$0xff] %vm796_vm0, %v6054_v0 }
  0xdf PF: > { %v925_v1 = vld [vmem:[%s6645_s14 + $0x8] sm:$0xff]  ;;  %v927_v2 = vld [vmem:[%s6645_s14 + $0x18] sm:$0xff]  ;;  %v924_v11 = vld [vmem:[%s6645_s14] sm:$0xff]  ;;  %vm2847_vm1 = vcmask 556032   ;;  %p5612_p10 = scmp.ne.s32.totalorder %s6102_s21, 1 }
  0xe0   : > { %v1053_v3 = vld [vmem:[%s6650_s17 + $0x8] sm:$0xff]  ;;  %v1055_v4 = vld [vmem:[%s6650_s17 + $0x18] sm:$0xff]  ;;  %v926_v15 = vld [vmem:[%s6645_s14 + $0x10] sm:$0xff] }
  0xe1   : > { %v1181_v5 = vadd.f32 %v1053_v3, %v925_v1  ;;  %v989_v6 = vld [vmem:[%s6645_s14 + $0x208] sm:$0xff]  ;;  %v991_v7 = vld [vmem:[%s6645_s14 + $0x218] sm:$0xff]  ;;  %v1183_v8 = vadd.f32 %v1055_v4, %v927_v2  ;;  %v1052_v16 = vld [vmem:[%s6650_s17] sm:$0xff] }
  0xe2   : > { %v1117_v9 = vld [vmem:[%s6650_s17 + $0x208] sm:$0xff]  ;;  %v1119_v10 = vld [vmem:[%s6650_s17 + $0x218] sm:$0xff]  ;;  %v1054_v17 = vld [vmem:[%s6650_s17 + $0x10] sm:$0xff]  ;;  %v1180_v19 = vadd.f32 %v1052_v16, %v924_v11 }
  0xe3   : > { %v1309_v12 = vmax.f32 %v1181_v5, 0.0  ;;  %v1245_v13 = vadd.f32 %v1117_v9, %v989_v6  ;;  %v1247_v14 = vadd.f32 %v1119_v10, %v991_v7  ;;  %v1311_v18 = vmax.f32 %v1183_v8, 0.0  ;;  %v988_v21 = vld [vmem:[%s6645_s14 + $0x200] sm:$0xff]  ;;  %v990_v22 = vld [vmem:[%s6645_s14 + $0x210] sm:$0xff]  ;;  %v929_v28 = vld [vmem:[%s6645_s14 + $0x28] sm:$0xff] }
  0xe4   : > { %v1182_v20 = vadd.f32 %v1054_v17, %v926_v15  ;;  %v1116_v23 = vld [vmem:[%s6650_s17 + $0x200] sm:$0xff]  ;;  %v1118_v26 = vld [vmem:[%s6650_s17 + $0x210] sm:$0xff]  ;;  %v931_v29 = vld [vmem:[%s6645_s14 + $0x38] sm:$0xff]  ;;  %v1308_v31 = vmax.f32 %v1180_v19, 0.0 }
  0xe5   : > { %v1373_v24 = vmax.f32 %v1245_v13, 0.0  ;;  %v1375_v25 = vmax.f32 %v1247_v14, 0.0  ;;  %v1244_v27 = vadd.f32 %v1116_v23, %v988_v21  ;;  %v1437_v30 = vpack.c.bf16 %v1311_v18, %v1309_v12  ;;  %v1057_v34 = vld [vmem:[%s6650_s17 + $0x28] sm:$0xff]  ;;  %v1059_v35 = vld [vmem:[%s6650_s17 + $0x38] sm:$0xff]  ;;  %v928_v48 = vld [vmem:[%s6645_s14 + $0x20] sm:$0xff] }
  0xe6   : > { %v1310_v32 = vmax.f32 %v1182_v20, 0.0  ;;  %v1246_v33 = vadd.f32 %v1118_v26, %v990_v22  ;;  %v993_v36 = vld [vmem:[%s6645_s14 + $0x228] sm:$0xff]  ;;  %v1185_v39 = vadd.f32 %v1057_v34, %v929_v28  ;;  %v1187_v40 = vadd.f32 %v1059_v35, %v931_v29  ;;  %v995_v41 = vld [vmem:[%s6645_s14 + $0x238] sm:$0xff]  ;;  %v930_v49 = vld [vmem:[%s6645_s14 + $0x30] sm:$0xff] }
  0xe7   : > { %v1469_v37 = vpack.c.bf16 %v1375_v25, %v1373_v24  ;;  %v1372_v38 = vmax.f32 %v1244_v27, 0.0  ;;  %v1121_v42 = vld [vmem:[%s6650_s17 + $0x228] sm:$0xff]  ;;  %v1123_v43 = vld [vmem:[%s6650_s17 + $0x238] sm:$0xff]  ;;  %2012 = vmatprep.subr.bf16.mxu1 %v1437_v30  ;;  %v1056_v50 = vld [vmem:[%s6650_s17 + $0x20] sm:$0xff] }
  0xe8   : > { %v1436_v44 = vpack.c.bf16 %v1310_v32, %v1308_v31  ;;  %v1374_v45 = vmax.f32 %v1246_v33, 0.0  ;;  %v1249_v46 = vadd.f32 %v1121_v42, %v993_v36  ;;  %v1251_v47 = vadd.f32 %v1123_v43, %v995_v41  ;;  %v1058_v53 = vld [vmem:[%s6650_s17 + $0x30] sm:$0xff]  ;;  %v992_v55 = vld [vmem:[%s6645_s14 + $0x220] sm:$0xff]  ;;  %v933_v63 = vld [vmem:[%s6645_s14 + $0x48] sm:$0xff] }
  0xe9   : > { %2365 = vmatprep.subr.bf16.mxu0 %v1469_v37  ;;  %v1313_v51 = vmax.f32 %v1185_v39, 0.0  ;;  %v1315_v52 = vmax.f32 %v1187_v40, 0.0  ;;  %v1184_v54 = vadd.f32 %v1056_v50, %v928_v48  ;;  %v994_v56 = vld [vmem:[%s6645_s14 + $0x230] sm:$0xff]  ;;  %v1186_v60 = vadd.f32 %v1058_v53, %v930_v49  ;;  %v1120_v61 = vld [vmem:[%s6650_s17 + $0x220] sm:$0xff]  ;;  %v935_v4 = vld [vmem:[%s6645_s14 + $0x58] sm:$0xff] }
  0xea   : > { %2013 = vmatpush1.bf16.msra.mxu1 %v1436_v44  ;;  %v1468_v57 = vpack.c.bf16 %v1374_v45, %v1372_v38  ;;  %v1377_v58 = vmax.f32 %v1249_v46, 0.0  ;;  %v1379_v59 = vmax.f32 %v1251_v47, 0.0  ;;  %v1122_v62 = vld [vmem:[%s6650_s17 + $0x230] sm:$0xff]  ;;  %v1248_v2 = vadd.f32 %v1120_v61, %v992_v55  ;;  %v1061_v5 = vld [vmem:[%s6650_s17 + $0x48] sm:$0xff]  ;;  %v1063_v6 = vld [vmem:[%s6650_s17 + $0x58] sm:$0xff] }
  0xeb   : > { %v1439_v0 = vpack.c.bf16 %v1315_v52, %v1313_v51  ;;  %v1312_v1 = vmax.f32 %v1184_v54, 0.0  ;;  %v1250_v3 = vadd.f32 %v1122_v62, %v994_v56  ;;  %v1314_v8 = vmax.f32 %v1186_v60, 0.0  ;;  %v997_v11 = vld [vmem:[%s6645_s14 + $0x248] sm:$0xff]  ;;  %v999_v12 = vld [vmem:[%s6645_s14 + $0x258] sm:$0xff]  ;;  %v932_v18 = vld [vmem:[%s6645_s14 + $0x40] sm:$0xff] }
  0xec   : > { %2366 = vmatpush1.bf16.msra.mxu0 %v1468_v57  ;;  %v1471_v7 = vpack.c.bf16 %v1379_v59, %v1377_v58  ;;  %v1189_v9 = vadd.f32 %v1061_v5, %v933_v63  ;;  %v1191_v10 = vadd.f32 %v1063_v6, %v935_v4  ;;  %v1125_v13 = vld [vmem:[%s6650_s17 + $0x248] sm:$0xff]  ;;  %v1376_v14 = vmax.f32 %v1248_v2, 0.0  ;;  %v1127_v16 = vld [vmem:[%s6650_s17 + $0x258] sm:$0xff]  ;;  %v934_v19 = vld [vmem:[%s6645_s14 + $0x50] sm:$0xff] }
  0xed   : > { %2014 = vmatprep.subr.bf16.mxu1 %v1439_v0  ;;  %v1378_v15 = vmax.f32 %v1250_v3, 0.0  ;;  %v1253_v17 = vadd.f32 %v1125_v13, %v997_v11  ;;  %v1438_v20 = vpack.c.bf16 %v1314_v8, %v1312_v1  ;;  %v1255_v23 = vadd.f32 %v1127_v16, %v999_v12  ;;  %v1060_v24 = vld [vmem:[%s6650_s17 + $0x40] sm:$0xff]  ;;  %v1062_v25 = vld [vmem:[%s6650_s17 + $0x50] sm:$0xff]  ;;  %v937_v38 = vld [vmem:[%s6645_s14 + $0x68] sm:$0xff] }
  0xee   : > { %2367 = vmatprep.subr.bf16.mxu0 %v1471_v7  ;;  %v1317_v21 = vmax.f32 %v1189_v9, 0.0  ;;  %v1319_v22 = vmax.f32 %v1191_v10, 0.0  ;;  %v996_v26 = vld [vmem:[%s6645_s14 + $0x240] sm:$0xff]  ;;  %v1188_v29 = vadd.f32 %v1060_v24, %v932_v18  ;;  %v1190_v30 = vadd.f32 %v1062_v25, %v934_v19  ;;  %v998_v31 = vld [vmem:[%s6645_s14 + $0x250] sm:$0xff]  ;;  %v939_v39 = vld [vmem:[%s6645_s14 + $0x78] sm:$0xff] }
  0xef   : > { %v1470_v27 = vpack.c.bf16 %v1378_v15, %v1376_v14  ;;  %v1381_v28 = vmax.f32 %v1253_v17, 0.0  ;;  %v1124_v32 = vld [vmem:[%s6650_s17 + $0x240] sm:$0xff]  ;;  %v1126_v33 = vld [vmem:[%s6650_s17 + $0x250] sm:$0xff]  ;;  %2015 = vmatpush1.bf16.msra.mxu1 %v1438_v20  ;;  %v1383_v35 = vmax.f32 %v1255_v23, 0.0  ;;  %v1065_v40 = vld [vmem:[%s6650_s17 + $0x68] sm:$0xff] }
  0xf0   : > { %v1441_v34 = vpack.c.bf16 %v1319_v22, %v1317_v21  ;;  %v1252_v36 = vadd.f32 %v1124_v32, %v996_v26  ;;  %v1254_v37 = vadd.f32 %v1126_v33, %v998_v31  ;;  %v1316_v41 = vmax.f32 %v1188_v29, 0.0  ;;  %v1067_v43 = vld [vmem:[%s6650_s17 + $0x78] sm:$0xff]  ;;  %v1001_v45 = vld [vmem:[%s6645_s14 + $0x268] sm:$0xff]  ;;  %v936_v53 = vld [vmem:[%s6645_s14 + $0x60] sm:$0xff] }
  0xf1   : > { %2368 = vmatpush1.bf16.msra.mxu0 %v1470_v27  ;;  %v1318_v42 = vmax.f32 %v1190_v30, 0.0  ;;  %v1193_v44 = vadd.f32 %v1065_v40, %v937_v38  ;;  %v1003_v46 = vld [vmem:[%s6645_s14 + $0x278] sm:$0xff]  ;;  %v1473_v47 = vpack.c.bf16 %v1383_v35, %v1381_v28  ;;  %v1195_v50 = vadd.f32 %v1067_v43, %v939_v39  ;;  %v1129_v51 = vld [vmem:[%s6650_s17 + $0x268] sm:$0xff]  ;;  %v938_v58 = vld [vmem:[%s6645_s14 + $0x70] sm:$0xff] }
  0xf2   : > { %2016 = vmatprep.subr.bf16.mxu1 %v1441_v34  ;;  %v1380_v48 = vmax.f32 %v1252_v36, 0.0  ;;  %v1382_v49 = vmax.f32 %v1254_v37, 0.0  ;;  %v1131_v52 = vld [vmem:[%s6650_s17 + $0x278] sm:$0xff]  ;;  %v1257_v56 = vadd.f32 %v1129_v51, %v1001_v45  ;;  %v1064_v59 = vld [vmem:[%s6650_s17 + $0x60] sm:$0xff]  ;;  %v1066_v60 = vld [vmem:[%s6650_s17 + $0x70] sm:$0xff] }
  0xf3   : > { %v1440_v54 = vpack.c.bf16 %v1318_v42, %v1316_v41  ;;  %v1321_v55 = vmax.f32 %v1193_v44, 0.0  ;;  %v1259_v57 = vadd.f32 %v1131_v52, %v1003_v46  ;;  %2369 = vmatprep.subr.bf16.mxu0 %v1473_v47  ;;  %v1323_v62 = vmax.f32 %v1195_v50, 0.0  ;;  %v1000_v1 = vld [vmem:[%s6645_s14 + $0x260] sm:$0xff]  ;;  %v1002_v2 = vld [vmem:[%s6645_s14 + $0x270] sm:$0xff]  ;;  %v941_v8 = vld [vmem:[%s6645_s14 + $0x88] sm:$0xff] }
  0xf4   : > { %v1472_v61 = vpack.c.bf16 %v1382_v49, %v1380_v48  ;;  %v1192_v63 = vadd.f32 %v1064_v59, %v936_v53  ;;  %v1194_v0 = vadd.f32 %v1066_v60, %v938_v58  ;;  %v1128_v3 = vld [vmem:[%s6650_s17 + $0x260] sm:$0xff]  ;;  %v1385_v4 = vmax.f32 %v1257_v56, 0.0  ;;  %v1130_v6 = vld [vmem:[%s6650_s17 + $0x270] sm:$0xff]  ;;  %v943_v9 = vld [vmem:[%s6645_s14 + $0x98] sm:$0xff] }
  0xf5   : > { %2017 = vmatpush1.bf16.msra.mxu1 %v1440_v54  ;;  %v1387_v5 = vmax.f32 %v1259_v57, 0.0  ;;  %v1256_v7 = vadd.f32 %v1128_v3, %v1000_v1  ;;  %v1443_v10 = vpack.c.bf16 %v1323_v62, %v1321_v55  ;;  %v1258_v13 = vadd.f32 %v1130_v6, %v1002_v2  ;;  %v1069_v14 = vld [vmem:[%s6650_s17 + $0x88] sm:$0xff]  ;;  %v1071_v15 = vld [vmem:[%s6650_s17 + $0x98] sm:$0xff]  ;;  %v940_v28 = vld [vmem:[%s6645_s14 + $0x80] sm:$0xff] }
  0xf6   : > { %2370 = vmatpush1.bf16.msra.mxu0 %v1472_v61  ;;  %v1320_v11 = vmax.f32 %v1192_v63, 0.0  ;;  %v1322_v12 = vmax.f32 %v1194_v0, 0.0  ;;  %v1005_v16 = vld [vmem:[%s6645_s14 + $0x288] sm:$0xff]  ;;  %v1197_v19 = vadd.f32 %v1069_v14, %v941_v8  ;;  %v1199_v20 = vadd.f32 %v1071_v15, %v943_v9  ;;  %v1007_v21 = vld [vmem:[%s6645_s14 + $0x298] sm:$0xff]  ;;  %v942_v29 = vld [vmem:[%s6645_s14 + $0x90] sm:$0xff] }
  0xf7   : > { %v1475_v17 = vpack.c.bf16 %v1387_v5, %v1385_v4  ;;  %v1384_v18 = vmax.f32 %v1256_v7, 0.0  ;;  %v1133_v22 = vld [vmem:[%s6650_s17 + $0x288] sm:$0xff]  ;;  %v1135_v23 = vld [vmem:[%s6650_s17 + $0x298] sm:$0xff]  ;;  %2018 = vmatprep.subr.bf16.mxu1 %v1443_v10  ;;  %v1386_v25 = vmax.f32 %v1258_v13, 0.0  ;;  %v1068_v30 = vld [vmem:[%s6650_s17 + $0x80] sm:$0xff] }
  0xf8   : > { %v1442_v24 = vpack.c.bf16 %v1322_v12, %v1320_v11  ;;  %v1261_v26 = vadd.f32 %v1133_v22, %v1005_v16  ;;  %v1263_v27 = vadd.f32 %v1135_v23, %v1007_v21  ;;  %v1325_v31 = vmax.f32 %v1197_v19, 0.0  ;;  %v1070_v33 = vld [vmem:[%s6650_s17 + $0x90] sm:$0xff]  ;;  %v1004_v35 = vld [vmem:[%s6645_s14 + $0x280] sm:$0xff]  ;;  %v945_v43 = vld [vmem:[%s6645_s14 + $0xa8] sm:$0xff] }
  0xf9   : > { %2371 = vmatprep.subr.bf16.mxu0 %v1475_v17  ;;  %v1327_v32 = vmax.f32 %v1199_v20, 0.0  ;;  %v1196_v34 = vadd.f32 %v1068_v30, %v940_v28  ;;  %v1006_v36 = vld [vmem:[%s6645_s14 + $0x290] sm:$0xff]  ;;  %v1474_v37 = vpack.c.bf16 %v1386_v25, %v1384_v18  ;;  %v1198_v40 = vadd.f32 %v1070_v33, %v942_v29  ;;  %v1132_v41 = vld [vmem:[%s6650_s17 + $0x280] sm:$0xff]  ;;  %v947_v48 = vld [vmem:[%s6645_s14 + $0xb8] sm:$0xff] }
  0xfa   : > { %2019 = vmatpush1.bf16.msra.mxu1 %v1442_v24  ;;  %v1389_v38 = vmax.f32 %v1261_v26, 0.0  ;;  %v1391_v39 = vmax.f32 %v1263_v27, 0.0  ;;  %v1134_v42 = vld [vmem:[%s6650_s17 + $0x290] sm:$0xff]  ;;  %v1260_v46 = vadd.f32 %v1132_v41, %v1004_v35  ;;  %v1073_v49 = vld [vmem:[%s6650_s17 + $0xa8] sm:$0xff]  ;;  %v1075_v50 = vld [vmem:[%s6650_s17 + $0xb8] sm:$0xff] }
  0xfb   : > { %v1445_v44 = vpack.c.bf16 %v1327_v32, %v1325_v31  ;;  %v1324_v45 = vmax.f32 %v1196_v34, 0.0  ;;  %v1262_v47 = vadd.f32 %v1134_v42, %v1006_v36  ;;  %2372 = vmatpush1.bf16.msra.mxu0 %v1474_v37  ;;  %v1326_v52 = vmax.f32 %v1198_v40, 0.0  ;;  %v1009_v55 = vld [vmem:[%s6645_s14 + $0x2a8] sm:$0xff]  ;;  %v1011_v56 = vld [vmem:[%s6645_s14 + $0x2b8] sm:$0xff]  ;;  %v944_v62 = vld [vmem:[%s6645_s14 + $0xa0] sm:$0xff] }
  0xfc   : > { %v1477_v51 = vpack.c.bf16 %v1391_v39, %v1389_v38  ;;  %v1201_v53 = vadd.f32 %v1073_v49, %v945_v43  ;;  %v1203_v54 = vadd.f32 %v1075_v50, %v947_v48  ;;  %v1137_v57 = vld [vmem:[%s6650_s17 + $0x2a8] sm:$0xff]  ;;  %v1388_v58 = vmax.f32 %v1260_v46, 0.0  ;;  %v1139_v60 = vld [vmem:[%s6650_s17 + $0x2b8] sm:$0xff]  ;;  %v946_v63 = vld [vmem:[%s6645_s14 + $0xb0] sm:$0xff] }
  0xfd   : > { %2020 = vmatprep.subr.bf16.mxu1 %v1445_v44  ;;  %v1390_v59 = vmax.f32 %v1262_v47, 0.0  ;;  %v1265_v61 = vadd.f32 %v1137_v57, %v1009_v55  ;;  %v1444_v0 = vpack.c.bf16 %v1326_v52, %v1324_v45  ;;  %v1267_v3 = vadd.f32 %v1139_v60, %v1011_v56  ;;  %v1072_v4 = vld [vmem:[%s6650_s17 + $0xa0] sm:$0xff]  ;;  %v1074_v5 = vld [vmem:[%s6650_s17 + $0xb0] sm:$0xff]  ;;  %v949_v18 = vld [vmem:[%s6645_s14 + $0xc8] sm:$0xff] }
  0xfe   : > { %2373 = vmatprep.subr.bf16.mxu0 %v1477_v51  ;;  %v1329_v1 = vmax.f32 %v1201_v53, 0.0  ;;  %v1331_v2 = vmax.f32 %v1203_v54, 0.0  ;;  %v1008_v6 = vld [vmem:[%s6645_s14 + $0x2a0] sm:$0xff]  ;;  %v1200_v9 = vadd.f32 %v1072_v4, %v944_v62  ;;  %v1202_v10 = vadd.f32 %v1074_v5, %v946_v63  ;;  %v1010_v11 = vld [vmem:[%s6645_s14 + $0x2b0] sm:$0xff]  ;;  %v951_v19 = vld [vmem:[%s6645_s14 + $0xd8] sm:$0xff] }
  0xff   : > { %v1476_v7 = vpack.c.bf16 %v1390_v59, %v1388_v58  ;;  %v1393_v8 = vmax.f32 %v1265_v61, 0.0  ;;  %v1136_v12 = vld [vmem:[%s6650_s17 + $0x2a0] sm:$0xff]  ;;  %v1138_v13 = vld [vmem:[%s6650_s17 + $0x2b0] sm:$0xff]  ;;  %2021 = vmatpush1.bf16.msra.mxu1 %v1444_v0  ;;  %v1395_v15 = vmax.f32 %v1267_v3, 0.0  ;;  %v1077_v20 = vld [vmem:[%s6650_s17 + $0xc8] sm:$0xff] }
 0x100   : > { %v1447_v14 = vpack.c.bf16 %v1331_v2, %v1329_v1  ;;  %v1264_v16 = vadd.f32 %v1136_v12, %v1008_v6  ;;  %v1266_v17 = vadd.f32 %v1138_v13, %v1010_v11  ;;  %v1328_v21 = vmax.f32 %v1200_v9, 0.0  ;;  %v1079_v23 = vld [vmem:[%s6650_s17 + $0xd8] sm:$0xff]  ;;  %v1013_v25 = vld [vmem:[%s6645_s14 + $0x2c8] sm:$0xff]  ;;  %v948_v33 = vld [vmem:[%s6645_s14 + $0xc0] sm:$0xff] }
 0x101   : > { %2374 = vmatpush1.bf16.msra.mxu0 %v1476_v7  ;;  %v1330_v22 = vmax.f32 %v1202_v10, 0.0  ;;  %v1205_v24 = vadd.f32 %v1077_v20, %v949_v18  ;;  %v1015_v26 = vld [vmem:[%s6645_s14 + $0x2d8] sm:$0xff]  ;;  %v1479_v27 = vpack.c.bf16 %v1395_v15, %v1393_v8  ;;  %v1207_v30 = vadd.f32 %v1079_v23, %v951_v19  ;;  %v1141_v31 = vld [vmem:[%s6650_s17 + $0x2c8] sm:$0xff]  ;;  %v950_v38 = vld [vmem:[%s6645_s14 + $0xd0] sm:$0xff] }
 0x102   : > { %2022 = vmatprep.subr.bf16.mxu1 %v1447_v14  ;;  %v1392_v28 = vmax.f32 %v1264_v16, 0.0  ;;  %v1394_v29 = vmax.f32 %v1266_v17, 0.0  ;;  %v1143_v32 = vld [vmem:[%s6650_s17 + $0x2d8] sm:$0xff]  ;;  %v1269_v36 = vadd.f32 %v1141_v31, %v1013_v25  ;;  %v1076_v39 = vld [vmem:[%s6650_s17 + $0xc0] sm:$0xff]  ;;  %v1078_v40 = vld [vmem:[%s6650_s17 + $0xd0] sm:$0xff] }
 0x103   : > { %v1446_v34 = vpack.c.bf16 %v1330_v22, %v1328_v21  ;;  %v1333_v35 = vmax.f32 %v1205_v24, 0.0  ;;  %v1271_v37 = vadd.f32 %v1143_v32, %v1015_v26  ;;  %2375 = vmatprep.subr.bf16.mxu0 %v1479_v27  ;;  %v1335_v42 = vmax.f32 %v1207_v30, 0.0  ;;  %v1012_v45 = vld [vmem:[%s6645_s14 + $0x2c0] sm:$0xff]  ;;  %v1014_v46 = vld [vmem:[%s6645_s14 + $0x2d0] sm:$0xff]  ;;  %v953_v52 = vld [vmem:[%s6645_s14 + $0xe8] sm:$0xff] }
 0x104   : > { %v1478_v41 = vpack.c.bf16 %v1394_v29, %v1392_v28  ;;  %v1204_v43 = vadd.f32 %v1076_v39, %v948_v33  ;;  %v1206_v44 = vadd.f32 %v1078_v40, %v950_v38  ;;  %v1140_v47 = vld [vmem:[%s6650_s17 + $0x2c0] sm:$0xff]  ;;  %v1397_v48 = vmax.f32 %v1269_v36, 0.0  ;;  %v1142_v50 = vld [vmem:[%s6650_s17 + $0x2d0] sm:$0xff]  ;;  %v955_v53 = vld [vmem:[%s6645_s14 + $0xf8] sm:$0xff] }
 0x105   : > { %2023 = vmatpush1.bf16.msra.mxu1 %v1446_v34  ;;  %v1399_v49 = vmax.f32 %v1271_v37, 0.0  ;;  %v1268_v51 = vadd.f32 %v1140_v47, %v1012_v45  ;;  %v1449_v54 = vpack.c.bf16 %v1335_v42, %v1333_v35  ;;  %v1270_v57 = vadd.f32 %v1142_v50, %v1014_v46  ;;  %v1081_v58 = vld [vmem:[%s6650_s17 + $0xe8] sm:$0xff]  ;;  %v1083_v59 = vld [vmem:[%s6650_s17 + $0xf8] sm:$0xff]  ;;  %v952_v8 = vld [vmem:[%s6645_s14 + $0xe0] sm:$0xff] }
 0x106   : > { %2376 = vmatpush1.bf16.msra.mxu0 %v1478_v41  ;;  %v1332_v55 = vmax.f32 %v1204_v43, 0.0  ;;  %v1334_v56 = vmax.f32 %v1206_v44, 0.0  ;;  %v1017_v60 = vld [vmem:[%s6645_s14 + $0x2e8] sm:$0xff]  ;;  %v1209_v63 = vadd.f32 %v1081_v58, %v953_v52  ;;  %v1211_v0 = vadd.f32 %v1083_v59, %v955_v53  ;;  %v1019_v1 = vld [vmem:[%s6645_s14 + $0x2f8] sm:$0xff]  ;;  %v954_v9 = vld [vmem:[%s6645_s14 + $0xf0] sm:$0xff] }
 0x107   : > { %v1481_v61 = vpack.c.bf16 %v1399_v49, %v1397_v48  ;;  %v1396_v62 = vmax.f32 %v1268_v51, 0.0  ;;  %v1145_v2 = vld [vmem:[%s6650_s17 + $0x2e8] sm:$0xff]  ;;  %v1147_v3 = vld [vmem:[%s6650_s17 + $0x2f8] sm:$0xff]  ;;  %2024 = vmatprep.subr.bf16.mxu1 %v1449_v54  ;;  %v1398_v5 = vmax.f32 %v1270_v57, 0.0  ;;  %v1080_v10 = vld [vmem:[%s6650_s17 + $0xe0] sm:$0xff] }
 0x108   : > { %v1448_v4 = vpack.c.bf16 %v1334_v56, %v1332_v55  ;;  %v1273_v6 = vadd.f32 %v1145_v2, %v1017_v60  ;;  %v1275_v7 = vadd.f32 %v1147_v3, %v1019_v1  ;;  %v1337_v11 = vmax.f32 %v1209_v63, 0.0  ;;  %v1082_v13 = vld [vmem:[%s6650_s17 + $0xf0] sm:$0xff]  ;;  %v1016_v15 = vld [vmem:[%s6645_s14 + $0x2e0] sm:$0xff]  ;;  %v957_v23 = vld [vmem:[%s6645_s14 + $0x108] sm:$0xff] }
 0x109   : > { %2377 = vmatprep.subr.bf16.mxu0 %v1481_v61  ;;  %v1339_v12 = vmax.f32 %v1211_v0, 0.0  ;;  %v1208_v14 = vadd.f32 %v1080_v10, %v952_v8  ;;  %v1018_v16 = vld [vmem:[%s6645_s14 + $0x2f0] sm:$0xff]  ;;  %v1480_v17 = vpack.c.bf16 %v1398_v5, %v1396_v62  ;;  %v1210_v20 = vadd.f32 %v1082_v13, %v954_v9  ;;  %v1144_v21 = vld [vmem:[%s6650_s17 + $0x2e0] sm:$0xff]  ;;  %v959_v28 = vld [vmem:[%s6645_s14 + $0x118] sm:$0xff] }
 0x10a   : > { %2025 = vmatpush1.bf16.msra.mxu1 %v1448_v4  ;;  %v1401_v18 = vmax.f32 %v1273_v6, 0.0  ;;  %v1403_v19 = vmax.f32 %v1275_v7, 0.0  ;;  %v1146_v22 = vld [vmem:[%s6650_s17 + $0x2f0] sm:$0xff]  ;;  %v1272_v26 = vadd.f32 %v1144_v21, %v1016_v15  ;;  %v1085_v29 = vld [vmem:[%s6650_s17 + $0x108] sm:$0xff]  ;;  %v1087_v30 = vld [vmem:[%s6650_s17 + $0x118] sm:$0xff] }
 0x10b   : > { %v1451_v24 = vpack.c.bf16 %v1339_v12, %v1337_v11  ;;  %v1336_v25 = vmax.f32 %v1208_v14, 0.0  ;;  %v1274_v27 = vadd.f32 %v1146_v22, %v1018_v16  ;;  %2378 = vmatpush1.bf16.msra.mxu0 %v1480_v17  ;;  %v1338_v32 = vmax.f32 %v1210_v20, 0.0  ;;  %v1021_v35 = vld [vmem:[%s6645_s14 + $0x308] sm:$0xff]  ;;  %v1023_v36 = vld [vmem:[%s6645_s14 + $0x318] sm:$0xff]  ;;  %v956_v42 = vld [vmem:[%s6645_s14 + $0x100] sm:$0xff] }
 0x10c   : > { %v1483_v31 = vpack.c.bf16 %v1403_v19, %v1401_v18  ;;  %v1213_v33 = vadd.f32 %v1085_v29, %v957_v23  ;;  %v1215_v34 = vadd.f32 %v1087_v30, %v959_v28  ;;  %v1149_v37 = vld [vmem:[%s6650_s17 + $0x308] sm:$0xff]  ;;  %v1400_v38 = vmax.f32 %v1272_v26, 0.0  ;;  %v1151_v40 = vld [vmem:[%s6650_s17 + $0x318] sm:$0xff]  ;;  %v958_v43 = vld [vmem:[%s6645_s14 + $0x110] sm:$0xff] }
 0x10d   : > { %2026 = vmatprep.subr.bf16.mxu1 %v1451_v24  ;;  %v1402_v39 = vmax.f32 %v1274_v27, 0.0  ;;  %v1277_v41 = vadd.f32 %v1149_v37, %v1021_v35  ;;  %v1450_v44 = vpack.c.bf16 %v1338_v32, %v1336_v25  ;;  %v1279_v47 = vadd.f32 %v1151_v40, %v1023_v36  ;;  %v1084_v48 = vld [vmem:[%s6650_s17 + $0x100] sm:$0xff]  ;;  %v1086_v49 = vld [vmem:[%s6650_s17 + $0x110] sm:$0xff]  ;;  %v961_v62 = vld [vmem:[%s6645_s14 + $0x128] sm:$0xff] }
 0x10e   : > { %2379 = vmatprep.subr.bf16.mxu0 %v1483_v31  ;;  %v1341_v45 = vmax.f32 %v1213_v33, 0.0  ;;  %v1343_v46 = vmax.f32 %v1215_v34, 0.0  ;;  %v1020_v50 = vld [vmem:[%s6645_s14 + $0x300] sm:$0xff]  ;;  %v1212_v53 = vadd.f32 %v1084_v48, %v956_v42  ;;  %v1214_v54 = vadd.f32 %v1086_v49, %v958_v43  ;;  %v1022_v55 = vld [vmem:[%s6645_s14 + $0x310] sm:$0xff]  ;;  %v963_v63 = vld [vmem:[%s6645_s14 + $0x138] sm:$0xff] }
 0x10f   : > { %v1482_v51 = vpack.c.bf16 %v1402_v39, %v1400_v38  ;;  %v1405_v52 = vmax.f32 %v1277_v41, 0.0  ;;  %v1148_v56 = vld [vmem:[%s6650_s17 + $0x300] sm:$0xff]  ;;  %v1150_v57 = vld [vmem:[%s6650_s17 + $0x310] sm:$0xff]  ;;  %2027 = vmatpush1.bf16.msra.mxu1 %v1450_v44  ;;  %v1407_v59 = vmax.f32 %v1279_v47, 0.0  ;;  %v1089_v0 = vld [vmem:[%s6650_s17 + $0x128] sm:$0xff] }
 0x110   : > { %v1453_v58 = vpack.c.bf16 %v1343_v46, %v1341_v45  ;;  %v1276_v60 = vadd.f32 %v1148_v56, %v1020_v50  ;;  %v1278_v61 = vadd.f32 %v1150_v57, %v1022_v55  ;;  %v1340_v1 = vmax.f32 %v1212_v53, 0.0  ;;  %v1091_v3 = vld [vmem:[%s6650_s17 + $0x138] sm:$0xff]  ;;  %v1025_v5 = vld [vmem:[%s6645_s14 + $0x328] sm:$0xff]  ;;  %v960_v13 = vld [vmem:[%s6645_s14 + $0x120] sm:$0xff] }
 0x111   : > { %2380 = vmatpush1.bf16.msra.mxu0 %v1482_v51  ;;  %v1342_v2 = vmax.f32 %v1214_v54, 0.0  ;;  %v1217_v4 = vadd.f32 %v1089_v0, %v961_v62  ;;  %v1027_v6 = vld [vmem:[%s6645_s14 + $0x338] sm:$0xff]  ;;  %v1485_v7 = vpack.c.bf16 %v1407_v59, %v1405_v52  ;;  %v1219_v10 = vadd.f32 %v1091_v3, %v963_v63  ;;  %v1153_v11 = vld [vmem:[%s6650_s17 + $0x328] sm:$0xff]  ;;  %v962_v18 = vld [vmem:[%s6645_s14 + $0x130] sm:$0xff] }
 0x112   : > { %2028 = vmatprep.subr.bf16.mxu1 %v1453_v58  ;;  %v1404_v8 = vmax.f32 %v1276_v60, 0.0  ;;  %v1406_v9 = vmax.f32 %v1278_v61, 0.0  ;;  %v1155_v12 = vld [vmem:[%s6650_s17 + $0x338] sm:$0xff]  ;;  %v1281_v16 = vadd.f32 %v1153_v11, %v1025_v5  ;;  %v1088_v19 = vld [vmem:[%s6650_s17 + $0x120] sm:$0xff]  ;;  %v1090_v20 = vld [vmem:[%s6650_s17 + $0x130] sm:$0xff] }
 0x113   : > { %v1452_v14 = vpack.c.bf16 %v1342_v2, %v1340_v1  ;;  %v1345_v15 = vmax.f32 %v1217_v4, 0.0  ;;  %v1283_v17 = vadd.f32 %v1155_v12, %v1027_v6  ;;  %2381 = vmatprep.subr.bf16.mxu0 %v1485_v7  ;;  %v1347_v22 = vmax.f32 %v1219_v10, 0.0  ;;  %v1024_v25 = vld [vmem:[%s6645_s14 + $0x320] sm:$0xff]  ;;  %v1026_v26 = vld [vmem:[%s6645_s14 + $0x330] sm:$0xff]  ;;  %v965_v32 = vld [vmem:[%s6645_s14 + $0x148] sm:$0xff] }
 0x114   : > { %v1484_v21 = vpack.c.bf16 %v1406_v9, %v1404_v8  ;;  %v1216_v23 = vadd.f32 %v1088_v19, %v960_v13  ;;  %v1218_v24 = vadd.f32 %v1090_v20, %v962_v18  ;;  %v1152_v27 = vld [vmem:[%s6650_s17 + $0x320] sm:$0xff]  ;;  %v1409_v28 = vmax.f32 %v1281_v16, 0.0  ;;  %v1154_v30 = vld [vmem:[%s6650_s17 + $0x330] sm:$0xff]  ;;  %v967_v33 = vld [vmem:[%s6645_s14 + $0x158] sm:$0xff] }
 0x115   : > { %2029 = vmatpush1.bf16.msra.mxu1 %v1452_v14  ;;  %v1411_v29 = vmax.f32 %v1283_v17, 0.0  ;;  %v1280_v31 = vadd.f32 %v1152_v27, %v1024_v25  ;;  %v1455_v34 = vpack.c.bf16 %v1347_v22, %v1345_v15  ;;  %v1282_v37 = vadd.f32 %v1154_v30, %v1026_v26  ;;  %v1093_v38 = vld [vmem:[%s6650_s17 + $0x148] sm:$0xff]  ;;  %v1095_v39 = vld [vmem:[%s6650_s17 + $0x158] sm:$0xff]  ;;  %v964_v52 = vld [vmem:[%s6645_s14 + $0x140] sm:$0xff] }
 0x116   : > { %2382 = vmatpush1.bf16.msra.mxu0 %v1484_v21  ;;  %v1344_v35 = vmax.f32 %v1216_v23, 0.0  ;;  %v1346_v36 = vmax.f32 %v1218_v24, 0.0  ;;  %v1029_v40 = vld [vmem:[%s6645_s14 + $0x348] sm:$0xff]  ;;  %v1221_v43 = vadd.f32 %v1093_v38, %v965_v32  ;;  %v1223_v44 = vadd.f32 %v1095_v39, %v967_v33  ;;  %v1031_v45 = vld [vmem:[%s6645_s14 + $0x358] sm:$0xff]  ;;  %v966_v53 = vld [vmem:[%s6645_s14 + $0x150] sm:$0xff] }
 0x117   : > { %v1487_v41 = vpack.c.bf16 %v1411_v29, %v1409_v28  ;;  %v1408_v42 = vmax.f32 %v1280_v31, 0.0  ;;  %v1157_v46 = vld [vmem:[%s6650_s17 + $0x348] sm:$0xff]  ;;  %v1159_v47 = vld [vmem:[%s6650_s17 + $0x358] sm:$0xff]  ;;  %2030 = vmatprep.subr.bf16.mxu1 %v1455_v34  ;;  %v1410_v49 = vmax.f32 %v1282_v37, 0.0  ;;  %v1092_v54 = vld [vmem:[%s6650_s17 + $0x140] sm:$0xff] }
 0x118   : > { %v1454_v48 = vpack.c.bf16 %v1346_v36, %v1344_v35  ;;  %v1285_v50 = vadd.f32 %v1157_v46, %v1029_v40  ;;  %v1287_v51 = vadd.f32 %v1159_v47, %v1031_v45  ;;  %v1349_v55 = vmax.f32 %v1221_v43, 0.0  ;;  %v1094_v57 = vld [vmem:[%s6650_s17 + $0x150] sm:$0xff]  ;;  %v1028_v59 = vld [vmem:[%s6645_s14 + $0x340] sm:$0xff]  ;;  %v969_v3 = vld [vmem:[%s6645_s14 + $0x168] sm:$0xff] }
 0x119   : > { %2383 = vmatprep.subr.bf16.mxu0 %v1487_v41  ;;  %v1351_v56 = vmax.f32 %v1223_v44, 0.0  ;;  %v1220_v58 = vadd.f32 %v1092_v54, %v964_v52  ;;  %v1030_v60 = vld [vmem:[%s6645_s14 + $0x350] sm:$0xff]  ;;  %v1486_v61 = vpack.c.bf16 %v1410_v49, %v1408_v42  ;;  %v1222_v0 = vadd.f32 %v1094_v57, %v966_v53  ;;  %v1156_v1 = vld [vmem:[%s6650_s17 + $0x340] sm:$0xff]  ;;  %v971_v8 = vld [vmem:[%s6645_s14 + $0x178] sm:$0xff] }
 0x11a   : > { %2031 = vmatpush1.bf16.msra.mxu1 %v1454_v48  ;;  %v1413_v62 = vmax.f32 %v1285_v50, 0.0  ;;  %v1415_v63 = vmax.f32 %v1287_v51, 0.0  ;;  %v1158_v2 = vld [vmem:[%s6650_s17 + $0x350] sm:$0xff]  ;;  %v1284_v6 = vadd.f32 %v1156_v1, %v1028_v59  ;;  %v1097_v9 = vld [vmem:[%s6650_s17 + $0x168] sm:$0xff]  ;;  %v1099_v10 = vld [vmem:[%s6650_s17 + $0x178] sm:$0xff] }
 0x11b   : > { %v1457_v4 = vpack.c.bf16 %v1351_v56, %v1349_v55  ;;  %v1348_v5 = vmax.f32 %v1220_v58, 0.0  ;;  %v1286_v7 = vadd.f32 %v1158_v2, %v1030_v60  ;;  %2384 = vmatpush1.bf16.msra.mxu0 %v1486_v61  ;;  %v1350_v12 = vmax.f32 %v1222_v0, 0.0  ;;  %v1033_v15 = vld [vmem:[%s6645_s14 + $0x368] sm:$0xff]  ;;  %v1035_v16 = vld [vmem:[%s6645_s14 + $0x378] sm:$0xff]  ;;  %v968_v22 = vld [vmem:[%s6645_s14 + $0x160] sm:$0xff] }
 0x11c   : > { %v1489_v11 = vpack.c.bf16 %v1415_v63, %v1413_v62  ;;  %v1225_v13 = vadd.f32 %v1097_v9, %v969_v3  ;;  %v1227_v14 = vadd.f32 %v1099_v10, %v971_v8  ;;  %v1161_v17 = vld [vmem:[%s6650_s17 + $0x368] sm:$0xff]  ;;  %v1412_v18 = vmax.f32 %v1284_v6, 0.0  ;;  %v1163_v20 = vld [vmem:[%s6650_s17 + $0x378] sm:$0xff]  ;;  %v970_v23 = vld [vmem:[%s6645_s14 + $0x170] sm:$0xff] }
 0x11d   : > { %2032 = vmatprep.subr.bf16.mxu1 %v1457_v4  ;;  %v1414_v19 = vmax.f32 %v1286_v7, 0.0  ;;  %v1289_v21 = vadd.f32 %v1161_v17, %v1033_v15  ;;  %v1456_v24 = vpack.c.bf16 %v1350_v12, %v1348_v5  ;;  %v1291_v27 = vadd.f32 %v1163_v20, %v1035_v16  ;;  %v1096_v28 = vld [vmem:[%s6650_s17 + $0x160] sm:$0xff]  ;;  %v1098_v29 = vld [vmem:[%s6650_s17 + $0x170] sm:$0xff]  ;;  %v973_v42 = vld [vmem:[%s6645_s14 + $0x188] sm:$0xff] }
 0x11e   : > { %2385 = vmatprep.subr.bf16.mxu0 %v1489_v11  ;;  %v1353_v25 = vmax.f32 %v1225_v13, 0.0  ;;  %v1355_v26 = vmax.f32 %v1227_v14, 0.0  ;;  %v1032_v30 = vld [vmem:[%s6645_s14 + $0x360] sm:$0xff]  ;;  %v1224_v33 = vadd.f32 %v1096_v28, %v968_v22  ;;  %v1226_v34 = vadd.f32 %v1098_v29, %v970_v23  ;;  %v1034_v35 = vld [vmem:[%s6645_s14 + $0x370] sm:$0xff]  ;;  %v975_v43 = vld [vmem:[%s6645_s14 + $0x198] sm:$0xff] }
 0x11f   : > { %v1488_v31 = vpack.c.bf16 %v1414_v19, %v1412_v18  ;;  %v1417_v32 = vmax.f32 %v1289_v21, 0.0  ;;  %v1160_v36 = vld [vmem:[%s6650_s17 + $0x360] sm:$0xff]  ;;  %v1162_v37 = vld [vmem:[%s6650_s17 + $0x370] sm:$0xff]  ;;  %2033 = vmatpush1.bf16.msra.mxu1 %v1456_v24  ;;  %v1419_v39 = vmax.f32 %v1291_v27, 0.0  ;;  %v1101_v44 = vld [vmem:[%s6650_s17 + $0x188] sm:$0xff] }
 0x120   : > { %v1459_v38 = vpack.c.bf16 %v1355_v26, %v1353_v25  ;;  %v1288_v40 = vadd.f32 %v1160_v36, %v1032_v30  ;;  %v1290_v41 = vadd.f32 %v1162_v37, %v1034_v35  ;;  %v1352_v45 = vmax.f32 %v1224_v33, 0.0  ;;  %v1103_v47 = vld [vmem:[%s6650_s17 + $0x198] sm:$0xff]  ;;  %v1037_v49 = vld [vmem:[%s6645_s14 + $0x388] sm:$0xff]  ;;  %v972_v57 = vld [vmem:[%s6645_s14 + $0x180] sm:$0xff] }
 0x121   : > { %2386 = vmatpush1.bf16.msra.mxu0 %v1488_v31  ;;  %v1354_v46 = vmax.f32 %v1226_v34, 0.0  ;;  %v1229_v48 = vadd.f32 %v1101_v44, %v973_v42  ;;  %v1039_v50 = vld [vmem:[%s6645_s14 + $0x398] sm:$0xff]  ;;  %v1491_v51 = vpack.c.bf16 %v1419_v39, %v1417_v32  ;;  %v1231_v54 = vadd.f32 %v1103_v47, %v975_v43  ;;  %v1165_v55 = vld [vmem:[%s6650_s17 + $0x388] sm:$0xff]  ;;  %v974_v62 = vld [vmem:[%s6645_s14 + $0x190] sm:$0xff] }
 0x122   : > { %2034 = vmatprep.subr.bf16.mxu1 %v1459_v38  ;;  %v1416_v52 = vmax.f32 %v1288_v40, 0.0  ;;  %v1418_v53 = vmax.f32 %v1290_v41, 0.0  ;;  %v1167_v56 = vld [vmem:[%s6650_s17 + $0x398] sm:$0xff]  ;;  %v1293_v60 = vadd.f32 %v1165_v55, %v1037_v49  ;;  %v1100_v63 = vld [vmem:[%s6650_s17 + $0x180] sm:$0xff]  ;;  %v1102_v0 = vld [vmem:[%s6650_s17 + $0x190] sm:$0xff] }
 0x123   : > { %v1458_v58 = vpack.c.bf16 %v1354_v46, %v1352_v45  ;;  %v1357_v59 = vmax.f32 %v1229_v48, 0.0  ;;  %v1295_v61 = vadd.f32 %v1167_v56, %v1039_v50  ;;  %2387 = vmatprep.subr.bf16.mxu0 %v1491_v51  ;;  %v1359_v2 = vmax.f32 %v1231_v54, 0.0  ;;  %v1036_v5 = vld [vmem:[%s6645_s14 + $0x380] sm:$0xff]  ;;  %v1038_v6 = vld [vmem:[%s6645_s14 + $0x390] sm:$0xff]  ;;  %v977_v12 = vld [vmem:[%s6645_s14 + $0x1a8] sm:$0xff] }
 0x124   : > { %v1490_v1 = vpack.c.bf16 %v1418_v53, %v1416_v52  ;;  %v1228_v3 = vadd.f32 %v1100_v63, %v972_v57  ;;  %v1230_v4 = vadd.f32 %v1102_v0, %v974_v62  ;;  %v1164_v7 = vld [vmem:[%s6650_s17 + $0x380] sm:$0xff]  ;;  %v1421_v8 = vmax.f32 %v1293_v60, 0.0  ;;  %v1166_v10 = vld [vmem:[%s6650_s17 + $0x390] sm:$0xff]  ;;  %v979_v13 = vld [vmem:[%s6645_s14 + $0x1b8] sm:$0xff] }
 0x125   : > { %2035 = vmatpush1.bf16.msra.mxu1 %v1458_v58  ;;  %v1423_v9 = vmax.f32 %v1295_v61, 0.0  ;;  %v1292_v11 = vadd.f32 %v1164_v7, %v1036_v5  ;;  %v1461_v14 = vpack.c.bf16 %v1359_v2, %v1357_v59  ;;  %v1294_v17 = vadd.f32 %v1166_v10, %v1038_v6  ;;  %v1105_v18 = vld [vmem:[%s6650_s17 + $0x1a8] sm:$0xff]  ;;  %v1107_v19 = vld [vmem:[%s6650_s17 + $0x1b8] sm:$0xff]  ;;  %v976_v32 = vld [vmem:[%s6645_s14 + $0x1a0] sm:$0xff] }
 0x126   : > { %2388 = vmatpush1.bf16.msra.mxu0 %v1490_v1  ;;  %v1356_v15 = vmax.f32 %v1228_v3, 0.0  ;;  %v1358_v16 = vmax.f32 %v1230_v4, 0.0  ;;  %v1041_v20 = vld [vmem:[%s6645_s14 + $0x3a8] sm:$0xff]  ;;  %v1233_v23 = vadd.f32 %v1105_v18, %v977_v12  ;;  %v1235_v24 = vadd.f32 %v1107_v19, %v979_v13  ;;  %v1043_v25 = vld [vmem:[%s6645_s14 + $0x3b8] sm:$0xff]  ;;  %v978_v33 = vld [vmem:[%s6645_s14 + $0x1b0] sm:$0xff] }
 0x127   : > { %v1493_v21 = vpack.c.bf16 %v1423_v9, %v1421_v8  ;;  %v1420_v22 = vmax.f32 %v1292_v11, 0.0  ;;  %v1169_v26 = vld [vmem:[%s6650_s17 + $0x3a8] sm:$0xff]  ;;  %v1171_v27 = vld [vmem:[%s6650_s17 + $0x3b8] sm:$0xff]  ;;  %2036 = vmatprep.subr.bf16.mxu1 %v1461_v14  ;;  %v1422_v29 = vmax.f32 %v1294_v17, 0.0  ;;  %v1104_v34 = vld [vmem:[%s6650_s17 + $0x1a0] sm:$0xff] }
 0x128   : > { %v1460_v28 = vpack.c.bf16 %v1358_v16, %v1356_v15  ;;  %v1297_v30 = vadd.f32 %v1169_v26, %v1041_v20  ;;  %v1299_v31 = vadd.f32 %v1171_v27, %v1043_v25  ;;  %v1361_v35 = vmax.f32 %v1233_v23, 0.0  ;;  %v1106_v37 = vld [vmem:[%s6650_s17 + $0x1b0] sm:$0xff]  ;;  %v1040_v39 = vld [vmem:[%s6645_s14 + $0x3a0] sm:$0xff]  ;;  %v981_v47 = vld [vmem:[%s6645_s14 + $0x1c8] sm:$0xff] }
 0x129   : > { %2389 = vmatprep.subr.bf16.mxu0 %v1493_v21  ;;  %v1363_v36 = vmax.f32 %v1235_v24, 0.0  ;;  %v1232_v38 = vadd.f32 %v1104_v34, %v976_v32  ;;  %v1042_v40 = vld [vmem:[%s6645_s14 + $0x3b0] sm:$0xff]  ;;  %v1492_v41 = vpack.c.bf16 %v1422_v29, %v1420_v22  ;;  %v1234_v44 = vadd.f32 %v1106_v37, %v978_v33  ;;  %v1168_v45 = vld [vmem:[%s6650_s17 + $0x3a0] sm:$0xff]  ;;  %v983_v52 = vld [vmem:[%s6645_s14 + $0x1d8] sm:$0xff] }
 0x12a   : > { %2037 = vmatpush1.bf16.msra.mxu1 %v1460_v28  ;;  %v1425_v42 = vmax.f32 %v1297_v30, 0.0  ;;  %v1427_v43 = vmax.f32 %v1299_v31, 0.0  ;;  %v1170_v46 = vld [vmem:[%s6650_s17 + $0x3b0] sm:$0xff]  ;;  %v1296_v50 = vadd.f32 %v1168_v45, %v1040_v39  ;;  %v1109_v53 = vld [vmem:[%s6650_s17 + $0x1c8] sm:$0xff]  ;;  %v1111_v54 = vld [vmem:[%s6650_s17 + $0x1d8] sm:$0xff] }
 0x12b   : > { %v1463_v48 = vpack.c.bf16 %v1363_v36, %v1361_v35  ;;  %v1360_v49 = vmax.f32 %v1232_v38, 0.0  ;;  %v1298_v51 = vadd.f32 %v1170_v46, %v1042_v40  ;;  %2390 = vmatpush1.bf16.msra.mxu0 %v1492_v41  ;;  %v1362_v56 = vmax.f32 %v1234_v44, 0.0  ;;  %v1045_v59 = vld [vmem:[%s6645_s14 + $0x3c8] sm:$0xff]  ;;  %v1047_v60 = vld [vmem:[%s6645_s14 + $0x3d8] sm:$0xff]  ;;  %v980_v2 = vld [vmem:[%s6645_s14 + $0x1c0] sm:$0xff] }
 0x12c   : > { %v1495_v55 = vpack.c.bf16 %v1427_v43, %v1425_v42  ;;  %v1237_v57 = vadd.f32 %v1109_v53, %v981_v47  ;;  %v1239_v58 = vadd.f32 %v1111_v54, %v983_v52  ;;  %v1173_v61 = vld [vmem:[%s6650_s17 + $0x3c8] sm:$0xff]  ;;  %v1424_v62 = vmax.f32 %v1296_v50, 0.0  ;;  %v1175_v0 = vld [vmem:[%s6650_s17 + $0x3d8] sm:$0xff]  ;;  %v982_v3 = vld [vmem:[%s6645_s14 + $0x1d0] sm:$0xff] }
 0x12d   : > { %2038 = vmatprep.subr.bf16.mxu1 %v1463_v48  ;;  %v1426_v63 = vmax.f32 %v1298_v51, 0.0  ;;  %v1301_v1 = vadd.f32 %v1173_v61, %v1045_v59  ;;  %v1462_v4 = vpack.c.bf16 %v1362_v56, %v1360_v49  ;;  %v1303_v7 = vadd.f32 %v1175_v0, %v1047_v60  ;;  %v1108_v8 = vld [vmem:[%s6650_s17 + $0x1c0] sm:$0xff]  ;;  %v1110_v9 = vld [vmem:[%s6650_s17 + $0x1d0] sm:$0xff]  ;;  %v985_v22 = vld [vmem:[%s6645_s14 + $0x1e8] sm:$0xff] }
 0x12e   : > { %2391 = vmatprep.subr.bf16.mxu0 %v1495_v55  ;;  %v1365_v5 = vmax.f32 %v1237_v57, 0.0  ;;  %v1367_v6 = vmax.f32 %v1239_v58, 0.0  ;;  %v1044_v10 = vld [vmem:[%s6645_s14 + $0x3c0] sm:$0xff]  ;;  %v1236_v13 = vadd.f32 %v1108_v8, %v980_v2  ;;  %v1238_v14 = vadd.f32 %v1110_v9, %v982_v3  ;;  %v1046_v15 = vld [vmem:[%s6645_s14 + $0x3d0] sm:$0xff]  ;;  %v987_v23 = vld [vmem:[%s6645_s14 + $0x1f8] sm:$0xff] }
 0x12f   : > { %v1494_v11 = vpack.c.bf16 %v1426_v63, %v1424_v62  ;;  %v1429_v12 = vmax.f32 %v1301_v1, 0.0  ;;  %v1172_v16 = vld [vmem:[%s6650_s17 + $0x3c0] sm:$0xff]  ;;  %v1174_v17 = vld [vmem:[%s6650_s17 + $0x3d0] sm:$0xff]  ;;  %2039 = vmatpush1.bf16.msra.mxu1 %v1462_v4  ;;  %v1431_v19 = vmax.f32 %v1303_v7, 0.0  ;;  %v1113_v24 = vld [vmem:[%s6650_s17 + $0x1e8] sm:$0xff] }
 0x130   : > { %v1465_v18 = vpack.c.bf16 %v1367_v6, %v1365_v5  ;;  %v1300_v20 = vadd.f32 %v1172_v16, %v1044_v10  ;;  %v1302_v21 = vadd.f32 %v1174_v17, %v1046_v15  ;;  %v1364_v25 = vmax.f32 %v1236_v13, 0.0  ;;  %v1115_v27 = vld [vmem:[%s6650_s17 + $0x1f8] sm:$0xff]  ;;  %v1049_v29 = vld [vmem:[%s6645_s14 + $0x3e8] sm:$0xff]  ;;  %v984_v37 = vld [vmem:[%s6645_s14 + $0x1e0] sm:$0xff] }
 0x131   : > { %2392 = vmatpush1.bf16.msra.mxu0 %v1494_v11  ;;  %v1366_v26 = vmax.f32 %v1238_v14, 0.0  ;;  %v1241_v28 = vadd.f32 %v1113_v24, %v985_v22  ;;  %v1051_v30 = vld [vmem:[%s6645_s14 + $0x3f8] sm:$0xff]  ;;  %v1497_v31 = vpack.c.bf16 %v1431_v19, %v1429_v12  ;;  %v1243_v34 = vadd.f32 %v1115_v27, %v987_v23  ;;  %v1177_v35 = vld [vmem:[%s6650_s17 + $0x3e8] sm:$0xff]  ;;  %v986_v42 = vld [vmem:[%s6645_s14 + $0x1f0] sm:$0xff] }
 0x132   : > { %2040 = vmatprep.subr.bf16.mxu1 %v1465_v18  ;;  %v1428_v32 = vmax.f32 %v1300_v20, 0.0  ;;  %v1430_v33 = vmax.f32 %v1302_v21, 0.0  ;;  %v1179_v36 = vld [vmem:[%s6650_s17 + $0x3f8] sm:$0xff]  ;;  %v1305_v40 = vadd.f32 %v1177_v35, %v1049_v29  ;;  %v1112_v43 = vld [vmem:[%s6650_s17 + $0x1e0] sm:$0xff]  ;;  %v1114_v44 = vld [vmem:[%s6650_s17 + $0x1f0] sm:$0xff] }
 0x133   : > { %v1464_v38 = vpack.c.bf16 %v1366_v26, %v1364_v25  ;;  %v1369_v39 = vmax.f32 %v1241_v28, 0.0  ;;  %v1307_v41 = vadd.f32 %v1179_v36, %v1051_v30  ;;  %2393 = vmatprep.subr.bf16.mxu0 %v1497_v31  ;;  %v1371_v46 = vmax.f32 %v1243_v34, 0.0  ;;  %v1048_v49 = vld [vmem:[%s6645_s14 + $0x3e0] sm:$0xff]  ;;  %v1050_v50 = vld [vmem:[%s6645_s14 + $0x3f0] sm:$0xff]  ;;  %v1501_v56 = vld [vmem:[%s6652_s20 + $0x8] sm:$0xff] }
 0x134   : > { %v1496_v45 = vpack.c.bf16 %v1430_v33, %v1428_v32  ;;  %v1240_v47 = vadd.f32 %v1112_v43, %v984_v37  ;;  %v1242_v48 = vadd.f32 %v1114_v44, %v986_v42  ;;  %v1176_v51 = vld [vmem:[%s6650_s17 + $0x3e0] sm:$0xff]  ;;  %v1433_v52 = vmax.f32 %v1305_v40, 0.0  ;;  %v1178_v54 = vld [vmem:[%s6650_s17 + $0x3f0] sm:$0xff]  ;;  %v1505_v57 = vld [vmem:[%s6652_s20 + $0x28] sm:$0xff] }
 0x135   : > { %2041 = vmatpush1.bf16.msra.mxu1 %v1464_v38  ;;  %v1435_v53 = vmax.f32 %v1307_v41, 0.0  ;;  %v1304_v55 = vadd.f32 %v1176_v51, %v1048_v49  ;;  %v1467_v58 = vpack.c.bf16 %v1371_v46, %v1369_v39  ;;  %v1306_v61 = vadd.f32 %v1178_v54, %v1050_v50  ;;  %v1503_v62 = vld [vmem:[%s6652_s20 + $0x18] sm:$0xff]  ;;  %v1500_v0 = vld [vmem:[%s6652_s20] sm:$0xff]  ;;  %v1502_v6 = vld [vmem:[%s6652_s20 + $0x10] sm:$0xff] }
 0x136   : > { %2394 = vmatpush1.bf16.msra.mxu0 %v1496_v45  ;;  %v1368_v59 = vmax.f32 %v1240_v47, 0.0  ;;  %v1370_v60 = vmax.f32 %v1242_v48, 0.0  ;;  %v1507_v63 = vld [vmem:[%s6652_s20 + $0x38] sm:$0xff]  ;;  %v1757_v3 = vpack.c.bf16 %v1505_v57, %v1501_v56  ;;  %v1504_v5 = vld [vmem:[%s6652_s20 + $0x20] sm:$0xff]  ;;  %v1506_v9 = vld [vmem:[%s6652_s20 + $0x30] sm:$0xff] }
 0x137   : > { %v1499_v1 = vpack.c.bf16 %v1435_v53, %v1433_v52  ;;  %v1432_v2 = vmax.f32 %v1304_v55, 0.0  ;;  %v1759_v4 = vpack.c.bf16 %v1507_v63, %v1503_v62  ;;  %2042 = vmatprep.subr.bf16.mxu1 %v1467_v58  ;;  %v1434_v8 = vmax.f32 %v1306_v61, 0.0  ;;  %v1509_v10 = vld [vmem:[%s6652_s20 + $0x48] sm:$0xff]  ;;  %v1511_v13 = vld [vmem:[%s6652_s20 + $0x58] sm:$0xff]  ;;  %v1508_v19 = vld [vmem:[%s6652_s20 + $0x40] sm:$0xff] }
 0x138   : > { %v1466_v7 = vpack.c.bf16 %v1370_v60, %v1368_v59  ;;  %v1513_v11 = vld [vmem:[%s6652_s20 + $0x68] sm:$0xff]  ;;  %2044 = vmatprep.mubr.bf16.mxu1 %v1757_v3  ;;  %v1756_v12 = vpack.c.bf16 %v1504_v5, %v1500_v0  ;;  %v1515_v14 = vld [vmem:[%s6652_s20 + $0x78] sm:$0xff]  ;;  %v1758_v17 = vpack.c.bf16 %v1506_v9, %v1502_v6  ;;  %v1512_v20 = vld [vmem:[%s6652_s20 + $0x60] sm:$0xff] }
 0x139   : > { %2395 = vmatprep.subr.bf16.mxu0 %v1499_v1  ;;  %v1498_v15 = vpack.c.bf16 %v1434_v8, %v1432_v2  ;;  %2397 = vmatprep.mubr.bf16.mxu0 %v1759_v4  ;;  %v1761_v16 = vpack.c.bf16 %v1513_v11, %v1509_v10  ;;  %v1763_v18 = vpack.c.bf16 %v1515_v14, %v1511_v13  ;;  %v1517_v21 = vld [vmem:[%s6652_s20 + $0x88] sm:$0xff]  ;;  %v1510_v23 = vld [vmem:[%s6652_s20 + $0x50] sm:$0xff]  ;;  %v1519_v26 = vld [vmem:[%s6652_s20 + $0x98] sm:$0xff] }
 0x13a   : > { %2043 = vmatpush1.bf16.msra.mxu1 %v1466_v7  ;;  %v1521_v22 = vld [vmem:[%s6652_s20 + $0xa8] sm:$0xff]  ;;  %v1514_v24 = vld [vmem:[%s6652_s20 + $0x70] sm:$0xff]  ;;  %v1760_v25 = vpack.c.bf16 %v1512_v20, %v1508_v19  ;;  %v1523_v27 = vld [vmem:[%s6652_s20 + $0xb8] sm:$0xff] }
 0x13b   : > { %2396 = vmatpush1.bf16.msra.mxu0 %v1498_v15  ;;  %v1765_v28 = vpack.c.bf16 %v1521_v22, %v1517_v21  ;;  %v1762_v29 = vpack.c.bf16 %v1514_v24, %v1510_v23  ;;  %v1767_v30 = vpack.c.bf16 %v1523_v27, %v1519_v26  ;;  %v1516_v31 = vld [vmem:[%s6652_s20 + $0x80] sm:$0xff]  ;;  %v1525_v33 = vld [vmem:[%s6652_s20 + $0xc8] sm:$0xff]  ;;  %v1518_v35 = vld [vmem:[%s6652_s20 + $0x90] sm:$0xff] }
 0x13c   : > { %v1520_v32 = vld [vmem:[%s6652_s20 + $0xa0] sm:$0xff]  ;;  %v1529_v34 = vld [vmem:[%s6652_s20 + $0xe8] sm:$0xff]  ;;  %v1522_v36 = vld [vmem:[%s6652_s20 + $0xb0] sm:$0xff] }
 0x13d   : > { %2045 = vmatmul.mubr.bf16.vlgmr.msra.gmra.mrb[0].mxu1 %v1756_v12  ;;  %v1764_v37 = vpack.c.bf16 %v1520_v32, %v1516_v31  ;;  %v1527_v38 = vld [vmem:[%s6652_s20 + $0xd8] sm:$0xff]  ;;  %v1769_v40 = vpack.c.bf16 %v1529_v34, %v1525_v33  ;;  %v1766_v41 = vpack.c.bf16 %v1522_v36, %v1518_v35  ;;  %v1524_v43 = vld [vmem:[%s6652_s20 + $0xc0] sm:$0xff]  ;;  %v1533_v45 = vld [vmem:[%s6652_s20 + $0x108] sm:$0xff] }
 0x13e   : > { %2054 = vmatprep.mubr.bf16.mxu1 %v1761_v16  ;;  %2398 = vmatmul.mubr.bf16.vlgmr.msra.gmra.mrb[0].mxu0 %v1758_v17  ;;  %v1531_v39 = vld [vmem:[%s6652_s20 + $0xf8] sm:$0xff]  ;;  %v1528_v44 = vld [vmem:[%s6652_s20 + $0xe0] sm:$0xff]  ;;  %v1537_v46 = vld [vmem:[%s6652_s20 + $0x128] sm:$0xff] }
 0x13f   : > { %2407 = vmatprep.mubr.bf16.mxu0 %v1763_v18  ;;  %v1771_v42 = vpack.c.bf16 %v1531_v39, %v1527_v38  ;;  %v1526_v47 = vld [vmem:[%s6652_s20 + $0xd0] sm:$0xff]  ;;  %v1768_v49 = vpack.c.bf16 %v1528_v44, %v1524_v43  ;;  %v1535_v50 = vld [vmem:[%s6652_s20 + $0x118] sm:$0xff]  ;;  %v1773_v52 = vpack.c.bf16 %v1537_v46, %v1533_v45  ;;  %v1532_v55 = vld [vmem:[%s6652_s20 + $0x100] sm:$0xff] }
 0x140   : > { %v1530_v48 = vld [vmem:[%s6652_s20 + $0xf0] sm:$0xff]  ;;  %v1539_v51 = vld [vmem:[%s6652_s20 + $0x138] sm:$0xff]  ;;  %v1536_v56 = vld [vmem:[%s6652_s20 + $0x120] sm:$0xff] }
 0x141   : > { %v1770_v53 = vpack.c.bf16 %v1530_v48, %v1526_v47  ;;  %v1775_v54 = vpack.c.bf16 %v1539_v51, %v1535_v50  ;;  %v1541_v57 = vld [vmem:[%s6652_s20 + $0x148] sm:$0xff]  ;;  %v1534_v59 = vld [vmem:[%s6652_s20 + $0x110] sm:$0xff]  ;;  %v1772_v61 = vpack.c.bf16 %v1536_v56, %v1532_v55  ;;  %v1543_v62 = vld [vmem:[%s6652_s20 + $0x158] sm:$0xff] }
 0x142   : > { %v1545_v58 = vld [vmem:[%s6652_s20 + $0x168] sm:$0xff]  ;;  %v1538_v60 = vld [vmem:[%s6652_s20 + $0x130] sm:$0xff]  ;;  %v1547_v63 = vld [vmem:[%s6652_s20 + $0x178] sm:$0xff] }
 0x143   : > { %v1777_v0 = vpack.c.bf16 %v1545_v58, %v1541_v57  ;;  %v1774_v1 = vpack.c.bf16 %v1538_v60, %v1534_v59  ;;  %v1779_v2 = vpack.c.bf16 %v1547_v63, %v1543_v62  ;;  %v1540_v3 = vld [vmem:[%s6652_s20 + $0x140] sm:$0xff]  ;;  %v1549_v5 = vld [vmem:[%s6652_s20 + $0x188] sm:$0xff]  ;;  %v1542_v7 = vld [vmem:[%s6652_s20 + $0x150] sm:$0xff] }
 0x144   : > { %v1544_v4 = vld [vmem:[%s6652_s20 + $0x160] sm:$0xff]  ;;  %v1553_v6 = vld [vmem:[%s6652_s20 + $0x1a8] sm:$0xff]  ;;  %v1546_v8 = vld [vmem:[%s6652_s20 + $0x170] sm:$0xff] }
 0x145   : > { %2055 = vmatmul.mubr.bf16.gmra.mrb[4].mxu1 %v1760_v25  ;;  %v1776_v9 = vpack.c.bf16 %v1544_v4, %v1540_v3  ;;  %v1551_v10 = vld [vmem:[%s6652_s20 + $0x198] sm:$0xff]  ;;  %v1781_v12 = vpack.c.bf16 %v1553_v6, %v1549_v5  ;;  %v1778_v13 = vpack.c.bf16 %v1546_v8, %v1542_v7  ;;  %v1548_v15 = vld [vmem:[%s6652_s20 + $0x180] sm:$0xff]  ;;  %v1557_v17 = vld [vmem:[%s6652_s20 + $0x1c8] sm:$0xff] }
 0x146   : > { %2064 = vmatprep.mubr.bf16.mxu1 %v1765_v28  ;;  %2408 = vmatmul.mubr.bf16.gmra.mrb[4].mxu0 %v1762_v29  ;;  %v1555_v11 = vld [vmem:[%s6652_s20 + $0x1b8] sm:$0xff]  ;;  %v1552_v16 = vld [vmem:[%s6652_s20 + $0x1a0] sm:$0xff]  ;;  %v1561_v18 = vld [vmem:[%s6652_s20 + $0x1e8] sm:$0xff] }
 0x147   : > { %2417 = vmatprep.mubr.bf16.mxu0 %v1767_v30  ;;  %v1783_v14 = vpack.c.bf16 %v1555_v11, %v1551_v10  ;;  %v1550_v19 = vld [vmem:[%s6652_s20 + $0x190] sm:$0xff]  ;;  %v1780_v21 = vpack.c.bf16 %v1552_v16, %v1548_v15  ;;  %v1559_v22 = vld [vmem:[%s6652_s20 + $0x1d8] sm:$0xff]  ;;  %v1785_v24 = vpack.c.bf16 %v1561_v18, %v1557_v17  ;;  %v1556_v27 = vld [vmem:[%s6652_s20 + $0x1c0] sm:$0xff] }
 0x148   : > { %v1554_v20 = vld [vmem:[%s6652_s20 + $0x1b0] sm:$0xff]  ;;  %v1563_v23 = vld [vmem:[%s6652_s20 + $0x1f8] sm:$0xff]  ;;  %v1560_v28 = vld [vmem:[%s6652_s20 + $0x1e0] sm:$0xff] }
 0x149   : > { %v1782_v25 = vpack.c.bf16 %v1554_v20, %v1550_v19  ;;  %v1787_v26 = vpack.c.bf16 %v1563_v23, %v1559_v22  ;;  %v1565_v29 = vld [vmem:[%s6652_s20 + $0x208] sm:$0xff]  ;;  %v1558_v31 = vld [vmem:[%s6652_s20 + $0x1d0] sm:$0xff]  ;;  %v1784_v33 = vpack.c.bf16 %v1560_v28, %v1556_v27  ;;  %v1567_v34 = vld [vmem:[%s6652_s20 + $0x218] sm:$0xff] }
 0x14a   : > { %v1569_v30 = vld [vmem:[%s6652_s20 + $0x228] sm:$0xff]  ;;  %v1562_v32 = vld [vmem:[%s6652_s20 + $0x1f0] sm:$0xff]  ;;  %v1571_v35 = vld [vmem:[%s6652_s20 + $0x238] sm:$0xff] }
 0x14b   : > { %v1789_v36 = vpack.c.bf16 %v1569_v30, %v1565_v29  ;;  %v1791_v38 = vpack.c.bf16 %v1571_v35, %v1567_v34  ;;  %v1564_v39 = vld [vmem:[%s6652_s20 + $0x200] sm:$0xff]  ;;  %v1566_v43 = vld [vmem:[%s6652_s20 + $0x210] sm:$0xff]  ;;  %v1575_v46 = vld [vmem:[%s6652_s20 + $0x258] sm:$0xff] }
 0x14c   : > { %v1570_v44 = vld [vmem:[%s6652_s20 + $0x230] sm:$0xff]  ;;  %v1579_v47 = vld [vmem:[%s6652_s20 + $0x278] sm:$0xff]  ;;  %v1572_v51 = vld [vmem:[%s6652_s20 + $0x240] sm:$0xff] }
 0x14d   : > { %2065 = vmatmul.mubr.bf16.gmra.mrb[8].mxu1 %v1764_v37  ;;  %v1786_v37 = vpack.c.bf16 %v1562_v32, %v1558_v31  ;;  %v1795_v50 = vpack.c.bf16 %v1579_v47, %v1575_v46  ;;  %v1574_v55 = vld [vmem:[%s6652_s20 + $0x250] sm:$0xff]  ;;  %v1583_v58 = vld [vmem:[%s6652_s20 + $0x298] sm:$0xff]  ;;  %v1580_v63 = vld [vmem:[%s6652_s20 + $0x280] sm:$0xff] }
 0x14e   : > { %2074 = vmatprep.mubr.bf16.mxu1 %v1769_v40  ;;  %2418 = vmatmul.mubr.bf16.gmra.mrb[8].mxu0 %v1766_v41  ;;  %v1568_v40 = vld [vmem:[%s6652_s20 + $0x220] sm:$0xff]  ;;  %v1573_v41 = vld [vmem:[%s6652_s20 + $0x248] sm:$0xff]  ;;  %v1578_v56 = vld [vmem:[%s6652_s20 + $0x270] sm:$0xff] }
 0x14f   : > { %2427 = vmatprep.mubr.bf16.mxu0 %v1771_v42  ;;  %v1577_v42 = vld [vmem:[%s6652_s20 + $0x268] sm:$0xff]  ;;  %v1788_v45 = vpack.c.bf16 %v1568_v40, %v1564_v39  ;;  %v1587_v59 = vld [vmem:[%s6652_s20 + $0x2b8] sm:$0xff]  ;;  %v1582_v3 = vld [vmem:[%s6652_s20 + $0x290] sm:$0xff] }
 0x150   : > { %v1793_v48 = vpack.c.bf16 %v1577_v42, %v1573_v41  ;;  %v1799_v62 = vpack.c.bf16 %v1587_v59, %v1583_v58  ;;  %v1586_v4 = vld [vmem:[%s6652_s20 + $0x2b0] sm:$0xff]  ;;  %v1591_v6 = vld [vmem:[%s6652_s20 + $0x2d8] sm:$0xff]  ;;  %v1588_v11 = vld [vmem:[%s6652_s20 + $0x2c0] sm:$0xff] }
 0x151   : > { %v1595_v7 = vld [vmem:[%s6652_s20 + $0x2f8] sm:$0xff]  ;;  %v1590_v15 = vld [vmem:[%s6652_s20 + $0x2d0] sm:$0xff]  ;;  %v1596_v23 = vld [vmem:[%s6652_s20 + $0x300] sm:$0xff] }
 0x152   : > { %v1803_v10 = vpack.c.bf16 %v1595_v7, %v1591_v6  ;;  %v1594_v16 = vld [vmem:[%s6652_s20 + $0x2f0] sm:$0xff]  ;;  %v1599_v18 = vld [vmem:[%s6652_s20 + $0x318] sm:$0xff]  ;;  %v1604_v35 = vld [vmem:[%s6652_s20 + $0x340] sm:$0xff] }
 0x153   : > { %v1603_v19 = vld [vmem:[%s6652_s20 + $0x338] sm:$0xff]  ;;  %v1598_v27 = vld [vmem:[%s6652_s20 + $0x310] sm:$0xff]  ;;  %v1612_v47 = vld [vmem:[%s6652_s20 + $0x380] sm:$0xff] }
 0x154   : > { %v1807_v22 = vpack.c.bf16 %v1603_v19, %v1599_v18  ;;  %v1602_v28 = vld [vmem:[%s6652_s20 + $0x330] sm:$0xff]  ;;  %v1607_v30 = vld [vmem:[%s6652_s20 + $0x358] sm:$0xff]  ;;  %v1620_v59 = vld [vmem:[%s6652_s20 + $0x3c0] sm:$0xff] }
 0x155   : > { %2075 = vmatmul.mubr.bf16.gmra.mrb[12].mxu1 %v1768_v49  ;;  %v1790_v49 = vpack.c.bf16 %v1570_v44, %v1566_v43  ;;  %v1611_v31 = vld [vmem:[%s6652_s20 + $0x378] sm:$0xff]  ;;  %v1606_v39 = vld [vmem:[%s6652_s20 + $0x350] sm:$0xff]  ;;  %v1628_v7 = vld [vmem:[%s6652_s20 + $0x400] sm:$0xff] }
 0x156   : > { %2084 = vmatprep.mubr.bf16.mxu1 %v1773_v52  ;;  %2428 = vmatmul.mubr.bf16.gmra.mrb[12].mxu0 %v1770_v53  ;;  %v1576_v52 = vld [vmem:[%s6652_s20 + $0x260] sm:$0xff]  ;;  %v1581_v53 = vld [vmem:[%s6652_s20 + $0x288] sm:$0xff]  ;;  %v1811_v34 = vpack.c.bf16 %v1611_v31, %v1607_v30  ;;  %v1610_v40 = vld [vmem:[%s6652_s20 + $0x370] sm:$0xff] }
 0x157   : > { %2437 = vmatprep.mubr.bf16.mxu0 %v1775_v54  ;;  %v1585_v54 = vld [vmem:[%s6652_s20 + $0x2a8] sm:$0xff]  ;;  %v1792_v57 = vpack.c.bf16 %v1576_v52, %v1572_v51  ;;  %v1615_v42 = vld [vmem:[%s6652_s20 + $0x398] sm:$0xff]  ;;  %v1614_v51 = vld [vmem:[%s6652_s20 + $0x390] sm:$0xff] }
 0x158   : > { %v1797_v60 = vpack.c.bf16 %v1585_v54, %v1581_v53  ;;  %v1619_v43 = vld [vmem:[%s6652_s20 + $0x3b8] sm:$0xff]  ;;  %v1618_v52 = vld [vmem:[%s6652_s20 + $0x3b0] sm:$0xff]  ;;  %v1636_v19 = vld [vmem:[%s6652_s20 + $0x440] sm:$0xff] }
 0x159   : > { %v1815_v46 = vpack.c.bf16 %v1619_v43, %v1615_v42  ;;  %v1623_v54 = vld [vmem:[%s6652_s20 + $0x3d8] sm:$0xff]  ;;  %v1644_v31 = vld [vmem:[%s6652_s20 + $0x480] sm:$0xff] }
 0x15a   : > { %v1652_v43 = vld [vmem:[%s6652_s20 + $0x4c0] sm:$0xff] }
 0x15d   : > { %2085 = vmatmul.mubr.bf16.gmra.mrb[16].mxu1 %v1772_v61  ;;  %v1794_v61 = vpack.c.bf16 %v1578_v56, %v1574_v55  ;;  %v1627_v55 = vld [vmem:[%s6652_s20 + $0x3f8] sm:$0xff] }
 0x15e   : > { %2094 = vmatprep.mubr.bf16.mxu1 %v1777_v0  ;;  %2438 = vmatmul.mubr.bf16.gmra.mrb[16].mxu0 %v1774_v1  ;;  %v1584_v0 = vld [vmem:[%s6652_s20 + $0x2a0] sm:$0xff]  ;;  %v1589_v1 = vld [vmem:[%s6652_s20 + $0x2c8] sm:$0xff]  ;;  %v1819_v58 = vpack.c.bf16 %v1627_v55, %v1623_v54 }
 0x15f   : > { %2447 = vmatprep.mubr.bf16.mxu0 %v1779_v2  ;;  %v1593_v2 = vld [vmem:[%s6652_s20 + $0x2e8] sm:$0xff]  ;;  %v1796_v5 = vpack.c.bf16 %v1584_v0, %v1580_v63  ;;  %v1622_v63 = vld [vmem:[%s6652_s20 + $0x3d0] sm:$0xff]  ;;  %v1660_v55 = vld [vmem:[%s6652_s20 + $0x500] sm:$0xff] }
 0x160   : > { %v1801_v8 = vpack.c.bf16 %v1593_v2, %v1589_v1  ;;  %v1626_v0 = vld [vmem:[%s6652_s20 + $0x3f0] sm:$0xff]  ;;  %v1631_v2 = vld [vmem:[%s6652_s20 + $0x418] sm:$0xff] }
 0x165   : > { %2095 = vmatmul.mubr.bf16.gmra.mrb[20].mxu1 %v1776_v9  ;;  %v1798_v9 = vpack.c.bf16 %v1586_v4, %v1582_v3  ;;  %v1635_v3 = vld [vmem:[%s6652_s20 + $0x438] sm:$0xff] }
 0x166   : > { %2104 = vmatprep.mubr.bf16.mxu1 %v1781_v12  ;;  %2448 = vmatmul.mubr.bf16.gmra.mrb[20].mxu0 %v1778_v13  ;;  %v1592_v12 = vld [vmem:[%s6652_s20 + $0x2e0] sm:$0xff]  ;;  %v1597_v13 = vld [vmem:[%s6652_s20 + $0x308] sm:$0xff]  ;;  %v1823_v6 = vpack.c.bf16 %v1635_v3, %v1631_v2 }
 0x167   : > { %2457 = vmatprep.mubr.bf16.mxu0 %v1783_v14  ;;  %v1601_v14 = vld [vmem:[%s6652_s20 + $0x328] sm:$0xff]  ;;  %v1800_v17 = vpack.c.bf16 %v1592_v12, %v1588_v11  ;;  %v1630_v11 = vld [vmem:[%s6652_s20 + $0x410] sm:$0xff]  ;;  %v1668_v3 = vld [vmem:[%s6652_s20 + $0x540] sm:$0xff] }
 0x168   : > { %v1805_v20 = vpack.c.bf16 %v1601_v14, %v1597_v13  ;;  %v1634_v12 = vld [vmem:[%s6652_s20 + $0x430] sm:$0xff]  ;;  %v1639_v14 = vld [vmem:[%s6652_s20 + $0x458] sm:$0xff] }
 0x16d   : > { %2105 = vmatmul.mubr.bf16.gmra.mrb[24].mxu1 %v1780_v21  ;;  %v1802_v21 = vpack.c.bf16 %v1594_v16, %v1590_v15  ;;  %v1643_v15 = vld [vmem:[%s6652_s20 + $0x478] sm:$0xff] }
 0x16e   : > { %2114 = vmatprep.mubr.bf16.mxu1 %v1785_v24  ;;  %2458 = vmatmul.mubr.bf16.gmra.mrb[24].mxu0 %v1782_v25  ;;  %v1600_v24 = vld [vmem:[%s6652_s20 + $0x320] sm:$0xff]  ;;  %v1605_v25 = vld [vmem:[%s6652_s20 + $0x348] sm:$0xff]  ;;  %v1827_v18 = vpack.c.bf16 %v1643_v15, %v1639_v14 }
 0x16f   : > { %2467 = vmatprep.mubr.bf16.mxu0 %v1787_v26  ;;  %v1609_v26 = vld [vmem:[%s6652_s20 + $0x368] sm:$0xff]  ;;  %v1804_v29 = vpack.c.bf16 %v1600_v24, %v1596_v23  ;;  %v1638_v23 = vld [vmem:[%s6652_s20 + $0x450] sm:$0xff]  ;;  %v1676_v15 = vld [vmem:[%s6652_s20 + $0x580] sm:$0xff] }
 0x170   : > { %v1809_v32 = vpack.c.bf16 %v1609_v26, %v1605_v25  ;;  %v1642_v24 = vld [vmem:[%s6652_s20 + $0x470] sm:$0xff]  ;;  %v1647_v26 = vld [vmem:[%s6652_s20 + $0x498] sm:$0xff] }
 0x175   : > { %2115 = vmatmul.mubr.bf16.gmra.mrb[28].mxu1 %v1784_v33  ;;  %v1806_v33 = vpack.c.bf16 %v1602_v28, %v1598_v27  ;;  %v1651_v27 = vld [vmem:[%s6652_s20 + $0x4b8] sm:$0xff] }
 0x176   : > { %2124 = vmatprep.mubr.bf16.mxu1 %v1789_v36  ;;  %2468 = vmatmul.mubr.bf16.gmra.mrb[28].mxu0 %v1786_v37  ;;  %v1608_v36 = vld [vmem:[%s6652_s20 + $0x360] sm:$0xff]  ;;  %v1613_v37 = vld [vmem:[%s6652_s20 + $0x388] sm:$0xff]  ;;  %v1831_v30 = vpack.c.bf16 %v1651_v27, %v1647_v26 }
 0x177   : > { %2477 = vmatprep.mubr.bf16.mxu0 %v1791_v38  ;;  %v1617_v38 = vld [vmem:[%s6652_s20 + $0x3a8] sm:$0xff]  ;;  %v1808_v41 = vpack.c.bf16 %v1608_v36, %v1604_v35  ;;  %v1646_v35 = vld [vmem:[%s6652_s20 + $0x490] sm:$0xff]  ;;  %v1684_v27 = vld [vmem:[%s6652_s20 + $0x5c0] sm:$0xff] }
 0x178   : > { %v1813_v44 = vpack.c.bf16 %v1617_v38, %v1613_v37  ;;  %v1650_v36 = vld [vmem:[%s6652_s20 + $0x4b0] sm:$0xff]  ;;  %v1655_v38 = vld [vmem:[%s6652_s20 + $0x4d8] sm:$0xff] }
 0x17d   : > { %2125 = vmatmul.mubr.bf16.gmra.mrb[32].mxu1 %v1788_v45  ;;  %v1810_v45 = vpack.c.bf16 %v1610_v40, %v1606_v39  ;;  %v1659_v39 = vld [vmem:[%s6652_s20 + $0x4f8] sm:$0xff] }
 0x17e   : > { %2134 = vmatprep.mubr.bf16.mxu1 %v1793_v48  ;;  %2478 = vmatmul.mubr.bf16.gmra.mrb[32].mxu0 %v1790_v49  ;;  %v1616_v48 = vld [vmem:[%s6652_s20 + $0x3a0] sm:$0xff]  ;;  %v1621_v49 = vld [vmem:[%s6652_s20 + $0x3c8] sm:$0xff]  ;;  %v1835_v42 = vpack.c.bf16 %v1659_v39, %v1655_v38 }
 0x17f   : > { %2487 = vmatprep.mubr.bf16.mxu0 %v1795_v50  ;;  %v1625_v50 = vld [vmem:[%s6652_s20 + $0x3e8] sm:$0xff]  ;;  %v1812_v53 = vpack.c.bf16 %v1616_v48, %v1612_v47  ;;  %v1654_v47 = vld [vmem:[%s6652_s20 + $0x4d0] sm:$0xff]  ;;  %v1692_v39 = vld [vmem:[%s6652_s20 + $0x600] sm:$0xff] }
 0x180   : > { %v1817_v56 = vpack.c.bf16 %v1625_v50, %v1621_v49  ;;  %v1658_v48 = vld [vmem:[%s6652_s20 + $0x4f0] sm:$0xff]  ;;  %v1663_v50 = vld [vmem:[%s6652_s20 + $0x518] sm:$0xff] }
 0x185   : > { %2135 = vmatmul.mubr.bf16.gmra.mrb[36].mxu1 %v1792_v57  ;;  %v1814_v57 = vpack.c.bf16 %v1618_v52, %v1614_v51  ;;  %v1667_v51 = vld [vmem:[%s6652_s20 + $0x538] sm:$0xff] }
 0x186   : > { %2144 = vmatprep.mubr.bf16.mxu1 %v1797_v60  ;;  %2488 = vmatmul.mubr.bf16.gmra.mrb[36].mxu0 %v1794_v61  ;;  %v1624_v60 = vld [vmem:[%s6652_s20 + $0x3e0] sm:$0xff]  ;;  %v1629_v61 = vld [vmem:[%s6652_s20 + $0x408] sm:$0xff]  ;;  %v1839_v54 = vpack.c.bf16 %v1667_v51, %v1663_v50 }
 0x187   : > { %2497 = vmatprep.mubr.bf16.mxu0 %v1799_v62  ;;  %v1633_v62 = vld [vmem:[%s6652_s20 + $0x428] sm:$0xff]  ;;  %v1816_v1 = vpack.c.bf16 %v1624_v60, %v1620_v59  ;;  %v1662_v59 = vld [vmem:[%s6652_s20 + $0x510] sm:$0xff]  ;;  %v1700_v51 = vld [vmem:[%s6652_s20 + $0x640] sm:$0xff] }
 0x188   : > { %v1821_v4 = vpack.c.bf16 %v1633_v62, %v1629_v61  ;;  %v1666_v60 = vld [vmem:[%s6652_s20 + $0x530] sm:$0xff]  ;;  %v1671_v62 = vld [vmem:[%s6652_s20 + $0x558] sm:$0xff] }
 0x18d   : > { %2145 = vmatmul.mubr.bf16.gmra.mrb[40].mxu1 %v1796_v5  ;;  %v1818_v5 = vpack.c.bf16 %v1626_v0, %v1622_v63  ;;  %v1675_v63 = vld [vmem:[%s6652_s20 + $0x578] sm:$0xff] }
 0x18e   : > { %2154 = vmatprep.mubr.bf16.mxu1 %v1801_v8  ;;  %2498 = vmatmul.mubr.bf16.gmra.mrb[40].mxu0 %v1798_v9  ;;  %v1632_v8 = vld [vmem:[%s6652_s20 + $0x420] sm:$0xff]  ;;  %v1637_v9 = vld [vmem:[%s6652_s20 + $0x448] sm:$0xff]  ;;  %v1843_v2 = vpack.c.bf16 %v1675_v63, %v1671_v62 }
 0x18f   : > { %2507 = vmatprep.mubr.bf16.mxu0 %v1803_v10  ;;  %v1641_v10 = vld [vmem:[%s6652_s20 + $0x468] sm:$0xff]  ;;  %v1820_v13 = vpack.c.bf16 %v1632_v8, %v1628_v7  ;;  %v1670_v7 = vld [vmem:[%s6652_s20 + $0x550] sm:$0xff]  ;;  %v1708_v63 = vld [vmem:[%s6652_s20 + $0x680] sm:$0xff] }
 0x190   : > { %v1825_v16 = vpack.c.bf16 %v1641_v10, %v1637_v9  ;;  %v1674_v8 = vld [vmem:[%s6652_s20 + $0x570] sm:$0xff]  ;;  %v1679_v10 = vld [vmem:[%s6652_s20 + $0x598] sm:$0xff] }
 0x195   : > { %2155 = vmatmul.mubr.bf16.gmra.mrb[44].mxu1 %v1800_v17  ;;  %v1822_v17 = vpack.c.bf16 %v1634_v12, %v1630_v11  ;;  %v1683_v11 = vld [vmem:[%s6652_s20 + $0x5b8] sm:$0xff] }
 0x196   : > { %2164 = vmatprep.mubr.bf16.mxu1 %v1805_v20  ;;  %2508 = vmatmul.mubr.bf16.gmra.mrb[44].mxu0 %v1802_v21  ;;  %v1640_v20 = vld [vmem:[%s6652_s20 + $0x460] sm:$0xff]  ;;  %v1645_v21 = vld [vmem:[%s6652_s20 + $0x488] sm:$0xff]  ;;  %v1847_v14 = vpack.c.bf16 %v1683_v11, %v1679_v10 }
 0x197   : > { %2517 = vmatprep.mubr.bf16.mxu0 %v1807_v22  ;;  %v1649_v22 = vld [vmem:[%s6652_s20 + $0x4a8] sm:$0xff]  ;;  %v1824_v25 = vpack.c.bf16 %v1640_v20, %v1636_v19  ;;  %v1678_v19 = vld [vmem:[%s6652_s20 + $0x590] sm:$0xff]  ;;  %v1716_v11 = vld [vmem:[%s6652_s20 + $0x6c0] sm:$0xff] }
 0x198   : > { %v1829_v28 = vpack.c.bf16 %v1649_v22, %v1645_v21  ;;  %v1682_v20 = vld [vmem:[%s6652_s20 + $0x5b0] sm:$0xff]  ;;  %v1687_v22 = vld [vmem:[%s6652_s20 + $0x5d8] sm:$0xff] }
 0x19d   : > { %2165 = vmatmul.mubr.bf16.gmra.mrb[48].mxu1 %v1804_v29  ;;  %v1826_v29 = vpack.c.bf16 %v1642_v24, %v1638_v23  ;;  %v1691_v23 = vld [vmem:[%s6652_s20 + $0x5f8] sm:$0xff] }
 0x19e   : > { %2174 = vmatprep.mubr.bf16.mxu1 %v1809_v32  ;;  %2518 = vmatmul.mubr.bf16.gmra.mrb[48].mxu0 %v1806_v33  ;;  %v1648_v32 = vld [vmem:[%s6652_s20 + $0x4a0] sm:$0xff]  ;;  %v1653_v33 = vld [vmem:[%s6652_s20 + $0x4c8] sm:$0xff]  ;;  %v1851_v26 = vpack.c.bf16 %v1691_v23, %v1687_v22 }
 0x19f   : > { %2527 = vmatprep.mubr.bf16.mxu0 %v1811_v34  ;;  %v1657_v34 = vld [vmem:[%s6652_s20 + $0x4e8] sm:$0xff]  ;;  %v1828_v37 = vpack.c.bf16 %v1648_v32, %v1644_v31  ;;  %v1686_v31 = vld [vmem:[%s6652_s20 + $0x5d0] sm:$0xff]  ;;  %v1884_v22 = vld [vmem:[#allocation2] sm:$0xff] }
 0x1a0   : > { %v1833_v40 = vpack.c.bf16 %v1657_v34, %v1653_v33  ;;  %v1690_v32 = vld [vmem:[%s6652_s20 + $0x5f0] sm:$0xff]  ;;  %v1695_v34 = vld [vmem:[%s6652_s20 + $0x618] sm:$0xff] }
 0x1a5   : > { %2175 = vmatmul.mubr.bf16.gmra.mrb[52].mxu1 %v1808_v41  ;;  %v1830_v41 = vpack.c.bf16 %v1650_v36, %v1646_v35  ;;  %v1699_v35 = vld [vmem:[%s6652_s20 + $0x638] sm:$0xff] }
 0x1a6   : > { %2184 = vmatprep.mubr.bf16.mxu1 %v1813_v44  ;;  %2528 = vmatmul.mubr.bf16.gmra.mrb[52].mxu0 %v1810_v45  ;;  %v1656_v44 = vld [vmem:[%s6652_s20 + $0x4e0] sm:$0xff]  ;;  %v1661_v45 = vld [vmem:[%s6652_s20 + $0x508] sm:$0xff]  ;;  %v1855_v38 = vpack.c.bf16 %v1699_v35, %v1695_v34 }
 0x1a7   : > { %2537 = vmatprep.mubr.bf16.mxu0 %v1815_v46  ;;  %v1665_v46 = vld [vmem:[%s6652_s20 + $0x528] sm:$0xff]  ;;  %v1832_v49 = vpack.c.bf16 %v1656_v44, %v1652_v43  ;;  %v1694_v43 = vld [vmem:[%s6652_s20 + $0x610] sm:$0xff] }
 0x1a8   : > { %v1837_v52 = vpack.c.bf16 %v1665_v46, %v1661_v45  ;;  %v1698_v44 = vld [vmem:[%s6652_s20 + $0x630] sm:$0xff]  ;;  %v1703_v46 = vld [vmem:[%s6652_s20 + $0x658] sm:$0xff] }
 0x1ad   : > { %2185 = vmatmul.mubr.bf16.gmra.mrb[56].mxu1 %v1812_v53  ;;  %v1834_v53 = vpack.c.bf16 %v1658_v48, %v1654_v47  ;;  %v1707_v47 = vld [vmem:[%s6652_s20 + $0x678] sm:$0xff] }
 0x1ae   : > { %2194 = vmatprep.mubr.bf16.mxu1 %v1817_v56  ;;  %2538 = vmatmul.mubr.bf16.gmra.mrb[56].mxu0 %v1814_v57  ;;  %v1664_v56 = vld [vmem:[%s6652_s20 + $0x520] sm:$0xff]  ;;  %v1669_v57 = vld [vmem:[%s6652_s20 + $0x548] sm:$0xff]  ;;  %v1859_v50 = vpack.c.bf16 %v1707_v47, %v1703_v46 }
 0x1af   : > { %2547 = vmatprep.mubr.bf16.mxu0 %v1819_v58  ;;  %v1673_v58 = vld [vmem:[%s6652_s20 + $0x568] sm:$0xff]  ;;  %v1836_v61 = vpack.c.bf16 %v1664_v56, %v1660_v55  ;;  %v1702_v55 = vld [vmem:[%s6652_s20 + $0x650] sm:$0xff] }
 0x1b0   : > { %v1841_v0 = vpack.c.bf16 %v1673_v58, %v1669_v57  ;;  %v1706_v56 = vld [vmem:[%s6652_s20 + $0x670] sm:$0xff]  ;;  %v1711_v58 = vld [vmem:[%s6652_s20 + $0x698] sm:$0xff] }
 0x1b5   : > { %2195 = vmatmul.mubr.bf16.gmra.mrb[60].mxu1 %v1816_v1  ;;  %v1838_v1 = vpack.c.bf16 %v1666_v60, %v1662_v59  ;;  %v1715_v59 = vld [vmem:[%s6652_s20 + $0x6b8] sm:$0xff] }
 0x1b6   : > { %2204 = vmatprep.mubr.bf16.mxu1 %v1821_v4  ;;  %2548 = vmatmul.mubr.bf16.gmra.mrb[60].mxu0 %v1818_v5  ;;  %v1672_v4 = vld [vmem:[%s6652_s20 + $0x560] sm:$0xff]  ;;  %v1677_v5 = vld [vmem:[%s6652_s20 + $0x588] sm:$0xff]  ;;  %v1863_v62 = vpack.c.bf16 %v1715_v59, %v1711_v58 }
 0x1b7   : > { %2557 = vmatprep.mubr.bf16.mxu0 %v1823_v6  ;;  %v1681_v6 = vld [vmem:[%s6652_s20 + $0x5a8] sm:$0xff]  ;;  %v1840_v9 = vpack.c.bf16 %v1672_v4, %v1668_v3  ;;  %v1710_v3 = vld [vmem:[%s6652_s20 + $0x690] sm:$0xff] }
 0x1b8   : > { %v1845_v12 = vpack.c.bf16 %v1681_v6, %v1677_v5  ;;  %v1714_v4 = vld [vmem:[%s6652_s20 + $0x6b0] sm:$0xff]  ;;  %v1719_v6 = vld [vmem:[%s6652_s20 + $0x6d8] sm:$0xff]  ;;  %v1889_v59 = vld [vmem:[#allocation2 + $0x28] sm:$0xff] }
 0x1bd   : > { %2205 = vmatmul.mubr.bf16.gmra.mrb[64].mxu1 %v1820_v13  ;;  %v1842_v13 = vpack.c.bf16 %v1674_v8, %v1670_v7  ;;  %v1723_v7 = vld [vmem:[%s6652_s20 + $0x6f8] sm:$0xff] }
 0x1be   : > { %2214 = vmatprep.mubr.bf16.mxu1 %v1825_v16  ;;  %2558 = vmatmul.mubr.bf16.gmra.mrb[64].mxu0 %v1822_v17  ;;  %v1680_v16 = vld [vmem:[%s6652_s20 + $0x5a0] sm:$0xff]  ;;  %v1685_v17 = vld [vmem:[%s6652_s20 + $0x5c8] sm:$0xff]  ;;  %v1867_v10 = vpack.c.bf16 %v1723_v7, %v1719_v6 }
 0x1bf   : > { %2567 = vmatprep.mubr.bf16.mxu0 %v1827_v18  ;;  %v1689_v18 = vld [vmem:[%s6652_s20 + $0x5e8] sm:$0xff]  ;;  %v1844_v21 = vpack.c.bf16 %v1680_v16, %v1676_v15  ;;  %v1718_v16 = vld [vmem:[%s6652_s20 + $0x6d0] sm:$0xff] }
 0x1c0   : > { %v1849_v24 = vpack.c.bf16 %v1689_v18, %v1685_v17  ;;  %v1722_v17 = vld [vmem:[%s6652_s20 + $0x6f0] sm:$0xff] }
 0x1c5   : > { %2215 = vmatmul.mubr.bf16.gmra.mrb[68].mxu1 %v1824_v25  ;;  %v1846_v25 = vpack.c.bf16 %v1682_v20, %v1678_v19  ;;  %v1727_v20 = vld [vmem:[%s6652_s20 + $0x718] sm:$0xff] }
 0x1c6   : > { %2224 = vmatprep.mubr.bf16.mxu1 %v1829_v28  ;;  %2568 = vmatmul.mubr.bf16.gmra.mrb[68].mxu0 %v1826_v29  ;;  %v1688_v28 = vld [vmem:[%s6652_s20 + $0x5e0] sm:$0xff]  ;;  %v1693_v29 = vld [vmem:[%s6652_s20 + $0x608] sm:$0xff] }
 0x1c7   : > { %2577 = vmatprep.mubr.bf16.mxu0 %v1831_v30  ;;  %v1697_v30 = vld [vmem:[%s6652_s20 + $0x628] sm:$0xff]  ;;  %v1848_v33 = vpack.c.bf16 %v1688_v28, %v1684_v27 }
 0x1c8   : > { %v1853_v36 = vpack.c.bf16 %v1697_v30, %v1693_v29  ;;  %v1885_v27 = vld [vmem:[#allocation2 + $0x8] sm:$0xff]  ;;  %v1866_v30 = vpack.c.bf16 %v1722_v17, %v1718_v16  ;;  %v1734_v16 = vld [vmem:[%s6652_s20 + $0x750] sm:$0xff] }
 0x1c9   : > { %v1738_v17 = vld [vmem:[%s6652_s20 + $0x770] sm:$0xff] }
 0x1cd   : > { %2225 = vmatmul.mubr.bf16.gmra.mrb[72].mxu1 %v1828_v37  ;;  %v1850_v37 = vpack.c.bf16 %v1690_v32, %v1686_v31  ;;  %v1886_v32 = vld [vmem:[#allocation2 + $0x10] sm:$0xff] }
 0x1ce   : > { %2234 = vmatprep.mubr.bf16.mxu1 %v1833_v40  ;;  %2578 = vmatmul.mubr.bf16.gmra.mrb[72].mxu0 %v1830_v41  ;;  %v1696_v40 = vld [vmem:[%s6652_s20 + $0x620] sm:$0xff]  ;;  %v1701_v41 = vld [vmem:[%s6652_s20 + $0x648] sm:$0xff] }
 0x1cf   : > { %2587 = vmatprep.mubr.bf16.mxu0 %v1835_v42  ;;  %v1705_v42 = vld [vmem:[%s6652_s20 + $0x668] sm:$0xff]  ;;  %v1852_v45 = vpack.c.bf16 %v1696_v40, %v1692_v39 }
 0x1d0   : > { %v1857_v48 = vpack.c.bf16 %v1705_v42, %v1701_v41  ;;  %v1724_v41 = vld [vmem:[%s6652_s20 + $0x700] sm:$0xff] }
 0x1d1   : > { %v1728_v42 = vld [vmem:[%s6652_s20 + $0x720] sm:$0xff] }
 0x1d5   : > { %2235 = vmatmul.mubr.bf16.gmra.mrb[76].mxu1 %v1832_v49  ;;  %v1854_v49 = vpack.c.bf16 %v1698_v44, %v1694_v43  ;;  %v1733_v44 = vld [vmem:[%s6652_s20 + $0x748] sm:$0xff] }
 0x1d6   : > { %2244 = vmatprep.mubr.bf16.mxu1 %v1837_v52  ;;  %2588 = vmatmul.mubr.bf16.gmra.mrb[76].mxu0 %v1834_v53  ;;  %v1704_v52 = vld [vmem:[%s6652_s20 + $0x660] sm:$0xff]  ;;  %v1709_v53 = vld [vmem:[%s6652_s20 + $0x688] sm:$0xff] }
 0x1d7   : > { %2597 = vmatprep.mubr.bf16.mxu0 %v1839_v54  ;;  %v1713_v54 = vld [vmem:[%s6652_s20 + $0x6a8] sm:$0xff]  ;;  %v1856_v57 = vpack.c.bf16 %v1704_v52, %v1700_v51  ;;  %v1868_v51 = vpack.c.bf16 %v1728_v42, %v1724_v41  ;;  %v1735_v52 = vld [vmem:[%s6652_s20 + $0x758] sm:$0xff]  ;;  %v1740_v41 = vld [vmem:[%s6652_s20 + $0x780] sm:$0xff] }
 0x1d8   : > { %v1861_v60 = vpack.c.bf16 %v1713_v54, %v1709_v53  ;;  %v1739_v53 = vld [vmem:[%s6652_s20 + $0x778] sm:$0xff]  ;;  %v1888_v54 = vld [vmem:[#allocation2 + $0x20] sm:$0xff] }
 0x1d9   : > { %v1744_v42 = vld [vmem:[%s6652_s20 + $0x7a0] sm:$0xff] }
 0x1dd   : > { %2245 = vmatmul.mubr.bf16.gmra.mrb[80].mxu1 %v1836_v61  ;;  %v1858_v61 = vpack.c.bf16 %v1706_v56, %v1702_v55 }
 0x1de   : > { %2254 = vmatprep.mubr.bf16.mxu1 %v1841_v0  ;;  %2598 = vmatmul.mubr.bf16.gmra.mrb[80].mxu0 %v1838_v1  ;;  %v1712_v0 = vld [vmem:[%s6652_s20 + $0x6a0] sm:$0xff]  ;;  %v1717_v1 = vld [vmem:[%s6652_s20 + $0x6c8] sm:$0xff] }
 0x1df   : > { %2607 = vmatprep.mubr.bf16.mxu0 %v1843_v2  ;;  %v1721_v2 = vld [vmem:[%s6652_s20 + $0x6e8] sm:$0xff]  ;;  %v1860_v5 = vpack.c.bf16 %v1712_v0, %v1708_v63  ;;  %v1890_v0 = vld [vmem:[#allocation2 + $0x30] sm:$0xff] }
 0x1e0   : > { %v1865_v8 = vpack.c.bf16 %v1721_v2, %v1717_v1  ;;  %v1875_v2 = vpack.c.bf16 %v1739_v53, %v1735_v52  ;;  %v1751_v52 = vld [vmem:[%s6652_s20 + $0x7d8] sm:$0xff] }
 0x1e1   : > { %v1755_v53 = vld [vmem:[%s6652_s20 + $0x7f8] sm:$0xff] }
 0x1e5   : > { %2255 = vmatmul.mubr.bf16.gmra.mrb[84].mxu1 %v1840_v9  ;;  %v1862_v9 = vpack.c.bf16 %v1714_v4, %v1710_v3 }
 0x1e6   : > { %2264 = vmatprep.mubr.bf16.mxu1 %v1845_v12  ;;  %2608 = vmatmul.mubr.bf16.gmra.mrb[84].mxu0 %v1842_v13  ;;  %v1720_v12 = vld [vmem:[%s6652_s20 + $0x6e0] sm:$0xff]  ;;  %v1725_v13 = vld [vmem:[%s6652_s20 + $0x708] sm:$0xff] }
 0x1e7   : > { %2617 = vmatprep.mubr.bf16.mxu0 %v1847_v14  ;;  %v1729_v14 = vld [vmem:[%s6652_s20 + $0x728] sm:$0xff]  ;;  %v1864_v19 = vpack.c.bf16 %v1720_v12, %v1716_v11 }
 0x1e8   : > { %v1741_v12 = vld [vmem:[%s6652_s20 + $0x788] sm:$0xff] }
 0x1ed   : > { %2265 = vmatmul.mubr.bf16.gmra.mrb[88].mxu1 %v1844_v21  ;;  %v1731_v21 = vld [vmem:[%s6652_s20 + $0x738] sm:$0xff] }
 0x1ee   : > { %2274 = vmatprep.mubr.bf16.mxu1 %v1849_v24  ;;  %2618 = vmatmul.mubr.bf16.gmra.mrb[88].mxu0 %v1846_v25  ;;  %v1869_v25 = vpack.c.bf16 %v1729_v14, %v1725_v13  ;;  %v1871_v34 = vpack.c.bf16 %v1731_v21, %v1727_v20  ;;  %v1745_v13 = vld [vmem:[%s6652_s20 + $0x7a8] sm:$0xff]  ;;  %v1743_v20 = vld [vmem:[%s6652_s20 + $0x798] sm:$0xff] }
 0x1ef   : > { %2627 = vmatprep.mubr.bf16.mxu0 %v1851_v26  ;;  %v1747_v21 = vld [vmem:[%s6652_s20 + $0x7b8] sm:$0xff] }
 0x1f5   : > { %2275 = vmatmul.mubr.bf16.gmra.mrb[92].mxu1 %v1848_v33 }
 0x1f6   : > { %2284 = vmatprep.mubr.bf16.mxu1 %v1853_v36  ;;  %2628 = vmatmul.mubr.bf16.gmra.mrb[92].mxu0 %v1850_v37  ;;  %v1887_v37 = vld [vmem:[#allocation2 + $0x18] sm:$0xff] }
 0x1f7   : > { %2637 = vmatprep.mubr.bf16.mxu0 %v1855_v38 }
 0x1fd   : > { %2285 = vmatmul.mubr.bf16.gmra.mrb[96].mxu1 %v1852_v45  ;;  %v1737_v45 = vld [vmem:[%s6652_s20 + $0x768] sm:$0xff] }
 0x1fe   : > { %2294 = vmatprep.mubr.bf16.mxu1 %v1857_v48  ;;  %2638 = vmatmul.mubr.bf16.gmra.mrb[96].mxu0 %v1854_v49  ;;  %v1726_v48 = vld [vmem:[%s6652_s20 + $0x710] sm:$0xff] }
 0x1ff   : > { %2647 = vmatprep.mubr.bf16.mxu0 %v1859_v50  ;;  %v1730_v49 = vld [vmem:[%s6652_s20 + $0x730] sm:$0xff] }
 0x205   : > { %2295 = vmatmul.mubr.bf16.gmra.mrb[100].mxu1 %v1856_v57  ;;  %v1873_v57 = vpack.c.bf16 %v1737_v45, %v1733_v44  ;;  %v1749_v44 = vld [vmem:[%s6652_s20 + $0x7c8] sm:$0xff] }
 0x206   : > { %2304 = vmatprep.mubr.bf16.mxu1 %v1861_v60  ;;  %2648 = vmatmul.mubr.bf16.gmra.mrb[100].mxu0 %v1858_v61  ;;  %v1753_v45 = vld [vmem:[%s6652_s20 + $0x7e8] sm:$0xff] }
 0x207   : > { %2657 = vmatprep.mubr.bf16.mxu0 %v1863_v62  ;;  %v1870_v62 = vpack.c.bf16 %v1730_v49, %v1726_v48  ;;  %v1742_v48 = vld [vmem:[%s6652_s20 + $0x790] sm:$0xff] }
 0x208   : > { %v1746_v49 = vld [vmem:[%s6652_s20 + $0x7b0] sm:$0xff] }
 0x20d   : > { %2305 = vmatmul.mubr.bf16.gmra.mrb[104].mxu1 %v1860_v5  ;;  %v1891_v5 = vld [vmem:[#allocation2 + $0x38] sm:$0xff] }
 0x20e   : > { %2314 = vmatprep.mubr.bf16.mxu1 %v1865_v8  ;;  %2658 = vmatmul.mubr.bf16.gmra.mrb[104].mxu0 %v1862_v9  ;;  %v1732_v9 = vld [vmem:[%s6652_s20 + $0x740] sm:$0xff] }
 0x20f   : > { %2667 = vmatprep.mubr.bf16.mxu0 %v1867_v10  ;;  %v1736_v10 = vld [vmem:[%s6652_s20 + $0x760] sm:$0xff] }
 0x210   : > { %v2046_v15 = vpop.f32.mrb[0].mxu1 }
 0x211   : > { %v2048_v18 = vpop.f32.mrb[1].mxu1  ;;  %v2399_v23 = vpop.f32.mrb[0].mxu0 }
 0x212   : > { %v2050_v24 = vpop.f32.mrb[2].mxu1  ;;  %v2400_v26 = vadd.f32 %v2399_v23, %v2046_v15  ;;  %v2401_v28 = vpop.f32.mrb[1].mxu0 }
 0x213   : > { %v2052_v29 = vpop.f32.mrb[3].mxu1  ;;  %v2402_v31 = vadd.f32 %v2401_v28, %v2048_v18  ;;  %v2403_v33 = vpop.f32.mrb[2].mxu0 }
 0x214   : > { %v2718_v35 = vadd.f32 %v2400_v26, %v1884_v22  ;;  %v2404_v36 = vadd.f32 %v2403_v33, %v2050_v24  ;;  %v2405_v38 = vpop.f32.mrb[3].mxu0  ;;  %v1892_v22 = vld [vmem:[#allocation2 + $0x40] sm:$0xff] }
 0x215   : > { %2315 = vmatmul.mubr.bf16.gmra.mrb[108].mxu1 %v1864_v19  ;;  %v2719_v39 = vadd.f32 %v2402_v31, %v1885_v27  ;;  %v2406_v40 = vadd.f32 %v2405_v38, %v2052_v29  ;;  %v1872_v19 = vpack.c.bf16 %v1736_v10, %v1732_v9  ;;  %v1893_v27 = vld [vmem:[#allocation2 + $0x48] sm:$0xff]  ;;  %v1748_v9 = vld [vmem:[%s6652_s20 + $0x7c0] sm:$0xff] }
 0x216   : > { %2324 = vmatprep.mubr.bf16.mxu1 %v1869_v25  ;;  %2846 = vst [vmem:[#allocation2] sm:$0xff] %v2718_v35  ;;  %v2720_v43 = vadd.f32 %v2404_v36, %v1886_v32  ;;  %2668 = vmatmul.mubr.bf16.gmra.mrb[108].mxu0 %v1866_v30  ;;  %v1877_v25 = vpack.c.bf16 %v1745_v13, %v1741_v12  ;;  %v1894_v32 = vld [vmem:[#allocation2 + $0x50] sm:$0xff]  ;;  %v1752_v10 = vld [vmem:[%s6652_s20 + $0x7e0] sm:$0xff] }
 0x217   : > { %2848 = vst.msk [vmem:[#allocation2 + $0x8] sm:$0xff] %vm2847_vm1, %v2719_v39  ;;  %v2721_v46 = vadd.f32 %v2406_v40, %v1887_v37  ;;  %2677 = vmatprep.mubr.bf16.mxu0 %v1871_v34  ;;  %v1874_v30 = vpack.c.bf16 %v1738_v17, %v1734_v16  ;;  %v1879_v34 = vpack.c.bf16 %v1747_v21, %v1743_v20  ;;  %v1895_v37 = vld [vmem:[#allocation2 + $0x58] sm:$0xff] }
 0x218   : > { %v2056_v47 = vpop.f32.mrb[4].mxu1  ;;  %2849 = vst [vmem:[#allocation2 + $0x10] sm:$0xff] %v2720_v43  ;;  %v1880_v17 = vpack.c.bf16 %v1752_v10, %v1748_v9 }
 0x219   : > { %v2058_v50 = vpop.f32.mrb[5].mxu1  ;;  %2850 = vst.msk [vmem:[#allocation2 + $0x18] sm:$0xff] %vm2847_vm1, %v2721_v46  ;;  %v2409_v55 = vpop.f32.mrb[4].mxu0 }
 0x21a   : > { %v2060_v56 = vpop.f32.mrb[6].mxu1  ;;  %v2410_v58 = vadd.f32 %v2409_v55, %v2056_v47  ;;  %v2411_v60 = vpop.f32.mrb[5].mxu0 }
 0x21b   : > { %v2062_v61 = vpop.f32.mrb[7].mxu1  ;;  %v2412_v63 = vadd.f32 %v2411_v60, %v2058_v50  ;;  %v2413_v1 = vpop.f32.mrb[6].mxu0 }
 0x21c   : > { %v2722_v3 = vadd.f32 %v2410_v58, %v1888_v54  ;;  %v2414_v4 = vadd.f32 %v2413_v1, %v2060_v56  ;;  %v2415_v6 = vpop.f32.mrb[7].mxu0  ;;  %v1896_v54 = vld [vmem:[#allocation2 + $0x60] sm:$0xff] }
 0x21d   : > { %2325 = vmatmul.mubr.bf16.gmra.mrb[112].mxu1 %v1868_v51  ;;  %v2723_v7 = vadd.f32 %v2412_v63, %v1889_v59  ;;  %v2416_v8 = vadd.f32 %v2415_v6, %v2062_v61  ;;  %v1876_v51 = vpack.c.bf16 %v1744_v42, %v1740_v41  ;;  %v1897_v59 = vld [vmem:[#allocation2 + $0x68] sm:$0xff] }
 0x21e   : > { %2334 = vmatprep.mubr.bf16.mxu1 %v1873_v57  ;;  %2851 = vst [vmem:[#allocation2 + $0x20] sm:$0xff] %v2722_v3  ;;  %v2724_v11 = vadd.f32 %v2414_v4, %v1890_v0  ;;  %2678 = vmatmul.mubr.bf16.gmra.mrb[112].mxu0 %v1870_v62  ;;  %v1881_v57 = vpack.c.bf16 %v1753_v45, %v1749_v44  ;;  %v1898_v0 = vld [vmem:[#allocation2 + $0x70] sm:$0xff] }
 0x21f   : > { %2852 = vst.msk [vmem:[#allocation2 + $0x28] sm:$0xff] %vm2847_vm1, %v2723_v7  ;;  %v2725_v14 = vadd.f32 %v2416_v8, %v1891_v5  ;;  %2687 = vmatprep.mubr.bf16.mxu0 %v1875_v2  ;;  %v1878_v62 = vpack.c.bf16 %v1746_v49, %v1742_v48  ;;  %v1883_v2 = vpack.c.bf16 %v1755_v53, %v1751_v52  ;;  %v1899_v5 = vld [vmem:[#allocation2 + $0x78] sm:$0xff] }
 0x220   : > { %v2066_v15 = vpop.f32.mrb[8].mxu1  ;;  %2853 = vst [vmem:[#allocation2 + $0x30] sm:$0xff] %v2724_v11 }
 0x221   : > { %v2068_v18 = vpop.f32.mrb[9].mxu1  ;;  %2854 = vst.msk [vmem:[#allocation2 + $0x38] sm:$0xff] %vm2847_vm1, %v2725_v14  ;;  %v2419_v23 = vpop.f32.mrb[8].mxu0  ;;  %v1750_v14 = vld [vmem:[%s6652_s20 + $0x7d0] sm:$0xff] }
 0x222   : > { %v2070_v24 = vpop.f32.mrb[10].mxu1  ;;  %v2420_v26 = vadd.f32 %v2419_v23, %v2066_v15  ;;  %v2421_v28 = vpop.f32.mrb[9].mxu0  ;;  %v1754_v15 = vld [vmem:[%s6652_s20 + $0x7f0] sm:$0xff] }
 0x223   : > { %v2072_v29 = vpop.f32.mrb[11].mxu1  ;;  %v2422_v31 = vadd.f32 %v2421_v28, %v2068_v18  ;;  %v2423_v33 = vpop.f32.mrb[10].mxu0  ;;  %v1900_v18 = vld [vmem:[#allocation2 + $0x80] sm:$0xff] }
 0x224   : > { %v2726_v35 = vadd.f32 %v2420_v26, %v1892_v22  ;;  %v2424_v36 = vadd.f32 %v2423_v33, %v2070_v24  ;;  %v2425_v38 = vpop.f32.mrb[11].mxu0  ;;  %v1901_v22 = vld [vmem:[#allocation2 + $0x88] sm:$0xff] }
 0x225   : > { %2335 = vmatmul.mubr.bf16.gmra.mrb[116].mxu1 %v1872_v19  ;;  %v2727_v39 = vadd.f32 %v2422_v31, %v1893_v27  ;;  %v2426_v40 = vadd.f32 %v2425_v38, %v2072_v29  ;;  %v1902_v27 = vld [vmem:[#allocation2 + $0x90] sm:$0xff]  ;;  %v1903_v31 = vld [vmem:[#allocation2 + $0x98] sm:$0xff] }
 0x226   : > { %2344 = vmatprep.mubr.bf16.mxu1 %v1877_v25  ;;  %2855 = vst [vmem:[#allocation2 + $0x40] sm:$0xff] %v2726_v35  ;;  %v2728_v43 = vadd.f32 %v2424_v36, %v1894_v32  ;;  %2688 = vmatmul.mubr.bf16.gmra.mrb[116].mxu0 %v1874_v30  ;;  %v1882_v25 = vpack.c.bf16 %v1754_v15, %v1750_v14  ;;  %v1912_v15 = vld [vmem:[#allocation2 + $0xe0] sm:$0xff] }
 0x227   : > { %2856 = vst.msk [vmem:[#allocation2 + $0x48] sm:$0xff] %vm2847_vm1, %v2727_v39  ;;  %v2729_v46 = vadd.f32 %v2426_v40, %v1895_v37  ;;  %2697 = vmatprep.mubr.bf16.mxu0 %v1879_v34  ;;  %v1904_v39 = vld [vmem:[#allocation2 + $0xa0] sm:$0xff] }
 0x228   : > { %v2076_v47 = vpop.f32.mrb[12].mxu1  ;;  %2857 = vst [vmem:[#allocation2 + $0x50] sm:$0xff] %v2728_v43  ;;  %v1905_v43 = vld [vmem:[#allocation2 + $0xa8] sm:$0xff] }
 0x229   : > { %v2078_v50 = vpop.f32.mrb[13].mxu1  ;;  %2858 = vst.msk [vmem:[#allocation2 + $0x58] sm:$0xff] %vm2847_vm1, %v2729_v46  ;;  %v2429_v55 = vpop.f32.mrb[12].mxu0 }
 0x22a   : > { %v2080_v56 = vpop.f32.mrb[14].mxu1  ;;  %v2430_v58 = vadd.f32 %v2429_v55, %v2076_v47  ;;  %v2431_v60 = vpop.f32.mrb[13].mxu0  ;;  %v1906_v47 = vld [vmem:[#allocation2 + $0xb0] sm:$0xff] }
 0x22b   : > { %v2082_v61 = vpop.f32.mrb[15].mxu1  ;;  %v2432_v63 = vadd.f32 %v2431_v60, %v2078_v50  ;;  %v2433_v1 = vpop.f32.mrb[14].mxu0 }
 0x22c   : > { %v2730_v3 = vadd.f32 %v2430_v58, %v1896_v54  ;;  %v2434_v4 = vadd.f32 %v2433_v1, %v2080_v56  ;;  %v2435_v6 = vpop.f32.mrb[15].mxu0 }
 0x22d   : > { %2345 = vmatmul.mubr.bf16.gmra.mrb[120].mxu1 %v1876_v51  ;;  %v2731_v7 = vadd.f32 %v2432_v63, %v1897_v59  ;;  %v2436_v8 = vadd.f32 %v2435_v6, %v2082_v61  ;;  %v1907_v51 = vld [vmem:[#allocation2 + $0xb8] sm:$0xff]  ;;  %v1908_v59 = vld [vmem:[#allocation2 + $0xc0] sm:$0xff]  ;;  %v1909_v63 = vld [vmem:[#allocation2 + $0xc8] sm:$0xff] }
 0x22e   : > { %2354 = vmatprep.mubr.bf16.mxu1 %v1881_v57  ;;  %2859 = vst [vmem:[#allocation2 + $0x60] sm:$0xff] %v2730_v3  ;;  %v2732_v11 = vadd.f32 %v2434_v4, %v1898_v0  ;;  %2698 = vmatmul.mubr.bf16.gmra.mrb[120].mxu0 %v1878_v62  ;;  %v1910_v3 = vld [vmem:[#allocation2 + $0xd0] sm:$0xff] }
 0x22f   : > { %2860 = vst.msk [vmem:[#allocation2 + $0x68] sm:$0xff] %vm2847_vm1, %v2731_v7  ;;  %v2733_v12 = vadd.f32 %v2436_v8, %v1899_v5  ;;  %2707 = vmatprep.mubr.bf16.mxu0 %v1883_v2  ;;  %v1911_v7 = vld [vmem:[#allocation2 + $0xd8] sm:$0xff] }
 0x230   : > { %v2086_v13 = vpop.f32.mrb[16].mxu1  ;;  %2861 = vst [vmem:[#allocation2 + $0x70] sm:$0xff] %v2732_v11 }
 0x231   : > { %v2088_v16 = vpop.f32.mrb[17].mxu1  ;;  %2862 = vst.msk [vmem:[#allocation2 + $0x78] sm:$0xff] %vm2847_vm1, %v2733_v12  ;;  %v2439_v19 = vpop.f32.mrb[16].mxu0 }
 0x232   : > { %v2090_v20 = vpop.f32.mrb[18].mxu1  ;;  %v2440_v21 = vadd.f32 %v2439_v19, %v2086_v13  ;;  %v2441_v23 = vpop.f32.mrb[17].mxu0  ;;  %v1913_v19 = vld [vmem:[#allocation2 + $0xe8] sm:$0xff] }
 0x233   : > { %v2092_v24 = vpop.f32.mrb[19].mxu1  ;;  %v2442_v26 = vadd.f32 %v2441_v23, %v2088_v16  ;;  %v2443_v28 = vpop.f32.mrb[18].mxu0  ;;  %v1914_v23 = vld [vmem:[#allocation2 + $0xf0] sm:$0xff] }
 0x234   : > { %v2734_v29 = vadd.f32 %v2440_v21, %v1900_v18  ;;  %v2444_v30 = vadd.f32 %v2443_v28, %v2090_v20  ;;  %v2445_v32 = vpop.f32.mrb[19].mxu0 }
 0x235   : > { %2355 = vmatmul.mubr.bf16.gmra.mrb[124].mxu1 %v1880_v17  ;;  %v2735_v33 = vadd.f32 %v2442_v26, %v1901_v22  ;;  %v2446_v34 = vadd.f32 %v2445_v32, %v2092_v24 }
 0x236   : > { %2863 = vst [vmem:[#allocation2 + $0x80] sm:$0xff] %v2734_v29  ;;  %v2736_v35 = vadd.f32 %v2444_v30, %v1902_v27  ;;  %2708 = vmatmul.mubr.bf16.gmra.mrb[124].mxu0 %v1882_v25  ;;  %v1915_v27 = vld [vmem:[#allocation2 + $0xf8] sm:$0xff] }
 0x237   : > { %2864 = vst.msk [vmem:[#allocation2 + $0x88] sm:$0xff] %vm2847_vm1, %v2735_v33  ;;  %v2737_v36 = vadd.f32 %v2446_v34, %v1903_v31 }
 0x238   : > { %v2096_v37 = vpop.f32.mrb[20].mxu1  ;;  %2865 = vst [vmem:[#allocation2 + $0x90] sm:$0xff] %v2736_v35  ;;  %v1916_v35 = vld [vmem:[#allocation2 + $0x100] sm:$0xff] }
 0x239   : > { %v2098_v38 = vpop.f32.mrb[21].mxu1  ;;  %2866 = vst.msk [vmem:[#allocation2 + $0x98] sm:$0xff] %vm2847_vm1, %v2737_v36  ;;  %v2449_v40 = vpop.f32.mrb[20].mxu0 }
 0x23a   : > { %v2100_v41 = vpop.f32.mrb[22].mxu1  ;;  %v2450_v42 = vadd.f32 %v2449_v40, %v2096_v37  ;;  %v2451_v44 = vpop.f32.mrb[21].mxu0 }
 0x23b   : > { %v2102_v45 = vpop.f32.mrb[23].mxu1  ;;  %v2452_v46 = vadd.f32 %v2451_v44, %v2098_v38  ;;  %v2453_v48 = vpop.f32.mrb[22].mxu0 }
 0x23c   : > { %v2738_v49 = vadd.f32 %v2450_v42, %v1904_v39  ;;  %v2454_v50 = vadd.f32 %v2453_v48, %v2100_v41  ;;  %v2455_v52 = vpop.f32.mrb[23].mxu0  ;;  %v1917_v39 = vld [vmem:[#allocation2 + $0x108] sm:$0xff] }
 0x23d   : > { %v2739_v53 = vadd.f32 %v2452_v46, %v1905_v43  ;;  %v2456_v54 = vadd.f32 %v2455_v52, %v2102_v45  ;;  %v1918_v43 = vld [vmem:[#allocation2 + $0x110] sm:$0xff] }
 0x23e   : > { %2867 = vst [vmem:[#allocation2 + $0xa0] sm:$0xff] %v2738_v49  ;;  %v2740_v55 = vadd.f32 %v2454_v50, %v1906_v47  ;;  %v1919_v47 = vld [vmem:[#allocation2 + $0x118] sm:$0xff] }
 0x23f   : > { %2868 = vst.msk [vmem:[#allocation2 + $0xa8] sm:$0xff] %vm2847_vm1, %v2739_v53  ;;  %v2741_v56 = vadd.f32 %v2456_v54, %v1907_v51 }
 0x240   : > { %v2106_v57 = vpop.f32.mrb[24].mxu1  ;;  %2869 = vst [vmem:[#allocation2 + $0xb0] sm:$0xff] %v2740_v55  ;;  %v1920_v55 = vld [vmem:[#allocation2 + $0x120] sm:$0xff] }
 0x241   : > { %v2108_v58 = vpop.f32.mrb[25].mxu1  ;;  %2870 = vst.msk [vmem:[#allocation2 + $0xb8] sm:$0xff] %vm2847_vm1, %v2741_v56  ;;  %v2459_v60 = vpop.f32.mrb[24].mxu0 }
 0x242   : > { %v2110_v61 = vpop.f32.mrb[26].mxu1  ;;  %v2460_v62 = vadd.f32 %v2459_v60, %v2106_v57  ;;  %v2461_v0 = vpop.f32.mrb[25].mxu0 }
 0x243   : > { %v2112_v1 = vpop.f32.mrb[27].mxu1  ;;  %v2462_v2 = vadd.f32 %v2461_v0, %v2108_v58  ;;  %v2463_v4 = vpop.f32.mrb[26].mxu0 }
 0x244   : > { %v2742_v5 = vadd.f32 %v2460_v62, %v1908_v59  ;;  %v2464_v6 = vadd.f32 %v2463_v4, %v2110_v61  ;;  %v2465_v8 = vpop.f32.mrb[27].mxu0  ;;  %v1921_v59 = vld [vmem:[#allocation2 + $0x128] sm:$0xff] }
 0x245   : > { %v2743_v9 = vadd.f32 %v2462_v2, %v1909_v63  ;;  %v2466_v10 = vadd.f32 %v2465_v8, %v2112_v1  ;;  %v1922_v63 = vld [vmem:[#allocation2 + $0x130] sm:$0xff] }
 0x246   : > { %2871 = vst [vmem:[#allocation2 + $0xc0] sm:$0xff] %v2742_v5  ;;  %v2744_v11 = vadd.f32 %v2464_v6, %v1910_v3  ;;  %v1923_v3 = vld [vmem:[#allocation2 + $0x138] sm:$0xff] }
 0x247   : > { %2872 = vst.msk [vmem:[#allocation2 + $0xc8] sm:$0xff] %vm2847_vm1, %v2743_v9  ;;  %v2745_v12 = vadd.f32 %v2466_v10, %v1911_v7 }
 0x248   : > { %v2116_v13 = vpop.f32.mrb[28].mxu1  ;;  %2873 = vst [vmem:[#allocation2 + $0xd0] sm:$0xff] %v2744_v11  ;;  %v1924_v11 = vld [vmem:[#allocation2 + $0x140] sm:$0xff] }
 0x249   : > { %v2118_v14 = vpop.f32.mrb[29].mxu1  ;;  %2874 = vst.msk [vmem:[#allocation2 + $0xd8] sm:$0xff] %vm2847_vm1, %v2745_v12  ;;  %v2469_v16 = vpop.f32.mrb[28].mxu0 }
 0x24a   : > { %v2120_v17 = vpop.f32.mrb[30].mxu1  ;;  %v2470_v18 = vadd.f32 %v2469_v16, %v2116_v13  ;;  %v2471_v20 = vpop.f32.mrb[29].mxu0 }
 0x24b   : > { %v2122_v21 = vpop.f32.mrb[31].mxu1  ;;  %v2472_v22 = vadd.f32 %v2471_v20, %v2118_v14  ;;  %v2473_v24 = vpop.f32.mrb[30].mxu0 }
 0x24c   : > { %v2746_v25 = vadd.f32 %v2470_v18, %v1912_v15  ;;  %v2474_v26 = vadd.f32 %v2473_v24, %v2120_v17  ;;  %v2475_v28 = vpop.f32.mrb[31].mxu0  ;;  %v1925_v15 = vld [vmem:[#allocation2 + $0x148] sm:$0xff] }
 0x24d   : > { %v2747_v29 = vadd.f32 %v2472_v22, %v1913_v19  ;;  %v2476_v30 = vadd.f32 %v2475_v28, %v2122_v21  ;;  %v1926_v19 = vld [vmem:[#allocation2 + $0x150] sm:$0xff] }
 0x24e   : > { %2875 = vst [vmem:[#allocation2 + $0xe0] sm:$0xff] %v2746_v25  ;;  %v2748_v31 = vadd.f32 %v2474_v26, %v1914_v23  ;;  %v1927_v23 = vld [vmem:[#allocation2 + $0x158] sm:$0xff] }
 0x24f   : > { %2876 = vst.msk [vmem:[#allocation2 + $0xe8] sm:$0xff] %vm2847_vm1, %v2747_v29  ;;  %v2749_v32 = vadd.f32 %v2476_v30, %v1915_v27 }
 0x250   : > { %v2126_v33 = vpop.f32.mrb[32].mxu1  ;;  %2877 = vst [vmem:[#allocation2 + $0xf0] sm:$0xff] %v2748_v31  ;;  %v1928_v31 = vld [vmem:[#allocation2 + $0x160] sm:$0xff] }
 0x251   : > { %v2128_v34 = vpop.f32.mrb[33].mxu1  ;;  %2878 = vst.msk [vmem:[#allocation2 + $0xf8] sm:$0xff] %vm2847_vm1, %v2749_v32  ;;  %v2479_v36 = vpop.f32.mrb[32].mxu0 }
 0x252   : > { %v2130_v37 = vpop.f32.mrb[34].mxu1  ;;  %v2480_v38 = vadd.f32 %v2479_v36, %v2126_v33  ;;  %v2481_v40 = vpop.f32.mrb[33].mxu0 }
 0x253   : > { %v2132_v41 = vpop.f32.mrb[35].mxu1  ;;  %v2482_v42 = vadd.f32 %v2481_v40, %v2128_v34  ;;  %v2483_v44 = vpop.f32.mrb[34].mxu0 }
 0x254   : > { %v2750_v45 = vadd.f32 %v2480_v38, %v1916_v35  ;;  %v2484_v46 = vadd.f32 %v2483_v44, %v2130_v37  ;;  %v2485_v48 = vpop.f32.mrb[35].mxu0  ;;  %v1929_v35 = vld [vmem:[#allocation2 + $0x168] sm:$0xff] }
 0x255   : > { %v2751_v49 = vadd.f32 %v2482_v42, %v1917_v39  ;;  %v2486_v50 = vadd.f32 %v2485_v48, %v2132_v41  ;;  %v1930_v39 = vld [vmem:[#allocation2 + $0x170] sm:$0xff] }
 0x256   : > { %2879 = vst [vmem:[#allocation2 + $0x100] sm:$0xff] %v2750_v45  ;;  %v2752_v51 = vadd.f32 %v2484_v46, %v1918_v43  ;;  %v1931_v43 = vld [vmem:[#allocation2 + $0x178] sm:$0xff] }
 0x257   : > { %2880 = vst.msk [vmem:[#allocation2 + $0x108] sm:$0xff] %vm2847_vm1, %v2751_v49  ;;  %v2753_v52 = vadd.f32 %v2486_v50, %v1919_v47 }
 0x258   : > { %v2136_v53 = vpop.f32.mrb[36].mxu1  ;;  %2881 = vst [vmem:[#allocation2 + $0x110] sm:$0xff] %v2752_v51  ;;  %v1932_v51 = vld [vmem:[#allocation2 + $0x180] sm:$0xff] }
 0x259   : > { %v2138_v54 = vpop.f32.mrb[37].mxu1  ;;  %2882 = vst.msk [vmem:[#allocation2 + $0x118] sm:$0xff] %vm2847_vm1, %v2753_v52  ;;  %v2489_v56 = vpop.f32.mrb[36].mxu0 }
 0x25a   : > { %v2140_v57 = vpop.f32.mrb[38].mxu1  ;;  %v2490_v58 = vadd.f32 %v2489_v56, %v2136_v53  ;;  %v2491_v60 = vpop.f32.mrb[37].mxu0 }
 0x25b   : > { %v2142_v61 = vpop.f32.mrb[39].mxu1  ;;  %v2492_v62 = vadd.f32 %v2491_v60, %v2138_v54  ;;  %v2493_v0 = vpop.f32.mrb[38].mxu0 }
 0x25c   : > { %v2754_v1 = vadd.f32 %v2490_v58, %v1920_v55  ;;  %v2494_v2 = vadd.f32 %v2493_v0, %v2140_v57  ;;  %v2495_v4 = vpop.f32.mrb[39].mxu0  ;;  %v1933_v55 = vld [vmem:[#allocation2 + $0x188] sm:$0xff] }
 0x25d   : > { %v2755_v5 = vadd.f32 %v2492_v62, %v1921_v59  ;;  %v2496_v6 = vadd.f32 %v2495_v4, %v2142_v61  ;;  %v1934_v59 = vld [vmem:[#allocation2 + $0x190] sm:$0xff] }
 0x25e   : > { %2883 = vst [vmem:[#allocation2 + $0x120] sm:$0xff] %v2754_v1  ;;  %v2756_v7 = vadd.f32 %v2494_v2, %v1922_v63  ;;  %v1935_v63 = vld [vmem:[#allocation2 + $0x198] sm:$0xff] }
 0x25f   : > { %2884 = vst.msk [vmem:[#allocation2 + $0x128] sm:$0xff] %vm2847_vm1, %v2755_v5  ;;  %v2757_v8 = vadd.f32 %v2496_v6, %v1923_v3 }
 0x260   : > { %v2146_v9 = vpop.f32.mrb[40].mxu1  ;;  %2885 = vst [vmem:[#allocation2 + $0x130] sm:$0xff] %v2756_v7  ;;  %v1936_v7 = vld [vmem:[#allocation2 + $0x1a0] sm:$0xff] }
 0x261   : > { %v2148_v10 = vpop.f32.mrb[41].mxu1  ;;  %2886 = vst.msk [vmem:[#allocation2 + $0x138] sm:$0xff] %vm2847_vm1, %v2757_v8  ;;  %v2499_v12 = vpop.f32.mrb[40].mxu0 }
 0x262   : > { %v2150_v13 = vpop.f32.mrb[42].mxu1  ;;  %v2500_v14 = vadd.f32 %v2499_v12, %v2146_v9  ;;  %v2501_v16 = vpop.f32.mrb[41].mxu0 }
 0x263   : > { %v2152_v17 = vpop.f32.mrb[43].mxu1  ;;  %v2502_v18 = vadd.f32 %v2501_v16, %v2148_v10  ;;  %v2503_v20 = vpop.f32.mrb[42].mxu0 }
 0x264   : > { %v2758_v21 = vadd.f32 %v2500_v14, %v1924_v11  ;;  %v2504_v22 = vadd.f32 %v2503_v20, %v2150_v13  ;;  %v2505_v24 = vpop.f32.mrb[43].mxu0  ;;  %v1937_v11 = vld [vmem:[#allocation2 + $0x1a8] sm:$0xff] }
 0x265   : > { %v2759_v25 = vadd.f32 %v2502_v18, %v1925_v15  ;;  %v2506_v26 = vadd.f32 %v2505_v24, %v2152_v17  ;;  %v1938_v15 = vld [vmem:[#allocation2 + $0x1b0] sm:$0xff] }
 0x266   : > { %2887 = vst [vmem:[#allocation2 + $0x140] sm:$0xff] %v2758_v21  ;;  %v2760_v27 = vadd.f32 %v2504_v22, %v1926_v19  ;;  %v1939_v19 = vld [vmem:[#allocation2 + $0x1b8] sm:$0xff] }
 0x267   : > { %2888 = vst.msk [vmem:[#allocation2 + $0x148] sm:$0xff] %vm2847_vm1, %v2759_v25  ;;  %v2761_v28 = vadd.f32 %v2506_v26, %v1927_v23 }
 0x268   : > { %v2156_v29 = vpop.f32.mrb[44].mxu1  ;;  %2889 = vst [vmem:[#allocation2 + $0x150] sm:$0xff] %v2760_v27  ;;  %v1940_v27 = vld [vmem:[#allocation2 + $0x1c0] sm:$0xff] }
 0x269   : > { %v2158_v30 = vpop.f32.mrb[45].mxu1  ;;  %2890 = vst.msk [vmem:[#allocation2 + $0x158] sm:$0xff] %vm2847_vm1, %v2761_v28  ;;  %v2509_v32 = vpop.f32.mrb[44].mxu0 }
 0x26a   : > { %v2160_v33 = vpop.f32.mrb[46].mxu1  ;;  %v2510_v34 = vadd.f32 %v2509_v32, %v2156_v29  ;;  %v2511_v36 = vpop.f32.mrb[45].mxu0 }
 0x26b   : > { %v2162_v37 = vpop.f32.mrb[47].mxu1  ;;  %v2512_v38 = vadd.f32 %v2511_v36, %v2158_v30  ;;  %v2513_v40 = vpop.f32.mrb[46].mxu0 }
 0x26c   : > { %v2762_v41 = vadd.f32 %v2510_v34, %v1928_v31  ;;  %v2514_v42 = vadd.f32 %v2513_v40, %v2160_v33  ;;  %v2515_v44 = vpop.f32.mrb[47].mxu0  ;;  %v1941_v31 = vld [vmem:[#allocation2 + $0x1c8] sm:$0xff] }
 0x26d   : > { %v2763_v45 = vadd.f32 %v2512_v38, %v1929_v35  ;;  %v2516_v46 = vadd.f32 %v2515_v44, %v2162_v37  ;;  %v1942_v35 = vld [vmem:[#allocation2 + $0x1d0] sm:$0xff] }
 0x26e   : > { %2891 = vst [vmem:[#allocation2 + $0x160] sm:$0xff] %v2762_v41  ;;  %v2764_v47 = vadd.f32 %v2514_v42, %v1930_v39  ;;  %v1943_v39 = vld [vmem:[#allocation2 + $0x1d8] sm:$0xff] }
 0x26f   : > { %2892 = vst.msk [vmem:[#allocation2 + $0x168] sm:$0xff] %vm2847_vm1, %v2763_v45  ;;  %v2765_v48 = vadd.f32 %v2516_v46, %v1931_v43 }
 0x270   : > { %v2166_v49 = vpop.f32.mrb[48].mxu1  ;;  %2893 = vst [vmem:[#allocation2 + $0x170] sm:$0xff] %v2764_v47  ;;  %v1944_v47 = vld [vmem:[#allocation2 + $0x1e0] sm:$0xff] }
 0x271   : > { %v2168_v50 = vpop.f32.mrb[49].mxu1  ;;  %2894 = vst.msk [vmem:[#allocation2 + $0x178] sm:$0xff] %vm2847_vm1, %v2765_v48  ;;  %v2519_v52 = vpop.f32.mrb[48].mxu0 }
 0x272   : > { %v2170_v53 = vpop.f32.mrb[50].mxu1  ;;  %v2520_v54 = vadd.f32 %v2519_v52, %v2166_v49  ;;  %v2521_v56 = vpop.f32.mrb[49].mxu0 }
 0x273   : > { %v2172_v57 = vpop.f32.mrb[51].mxu1  ;;  %v2522_v58 = vadd.f32 %v2521_v56, %v2168_v50  ;;  %v2523_v60 = vpop.f32.mrb[50].mxu0 }
 0x274   : > { %v2766_v61 = vadd.f32 %v2520_v54, %v1932_v51  ;;  %v2524_v62 = vadd.f32 %v2523_v60, %v2170_v53  ;;  %v2525_v0 = vpop.f32.mrb[51].mxu0  ;;  %v1945_v51 = vld [vmem:[#allocation2 + $0x1e8] sm:$0xff] }
 0x275   : > { %v2767_v1 = vadd.f32 %v2522_v58, %v1933_v55  ;;  %v2526_v2 = vadd.f32 %v2525_v0, %v2172_v57  ;;  %v1946_v55 = vld [vmem:[#allocation2 + $0x1f0] sm:$0xff] }
 0x276   : > { %2895 = vst [vmem:[#allocation2 + $0x180] sm:$0xff] %v2766_v61  ;;  %v2768_v3 = vadd.f32 %v2524_v62, %v1934_v59  ;;  %v1947_v59 = vld [vmem:[#allocation2 + $0x1f8] sm:$0xff] }
 0x277   : > { %2896 = vst.msk [vmem:[#allocation2 + $0x188] sm:$0xff] %vm2847_vm1, %v2767_v1  ;;  %v2769_v4 = vadd.f32 %v2526_v2, %v1935_v63 }
 0x278   : > { %v2176_v5 = vpop.f32.mrb[52].mxu1  ;;  %2897 = vst [vmem:[#allocation2 + $0x190] sm:$0xff] %v2768_v3  ;;  %v1948_v3 = vld [vmem:[#allocation2 + $0x200] sm:$0xff] }
 0x279   : > { %v2178_v6 = vpop.f32.mrb[53].mxu1  ;;  %2898 = vst.msk [vmem:[#allocation2 + $0x198] sm:$0xff] %vm2847_vm1, %v2769_v4  ;;  %v2529_v8 = vpop.f32.mrb[52].mxu0 }
 0x27a   : > { %v2180_v9 = vpop.f32.mrb[54].mxu1  ;;  %v2530_v10 = vadd.f32 %v2529_v8, %v2176_v5  ;;  %v2531_v12 = vpop.f32.mrb[53].mxu0 }
 0x27b   : > { %v2182_v13 = vpop.f32.mrb[55].mxu1  ;;  %v2532_v14 = vadd.f32 %v2531_v12, %v2178_v6  ;;  %v2533_v16 = vpop.f32.mrb[54].mxu0 }
 0x27c   : > { %v2770_v17 = vadd.f32 %v2530_v10, %v1936_v7  ;;  %v2534_v18 = vadd.f32 %v2533_v16, %v2180_v9  ;;  %v2535_v20 = vpop.f32.mrb[55].mxu0  ;;  %v1949_v7 = vld [vmem:[#allocation2 + $0x208] sm:$0xff] }
 0x27d   : > { %v2771_v21 = vadd.f32 %v2532_v14, %v1937_v11  ;;  %v2536_v22 = vadd.f32 %v2535_v20, %v2182_v13  ;;  %v1950_v11 = vld [vmem:[#allocation2 + $0x210] sm:$0xff] }
 0x27e   : > { %2899 = vst [vmem:[#allocation2 + $0x1a0] sm:$0xff] %v2770_v17  ;;  %v2772_v23 = vadd.f32 %v2534_v18, %v1938_v15  ;;  %v1951_v15 = vld [vmem:[#allocation2 + $0x218] sm:$0xff] }
 0x27f   : > { %2900 = vst.msk [vmem:[#allocation2 + $0x1a8] sm:$0xff] %vm2847_vm1, %v2771_v21  ;;  %v2773_v24 = vadd.f32 %v2536_v22, %v1939_v19 }
 0x280   : > { %v2186_v25 = vpop.f32.mrb[56].mxu1  ;;  %2901 = vst [vmem:[#allocation2 + $0x1b0] sm:$0xff] %v2772_v23  ;;  %v1952_v23 = vld [vmem:[#allocation2 + $0x220] sm:$0xff] }
 0x281   : > { %v2188_v26 = vpop.f32.mrb[57].mxu1  ;;  %2902 = vst.msk [vmem:[#allocation2 + $0x1b8] sm:$0xff] %vm2847_vm1, %v2773_v24  ;;  %v2539_v28 = vpop.f32.mrb[56].mxu0 }
 0x282   : > { %v2190_v29 = vpop.f32.mrb[58].mxu1  ;;  %v2540_v30 = vadd.f32 %v2539_v28, %v2186_v25  ;;  %v2541_v32 = vpop.f32.mrb[57].mxu0 }
 0x283   : > { %v2192_v33 = vpop.f32.mrb[59].mxu1  ;;  %v2542_v34 = vadd.f32 %v2541_v32, %v2188_v26  ;;  %v2543_v36 = vpop.f32.mrb[58].mxu0 }
 0x284   : > { %v2774_v37 = vadd.f32 %v2540_v30, %v1940_v27  ;;  %v2544_v38 = vadd.f32 %v2543_v36, %v2190_v29  ;;  %v2545_v40 = vpop.f32.mrb[59].mxu0  ;;  %v1953_v27 = vld [vmem:[#allocation2 + $0x228] sm:$0xff] }
 0x285   : > { %v2775_v41 = vadd.f32 %v2542_v34, %v1941_v31  ;;  %v2546_v42 = vadd.f32 %v2545_v40, %v2192_v33  ;;  %v1954_v31 = vld [vmem:[#allocation2 + $0x230] sm:$0xff] }
 0x286   : > { %2903 = vst [vmem:[#allocation2 + $0x1c0] sm:$0xff] %v2774_v37  ;;  %v2776_v43 = vadd.f32 %v2544_v38, %v1942_v35  ;;  %v1955_v35 = vld [vmem:[#allocation2 + $0x238] sm:$0xff] }
 0x287   : > { %2904 = vst.msk [vmem:[#allocation2 + $0x1c8] sm:$0xff] %vm2847_vm1, %v2775_v41  ;;  %v2777_v44 = vadd.f32 %v2546_v42, %v1943_v39 }
 0x288   : > { %v2196_v45 = vpop.f32.mrb[60].mxu1  ;;  %2905 = vst [vmem:[#allocation2 + $0x1d0] sm:$0xff] %v2776_v43  ;;  %v1956_v43 = vld [vmem:[#allocation2 + $0x240] sm:$0xff] }
 0x289   : > { %v2198_v46 = vpop.f32.mrb[61].mxu1  ;;  %2906 = vst.msk [vmem:[#allocation2 + $0x1d8] sm:$0xff] %vm2847_vm1, %v2777_v44  ;;  %v2549_v48 = vpop.f32.mrb[60].mxu0 }
 0x28a   : > { %v2200_v49 = vpop.f32.mrb[62].mxu1  ;;  %v2550_v50 = vadd.f32 %v2549_v48, %v2196_v45  ;;  %v2551_v52 = vpop.f32.mrb[61].mxu0 }
 0x28b   : > { %v2202_v53 = vpop.f32.mrb[63].mxu1  ;;  %v2552_v54 = vadd.f32 %v2551_v52, %v2198_v46  ;;  %v2553_v56 = vpop.f32.mrb[62].mxu0 }
 0x28c   : > { %v2778_v57 = vadd.f32 %v2550_v50, %v1944_v47  ;;  %v2554_v58 = vadd.f32 %v2553_v56, %v2200_v49  ;;  %v2555_v60 = vpop.f32.mrb[63].mxu0  ;;  %v1957_v47 = vld [vmem:[#allocation2 + $0x248] sm:$0xff] }
 0x28d   : > { %v2779_v61 = vadd.f32 %v2552_v54, %v1945_v51  ;;  %v2556_v62 = vadd.f32 %v2555_v60, %v2202_v53  ;;  %v1958_v51 = vld [vmem:[#allocation2 + $0x250] sm:$0xff] }
 0x28e   : > { %2907 = vst [vmem:[#allocation2 + $0x1e0] sm:$0xff] %v2778_v57  ;;  %v2780_v63 = vadd.f32 %v2554_v58, %v1946_v55  ;;  %v1959_v55 = vld [vmem:[#allocation2 + $0x258] sm:$0xff] }
 0x28f   : > { %2908 = vst.msk [vmem:[#allocation2 + $0x1e8] sm:$0xff] %vm2847_vm1, %v2779_v61  ;;  %v2781_v0 = vadd.f32 %v2556_v62, %v1947_v59 }
 0x290   : > { %v2206_v1 = vpop.f32.mrb[64].mxu1  ;;  %2909 = vst [vmem:[#allocation2 + $0x1f0] sm:$0xff] %v2780_v63  ;;  %v1960_v63 = vld [vmem:[#allocation2 + $0x260] sm:$0xff] }
 0x291   : > { %v2208_v2 = vpop.f32.mrb[65].mxu1  ;;  %2910 = vst.msk [vmem:[#allocation2 + $0x1f8] sm:$0xff] %vm2847_vm1, %v2781_v0  ;;  %v2559_v4 = vpop.f32.mrb[64].mxu0 }
 0x292   : > { %v2210_v5 = vpop.f32.mrb[66].mxu1  ;;  %v2560_v6 = vadd.f32 %v2559_v4, %v2206_v1  ;;  %v2561_v8 = vpop.f32.mrb[65].mxu0 }
 0x293   : > { %v2212_v9 = vpop.f32.mrb[67].mxu1  ;;  %v2562_v10 = vadd.f32 %v2561_v8, %v2208_v2  ;;  %v2563_v12 = vpop.f32.mrb[66].mxu0 }
 0x294   : > { %v2782_v13 = vadd.f32 %v2560_v6, %v1948_v3  ;;  %v2564_v14 = vadd.f32 %v2563_v12, %v2210_v5  ;;  %v2565_v16 = vpop.f32.mrb[67].mxu0  ;;  %v1961_v3 = vld [vmem:[#allocation2 + $0x268] sm:$0xff] }
 0x295   : > { %v2783_v17 = vadd.f32 %v2562_v10, %v1949_v7  ;;  %v2566_v18 = vadd.f32 %v2565_v16, %v2212_v9  ;;  %v1962_v7 = vld [vmem:[#allocation2 + $0x270] sm:$0xff] }
 0x296   : > { %2911 = vst [vmem:[#allocation2 + $0x200] sm:$0xff] %v2782_v13  ;;  %v2784_v19 = vadd.f32 %v2564_v14, %v1950_v11  ;;  %v1963_v11 = vld [vmem:[#allocation2 + $0x278] sm:$0xff] }
 0x297   : > { %2912 = vst.msk [vmem:[#allocation2 + $0x208] sm:$0xff] %vm2847_vm1, %v2783_v17  ;;  %v2785_v20 = vadd.f32 %v2566_v18, %v1951_v15 }
 0x298   : > { %v2216_v21 = vpop.f32.mrb[68].mxu1  ;;  %2913 = vst [vmem:[#allocation2 + $0x210] sm:$0xff] %v2784_v19  ;;  %v1964_v19 = vld [vmem:[#allocation2 + $0x280] sm:$0xff] }
 0x299   : > { %v2218_v22 = vpop.f32.mrb[69].mxu1  ;;  %2914 = vst.msk [vmem:[#allocation2 + $0x218] sm:$0xff] %vm2847_vm1, %v2785_v20  ;;  %v2569_v24 = vpop.f32.mrb[68].mxu0 }
 0x29a   : > { %v2220_v25 = vpop.f32.mrb[70].mxu1  ;;  %v2570_v26 = vadd.f32 %v2569_v24, %v2216_v21  ;;  %v2571_v28 = vpop.f32.mrb[69].mxu0 }
 0x29b   : > { %v2222_v29 = vpop.f32.mrb[71].mxu1  ;;  %v2572_v30 = vadd.f32 %v2571_v28, %v2218_v22  ;;  %v2573_v32 = vpop.f32.mrb[70].mxu0 }
 0x29c   : > { %v2786_v33 = vadd.f32 %v2570_v26, %v1952_v23  ;;  %v2574_v34 = vadd.f32 %v2573_v32, %v2220_v25  ;;  %v2575_v36 = vpop.f32.mrb[71].mxu0  ;;  %v1965_v23 = vld [vmem:[#allocation2 + $0x288] sm:$0xff] }
 0x29d   : > { %v2787_v37 = vadd.f32 %v2572_v30, %v1953_v27  ;;  %v2576_v38 = vadd.f32 %v2575_v36, %v2222_v29  ;;  %v1966_v27 = vld [vmem:[#allocation2 + $0x290] sm:$0xff] }
 0x29e   : > { %2915 = vst [vmem:[#allocation2 + $0x220] sm:$0xff] %v2786_v33  ;;  %v2788_v39 = vadd.f32 %v2574_v34, %v1954_v31  ;;  %v1967_v31 = vld [vmem:[#allocation2 + $0x298] sm:$0xff] }
 0x29f   : > { %2916 = vst.msk [vmem:[#allocation2 + $0x228] sm:$0xff] %vm2847_vm1, %v2787_v37  ;;  %v2789_v40 = vadd.f32 %v2576_v38, %v1955_v35 }
 0x2a0   : > { %v2226_v41 = vpop.f32.mrb[72].mxu1  ;;  %2917 = vst [vmem:[#allocation2 + $0x230] sm:$0xff] %v2788_v39  ;;  %v1968_v39 = vld [vmem:[#allocation2 + $0x2a0] sm:$0xff] }
 0x2a1   : > { %v2228_v42 = vpop.f32.mrb[73].mxu1  ;;  %2918 = vst.msk [vmem:[#allocation2 + $0x238] sm:$0xff] %vm2847_vm1, %v2789_v40  ;;  %v2579_v44 = vpop.f32.mrb[72].mxu0 }
 0x2a2   : > { %v2230_v45 = vpop.f32.mrb[74].mxu1  ;;  %v2580_v46 = vadd.f32 %v2579_v44, %v2226_v41  ;;  %v2581_v48 = vpop.f32.mrb[73].mxu0 }
 0x2a3   : > { %v2232_v49 = vpop.f32.mrb[75].mxu1  ;;  %v2582_v50 = vadd.f32 %v2581_v48, %v2228_v42  ;;  %v2583_v52 = vpop.f32.mrb[74].mxu0 }
 0x2a4   : > { %v2790_v53 = vadd.f32 %v2580_v46, %v1956_v43  ;;  %v2584_v54 = vadd.f32 %v2583_v52, %v2230_v45  ;;  %v2585_v56 = vpop.f32.mrb[75].mxu0  ;;  %v1969_v43 = vld [vmem:[#allocation2 + $0x2a8] sm:$0xff] }
 0x2a5   : > { %v2791_v57 = vadd.f32 %v2582_v50, %v1957_v47  ;;  %v2586_v58 = vadd.f32 %v2585_v56, %v2232_v49  ;;  %v1970_v47 = vld [vmem:[#allocation2 + $0x2b0] sm:$0xff] }
 0x2a6   : > { %2919 = vst [vmem:[#allocation2 + $0x240] sm:$0xff] %v2790_v53  ;;  %v2792_v59 = vadd.f32 %v2584_v54, %v1958_v51  ;;  %v1971_v51 = vld [vmem:[#allocation2 + $0x2b8] sm:$0xff] }
 0x2a7   : > { %2920 = vst.msk [vmem:[#allocation2 + $0x248] sm:$0xff] %vm2847_vm1, %v2791_v57  ;;  %v2793_v60 = vadd.f32 %v2586_v58, %v1959_v55 }
 0x2a8   : > { %v2236_v61 = vpop.f32.mrb[76].mxu1  ;;  %2921 = vst [vmem:[#allocation2 + $0x250] sm:$0xff] %v2792_v59  ;;  %v1972_v59 = vld [vmem:[#allocation2 + $0x2c0] sm:$0xff] }
 0x2a9   : > { %v2238_v62 = vpop.f32.mrb[77].mxu1  ;;  %2922 = vst.msk [vmem:[#allocation2 + $0x258] sm:$0xff] %vm2847_vm1, %v2793_v60  ;;  %v2589_v0 = vpop.f32.mrb[76].mxu0 }
 0x2aa   : > { %v2240_v1 = vpop.f32.mrb[78].mxu1  ;;  %v2590_v2 = vadd.f32 %v2589_v0, %v2236_v61  ;;  %v2591_v4 = vpop.f32.mrb[77].mxu0 }
 0x2ab   : > { %v2242_v5 = vpop.f32.mrb[79].mxu1  ;;  %v2592_v6 = vadd.f32 %v2591_v4, %v2238_v62  ;;  %v2593_v8 = vpop.f32.mrb[78].mxu0 }
 0x2ac   : > { %v2794_v9 = vadd.f32 %v2590_v2, %v1960_v63  ;;  %v2594_v10 = vadd.f32 %v2593_v8, %v2240_v1  ;;  %v2595_v12 = vpop.f32.mrb[79].mxu0  ;;  %v1973_v63 = vld [vmem:[#allocation2 + $0x2c8] sm:$0xff] }
 0x2ad   : > { %v2795_v13 = vadd.f32 %v2592_v6, %v1961_v3  ;;  %v2596_v14 = vadd.f32 %v2595_v12, %v2242_v5  ;;  %v1974_v3 = vld [vmem:[#allocation2 + $0x2d0] sm:$0xff] }
 0x2ae   : > { %2923 = vst [vmem:[#allocation2 + $0x260] sm:$0xff] %v2794_v9  ;;  %v2796_v15 = vadd.f32 %v2594_v10, %v1962_v7  ;;  %v1975_v7 = vld [vmem:[#allocation2 + $0x2d8] sm:$0xff] }
 0x2af   : > { %2924 = vst.msk [vmem:[#allocation2 + $0x268] sm:$0xff] %vm2847_vm1, %v2795_v13  ;;  %v2797_v16 = vadd.f32 %v2596_v14, %v1963_v11 }
 0x2b0   : > { %v2246_v17 = vpop.f32.mrb[80].mxu1  ;;  %2925 = vst [vmem:[#allocation2 + $0x270] sm:$0xff] %v2796_v15  ;;  %v1976_v15 = vld [vmem:[#allocation2 + $0x2e0] sm:$0xff] }
 0x2b1   : > { %v2248_v18 = vpop.f32.mrb[81].mxu1  ;;  %2926 = vst.msk [vmem:[#allocation2 + $0x278] sm:$0xff] %vm2847_vm1, %v2797_v16  ;;  %v2599_v20 = vpop.f32.mrb[80].mxu0 }
 0x2b2   : > { %v2250_v21 = vpop.f32.mrb[82].mxu1  ;;  %v2600_v22 = vadd.f32 %v2599_v20, %v2246_v17  ;;  %v2601_v24 = vpop.f32.mrb[81].mxu0 }
 0x2b3   : > { %v2252_v25 = vpop.f32.mrb[83].mxu1  ;;  %v2602_v26 = vadd.f32 %v2601_v24, %v2248_v18  ;;  %v2603_v28 = vpop.f32.mrb[82].mxu0 }
 0x2b4   : > { %v2798_v29 = vadd.f32 %v2600_v22, %v1964_v19  ;;  %v2604_v30 = vadd.f32 %v2603_v28, %v2250_v21  ;;  %v2605_v32 = vpop.f32.mrb[83].mxu0  ;;  %v1977_v19 = vld [vmem:[#allocation2 + $0x2e8] sm:$0xff] }
 0x2b5   : > { %v2799_v33 = vadd.f32 %v2602_v26, %v1965_v23  ;;  %v2606_v34 = vadd.f32 %v2605_v32, %v2252_v25  ;;  %v1978_v23 = vld [vmem:[#allocation2 + $0x2f0] sm:$0xff] }
 0x2b6   : > { %2927 = vst [vmem:[#allocation2 + $0x280] sm:$0xff] %v2798_v29  ;;  %v2800_v35 = vadd.f32 %v2604_v30, %v1966_v27  ;;  %v1979_v27 = vld [vmem:[#allocation2 + $0x2f8] sm:$0xff] }
 0x2b7   : > { %2928 = vst.msk [vmem:[#allocation2 + $0x288] sm:$0xff] %vm2847_vm1, %v2799_v33  ;;  %v2801_v36 = vadd.f32 %v2606_v34, %v1967_v31 }
 0x2b8   : > { %v2256_v37 = vpop.f32.mrb[84].mxu1  ;;  %2929 = vst [vmem:[#allocation2 + $0x290] sm:$0xff] %v2800_v35  ;;  %v1980_v35 = vld [vmem:[#allocation2 + $0x300] sm:$0xff] }
 0x2b9   : > { %v2258_v38 = vpop.f32.mrb[85].mxu1  ;;  %2930 = vst.msk [vmem:[#allocation2 + $0x298] sm:$0xff] %vm2847_vm1, %v2801_v36  ;;  %v2609_v40 = vpop.f32.mrb[84].mxu0 }
 0x2ba   : > { %v2260_v41 = vpop.f32.mrb[86].mxu1  ;;  %v2610_v42 = vadd.f32 %v2609_v40, %v2256_v37  ;;  %v2611_v44 = vpop.f32.mrb[85].mxu0 }
 0x2bb   : > { %v2262_v45 = vpop.f32.mrb[87].mxu1  ;;  %v2612_v46 = vadd.f32 %v2611_v44, %v2258_v38  ;;  %v2613_v48 = vpop.f32.mrb[86].mxu0 }
 0x2bc   : > { %v2802_v49 = vadd.f32 %v2610_v42, %v1968_v39  ;;  %v2614_v50 = vadd.f32 %v2613_v48, %v2260_v41  ;;  %v2615_v52 = vpop.f32.mrb[87].mxu0  ;;  %v1981_v39 = vld [vmem:[#allocation2 + $0x308] sm:$0xff] }
 0x2bd   : > { %v2803_v53 = vadd.f32 %v2612_v46, %v1969_v43  ;;  %v2616_v54 = vadd.f32 %v2615_v52, %v2262_v45  ;;  %v1982_v43 = vld [vmem:[#allocation2 + $0x310] sm:$0xff] }
 0x2be   : > { %2931 = vst [vmem:[#allocation2 + $0x2a0] sm:$0xff] %v2802_v49  ;;  %v2804_v55 = vadd.f32 %v2614_v50, %v1970_v47  ;;  %v1983_v47 = vld [vmem:[#allocation2 + $0x318] sm:$0xff] }
 0x2bf   : > { %2932 = vst.msk [vmem:[#allocation2 + $0x2a8] sm:$0xff] %vm2847_vm1, %v2803_v53  ;;  %v2805_v56 = vadd.f32 %v2616_v54, %v1971_v51 }
 0x2c0   : > { %v2266_v57 = vpop.f32.mrb[88].mxu1  ;;  %2933 = vst [vmem:[#allocation2 + $0x2b0] sm:$0xff] %v2804_v55  ;;  %v1984_v55 = vld [vmem:[#allocation2 + $0x320] sm:$0xff] }
 0x2c1   : > { %v2268_v58 = vpop.f32.mrb[89].mxu1  ;;  %2934 = vst.msk [vmem:[#allocation2 + $0x2b8] sm:$0xff] %vm2847_vm1, %v2805_v56  ;;  %v2619_v60 = vpop.f32.mrb[88].mxu0 }
 0x2c2   : > { %v2270_v61 = vpop.f32.mrb[90].mxu1  ;;  %v2620_v62 = vadd.f32 %v2619_v60, %v2266_v57  ;;  %v2621_v0 = vpop.f32.mrb[89].mxu0 }
 0x2c3   : > { %v2272_v1 = vpop.f32.mrb[91].mxu1  ;;  %v2622_v2 = vadd.f32 %v2621_v0, %v2268_v58  ;;  %v2623_v4 = vpop.f32.mrb[90].mxu0 }
 0x2c4   : > { %v2806_v5 = vadd.f32 %v2620_v62, %v1972_v59  ;;  %v2624_v6 = vadd.f32 %v2623_v4, %v2270_v61  ;;  %v2625_v8 = vpop.f32.mrb[91].mxu0  ;;  %v1985_v59 = vld [vmem:[#allocation2 + $0x328] sm:$0xff] }
 0x2c5   : > { %v2807_v9 = vadd.f32 %v2622_v2, %v1973_v63  ;;  %v2626_v10 = vadd.f32 %v2625_v8, %v2272_v1  ;;  %v1986_v63 = vld [vmem:[#allocation2 + $0x330] sm:$0xff] }
 0x2c6   : > { %2935 = vst [vmem:[#allocation2 + $0x2c0] sm:$0xff] %v2806_v5  ;;  %v2808_v11 = vadd.f32 %v2624_v6, %v1974_v3  ;;  %v1987_v3 = vld [vmem:[#allocation2 + $0x338] sm:$0xff] }
 0x2c7   : > { %2936 = vst.msk [vmem:[#allocation2 + $0x2c8] sm:$0xff] %vm2847_vm1, %v2807_v9  ;;  %v2809_v12 = vadd.f32 %v2626_v10, %v1975_v7 }
 0x2c8   : > { %v2276_v13 = vpop.f32.mrb[92].mxu1  ;;  %2937 = vst [vmem:[#allocation2 + $0x2d0] sm:$0xff] %v2808_v11  ;;  %v1988_v11 = vld [vmem:[#allocation2 + $0x340] sm:$0xff] }
 0x2c9   : > { %v2278_v14 = vpop.f32.mrb[93].mxu1  ;;  %2938 = vst.msk [vmem:[#allocation2 + $0x2d8] sm:$0xff] %vm2847_vm1, %v2809_v12  ;;  %v2629_v16 = vpop.f32.mrb[92].mxu0 }
 0x2ca   : > { %v2280_v17 = vpop.f32.mrb[94].mxu1  ;;  %v2630_v18 = vadd.f32 %v2629_v16, %v2276_v13  ;;  %v2631_v20 = vpop.f32.mrb[93].mxu0 }
 0x2cb   : > { %v2282_v21 = vpop.f32.mrb[95].mxu1  ;;  %v2632_v22 = vadd.f32 %v2631_v20, %v2278_v14  ;;  %v2633_v24 = vpop.f32.mrb[94].mxu0 }
 0x2cc   : > { %v2810_v25 = vadd.f32 %v2630_v18, %v1976_v15  ;;  %v2634_v26 = vadd.f32 %v2633_v24, %v2280_v17  ;;  %v2635_v28 = vpop.f32.mrb[95].mxu0  ;;  %v1989_v15 = vld [vmem:[#allocation2 + $0x348] sm:$0xff] }
 0x2cd   : > { %v2811_v29 = vadd.f32 %v2632_v22, %v1977_v19  ;;  %v2636_v30 = vadd.f32 %v2635_v28, %v2282_v21  ;;  %v1990_v19 = vld [vmem:[#allocation2 + $0x350] sm:$0xff] }
 0x2ce   : > { %2939 = vst [vmem:[#allocation2 + $0x2e0] sm:$0xff] %v2810_v25  ;;  %v2812_v31 = vadd.f32 %v2634_v26, %v1978_v23  ;;  %v1991_v23 = vld [vmem:[#allocation2 + $0x358] sm:$0xff] }
 0x2cf   : > { %2940 = vst.msk [vmem:[#allocation2 + $0x2e8] sm:$0xff] %vm2847_vm1, %v2811_v29  ;;  %v2813_v32 = vadd.f32 %v2636_v30, %v1979_v27 }
 0x2d0   : > { %v2286_v33 = vpop.f32.mrb[96].mxu1  ;;  %2941 = vst [vmem:[#allocation2 + $0x2f0] sm:$0xff] %v2812_v31  ;;  %v1992_v31 = vld [vmem:[#allocation2 + $0x360] sm:$0xff] }
 0x2d1   : > { %v2288_v34 = vpop.f32.mrb[97].mxu1  ;;  %2942 = vst.msk [vmem:[#allocation2 + $0x2f8] sm:$0xff] %vm2847_vm1, %v2813_v32  ;;  %v2639_v36 = vpop.f32.mrb[96].mxu0 }
 0x2d2   : > { %v2290_v37 = vpop.f32.mrb[98].mxu1  ;;  %v2640_v38 = vadd.f32 %v2639_v36, %v2286_v33  ;;  %v2641_v40 = vpop.f32.mrb[97].mxu0 }
 0x2d3   : > { %v2292_v41 = vpop.f32.mrb[99].mxu1  ;;  %v2642_v42 = vadd.f32 %v2641_v40, %v2288_v34  ;;  %v2643_v44 = vpop.f32.mrb[98].mxu0 }
 0x2d4   : > { %v2814_v45 = vadd.f32 %v2640_v38, %v1980_v35  ;;  %v2644_v46 = vadd.f32 %v2643_v44, %v2290_v37  ;;  %v2645_v48 = vpop.f32.mrb[99].mxu0  ;;  %v1993_v35 = vld [vmem:[#allocation2 + $0x368] sm:$0xff] }
 0x2d5   : > { %v2815_v49 = vadd.f32 %v2642_v42, %v1981_v39  ;;  %v2646_v50 = vadd.f32 %v2645_v48, %v2292_v41  ;;  %v1994_v39 = vld [vmem:[#allocation2 + $0x370] sm:$0xff] }
 0x2d6   : > { %2943 = vst [vmem:[#allocation2 + $0x300] sm:$0xff] %v2814_v45  ;;  %v2816_v51 = vadd.f32 %v2644_v46, %v1982_v43  ;;  %v1995_v43 = vld [vmem:[#allocation2 + $0x378] sm:$0xff] }
 0x2d7   : > { %2944 = vst.msk [vmem:[#allocation2 + $0x308] sm:$0xff] %vm2847_vm1, %v2815_v49  ;;  %v2817_v52 = vadd.f32 %v2646_v50, %v1983_v47 }
 0x2d8   : > { %v2296_v53 = vpop.f32.mrb[100].mxu1  ;;  %2945 = vst [vmem:[#allocation2 + $0x310] sm:$0xff] %v2816_v51  ;;  %v1996_v51 = vld [vmem:[#allocation2 + $0x380] sm:$0xff] }
 0x2d9   : > { %v2298_v54 = vpop.f32.mrb[101].mxu1  ;;  %2946 = vst.msk [vmem:[#allocation2 + $0x318] sm:$0xff] %vm2847_vm1, %v2817_v52  ;;  %v2649_v56 = vpop.f32.mrb[100].mxu0 }
 0x2da   : > { %v2300_v57 = vpop.f32.mrb[102].mxu1  ;;  %v2650_v58 = vadd.f32 %v2649_v56, %v2296_v53  ;;  %v2651_v60 = vpop.f32.mrb[101].mxu0 }
 0x2db   : > { %v2302_v61 = vpop.f32.mrb[103].mxu1  ;;  %v2652_v62 = vadd.f32 %v2651_v60, %v2298_v54  ;;  %v2653_v0 = vpop.f32.mrb[102].mxu0 }
 0x2dc   : > { %v2818_v1 = vadd.f32 %v2650_v58, %v1984_v55  ;;  %v2654_v2 = vadd.f32 %v2653_v0, %v2300_v57  ;;  %v2655_v4 = vpop.f32.mrb[103].mxu0  ;;  %v1997_v55 = vld [vmem:[#allocation2 + $0x388] sm:$0xff] }
 0x2dd   : > { %v2819_v5 = vadd.f32 %v2652_v62, %v1985_v59  ;;  %v2656_v6 = vadd.f32 %v2655_v4, %v2302_v61  ;;  %v1998_v59 = vld [vmem:[#allocation2 + $0x390] sm:$0xff] }
 0x2de   : > { %2947 = vst [vmem:[#allocation2 + $0x320] sm:$0xff] %v2818_v1  ;;  %v2820_v7 = vadd.f32 %v2654_v2, %v1986_v63  ;;  %v1999_v63 = vld [vmem:[#allocation2 + $0x398] sm:$0xff] }
 0x2df   : > { %2948 = vst.msk [vmem:[#allocation2 + $0x328] sm:$0xff] %vm2847_vm1, %v2819_v5  ;;  %v2821_v8 = vadd.f32 %v2656_v6, %v1987_v3 }
 0x2e0   : > { %v2306_v9 = vpop.f32.mrb[104].mxu1  ;;  %2949 = vst [vmem:[#allocation2 + $0x330] sm:$0xff] %v2820_v7  ;;  %v2000_v7 = vld [vmem:[#allocation2 + $0x3a0] sm:$0xff] }
 0x2e1   : > { %v2308_v10 = vpop.f32.mrb[105].mxu1  ;;  %2950 = vst.msk [vmem:[#allocation2 + $0x338] sm:$0xff] %vm2847_vm1, %v2821_v8  ;;  %v2659_v12 = vpop.f32.mrb[104].mxu0 }
 0x2e2   : > { %v2310_v13 = vpop.f32.mrb[106].mxu1  ;;  %v2660_v14 = vadd.f32 %v2659_v12, %v2306_v9  ;;  %v2661_v16 = vpop.f32.mrb[105].mxu0 }
 0x2e3   : > { %v2312_v17 = vpop.f32.mrb[107].mxu1  ;;  %v2662_v18 = vadd.f32 %v2661_v16, %v2308_v10  ;;  %v2663_v20 = vpop.f32.mrb[106].mxu0 }
 0x2e4   : > { %v2822_v21 = vadd.f32 %v2660_v14, %v1988_v11  ;;  %v2664_v22 = vadd.f32 %v2663_v20, %v2310_v13  ;;  %v2665_v24 = vpop.f32.mrb[107].mxu0  ;;  %v2001_v11 = vld [vmem:[#allocation2 + $0x3a8] sm:$0xff] }
 0x2e5   : > { %v2823_v25 = vadd.f32 %v2662_v18, %v1989_v15  ;;  %v2666_v26 = vadd.f32 %v2665_v24, %v2312_v17  ;;  %v2002_v15 = vld [vmem:[#allocation2 + $0x3b0] sm:$0xff] }
 0x2e6   : > { %2951 = vst [vmem:[#allocation2 + $0x340] sm:$0xff] %v2822_v21  ;;  %v2824_v27 = vadd.f32 %v2664_v22, %v1990_v19  ;;  %v2003_v19 = vld [vmem:[#allocation2 + $0x3b8] sm:$0xff] }
 0x2e7   : > { %2952 = vst.msk [vmem:[#allocation2 + $0x348] sm:$0xff] %vm2847_vm1, %v2823_v25  ;;  %v2825_v28 = vadd.f32 %v2666_v26, %v1991_v23 }
 0x2e8   : > { %v2316_v29 = vpop.f32.mrb[108].mxu1  ;;  %2953 = vst [vmem:[#allocation2 + $0x350] sm:$0xff] %v2824_v27  ;;  %v2004_v27 = vld [vmem:[#allocation2 + $0x3c0] sm:$0xff] }
 0x2e9   : > { %v2318_v30 = vpop.f32.mrb[109].mxu1  ;;  %2954 = vst.msk [vmem:[#allocation2 + $0x358] sm:$0xff] %vm2847_vm1, %v2825_v28  ;;  %v2669_v32 = vpop.f32.mrb[108].mxu0 }
 0x2ea   : > { %v2320_v33 = vpop.f32.mrb[110].mxu1  ;;  %v2670_v34 = vadd.f32 %v2669_v32, %v2316_v29  ;;  %v2671_v36 = vpop.f32.mrb[109].mxu0 }
 0x2eb   : > { %v2322_v37 = vpop.f32.mrb[111].mxu1  ;;  %v2672_v38 = vadd.f32 %v2671_v36, %v2318_v30  ;;  %v2673_v40 = vpop.f32.mrb[110].mxu0 }
 0x2ec   : > { %v2826_v41 = vadd.f32 %v2670_v34, %v1992_v31  ;;  %v2674_v42 = vadd.f32 %v2673_v40, %v2320_v33  ;;  %v2675_v44 = vpop.f32.mrb[111].mxu0  ;;  %v2005_v31 = vld [vmem:[#allocation2 + $0x3c8] sm:$0xff] }
 0x2ed   : > { %v2827_v45 = vadd.f32 %v2672_v38, %v1993_v35  ;;  %v2676_v46 = vadd.f32 %v2675_v44, %v2322_v37  ;;  %v2006_v35 = vld [vmem:[#allocation2 + $0x3d0] sm:$0xff] }
 0x2ee   : > { %2955 = vst [vmem:[#allocation2 + $0x360] sm:$0xff] %v2826_v41  ;;  %v2828_v47 = vadd.f32 %v2674_v42, %v1994_v39  ;;  %v2007_v39 = vld [vmem:[#allocation2 + $0x3d8] sm:$0xff] }
 0x2ef   : > { %2956 = vst.msk [vmem:[#allocation2 + $0x368] sm:$0xff] %vm2847_vm1, %v2827_v45  ;;  %v2829_v48 = vadd.f32 %v2676_v46, %v1995_v43 }
 0x2f0   : > { %v2326_v49 = vpop.f32.mrb[112].mxu1  ;;  %2957 = vst [vmem:[#allocation2 + $0x370] sm:$0xff] %v2828_v47  ;;  %v2008_v47 = vld [vmem:[#allocation2 + $0x3e0] sm:$0xff] }
 0x2f1   : > { %v2328_v50 = vpop.f32.mrb[113].mxu1  ;;  %2958 = vst.msk [vmem:[#allocation2 + $0x378] sm:$0xff] %vm2847_vm1, %v2829_v48  ;;  %v2679_v52 = vpop.f32.mrb[112].mxu0 }
 0x2f2   : > { %v2330_v53 = vpop.f32.mrb[114].mxu1  ;;  %v2680_v54 = vadd.f32 %v2679_v52, %v2326_v49  ;;  %v2681_v56 = vpop.f32.mrb[113].mxu0 }
 0x2f3   : > { %v2332_v57 = vpop.f32.mrb[115].mxu1  ;;  %v2682_v58 = vadd.f32 %v2681_v56, %v2328_v50  ;;  %v2683_v60 = vpop.f32.mrb[114].mxu0 }
 0x2f4   : > { %v2830_v61 = vadd.f32 %v2680_v54, %v1996_v51  ;;  %v2684_v62 = vadd.f32 %v2683_v60, %v2330_v53  ;;  %v2685_v0 = vpop.f32.mrb[115].mxu0  ;;  %v2009_v51 = vld [vmem:[#allocation2 + $0x3e8] sm:$0xff] }
 0x2f5   : > { %v2831_v1 = vadd.f32 %v2682_v58, %v1997_v55  ;;  %v2686_v2 = vadd.f32 %v2685_v0, %v2332_v57  ;;  %v2010_v55 = vld [vmem:[#allocation2 + $0x3f0] sm:$0xff] }
 0x2f6   : > { %2959 = vst [vmem:[#allocation2 + $0x380] sm:$0xff] %v2830_v61  ;;  %v2832_v3 = vadd.f32 %v2684_v62, %v1998_v59  ;;  %v2011_v59 = vld [vmem:[#allocation2 + $0x3f8] sm:$0xff] }
 0x2f7   : > { %2960 = vst.msk [vmem:[#allocation2 + $0x388] sm:$0xff] %vm2847_vm1, %v2831_v1  ;;  %v2833_v4 = vadd.f32 %v2686_v2, %v1999_v63 }
 0x2f8   : > { %v2336_v5 = vpop.f32.mrb[116].mxu1  ;;  %2961 = vst [vmem:[#allocation2 + $0x390] sm:$0xff] %v2832_v3 }
 0x2f9   : > { %v2338_v6 = vpop.f32.mrb[117].mxu1  ;;  %2962 = vst.msk [vmem:[#allocation2 + $0x398] sm:$0xff] %vm2847_vm1, %v2833_v4  ;;  %v2689_v8 = vpop.f32.mrb[116].mxu0 }
 0x2fa   : > { %v2340_v9 = vpop.f32.mrb[118].mxu1  ;;  %v2690_v10 = vadd.f32 %v2689_v8, %v2336_v5  ;;  %v2691_v12 = vpop.f32.mrb[117].mxu0 }
 0x2fb   : > { %v2342_v13 = vpop.f32.mrb[119].mxu1  ;;  %v2692_v14 = vadd.f32 %v2691_v12, %v2338_v6  ;;  %v2693_v16 = vpop.f32.mrb[118].mxu0 }
 0x2fc   : > { %v2834_v17 = vadd.f32 %v2690_v10, %v2000_v7  ;;  %v2694_v18 = vadd.f32 %v2693_v16, %v2340_v9  ;;  %v2695_v20 = vpop.f32.mrb[119].mxu0 }
 0x2fd   : > { %v2835_v21 = vadd.f32 %v2692_v14, %v2001_v11  ;;  %v2696_v22 = vadd.f32 %v2695_v20, %v2342_v13 }
 0x2fe   : > { %2963 = vst [vmem:[#allocation2 + $0x3a0] sm:$0xff] %v2834_v17  ;;  %v2836_v23 = vadd.f32 %v2694_v18, %v2002_v15 }
 0x2ff   : > { %2964 = vst.msk [vmem:[#allocation2 + $0x3a8] sm:$0xff] %vm2847_vm1, %v2835_v21  ;;  %v2837_v24 = vadd.f32 %v2696_v22, %v2003_v19 }
 0x300   : > { %v2346_v25 = vpop.f32.mrb[120].mxu1  ;;  %2965 = vst [vmem:[#allocation2 + $0x3b0] sm:$0xff] %v2836_v23 }
 0x301   : > { %v2348_v26 = vpop.f32.mrb[121].mxu1  ;;  %2966 = vst.msk [vmem:[#allocation2 + $0x3b8] sm:$0xff] %vm2847_vm1, %v2837_v24  ;;  %v2699_v28 = vpop.f32.mrb[120].mxu0 }
 0x302   : > { %v2350_v29 = vpop.f32.mrb[122].mxu1  ;;  %v2700_v30 = vadd.f32 %v2699_v28, %v2346_v25  ;;  %v2701_v32 = vpop.f32.mrb[121].mxu0 }
 0x303   : > { %v2352_v33 = vpop.f32.mrb[123].mxu1  ;;  %v2702_v34 = vadd.f32 %v2701_v32, %v2348_v26  ;;  %v2703_v36 = vpop.f32.mrb[122].mxu0 }
 0x304   : > { %v2838_v37 = vadd.f32 %v2700_v30, %v2004_v27  ;;  %v2704_v38 = vadd.f32 %v2703_v36, %v2350_v29  ;;  %v2705_v40 = vpop.f32.mrb[123].mxu0 }
 0x305   : > { %v2839_v41 = vadd.f32 %v2702_v34, %v2005_v31  ;;  %v2706_v42 = vadd.f32 %v2705_v40, %v2352_v33 }
 0x306   : > { %2967 = vst [vmem:[#allocation2 + $0x3c0] sm:$0xff] %v2838_v37  ;;  %v2840_v43 = vadd.f32 %v2704_v38, %v2006_v35 }
 0x307   : > { %2968 = vst.msk [vmem:[#allocation2 + $0x3c8] sm:$0xff] %vm2847_vm1, %v2839_v41  ;;  %v2841_v44 = vadd.f32 %v2706_v42, %v2007_v39 }
 0x308   : > { %v2356_v45 = vpop.f32.mrb[124].mxu1  ;;  %2969 = vst [vmem:[#allocation2 + $0x3d0] sm:$0xff] %v2840_v43 }
 0x309   : > { %v2358_v46 = vpop.f32.mrb[125].mxu1  ;;  %2970 = vst.msk [vmem:[#allocation2 + $0x3d8] sm:$0xff] %vm2847_vm1, %v2841_v44  ;;  %v2709_v48 = vpop.f32.mrb[124].mxu0 }
 0x30a   : > { %v2360_v49 = vpop.f32.mrb[126].mxu1  ;;  %v2710_v50 = vadd.f32 %v2709_v48, %v2356_v45  ;;  %v2711_v52 = vpop.f32.mrb[125].mxu0 }
 0x30b   : > { %v2362_v53 = vpop.f32.mrb[127].mxu1  ;;  %v2712_v54 = vadd.f32 %v2711_v52, %v2358_v46  ;;  %v2713_v56 = vpop.f32.mrb[126].mxu0  ;;  %2978 = sbr.rel (%p5612_p10) target bundleno = 1477 (0x5c5), region = 71 }
 0x30c   : > { %v2842_v57 = vadd.f32 %v2710_v50, %v2008_v47  ;;  %v2714_v58 = vadd.f32 %v2713_v56, %v2360_v49  ;;  %v2715_v60 = vpop.f32.mrb[127].mxu0 }
 0x30d   : > { %v2843_v61 = vadd.f32 %v2712_v54, %v2009_v51  ;;  %v2716_v62 = vadd.f32 %v2715_v60, %v2362_v53 }
 0x30e   : > { %2971 = vst [vmem:[#allocation2 + $0x3e0] sm:$0xff] %v2842_v57  ;;  %v2844_v63 = vadd.f32 %v2714_v58, %v2010_v55 }
 0x30f   : > { %2972 = vst.msk [vmem:[#allocation2 + $0x3e8] sm:$0xff] %vm2847_vm1, %v2843_v61  ;;  %v2845_v0 = vadd.f32 %v2716_v62, %v2011_v59 }
 0x310   : > { %2973 = vst [vmem:[#allocation2 + $0x3f0] sm:$0xff] %v2844_v63 }
 0x311   : > { %2974 = vst.msk [vmem:[#allocation2 + $0x3f8] sm:$0xff] %vm2847_vm1, %v2845_v0 }
 0x312   : > { %v7424_v1 = vld [vmem:[#allocation2 + $0x20] sm:$0xff]  ;;  %v7426_v2 = vld [vmem:[#allocation2 + $0x28] sm:$0xff]  ;;  %v7434_v6 = vld [vmem:[#allocation2 + $0x30] sm:$0xff] }
 0x313   : > { %v7428_v3 = vld [vmem:[#allocation2] sm:$0xff]  ;;  %v3115_v4 = vsel %vm2847_vm1, %v7426_v2, 0.0  ;;  %v7432_v5 = vld [vmem:[#allocation2 + $0x8] sm:$0xff]  ;;  %v7436_v7 = vld [vmem:[#allocation2 + $0x38] sm:$0xff] }
 0x314   : > { %v3116_v8 = vadd.f32 %v3115_v4, %v7424_v1  ;;  %v3107_v9 = vsel %vm2847_vm1, %v7432_v5, 0.0  ;;  %v3119_v10 = vsel %vm2847_vm1, %v7436_v7, 0.0  ;;  %v7443_v11 = vld [vmem:[#allocation2 + $0x10] sm:$0xff]  ;;  %v7445_v12 = vld [vmem:[#allocation2 + $0x18] sm:$0xff]  ;;  %v7452_v16 = vld [vmem:[#allocation2 + $0x48] sm:$0xff] }
 0x315   : > { %v3108_v13 = vadd.f32 %v3107_v9, %v7428_v3  ;;  %v3111_v14 = vsel %vm2847_vm1, %v7445_v12, 0.0  ;;  %v7450_v15 = vld [vmem:[#allocation2 + $0x58] sm:$0xff]  ;;  %v3120_v17 = vadd.f32 %v3119_v10, %v7434_v6  ;;  %v7456_v19 = vld [vmem:[#allocation2 + $0x50] sm:$0xff]  ;;  %v7460_v21 = vld [vmem:[#allocation2 + $0x40] sm:$0xff]  ;;  %v3123_v22 = vsel %vm2847_vm1, %v7452_v16, 0.0 }
 0x316   : > { %3117 = vadd.xlane.f32.xlu1 %v3116_v8  ;;  %v3112_v18 = vadd.f32 %v3111_v14, %v7443_v11  ;;  %v3127_v20 = vsel %vm2847_vm1, %v7450_v15, 0.0  ;;  %v7464_v23 = vld [vmem:[#allocation2 + $0x78] sm:$0xff]  ;;  %v7466_v24 = vld [vmem:[#allocation2 + $0x68] sm:$0xff]  ;;  %v3124_v26 = vadd.f32 %v3123_v22, %v7460_v21  ;;  %v7470_v27 = vld [vmem:[#allocation2 + $0x70] sm:$0xff] }
 0x317   : > { %3109 = vadd.xlane.f32.xlu0 %v3108_v13  ;;  %v3128_v25 = vadd.f32 %v3127_v20, %v7456_v19  ;;  %v3135_v28 = vsel %vm2847_vm1, %v7464_v23, 0.0  ;;  %v7474_v29 = vld [vmem:[#allocation2 + $0x60] sm:$0xff]  ;;  %v3131_v30 = vsel %vm2847_vm1, %v7466_v24, 0.0  ;;  %v7478_v31 = vld [vmem:[#allocation2 + $0x98] sm:$0xff]  ;;  %v7480_v32 = vld [vmem:[#allocation2 + $0x88] sm:$0xff] }
 0x318   : > { %v3136_v33 = vadd.f32 %v3135_v28, %v7470_v27  ;;  %v3132_v34 = vadd.f32 %v3131_v30, %v7474_v29  ;;  %v7484_v35 = vld [vmem:[#allocation2 + $0x90] sm:$0xff]  ;;  %v3143_v36 = vsel %vm2847_vm1, %v7478_v31, 0.0  ;;  %v7488_v37 = vld [vmem:[#allocation2 + $0x80] sm:$0xff]  ;;  %v3139_v38 = vsel %vm2847_vm1, %v7480_v32, 0.0  ;;  %v7492_v39 = vld [vmem:[#allocation2 + $0xb8] sm:$0xff] }
 0x319   : > { %v7494_v40 = vld [vmem:[#allocation2 + $0xa8] sm:$0xff]  ;;  %v3144_v41 = vadd.f32 %v3143_v36, %v7484_v35  ;;  %v3140_v42 = vadd.f32 %v3139_v38, %v7488_v37  ;;  %v7498_v43 = vld [vmem:[#allocation2 + $0xb0] sm:$0xff]  ;;  %v3151_v44 = vsel %vm2847_vm1, %v7492_v39, 0.0  ;;  %v7502_v45 = vld [vmem:[#allocation2 + $0xa0] sm:$0xff] }
 0x31a   : > { %3121 = vadd.xlane.f32.xlu1 %v3120_v17  ;;  %v3147_v46 = vsel %vm2847_vm1, %v7494_v40, 0.0  ;;  %v7506_v47 = vld [vmem:[#allocation2 + $0xd8] sm:$0xff]  ;;  %v7508_v48 = vld [vmem:[#allocation2 + $0xc8] sm:$0xff]  ;;  %v3152_v49 = vadd.f32 %v3151_v44, %v7498_v43  ;;  %v7512_v51 = vld [vmem:[#allocation2 + $0xd0] sm:$0xff] }
 0x31b   : > { %3113 = vadd.xlane.f32.xlu0 %v3112_v18  ;;  %v3148_v50 = vadd.f32 %v3147_v46, %v7502_v45  ;;  %v3159_v52 = vsel %vm2847_vm1, %v7506_v47, 0.0  ;;  %v7516_v53 = vld [vmem:[#allocation2 + $0xc0] sm:$0xff]  ;;  %v3155_v54 = vsel %vm2847_vm1, %v7508_v48, 0.0  ;;  %v7520_v55 = vld [vmem:[#allocation2 + $0xf8] sm:$0xff]  ;;  %v7522_v56 = vld [vmem:[#allocation2 + $0xe8] sm:$0xff] }
 0x31c   : > { %v3160_v57 = vadd.f32 %v3159_v52, %v7512_v51  ;;  %v3156_v58 = vadd.f32 %v3155_v54, %v7516_v53  ;;  %v7526_v59 = vld [vmem:[#allocation2 + $0xf0] sm:$0xff]  ;;  %v3167_v60 = vsel %vm2847_vm1, %v7520_v55, 0.0  ;;  %v7530_v61 = vld [vmem:[#allocation2 + $0xe0] sm:$0xff]  ;;  %v3163_v62 = vsel %vm2847_vm1, %v7522_v56, 0.0  ;;  %v7534_v63 = vld [vmem:[#allocation2 + $0x118] sm:$0xff] }
 0x31d   : > { %v7536_v0 = vld [vmem:[#allocation2 + $0x108] sm:$0xff]  ;;  %v3168_v4 = vadd.f32 %v3167_v60, %v7526_v59  ;;  %v3164_v8 = vadd.f32 %v3163_v62, %v7530_v61  ;;  %v7540_v9 = vld [vmem:[#allocation2 + $0x110] sm:$0xff]  ;;  %v3175_v10 = vsel %vm2847_vm1, %v7534_v63, 0.0  ;;  %v7544_v13 = vld [vmem:[#allocation2 + $0x100] sm:$0xff] }
 0x31e   : > { %3129 = vadd.xlane.f32.xlu1 %v3128_v25  ;;  %v3171_v14 = vsel %vm2847_vm1, %v7536_v0, 0.0  ;;  %v7548_v17 = vld [vmem:[#allocation2 + $0x138] sm:$0xff]  ;;  %v7550_v18 = vld [vmem:[#allocation2 + $0x128] sm:$0xff]  ;;  %v3176_v20 = vadd.f32 %v3175_v10, %v7540_v9  ;;  %v7554_v25 = vld [vmem:[#allocation2 + $0x130] sm:$0xff] }
 0x31f   : > { %3125 = vadd.xlane.f32.xlu0 %v3124_v26  ;;  %v3172_v22 = vadd.f32 %v3171_v14, %v7544_v13  ;;  %v3183_v26 = vsel %vm2847_vm1, %v7548_v17, 0.0  ;;  %v7558_v28 = vld [vmem:[#allocation2 + $0x120] sm:$0xff]  ;;  %v3179_v30 = vsel %vm2847_vm1, %v7550_v18, 0.0 }
 0x320   : > { %v3184_v36 = vadd.f32 %v3183_v26, %v7554_v25  ;;  %v3180_v38 = vadd.f32 %v3179_v30, %v7558_v28  ;;  %v7572_v44 = vld [vmem:[#allocation2 + $0x140] sm:$0xff] }
 0x321   : > { %v7586_v60 = vld [vmem:[#allocation2 + $0x160] sm:$0xff] }
 0x322   : > { %3137 = vadd.xlane.f32.xlu1 %v3136_v33  ;;  %v7562_v33 = vld [vmem:[#allocation2 + $0x158] sm:$0xff]  ;;  %v7600_v26 = vld [vmem:[#allocation2 + $0x180] sm:$0xff] }
 0x323   : > { %3133 = vadd.xlane.f32.xlu0 %v3132_v34  ;;  %v7564_v34 = vld [vmem:[#allocation2 + $0x148] sm:$0xff]  ;;  %10234 = vst [vmem:[#allocation7_spill] sm:$0xff] %v7600_v26 }
 0x324   : > { %v3187_v46 = vsel %vm2847_vm1, %v7564_v34, 0.0 }
 0x325   : > { %v3188_v54 = vadd.f32 %v3187_v46, %v7572_v44 }
 0x326   : > { %3145 = vadd.xlane.f32.xlu1 %v3144_v41  ;;  %v7568_v41 = vld [vmem:[#allocation2 + $0x150] sm:$0xff] }
 0x327   : > { %3141 = vadd.xlane.f32.xlu0 %v3140_v42  ;;  %v3191_v42 = vsel %vm2847_vm1, %v7562_v33, 0.0 }
 0x328   : > { %v3192_v52 = vadd.f32 %v3191_v42, %v7568_v41 }
 0x32a   : > { %3153 = vadd.xlane.f32.xlu1 %v3152_v49  ;;  %v7576_v49 = vld [vmem:[#allocation2 + $0x178] sm:$0xff] }
 0x32b   : > { %3149 = vadd.xlane.f32.xlu0 %v3148_v50  ;;  %v7578_v50 = vld [vmem:[#allocation2 + $0x168] sm:$0xff] }
 0x32c   : > { %v3195_v62 = vsel %vm2847_vm1, %v7578_v50, 0.0 }
 0x32d   : > { %v3196_v14 = vadd.f32 %v3195_v62, %v7586_v60 }
 0x32e   : > { %3161 = vadd.xlane.f32.xlu1 %v3160_v57  ;;  %v7582_v57 = vld [vmem:[#allocation2 + $0x170] sm:$0xff] }
 0x32f   : > { %3157 = vadd.xlane.f32.xlu0 %v3156_v58  ;;  %v3199_v58 = vsel %vm2847_vm1, %v7576_v49, 0.0 }
 0x330   : > { %v3200_v10 = vadd.f32 %v3199_v58, %v7582_v57  ;;  %v7614_v58 = vld [vmem:[#allocation2 + $0x1a0] sm:$0xff] }
 0x331   : > { %10238 = vst [vmem:[#allocation11_spill] sm:$0xff] %v7614_v58 }
 0x332   : > { %3169 = vadd.xlane.f32.xlu1 %v3168_v4  ;;  %v7590_v4 = vld [vmem:[#allocation2 + $0x198] sm:$0xff] }
 0x333   : > { %3165 = vadd.xlane.f32.xlu0 %v3164_v8  ;;  %10231 = vst [vmem:[#allocation4_spill] sm:$0xff] %v7590_v4  ;;  %v7592_v8 = vld [vmem:[#allocation2 + $0x188] sm:$0xff] }
 0x334   : > { %10232 = vst [vmem:[#allocation5_spill] sm:$0xff] %v7592_v8  ;;  %v3203_v30 = vsel %vm2847_vm1, %v7592_v8, 0.0  ;;  %v7618_v8 = vld [vmem:[#allocation2 + $0x1d8] sm:$0xff] }
 0x335   : > { %v3204_v46 = vadd.f32 %v3203_v30, %v7600_v26  ;;  %10239 = vst [vmem:[#allocation12_spill] sm:$0xff] %v7618_v8  ;;  %v3223_v30 = vsel %vm2847_vm1, %v7618_v8, 0.0  ;;  %v7632_v26 = vld [vmem:[#allocation2 + $0x1f8] sm:$0xff]  ;;  %v7642_v8 = vld [vmem:[#allocation2 + $0x1e0] sm:$0xff] }
 0x336   : > { %3177 = vadd.xlane.f32.xlu1 %v3176_v20  ;;  %v7596_v20 = vld [vmem:[#allocation2 + $0x190] sm:$0xff]  ;;  %10243 = vst [vmem:[#allocation16_spill] sm:$0xff] %v7632_v26  ;;  %10246 = vst [vmem:[#allocation19_spill] sm:$0xff] %v7642_v8 }
 0x337   : > { %3173 = vadd.xlane.f32.xlu0 %v3172_v22  ;;  %10233 = vst [vmem:[#allocation6_spill] sm:$0xff] %v7596_v20  ;;  %v3207_v22 = vsel %vm2847_vm1, %v7590_v4, 0.0  ;;  %v7620_v4 = vld [vmem:[#allocation2 + $0x1c8] sm:$0xff] }
 0x338   : > { %v3208_v42 = vadd.f32 %v3207_v22, %v7596_v20  ;;  %10240 = vst [vmem:[#allocation13_spill] sm:$0xff] %v7620_v4  ;;  %v7624_v22 = vld [vmem:[#allocation2 + $0x1d0] sm:$0xff]  ;;  %v7634_v20 = vld [vmem:[#allocation2 + $0x1e8] sm:$0xff] }
 0x339   : > { %10241 = vst [vmem:[#allocation14_spill] sm:$0xff] %v7624_v22  ;;  %10244 = vst [vmem:[#allocation17_spill] sm:$0xff] %v7634_v20 }
 0x33a   : > { %3185 = vadd.xlane.f32.xlu1 %v3184_v36  ;;  %v7604_v36 = vld [vmem:[#allocation2 + $0x1b8] sm:$0xff] }
 0x33b   : > { %3181 = vadd.xlane.f32.xlu0 %v3180_v38  ;;  %10235 = vst [vmem:[#allocation8_spill] sm:$0xff] %v7604_v36  ;;  %v7606_v38 = vld [vmem:[#allocation2 + $0x1a8] sm:$0xff] }
 0x33c   : > { %10236 = vst [vmem:[#allocation9_spill] sm:$0xff] %v7606_v38  ;;  %v3211_v62 = vsel %vm2847_vm1, %v7606_v38, 0.0  ;;  %v3219_v38 = vsel %vm2847_vm1, %v7620_v4, 0.0  ;;  %v3227_v4 = vsel %vm2847_vm1, %v7634_v20, 0.0 }
 0x33e   : > { %3193 = vadd.xlane.f32.xlu1 %v3192_v52  ;;  %v7610_v52 = vld [vmem:[#allocation2 + $0x1b0] sm:$0xff] }
 0x33f   : > { %3189 = vadd.xlane.f32.xlu0 %v3188_v54  ;;  %10237 = vst [vmem:[#allocation10_spill] sm:$0xff] %v7610_v52  ;;  %v3215_v54 = vsel %vm2847_vm1, %v7604_v36, 0.0  ;;  %v7628_v36 = vld [vmem:[#allocation2 + $0x1c0] sm:$0xff] }
 0x340   : > { %10242 = vst [vmem:[#allocation15_spill] sm:$0xff] %v7628_v36 }
 0x342   : > { %3201 = vadd.xlane.f32.xlu1 %v3200_v10  ;;  %v3216_v10 = vadd.f32 %v3215_v54, %v7610_v52  ;;  %v7638_v54 = vld [vmem:[#allocation2 + $0x1f0] sm:$0xff]  ;;  %v7648_v52 = vld [vmem:[#allocation2 + $0x208] sm:$0xff] }
 0x343   : > { %3197 = vadd.xlane.f32.xlu0 %v3196_v14  ;;  %v3212_v14 = vadd.f32 %v3211_v62, %v7614_v58  ;;  %10245 = vst [vmem:[#allocation18_spill] sm:$0xff] %v7638_v54  ;;  %v3231_v62 = vsel %vm2847_vm1, %v7632_v26, 0.0  ;;  %v7646_v58 = vld [vmem:[#allocation2 + $0x218] sm:$0xff]  ;;  %10248 = vst [vmem:[#allocation21_spill] sm:$0xff] %v7648_v52  ;;  %v7656_v26 = vld [vmem:[#allocation2 + $0x200] sm:$0xff]  ;;  %v3235_v20 = vsel %vm2847_vm1, %v7648_v52, 0.0 }
 0x344   : > { %10247 = vst [vmem:[#allocation20_spill] sm:$0xff] %v7646_v58  ;;  %10250 = vst [vmem:[#allocation23_spill] sm:$0xff] %v7656_v26 }
 0x346   : > { %3209 = vadd.xlane.f32.xlu1 %v3208_v42  ;;  %v3224_v42 = vadd.f32 %v3223_v30, %v7624_v22  ;;  %v3239_v30 = vsel %vm2847_vm1, %v7646_v58, 0.0  ;;  %v7662_v22 = vld [vmem:[#allocation2 + $0x228] sm:$0xff]  ;;  %v7670_v58 = vld [vmem:[#allocation2 + $0x220] sm:$0xff] }
 0x347   : > { %3205 = vadd.xlane.f32.xlu0 %v3204_v46  ;;  %v3220_v46 = vadd.f32 %v3219_v38, %v7628_v36  ;;  %v3228_v38 = vadd.f32 %v3227_v4, %v7642_v8  ;;  %v7660_v36 = vld [vmem:[#allocation2 + $0x238] sm:$0xff]  ;;  %10252 = vst [vmem:[#allocation25_spill] sm:$0xff] %v7662_v22  ;;  %v3236_v4 = vadd.f32 %v3235_v20, %v7656_v26  ;;  %10254 = vst [vmem:[#allocation27_spill] sm:$0xff] %v7670_v58 }
 0x348   : > { %10251 = vst [vmem:[#allocation24_spill] sm:$0xff] %v7660_v36  ;;  %v3243_v52 = vsel %vm2847_vm1, %v7662_v22, 0.0  ;;  %v7674_v8 = vld [vmem:[#allocation2 + $0x258] sm:$0xff] }
 0x349   : > { %10255 = vst [vmem:[#allocation28_spill] sm:$0xff] %v7674_v8  ;;  %v3244_v20 = vadd.f32 %v3243_v52, %v7670_v58  ;;  %v7688_v26 = vld [vmem:[#allocation2 + $0x278] sm:$0xff] }
 0x34a   : > { %3217 = vadd.xlane.f32.xlu1 %v3216_v10  ;;  %v3232_v10 = vadd.f32 %v3231_v62, %v7638_v54  ;;  %v3247_v62 = vsel %vm2847_vm1, %v7660_v36, 0.0  ;;  %v7676_v54 = vld [vmem:[#allocation2 + $0x248] sm:$0xff]  ;;  %v7684_v36 = vld [vmem:[#allocation2 + $0x240] sm:$0xff]  ;;  %10259 = vst [vmem:[#allocation32_spill] sm:$0xff] %v7688_v26  ;;  %v7702_v58 = vld [vmem:[#allocation2 + $0x298] sm:$0xff] }
 0x34b   : > { %3213 = vadd.xlane.f32.xlu0 %v3212_v14  ;;  %v7652_v14 = vld [vmem:[#allocation2 + $0x210] sm:$0xff]  ;;  %10256 = vst [vmem:[#allocation29_spill] sm:$0xff] %v7676_v54  ;;  %10258 = vst [vmem:[#allocation31_spill] sm:$0xff] %v7684_v36  ;;  %v3251_v22 = vsel %vm2847_vm1, %v7676_v54, 0.0 }
 0x34c   : > { %10249 = vst [vmem:[#allocation22_spill] sm:$0xff] %v7652_v14  ;;  %v3252_v52 = vadd.f32 %v3251_v22, %v7684_v36  ;;  %10263 = vst [vmem:[#allocation36_spill] sm:$0xff] %v7702_v58  ;;  %v7716_v36 = vld [vmem:[#allocation2 + $0x2b8] sm:$0xff] }
 0x34d   : > { %10267 = vst [vmem:[#allocation40_spill] sm:$0xff] %v7716_v36 }
 0x34e   : > { %3225 = vadd.xlane.f32.xlu1 %v3224_v42  ;;  %v3240_v42 = vadd.f32 %v3239_v30, %v7652_v14  ;;  %v3255_v30 = vsel %vm2847_vm1, %v7674_v8, 0.0  ;;  %v7690_v14 = vld [vmem:[#allocation2 + $0x268] sm:$0xff]  ;;  %v7698_v8 = vld [vmem:[#allocation2 + $0x260] sm:$0xff] }
 0x34f   : > { %3221 = vadd.xlane.f32.xlu0 %v3220_v46  ;;  %v7666_v46 = vld [vmem:[#allocation2 + $0x230] sm:$0xff]  ;;  %10260 = vst [vmem:[#allocation33_spill] sm:$0xff] %v7690_v14  ;;  %10262 = vst [vmem:[#allocation35_spill] sm:$0xff] %v7698_v8  ;;  %v3259_v54 = vsel %vm2847_vm1, %v7690_v14, 0.0 }
 0x350   : > { %10253 = vst [vmem:[#allocation26_spill] sm:$0xff] %v7666_v46  ;;  %v3260_v22 = vadd.f32 %v3259_v54, %v7698_v8  ;;  %v7730_v8 = vld [vmem:[#allocation2 + $0x2d8] sm:$0xff] }
 0x351   : > { %10271 = vst [vmem:[#allocation44_spill] sm:$0xff] %v7730_v8 }
 0x352   : > { %3233 = vadd.xlane.f32.xlu1 %v3232_v10  ;;  %v3248_v10 = vadd.f32 %v3247_v62, %v7666_v46  ;;  %v3263_v62 = vsel %vm2847_vm1, %v7688_v26, 0.0  ;;  %v7704_v46 = vld [vmem:[#allocation2 + $0x288] sm:$0xff]  ;;  %v7712_v26 = vld [vmem:[#allocation2 + $0x280] sm:$0xff] }
 0x353   : > { %3229 = vadd.xlane.f32.xlu0 %v3228_v38  ;;  %v7680_v38 = vld [vmem:[#allocation2 + $0x250] sm:$0xff]  ;;  %10264 = vst [vmem:[#allocation37_spill] sm:$0xff] %v7704_v46  ;;  %10266 = vst [vmem:[#allocation39_spill] sm:$0xff] %v7712_v26  ;;  %v3267_v14 = vsel %vm2847_vm1, %v7704_v46, 0.0 }
 0x354   : > { %10257 = vst [vmem:[#allocation30_spill] sm:$0xff] %v7680_v38  ;;  %v3268_v54 = vadd.f32 %v3267_v14, %v7712_v26  ;;  %v7744_v26 = vld [vmem:[#allocation2 + $0x2f8] sm:$0xff] }
 0x355   : > { %10275 = vst [vmem:[#allocation48_spill] sm:$0xff] %v7744_v26 }
 0x356   : > { %3241 = vadd.xlane.f32.xlu1 %v3240_v42  ;;  %v3256_v42 = vadd.f32 %v3255_v30, %v7680_v38  ;;  %v3271_v30 = vsel %vm2847_vm1, %v7702_v58, 0.0  ;;  %v7718_v38 = vld [vmem:[#allocation2 + $0x2a8] sm:$0xff]  ;;  %v7726_v58 = vld [vmem:[#allocation2 + $0x2a0] sm:$0xff] }
 0x357   : > { %3237 = vadd.xlane.f32.xlu0 %v3236_v4  ;;  %v7694_v4 = vld [vmem:[#allocation2 + $0x270] sm:$0xff]  ;;  %10268 = vst [vmem:[#allocation41_spill] sm:$0xff] %v7718_v38  ;;  %10270 = vst [vmem:[#allocation43_spill] sm:$0xff] %v7726_v58  ;;  %v3275_v46 = vsel %vm2847_vm1, %v7718_v38, 0.0 }
 0x358   : > { %10261 = vst [vmem:[#allocation34_spill] sm:$0xff] %v7694_v4  ;;  %v3276_v14 = vadd.f32 %v3275_v46, %v7726_v58  ;;  %v7758_v58 = vld [vmem:[#allocation2 + $0x318] sm:$0xff] }
 0x359   : > { %10279 = vst [vmem:[#allocation52_spill] sm:$0xff] %v7758_v58 }
 0x35a   : > { %3249 = vadd.xlane.f32.xlu1 %v3248_v10  ;;  %v3264_v10 = vadd.f32 %v3263_v62, %v7694_v4  ;;  %v3279_v62 = vsel %vm2847_vm1, %v7716_v36, 0.0  ;;  %v7732_v4 = vld [vmem:[#allocation2 + $0x2c8] sm:$0xff]  ;;  %v7740_v36 = vld [vmem:[#allocation2 + $0x2c0] sm:$0xff] }
 0x35b   : > { %3245 = vadd.xlane.f32.xlu0 %v3244_v20  ;;  %v7708_v20 = vld [vmem:[#allocation2 + $0x290] sm:$0xff]  ;;  %10272 = vst [vmem:[#allocation45_spill] sm:$0xff] %v7732_v4  ;;  %10274 = vst [vmem:[#allocation47_spill] sm:$0xff] %v7740_v36  ;;  %v3283_v38 = vsel %vm2847_vm1, %v7732_v4, 0.0 }
 0x35c   : > { %10265 = vst [vmem:[#allocation38_spill] sm:$0xff] %v7708_v20  ;;  %v3284_v46 = vadd.f32 %v3283_v38, %v7740_v36  ;;  %v7772_v36 = vld [vmem:[#allocation2 + $0x338] sm:$0xff] }
 0x35d   : > { %10283 = vst [vmem:[#allocation56_spill] sm:$0xff] %v7772_v36 }
 0x35e   : > { %3257 = vadd.xlane.f32.xlu1 %v3256_v42  ;;  %v3272_v42 = vadd.f32 %v3271_v30, %v7708_v20  ;;  %v3287_v30 = vsel %vm2847_vm1, %v7730_v8, 0.0  ;;  %v7746_v20 = vld [vmem:[#allocation2 + $0x2e8] sm:$0xff]  ;;  %v7754_v8 = vld [vmem:[#allocation2 + $0x2e0] sm:$0xff] }
 0x35f   : > { %3253 = vadd.xlane.f32.xlu0 %v3252_v52  ;;  %v7722_v52 = vld [vmem:[#allocation2 + $0x2b0] sm:$0xff]  ;;  %10276 = vst [vmem:[#allocation49_spill] sm:$0xff] %v7746_v20  ;;  %10278 = vst [vmem:[#allocation51_spill] sm:$0xff] %v7754_v8  ;;  %v3291_v4 = vsel %vm2847_vm1, %v7746_v20, 0.0 }
 0x360   : > { %10269 = vst [vmem:[#allocation42_spill] sm:$0xff] %v7722_v52  ;;  %v3292_v38 = vadd.f32 %v3291_v4, %v7754_v8  ;;  %v7786_v8 = vld [vmem:[#allocation2 + $0x358] sm:$0xff] }
 0x361   : > { %10287 = vst [vmem:[#allocation60_spill] sm:$0xff] %v7786_v8 }
 0x362   : > { %3265 = vadd.xlane.f32.xlu1 %v3264_v10  ;;  %v3280_v10 = vadd.f32 %v3279_v62, %v7722_v52  ;;  %v3295_v62 = vsel %vm2847_vm1, %v7744_v26, 0.0  ;;  %v7760_v52 = vld [vmem:[#allocation2 + $0x308] sm:$0xff]  ;;  %v7768_v26 = vld [vmem:[#allocation2 + $0x300] sm:$0xff] }
 0x363   : > { %3261 = vadd.xlane.f32.xlu0 %v3260_v22  ;;  %v7736_v22 = vld [vmem:[#allocation2 + $0x2d0] sm:$0xff]  ;;  %10280 = vst [vmem:[#allocation53_spill] sm:$0xff] %v7760_v52  ;;  %10282 = vst [vmem:[#allocation55_spill] sm:$0xff] %v7768_v26  ;;  %v3299_v20 = vsel %vm2847_vm1, %v7760_v52, 0.0 }
 0x364   : > { %10273 = vst [vmem:[#allocation46_spill] sm:$0xff] %v7736_v22  ;;  %v3300_v4 = vadd.f32 %v3299_v20, %v7768_v26  ;;  %v7800_v26 = vld [vmem:[#allocation2 + $0x378] sm:$0xff] }
 0x365   : > { %10291 = vst [vmem:[#allocation64_spill] sm:$0xff] %v7800_v26 }
 0x366   : > { %3273 = vadd.xlane.f32.xlu1 %v3272_v42  ;;  %v3288_v42 = vadd.f32 %v3287_v30, %v7736_v22  ;;  %v3303_v30 = vsel %vm2847_vm1, %v7758_v58, 0.0  ;;  %v7774_v22 = vld [vmem:[#allocation2 + $0x328] sm:$0xff]  ;;  %v7782_v58 = vld [vmem:[#allocation2 + $0x320] sm:$0xff] }
 0x367   : > { %3269 = vadd.xlane.f32.xlu0 %v3268_v54  ;;  %v7750_v54 = vld [vmem:[#allocation2 + $0x2f0] sm:$0xff]  ;;  %10284 = vst [vmem:[#allocation57_spill] sm:$0xff] %v7774_v22  ;;  %10286 = vst [vmem:[#allocation59_spill] sm:$0xff] %v7782_v58  ;;  %v3307_v52 = vsel %vm2847_vm1, %v7774_v22, 0.0 }
 0x368   : > { %10277 = vst [vmem:[#allocation50_spill] sm:$0xff] %v7750_v54  ;;  %v3308_v20 = vadd.f32 %v3307_v52, %v7782_v58  ;;  %v7814_v58 = vld [vmem:[#allocation2 + $0x398] sm:$0xff] }
 0x369   : > { %10295 = vst [vmem:[#allocation68_spill] sm:$0xff] %v7814_v58 }
 0x36a   : > { %3281 = vadd.xlane.f32.xlu1 %v3280_v10  ;;  %v3296_v10 = vadd.f32 %v3295_v62, %v7750_v54  ;;  %v3311_v62 = vsel %vm2847_vm1, %v7772_v36, 0.0  ;;  %v7788_v54 = vld [vmem:[#allocation2 + $0x348] sm:$0xff]  ;;  %v7796_v36 = vld [vmem:[#allocation2 + $0x340] sm:$0xff] }
 0x36b   : > { %3277 = vadd.xlane.f32.xlu0 %v3276_v14  ;;  %v7764_v14 = vld [vmem:[#allocation2 + $0x310] sm:$0xff]  ;;  %10288 = vst [vmem:[#allocation61_spill] sm:$0xff] %v7788_v54  ;;  %10290 = vst [vmem:[#allocation63_spill] sm:$0xff] %v7796_v36  ;;  %v3315_v22 = vsel %vm2847_vm1, %v7788_v54, 0.0 }
 0x36c   : > { %10281 = vst [vmem:[#allocation54_spill] sm:$0xff] %v7764_v14  ;;  %v3316_v52 = vadd.f32 %v3315_v22, %v7796_v36  ;;  %v7828_v36 = vld [vmem:[#allocation2 + $0x3b8] sm:$0xff] }
 0x36d   : > { %10299 = vst [vmem:[#allocation72_spill] sm:$0xff] %v7828_v36 }
 0x36e   : > { %3289 = vadd.xlane.f32.xlu1 %v3288_v42  ;;  %v3304_v42 = vadd.f32 %v3303_v30, %v7764_v14  ;;  %v3319_v30 = vsel %vm2847_vm1, %v7786_v8, 0.0  ;;  %v7802_v14 = vld [vmem:[#allocation2 + $0x368] sm:$0xff]  ;;  %v7810_v8 = vld [vmem:[#allocation2 + $0x360] sm:$0xff] }
 0x36f   : > { %3285 = vadd.xlane.f32.xlu0 %v3284_v46  ;;  %v7778_v46 = vld [vmem:[#allocation2 + $0x330] sm:$0xff]  ;;  %10292 = vst [vmem:[#allocation65_spill] sm:$0xff] %v7802_v14  ;;  %10294 = vst [vmem:[#allocation67_spill] sm:$0xff] %v7810_v8  ;;  %v3323_v54 = vsel %vm2847_vm1, %v7802_v14, 0.0 }
 0x370   : > { %10285 = vst [vmem:[#allocation58_spill] sm:$0xff] %v7778_v46  ;;  %v3324_v22 = vadd.f32 %v3323_v54, %v7810_v8  ;;  %v7842_v8 = vld [vmem:[#allocation2 + $0x3d8] sm:$0xff] }
 0x371   : > { %10302 = vst [vmem:[#allocation75_spill] sm:$0xff] %v7842_v8 }
 0x372   : > { %3297 = vadd.xlane.f32.xlu1 %v3296_v10  ;;  %v3312_v10 = vadd.f32 %v3311_v62, %v7778_v46  ;;  %v3327_v62 = vsel %vm2847_vm1, %v7800_v26, 0.0  ;;  %v7816_v46 = vld [vmem:[#allocation2 + $0x388] sm:$0xff]  ;;  %v7824_v26 = vld [vmem:[#allocation2 + $0x380] sm:$0xff] }
 0x373   : > { %3293 = vadd.xlane.f32.xlu0 %v3292_v38  ;;  %v7792_v38 = vld [vmem:[#allocation2 + $0x350] sm:$0xff]  ;;  %10296 = vst [vmem:[#allocation69_spill] sm:$0xff] %v7816_v46  ;;  %10298 = vst [vmem:[#allocation71_spill] sm:$0xff] %v7824_v26  ;;  %v3331_v14 = vsel %vm2847_vm1, %v7816_v46, 0.0 }
 0x374   : > { %10289 = vst [vmem:[#allocation62_spill] sm:$0xff] %v7792_v38  ;;  %v3332_v54 = vadd.f32 %v3331_v14, %v7824_v26  ;;  %v7856_v26 = vld [vmem:[#allocation2 + $0x3f8] sm:$0xff] }
 0x375   : > { %10305 = vst [vmem:[#allocation78_spill] sm:$0xff] %v7856_v26 }
 0x376   : > { %3305 = vadd.xlane.f32.xlu1 %v3304_v42  ;;  %v3320_v42 = vadd.f32 %v3319_v30, %v7792_v38  ;;  %v3335_v30 = vsel %vm2847_vm1, %v7814_v58, 0.0  ;;  %v7830_v38 = vld [vmem:[#allocation2 + $0x3a8] sm:$0xff]  ;;  %v7838_v58 = vld [vmem:[#allocation2 + $0x3a0] sm:$0xff] }
 0x377   : > { %3301 = vadd.xlane.f32.xlu0 %v3300_v4  ;;  %v7806_v4 = vld [vmem:[#allocation2 + $0x370] sm:$0xff]  ;;  %10300 = vst [vmem:[#allocation73_spill] sm:$0xff] %v7830_v38  ;;  %10301 = vst [vmem:[#allocation74_spill] sm:$0xff] %v7838_v58  ;;  %v3339_v46 = vsel %vm2847_vm1, %v7830_v38, 0.0 }
 0x378   : > { %10293 = vst [vmem:[#allocation66_spill] sm:$0xff] %v7806_v4  ;;  %v3340_v14 = vadd.f32 %v3339_v46, %v7838_v58  ;;  %v7868_v58 = vld [vmem:[#allocation2 + $0x3e0] sm:$0xff] }
 0x37a   : > { %3313 = vadd.xlane.f32.xlu1 %v3312_v10  ;;  %v3328_v10 = vadd.f32 %v3327_v62, %v7806_v4  ;;  %v3343_v62 = vsel %vm2847_vm1, %v7828_v36, 0.0  ;;  %v7844_v4 = vld [vmem:[#allocation2 + $0x3c8] sm:$0xff]  ;;  %v7852_v36 = vld [vmem:[#allocation2 + $0x3c0] sm:$0xff] }
 0x37b   : > { %3309 = vadd.xlane.f32.xlu0 %v3308_v20  ;;  %v7820_v20 = vld [vmem:[#allocation2 + $0x390] sm:$0xff]  ;;  %10303 = vst [vmem:[#allocation76_spill] sm:$0xff] %v7844_v4  ;;  %10304 = vst [vmem:[#allocation77_spill] sm:$0xff] %v7852_v36  ;;  %v3347_v38 = vsel %vm2847_vm1, %v7844_v4, 0.0 }
 0x37c   : > { %10297 = vst [vmem:[#allocation70_spill] sm:$0xff] %v7820_v20  ;;  %v3348_v46 = vadd.f32 %v3347_v38, %v7852_v36  ;;  %v3365_v38 = vmul.f32 %v7443_v11, %v7443_v11  ;;  %v3369_v11 = vmul.f32 %v7434_v6, %v7434_v6  ;;  %v3373_v6 = vmul.f32 %v7456_v19, %v7456_v19 }
 0x37d   : > { %v3377_v19 = vmul.f32 %v7470_v27, %v7470_v27  ;;  %v3381_v27 = vmul.f32 %v7484_v35, %v7484_v35  ;;  %v3385_v35 = vmul.f32 %v7498_v43, %v7498_v43 }
 0x37e   : > { %3321 = vadd.xlane.f32.xlu1 %v3320_v42  ;;  %v3336_v42 = vadd.f32 %v3335_v30, %v7820_v20  ;;  %v3351_v30 = vsel %vm2847_vm1, %v7842_v8, 0.0  ;;  %v7858_v20 = vld [vmem:[#allocation2 + $0x3e8] sm:$0xff]  ;;  %v3366_v8 = vmul.f32 %v7445_v12, %v7445_v12  ;;  %v3363_v12 = vmul.f32 %v7428_v3, %v7428_v3 }
 0x37f   : > { %3317 = vadd.xlane.f32.xlu0 %v3316_v52  ;;  %v7834_v52 = vld [vmem:[#allocation2 + $0x3b0] sm:$0xff]  ;;  %10306 = vst [vmem:[#allocation79_spill] sm:$0xff] %v7858_v20  ;;  %v3355_v4 = vsel %vm2847_vm1, %v7858_v20, 0.0  ;;  %v3370_v20 = vmul.f32 %v7436_v7, %v7436_v7  ;;  %v3367_v3 = vmul.f32 %v7424_v1, %v7424_v1  ;;  %v3374_v7 = vmul.f32 %v7450_v15, %v7450_v15 }
 0x380   : > { %v3371_v1 = vmul.f32 %v7460_v21, %v7460_v21  ;;  %v3378_v15 = vmul.f32 %v7464_v23, %v7464_v23  ;;  %v3375_v21 = vmul.f32 %v7474_v29, %v7474_v29  ;;  %v3382_v23 = vmul.f32 %v7478_v31, %v7478_v31 }
 0x381   : > { %v3379_v29 = vmul.f32 %v7488_v37, %v7488_v37  ;;  %v3386_v31 = vmul.f32 %v7492_v39, %v7492_v39  ;;  %v3383_v37 = vmul.f32 %v7502_v45, %v7502_v45  ;;  %v3390_v39 = vmul.f32 %v7506_v47, %v7506_v47 }
 0x382   : > { %3329 = vadd.xlane.f32.xlu1 %v3328_v10  ;;  %v3344_v10 = vadd.f32 %v3343_v62, %v7834_v52  ;;  %v3359_v62 = vsel %vm2847_vm1, %v7856_v26, 0.0  ;;  %v3495_v26 = vsel %vm2847_vm1, %v3366_v8, 0.0  ;;  %v3503_v8 = vsel %vm2847_vm1, %v3370_v20, 0.0 }
 0x383   : > { %3325 = vadd.xlane.f32.xlu0 %v3324_v22  ;;  %v7848_v22 = vld [vmem:[#allocation2 + $0x3d0] sm:$0xff]  ;;  %v3511_v20 = vsel %vm2847_vm1, %v3374_v7, 0.0  ;;  %v3535_v7 = vsel %vm2847_vm1, %v3386_v31, 0.0  ;;  %v3543_v45 = vsel %vm2847_vm1, %v3390_v39, 0.0  ;;  %v3387_v47 = vmul.f32 %v7516_v53, %v7516_v53 }
 0x384   : > { %v3536_v43 = vadd.f32 %v3535_v7, %v3385_v35  ;;  %v3406_v31 = vmul.f32 %v7562_v33, %v7562_v33  ;;  %v3403_v33 = vmul.f32 %v7572_v44, %v7572_v44  ;;  %v3410_v7 = vmul.f32 %v7576_v49, %v7576_v49 }
 0x385   : > { %v3408_v39 = vmul.f32 %v7578_v50, %v7578_v50 }
 0x386   : > { %3337 = vadd.xlane.f32.xlu1 %v3336_v42  ;;  %v3352_v42 = vadd.f32 %v3351_v30, %v7848_v22  ;;  %v3356_v30 = vadd.f32 %v3355_v4, %v7868_v58  ;;  %v3583_v49 = vsel %vm2847_vm1, %v3410_v7, 0.0 }
 0x387   : > { %3333 = vadd.xlane.f32.xlu0 %v3332_v54  ;;  %v7862_v54 = vld [vmem:[#allocation2 + $0x3f0] sm:$0xff] }
 0x38a   : > { %3345 = vadd.xlane.f32.xlu1 %v3344_v10  ;;  %v3364_v10 = vmul.f32 %v7432_v5, %v7432_v5  ;;  %v3368_v5 = vmul.f32 %v7426_v2, %v7426_v2  ;;  %v3372_v2 = vmul.f32 %v7452_v16, %v7452_v16  ;;  %v3376_v16 = vmul.f32 %v7466_v24, %v7466_v24 }
 0x38b   : > { %3341 = vadd.xlane.f32.xlu0 %v3340_v14  ;;  %v3360_v14 = vadd.f32 %v3359_v62, %v7862_v54  ;;  %v3380_v24 = vmul.f32 %v7480_v32, %v7480_v32  ;;  %v3384_v32 = vmul.f32 %v7494_v40, %v7494_v40 }
 0x38c   : > { %v3491_v36 = vsel %vm2847_vm1, %v3364_v10, 0.0  ;;  %v3507_v62 = vsel %vm2847_vm1, %v3372_v2, 0.0  ;;  %v3512_v10 = vadd.f32 %v3511_v20, %v3373_v6  ;;  %v3388_v2 = vmul.f32 %v7508_v48, %v7508_v48 }
 0x38d   : > { %v3492_v4 = vadd.f32 %v3491_v36, %v3363_v12  ;;  %v3531_v40 = vsel %vm2847_vm1, %v3384_v32, 0.0  ;;  %v3394_v20 = vmul.f32 %v7520_v55, %v7520_v55  ;;  %v3391_v55 = vmul.f32 %v7530_v61, %v7530_v61 }
 0x38e   : > { %3353 = vadd.xlane.f32.xlu1 %v3352_v42  ;;  %v3496_v42 = vadd.f32 %v3495_v26, %v3365_v38  ;;  %v3504_v26 = vadd.f32 %v3503_v8, %v3369_v11  ;;  %v3519_v38 = vsel %vm2847_vm1, %v3378_v15, 0.0  ;;  %v3523_v11 = vsel %vm2847_vm1, %v3380_v24, 0.0 }
 0x38f   : > { %3349 = vadd.xlane.f32.xlu0 %v3348_v46  ;;  %v3499_v46 = vsel %vm2847_vm1, %v3368_v5, 0.0  ;;  %v3520_v12 = vadd.f32 %v3519_v38, %v3377_v19  ;;  %v3539_v48 = vsel %vm2847_vm1, %v3388_v2, 0.0  ;;  %v3392_v15 = vmul.f32 %v7522_v56, %v7522_v56 }
 0x390   : > { %v3500_v36 = vadd.f32 %v3499_v46, %v3367_v3  ;;  %v3524_v3 = vadd.f32 %v3523_v11, %v3379_v29  ;;  %v3551_v53 = vsel %vm2847_vm1, %v3394_v20, 0.0  ;;  %v3398_v19 = vmul.f32 %v7534_v63, %v7534_v63  ;;  %v10308_v20 = vld [vmem:[#allocation5_spill] sm:$0xff] }
 0x391   : > { %v3547_v56 = vsel %vm2847_vm1, %v3392_v15, 0.0  ;;  %v3396_v38 = vmul.f32 %v7536_v0, %v7536_v0  ;;  %v3395_v63 = vmul.f32 %v7544_v13, %v7544_v13  ;;  %v3402_v24 = vmul.f32 %v7548_v17, %v7548_v17  ;;  %v10309_v15 = vld [vmem:[#allocation6_spill] sm:$0xff] }
 0x392   : > { %3361 = vadd.xlane.f32.xlu1 %v3360_v14  ;;  %v3508_v14 = vadd.f32 %v3507_v62, %v3371_v1  ;;  %v3393_v62 = vmul.f32 %v7526_v59, %v7526_v59  ;;  %v3559_v61 = vsel %vm2847_vm1, %v3398_v19, 0.0  ;;  %v3399_v17 = vmul.f32 %v7558_v28, %v7558_v28  ;;  %v10311_v19 = vld [vmem:[#allocation8_spill] sm:$0xff] }
 0x393   : > { %3357 = vadd.xlane.f32.xlu0 %v3356_v30  ;;  %v3515_v30 = vsel %vm2847_vm1, %v3376_v16, 0.0  ;;  %v3555_v0 = vsel %vm2847_vm1, %v3396_v38, 0.0  ;;  %v3567_v13 = vsel %vm2847_vm1, %v3402_v24, 0.0  ;;  %v3404_v32 = vmul.f32 %v7564_v34, %v7564_v34 }
 0x394   : > { %v3516_v5 = vadd.f32 %v3515_v30, %v3375_v21  ;;  %v3552_v59 = vadd.f32 %v3551_v53, %v3393_v62  ;;  %v3397_v21 = vmul.f32 %v7540_v9, %v7540_v9  ;;  %v3548_v30 = vadd.f32 %v3547_v56, %v3391_v55  ;;  %v10310_v53 = vld [vmem:[#allocation7_spill] sm:$0xff] }
 0x395   : > { %v3556_v29 = vadd.f32 %v3555_v0, %v3395_v63  ;;  %v3575_v28 = vsel %vm2847_vm1, %v3406_v31, 0.0  ;;  %v3571_v34 = vsel %vm2847_vm1, %v3404_v32, 0.0  ;;  %v3409_v2 = vmul.f32 %v7582_v57, %v7582_v57  ;;  %v10313_v63 = vld [vmem:[#allocation10_spill] sm:$0xff]  ;;  %v10316_v32 = vld [vmem:[#allocation13_spill] sm:$0xff] }
 0x396   : > { %3497 = vadd.xlane.f32.xlu1 %v3496_v42  ;;  %v3527_v42 = vsel %vm2847_vm1, %v3382_v23, 0.0  ;;  %v3560_v9 = vadd.f32 %v3559_v61, %v3397_v21  ;;  %v3411_v55 = vmul.f32 %v10310_v53, %v10310_v53  ;;  %v3418_v56 = vmul.f32 %v10311_v19, %v10311_v19  ;;  %v10312_v21 = vld [vmem:[#allocation9_spill] sm:$0xff] }
 0x397   : > { %3493 = vadd.xlane.f32.xlu0 %v3492_v4  ;;  %v3528_v4 = vadd.f32 %v3527_v42, %v3381_v27  ;;  %v3400_v27 = vmul.f32 %v7550_v18, %v7550_v18  ;;  %v3584_v57 = vadd.f32 %v3583_v49, %v3409_v2  ;;  %v3417_v24 = vmul.f32 %v10313_v63, %v10313_v63 }
 0x399   : > { %v3563_v18 = vsel %vm2847_vm1, %v3400_v27, 0.0 }
 0x39a   : > { %3505 = vadd.xlane.f32.xlu1 %v3504_v26  ;;  %v3389_v26 = vmul.f32 %v7512_v51, %v7512_v51 }
 0x39b   : > { %3501 = vadd.xlane.f32.xlu0 %v3500_v36  ;;  %v3532_v36 = vadd.f32 %v3531_v40, %v3383_v37 }
 0x39c   : > { %v3544_v51 = vadd.f32 %v3543_v45, %v3389_v26  ;;  %v3407_v26 = vmul.f32 %v7586_v60, %v7586_v60 }
 0x39e   : > { %3513 = vadd.xlane.f32.xlu1 %v3512_v10  ;;  %v3540_v10 = vadd.f32 %v3539_v48, %v3387_v47  ;;  %v3579_v47 = vsel %vm2847_vm1, %v3408_v39, 0.0  ;;  %v3412_v48 = vmul.f32 %v10308_v20, %v10308_v20  ;;  %v10318_v39 = vld [vmem:[#allocation15_spill] sm:$0xff] }
 0x39f   : > { %3509 = vadd.xlane.f32.xlu0 %v3508_v14 }
 0x3a2   : > { %3521 = vadd.xlane.f32.xlu1 %v3520_v12 }
 0x3a3   : > { %3517 = vadd.xlane.f32.xlu0 %v3516_v5  ;;  %v7928_v8 = vpop.xlane.xlu1 %3117  ;;  %v3401_v5 = vmul.f32 %v7554_v25, %v7554_v25 }
 0x3a4   : > { %v7935_v46 = vpop.xlane.xlu0 %3109 }
 0x3a5   : > { %v3568_v25 = vadd.f32 %v3567_v13, %v3401_v5  ;;  %v10314_v5 = vld [vmem:[#allocation11_spill] sm:$0xff]  ;;  %v10315_v13 = vld [vmem:[#allocation12_spill] sm:$0xff] }
 0x3a6   : > { %3529 = vadd.xlane.f32.xlu1 %v3528_v4  ;;  %v3405_v4 = vmul.f32 %v7568_v41, %v7568_v41  ;;  %v6055_v41 = vmov 0  }
 0x3a7   : > { %3525 = vadd.xlane.f32.xlu0 %v3524_v3  ;;  %v7942_v6 = vpop.xlane.xlu1 %3121  ;;  %v3564_v3 = vadd.f32 %v3563_v18, %v3399_v17  ;;  %5773 = vset.pattern.permute.xlu1 %v6055_v41  ;;  %v3422_v17 = vmul.f32 %v10315_v13, %v10315_v13 }
 0x3a8   : > { %v7949_v1 = vpop.xlane.xlu0 %3113  ;;  %5772 = vset.pattern.permute.xlu0 %v6055_v41  ;;  %v3576_v40 = vadd.f32 %v3575_v28, %v3405_v4  ;;  %v3419_v41 = vmul.f32 %v10318_v39, %v10318_v39 }
 0x3aa   : > { %3537 = vadd.xlane.f32.xlu1 %v3536_v43  ;;  %v3572_v43 = vadd.f32 %v3571_v34, %v3403_v33  ;;  %v3607_v34 = vsel %vm2847_vm1, %v3422_v17, 0.0 }
 0x3ab   : > { %3533 = vadd.xlane.f32.xlu0 %v3532_v36  ;;  %v7956_v16 = vpop.xlane.xlu1 %3129  ;;  %v10307_v36 = vld [vmem:[#allocation4_spill] sm:$0xff] }
 0x3ac   : > { %v7963_v14 = vpop.xlane.xlu0 %3125  ;;  %v3414_v50 = vmul.f32 %v10307_v36, %v10307_v36 }
 0x3ae   : > { %3545 = vadd.xlane.f32.xlu1 %v3544_v51  ;;  %v3413_v51 = vmul.f32 %v10309_v15, %v10309_v15  ;;  %v3591_v60 = vsel %vm2847_vm1, %v3414_v50, 0.0 }
 0x3af   : > { %3541 = vadd.xlane.f32.xlu0 %v3540_v10  ;;  %v7970_v23 = vpop.xlane.xlu1 %3137  ;;  %v3580_v10 = vadd.f32 %v3579_v47, %v3407_v26  ;;  %v10320_v26 = vld [vmem:[#allocation17_spill] sm:$0xff]  ;;  %v10321_v47 = vld [vmem:[#allocation18_spill] sm:$0xff] }
 0x3b0   : > { %v7977_v12 = vpop.xlane.xlu0 %3133  ;;  %v3592_v61 = vadd.f32 %v3591_v60, %v3413_v51  ;;  %v3424_v36 = vmul.f32 %v10320_v26, %v10320_v26  ;;  %v3425_v20 = vmul.f32 %v10321_v47, %v10321_v47  ;;  %v10322_v51 = vld [vmem:[#allocation19_spill] sm:$0xff]  ;;  %v10323_v60 = vld [vmem:[#allocation20_spill] sm:$0xff] }
 0x3b1   : > { %v3430_v53 = vmul.f32 %v10323_v60, %v10323_v60 }
 0x3b2   : > { %3553 = vadd.xlane.f32.xlu1 %v3552_v59  ;;  %v3587_v59 = vsel %vm2847_vm1, %v3412_v48, 0.0  ;;  %v3611_v19 = vsel %vm2847_vm1, %v3424_v36, 0.0 }
 0x3b3   : > { %3549 = vadd.xlane.f32.xlu0 %v3548_v30  ;;  %v7984_v42 = vpop.xlane.xlu1 %3145  ;;  %v3416_v30 = vmul.f32 %v10312_v21, %v10312_v21  ;;  %v3588_v27 = vadd.f32 %v3587_v59, %v3411_v55 }
 0x3b4   : > { %v7991_v11 = vpop.xlane.xlu0 %3141 }
 0x3b5   : > { %v3595_v18 = vsel %vm2847_vm1, %v3416_v30, 0.0  ;;  %v10325_v30 = vld [vmem:[#allocation22_spill] sm:$0xff] }
 0x3b6   : > { %3561 = vadd.xlane.f32.xlu1 %v3560_v9  ;;  %v3599_v9 = vsel %vm2847_vm1, %v3418_v56, 0.0  ;;  %v10324_v56 = vld [vmem:[#allocation21_spill] sm:$0xff] }
 0x3b7   : > { %3557 = vadd.xlane.f32.xlu0 %v3556_v29  ;;  %v7998_v35 = vpop.xlane.xlu1 %3153  ;;  %v3415_v29 = vmul.f32 %v10314_v5, %v10314_v5  ;;  %v3600_v4 = vadd.f32 %v3599_v9, %v3417_v24  ;;  %v3428_v59 = vmul.f32 %v10324_v56, %v10324_v56  ;;  %v10326_v9 = vld [vmem:[#allocation23_spill] sm:$0xff]  ;;  %v10335_v56 = vld [vmem:[#allocation32_spill] sm:$0xff] }
 0x3b8   : > { %v8005_v37 = vpop.xlane.xlu0 %3149  ;;  %v3427_v5 = vmul.f32 %v10326_v9, %v10326_v9  ;;  %v10337_v9 = vld [vmem:[#allocation34_spill] sm:$0xff] }
 0x3b9   : > { %v3596_v7 = vadd.f32 %v3595_v18, %v3415_v29  ;;  %v10327_v29 = vld [vmem:[#allocation24_spill] sm:$0xff]  ;;  %v3619_v18 = vsel %vm2847_vm1, %v3428_v59, 0.0  ;;  %v3442_v59 = vmul.f32 %v10335_v56, %v10335_v56 }
 0x3ba   : > { %3569 = vadd.xlane.f32.xlu1 %v3568_v25  ;;  %v3420_v25 = vmul.f32 %v10316_v32, %v10316_v32  ;;  %v3434_v13 = vmul.f32 %v10327_v29, %v10327_v29  ;;  %v10328_v32 = vld [vmem:[#allocation25_spill] sm:$0xff] }
 0x3bb   : > { %3565 = vadd.xlane.f32.xlu0 %v3564_v3  ;;  %v8012_v44 = vpop.xlane.xlu1 %3161  ;;  %v10317_v3 = vld [vmem:[#allocation14_spill] sm:$0xff] }
 0x3bc   : > { %v8019_v45 = vpop.xlane.xlu0 %3157  ;;  %v3421_v28 = vmul.f32 %v10317_v3, %v10317_v3  ;;  %v3603_v49 = vsel %vm2847_vm1, %v3420_v25, 0.0  ;;  %v3432_v25 = vmul.f32 %v10328_v32, %v10328_v32  ;;  %v10329_v3 = vld [vmem:[#allocation26_spill] sm:$0xff]  ;;  %v3631_v39 = vsel %vm2847_vm1, %v3434_v13, 0.0  ;;  %v10338_v32 = vld [vmem:[#allocation35_spill] sm:$0xff] }
 0x3be   : > { %3577 = vadd.xlane.f32.xlu1 %v3576_v40  ;;  %v10319_v40 = vld [vmem:[#allocation16_spill] sm:$0xff]  ;;  %v3608_v50 = vadd.f32 %v3607_v34, %v3421_v28  ;;  %v3433_v28 = vmul.f32 %v10329_v3, %v10329_v3  ;;  %v3620_v34 = vadd.f32 %v3619_v18, %v3427_v5  ;;  %v3627_v36 = vsel %vm2847_vm1, %v3432_v25, 0.0 }
 0x3bf   : > { %3573 = vadd.xlane.f32.xlu0 %v3572_v43  ;;  %v8026_v62 = vpop.xlane.xlu1 %3169  ;;  %v3426_v2 = vmul.f32 %v10319_v40, %v10319_v40  ;;  %v3441_v5 = vmul.f32 %v10337_v9, %v10337_v9  ;;  %v3647_v18 = vsel %vm2847_vm1, %v3442_v59, 0.0  ;;  %v3439_v25 = vmul.f32 %v10338_v32, %v10338_v32 }
 0x3c0   : > { %v8033_v38 = vpop.xlane.xlu0 %3165 }
 0x3c1   : > { %v3615_v15 = vsel %vm2847_vm1, %v3426_v2, 0.0  ;;  %v10331_v2 = vld [vmem:[#allocation28_spill] sm:$0xff] }
 0x3c2   : > { %3585 = vadd.xlane.f32.xlu1 %v3584_v57  ;;  %v3604_v57 = vadd.f32 %v3603_v49, %v3419_v41  ;;  %v3616_v21 = vadd.f32 %v3615_v15, %v3425_v20  ;;  %v10330_v41 = vld [vmem:[#allocation27_spill] sm:$0xff]  ;;  %v3438_v49 = vmul.f32 %v10331_v2, %v10331_v2  ;;  %v3632_v20 = vadd.f32 %v3631_v39, %v3433_v28  ;;  %v10340_v39 = vld [vmem:[#allocation37_spill] sm:$0xff]  ;;  %v10341_v2 = vld [vmem:[#allocation38_spill] sm:$0xff] }
 0x3c3   : > { %3581 = vadd.xlane.f32.xlu0 %v3580_v10  ;;  %v8040_v0 = vpop.xlane.xlu1 %3177  ;;  %v3423_v10 = vmul.f32 %v10322_v51, %v10322_v51  ;;  %v3431_v40 = vmul.f32 %v10330_v41, %v10330_v41  ;;  %v3444_v41 = vmul.f32 %v10340_v39, %v10340_v39 }
 0x3c4   : > { %v8047_v31 = vpop.xlane.xlu0 %3173  ;;  %v3639_v60 = vsel %vm2847_vm1, %v3438_v49, 0.0  ;;  %v3445_v49 = vmul.f32 %v10341_v2, %v10341_v2 }
 0x3c5   : > { %v3612_v24 = vadd.f32 %v3611_v19, %v3423_v10  ;;  %v3628_v10 = vadd.f32 %v3627_v36, %v3431_v40  ;;  %v3648_v40 = vadd.f32 %v3647_v18, %v3441_v5  ;;  %v10346_v5 = vld [vmem:[#allocation43_spill] sm:$0xff]  ;;  %v10347_v18 = vld [vmem:[#allocation44_spill] sm:$0xff] }
 0x3c6   : > { %3593 = vadd.xlane.f32.xlu1 %v3592_v61  ;;  %v3429_v61 = vmul.f32 %v10325_v30, %v10325_v30  ;;  %v3454_v32 = vmul.f32 %v10347_v18, %v10347_v18 }
 0x3c7   : > { %3589 = vadd.xlane.f32.xlu0 %v3588_v27  ;;  %v8054_v33 = vpop.xlane.xlu1 %3185  ;;  %v3623_v27 = vsel %vm2847_vm1, %v3430_v53, 0.0  ;;  %v10334_v53 = vld [vmem:[#allocation31_spill] sm:$0xff] }
 0x3c8   : > { %v8061_v43 = vpop.xlane.xlu0 %3181  ;;  %v3435_v19 = vmul.f32 %v10334_v53, %v10334_v53  ;;  %v3651_v53 = vsel %vm2847_vm1, %v3444_v41, 0.0  ;;  %v10349_v41 = vld [vmem:[#allocation46_spill] sm:$0xff] }
 0x3ca   : > { %3601 = vadd.xlane.f32.xlu1 %v3600_v4  ;;  %v3624_v4 = vadd.f32 %v3623_v27, %v3429_v61  ;;  %v10336_v61 = vld [vmem:[#allocation33_spill] sm:$0xff] }
 0x3cb   : > { %3597 = vadd.xlane.f32.xlu0 %v3596_v7  ;;  %v8068_v48 = vpop.xlane.xlu1 %3193 }
 0x3cc   : > { %v8075_v55 = vpop.xlane.xlu0 %3189 }
 0x3ce   : > { %3609 = vadd.xlane.f32.xlu1 %v3608_v50  ;;  %v10332_v50 = vld [vmem:[#allocation29_spill] sm:$0xff] }
 0x3cf   : > { %3605 = vadd.xlane.f32.xlu0 %v3604_v57  ;;  %v8082_v63 = vpop.xlane.xlu1 %3201  ;;  %v3436_v47 = vmul.f32 %v10332_v50, %v10332_v50  ;;  %v10333_v57 = vld [vmem:[#allocation30_spill] sm:$0xff] }
 0x3d0   : > { %v8089_v17 = vpop.xlane.xlu0 %3197  ;;  %v3437_v15 = vmul.f32 %v10333_v57, %v10333_v57 }
 0x3d1   : > { %v3635_v30 = vsel %vm2847_vm1, %v3436_v47, 0.0 }
 0x3d2   : > { %3617 = vadd.xlane.f32.xlu1 %v3616_v21  ;;  %v3640_v27 = vadd.f32 %v3639_v60, %v3437_v15  ;;  %v3636_v13 = vadd.f32 %v3635_v30, %v3435_v19  ;;  %v10343_v15 = vld [vmem:[#allocation40_spill] sm:$0xff]  ;;  %v10344_v19 = vld [vmem:[#allocation41_spill] sm:$0xff]  ;;  %v10345_v30 = vld [vmem:[#allocation42_spill] sm:$0xff] }
 0x3d3   : > { %3613 = vadd.xlane.f32.xlu0 %v3612_v24  ;;  %v8096_v7 = vpop.xlane.xlu1 %3209  ;;  %v3440_v24 = vmul.f32 %v10336_v61, %v10336_v61  ;;  %v3448_v56 = vmul.f32 %v10344_v19, %v10344_v19  ;;  %v3449_v61 = vmul.f32 %v10345_v30, %v10345_v30  ;;  %v10352_v19 = vld [vmem:[#allocation49_spill] sm:$0xff]  ;;  %v10353_v30 = vld [vmem:[#allocation50_spill] sm:$0xff] }
 0x3d4   : > { %v8103_v26 = vpop.xlane.xlu0 %3205 }
 0x3d6   : > { %3625 = vadd.xlane.f32.xlu1 %v3624_v4  ;;  %v10339_v4 = vld [vmem:[#allocation36_spill] sm:$0xff] }
 0x3d7   : > { %3621 = vadd.xlane.f32.xlu0 %v3620_v34  ;;  %v8110_v51 = vpop.xlane.xlu1 %3217  ;;  %v3446_v3 = vmul.f32 %v10339_v4, %v10339_v4  ;;  %v3643_v34 = vsel %vm2847_vm1, %v3440_v24, 0.0  ;;  %v3659_v4 = vsel %vm2847_vm1, %v3448_v56, 0.0  ;;  %v3456_v56 = vmul.f32 %v10352_v19, %v10352_v19  ;;  %v10359_v19 = vld [vmem:[#allocation56_spill] sm:$0xff] }
 0x3d8   : > { %v8117_v21 = vpop.xlane.xlu0 %3213  ;;  %v3644_v50 = vadd.f32 %v3643_v34, %v3439_v25 }
 0x3d9   : > { %v3655_v47 = vsel %vm2847_vm1, %v3446_v3, 0.0  ;;  %v10348_v3 = vld [vmem:[#allocation45_spill] sm:$0xff] }
 0x3da   : > { %3633 = vadd.xlane.f32.xlu1 %v3632_v20  ;;  %v10342_v20 = vld [vmem:[#allocation39_spill] sm:$0xff]  ;;  %v3656_v59 = vadd.f32 %v3655_v47, %v3445_v49  ;;  %v3452_v34 = vmul.f32 %v10348_v3, %v10348_v3 }
 0x3db   : > { %3629 = vadd.xlane.f32.xlu0 %v3628_v10  ;;  %v8124_v29 = vpop.xlane.xlu1 %3225  ;;  %v3443_v57 = vmul.f32 %v10342_v20, %v10342_v20  ;;  %v3450_v10 = vmul.f32 %v10343_v15, %v10343_v15  ;;  %v10350_v47 = vld [vmem:[#allocation47_spill] sm:$0xff] }
 0x3dc   : > { %v8131_v28 = vpop.xlane.xlu0 %3221  ;;  %v3451_v20 = vmul.f32 %v10350_v47, %v10350_v47 }
 0x3dd   : > { %v3663_v9 = vsel %vm2847_vm1, %v3450_v10, 0.0 }
 0x3de   : > { %3641 = vadd.xlane.f32.xlu1 %v3640_v27  ;;  %v3652_v27 = vadd.f32 %v3651_v53, %v3443_v57  ;;  %v3664_v39 = vadd.f32 %v3663_v9, %v3449_v61  ;;  %v10351_v57 = vld [vmem:[#allocation48_spill] sm:$0xff]  ;;  %v3667_v53 = vsel %vm2847_vm1, %v3452_v34, 0.0  ;;  %v3457_v61 = vmul.f32 %v10353_v30, %v10353_v30 }
 0x3df   : > { %3637 = vadd.xlane.f32.xlu0 %v3636_v13  ;;  %v8138_v36 = vpop.xlane.xlu1 %3233  ;;  %v3447_v13 = vmul.f32 %v10346_v5, %v10346_v5  ;;  %v3458_v15 = vmul.f32 %v10351_v57, %v10351_v57  ;;  %v3668_v9 = vadd.f32 %v3667_v53, %v3451_v20  ;;  %v3675_v34 = vsel %vm2847_vm1, %v3456_v56, 0.0 }
 0x3e0   : > { %v8145_v60 = vpop.xlane.xlu0 %3229  ;;  %v3466_v56 = vmul.f32 %v10359_v19, %v10359_v19 }
 0x3e1   : > { %v3660_v49 = vadd.f32 %v3659_v4, %v3447_v13  ;;  %v3679_v5 = vsel %vm2847_vm1, %v3458_v15, 0.0  ;;  %v10354_v13 = vld [vmem:[#allocation51_spill] sm:$0xff] }
 0x3e2   : > { %3649 = vadd.xlane.f32.xlu1 %v3648_v40  ;;  %v3453_v40 = vmul.f32 %v10349_v41, %v10349_v41  ;;  %v3455_v18 = vmul.f32 %v10354_v13, %v10354_v13  ;;  %v10358_v15 = vld [vmem:[#allocation55_spill] sm:$0xff]  ;;  %v10361_v13 = vld [vmem:[#allocation58_spill] sm:$0xff] }
 0x3e3   : > { %3645 = vadd.xlane.f32.xlu0 %v3644_v50  ;;  %v8152_v24 = vpop.xlane.xlu1 %3241  ;;  %v3671_v50 = vsel %vm2847_vm1, %v3454_v32, 0.0  ;;  %v10355_v32 = vld [vmem:[#allocation52_spill] sm:$0xff]  ;;  %v3459_v53 = vmul.f32 %v10358_v15, %v10358_v15 }
 0x3e4   : > { %v8159_v25 = vpop.xlane.xlu0 %3237  ;;  %v3462_v4 = vmul.f32 %v10355_v32, %v10355_v32  ;;  %v3676_v20 = vadd.f32 %v3675_v34, %v3455_v18  ;;  %v3465_v18 = vmul.f32 %v10361_v13, %v10361_v13  ;;  %v3695_v34 = vsel %vm2847_vm1, %v3466_v56, 0.0  ;;  %v10364_v15 = vld [vmem:[#allocation60_spill] sm:$0xff] }
 0x3e6   : > { %3657 = vadd.xlane.f32.xlu1 %v3656_v59  ;;  %v3672_v59 = vadd.f32 %v3671_v50, %v3453_v40  ;;  %v3680_v40 = vadd.f32 %v3679_v5, %v3457_v61  ;;  %v3687_v57 = vsel %vm2847_vm1, %v3462_v4, 0.0  ;;  %v10360_v61 = vld [vmem:[#allocation57_spill] sm:$0xff] }
 0x3e7   : > { %3653 = vadd.xlane.f32.xlu0 %v3652_v27  ;;  %v8166_v2 = vpop.xlane.xlu1 %3249  ;;  %v3464_v5 = vmul.f32 %v10360_v61, %v10360_v61  ;;  %v10367_v61 = vld [vmem:[#allocation62_spill] sm:$0xff] }
 0x3e8   : > { %v8173_v10 = vpop.xlane.xlu0 %3245 }
 0x3ea   : > { %3665 = vadd.xlane.f32.xlu1 %v3664_v39  ;;  %v10356_v39 = vld [vmem:[#allocation53_spill] sm:$0xff] }
 0x3eb   : > { %3661 = vadd.xlane.f32.xlu0 %v3660_v49  ;;  %v8180_v27 = vpop.xlane.xlu1 %3257  ;;  %v3460_v41 = vmul.f32 %v10356_v39, %v10356_v39  ;;  %v10357_v49 = vld [vmem:[#allocation54_spill] sm:$0xff]  ;;  %v10363_v39 = vld [vmem:[#allocation59_spill] sm:$0xff] }
 0x3ec   : > { %v8187_v3 = vpop.xlane.xlu0 %3253  ;;  %v3461_v50 = vmul.f32 %v10357_v49, %v10357_v49  ;;  %v3463_v49 = vmul.f32 %v10363_v39, %v10363_v39  ;;  %v10369_v39 = vld [vmem:[#allocation63_spill] sm:$0xff] }
 0x3ee   : > { %3673 = vadd.xlane.f32.xlu1 %v3672_v59  ;;  %v3683_v59 = vsel %vm2847_vm1, %v3460_v41, 0.0  ;;  %v3470_v41 = vmul.f32 %v10364_v15, %v10364_v15  ;;  %v3467_v15 = vmul.f32 %v10369_v39, %v10369_v39  ;;  %v10375_v39 = vld [vmem:[#allocation67_spill] sm:$0xff] }
 0x3ef   : > { %3669 = vadd.xlane.f32.xlu0 %v3668_v9  ;;  %v8194_v47 = vpop.xlane.xlu1 %3265  ;;  %v3688_v9 = vadd.f32 %v3687_v57, %v3461_v50  ;;  %v3684_v4 = vadd.f32 %v3683_v59, %v3459_v53  ;;  %v10366_v50 = vld [vmem:[#allocation61_spill] sm:$0xff]  ;;  %v3469_v53 = vmul.f32 %v10367_v61, %v10367_v61 }
 0x3f0   : > { %v8201_v30 = vpop.xlane.xlu0 %3261  ;;  %v3468_v57 = vmul.f32 %v10366_v50, %v10366_v50  ;;  %v3703_v13 = vsel %vm2847_vm1, %v3470_v41, 0.0  ;;  %v10373_v50 = vld [vmem:[#allocation66_spill] sm:$0xff] }
 0x3f2   : > { %3681 = vadd.xlane.f32.xlu1 %v3680_v40  ;;  %v3691_v40 = vsel %vm2847_vm1, %v3464_v5, 0.0 }
 0x3f3   : > { %3677 = vadd.xlane.f32.xlu0 %v3676_v20  ;;  %v8208_v32 = vpop.xlane.xlu1 %3273  ;;  %v3696_v20 = vadd.f32 %v3695_v34, %v3465_v18  ;;  %v3692_v59 = vadd.f32 %v3691_v40, %v3463_v49  ;;  %v10372_v18 = vld [vmem:[#allocation65_spill] sm:$0xff]  ;;  %v3473_v49 = vmul.f32 %v10373_v50, %v10373_v50 }
 0x3f4   : > { %10362 = vst [vmem:[#allocation4_spill] sm:$0xff] %v8208_v32  ;;  %v8215_v19 = vpop.xlane.xlu0 %3269  ;;  %v3472_v34 = vmul.f32 %v10372_v18, %v10372_v18  ;;  %v10379_v18 = vld [vmem:[#allocation70_spill] sm:$0xff] }
 0x3f5   : > { %10365 = vst [vmem:[#allocation5_spill] sm:$0xff] %v8215_v19  ;;  %v10370_v19 = vld [vmem:[#allocation64_spill] sm:$0xff] }
 0x3f6   : > { %3689 = vadd.xlane.f32.xlu1 %v3688_v9  ;;  %v3474_v5 = vmul.f32 %v10370_v19, %v10370_v19  ;;  %v3699_v9 = vsel %vm2847_vm1, %v3468_v57, 0.0  ;;  %v3471_v19 = vmul.f32 %v10375_v39, %v10375_v39  ;;  %v10380_v39 = vld [vmem:[#allocation71_spill] sm:$0xff] }
 0x3f7   : > { %3685 = vadd.xlane.f32.xlu0 %v3684_v4  ;;  %v8222_v56 = vpop.xlane.xlu1 %3281  ;;  %v3704_v4 = vadd.f32 %v3703_v13, %v3469_v53  ;;  %v3700_v40 = vadd.f32 %v3699_v9, %v3467_v15  ;;  %v10378_v53 = vld [vmem:[#allocation69_spill] sm:$0xff]  ;;  %v3477_v15 = vmul.f32 %v10379_v18, %v10379_v18  ;;  %v10384_v18 = vld [vmem:[#allocation74_spill] sm:$0xff] }
 0x3f8   : > { %10368 = vst [vmem:[#allocation6_spill] sm:$0xff] %v8222_v56  ;;  %v8229_v32 = vpop.xlane.xlu0 %3277  ;;  %v3711_v61 = vsel %vm2847_vm1, %v3474_v5, 0.0  ;;  %v3476_v13 = vmul.f32 %v10378_v53, %v10378_v53 }
 0x3f9   : > { %10371 = vst [vmem:[#allocation7_spill] sm:$0xff] %v8229_v32  ;;  %v10376_v32 = vld [vmem:[#allocation68_spill] sm:$0xff] }
 0x3fa   : > { %3697 = vadd.xlane.f32.xlu1 %v3696_v20  ;;  %v3478_v57 = vmul.f32 %v10376_v32, %v10376_v32  ;;  %v3707_v20 = vsel %vm2847_vm1, %v3472_v34, 0.0  ;;  %v3475_v32 = vmul.f32 %v10380_v39, %v10380_v39  ;;  %v10385_v39 = vld [vmem:[#allocation75_spill] sm:$0xff] }
 0x3fb   : > { %3693 = vadd.xlane.f32.xlu0 %v3692_v59  ;;  %v8236_v41 = vpop.xlane.xlu1 %3289  ;;  %v3712_v59 = vadd.f32 %v3711_v61, %v3473_v49  ;;  %v3708_v9 = vadd.f32 %v3707_v20, %v3471_v19  ;;  %v10383_v49 = vld [vmem:[#allocation73_spill] sm:$0xff]  ;;  %v3481_v19 = vmul.f32 %v7834_v52, %v7834_v52 }
 0x3fc   : > { %10374 = vst [vmem:[#allocation8_spill] sm:$0xff] %v8236_v41  ;;  %v8243_v56 = vpop.xlane.xlu0 %3285  ;;  %v3719_v50 = vsel %vm2847_vm1, %v3478_v57, 0.0  ;;  %v3480_v61 = vmul.f32 %v10383_v49, %v10383_v49  ;;  %v10388_v49 = vld [vmem:[#allocation77_spill] sm:$0xff] }
 0x3fd   : > { %10377 = vst [vmem:[#allocation9_spill] sm:$0xff] %v8243_v56  ;;  %v10381_v56 = vld [vmem:[#allocation72_spill] sm:$0xff] }
 0x3fe   : > { %3705 = vadd.xlane.f32.xlu1 %v3704_v4  ;;  %v3482_v34 = vmul.f32 %v10381_v56, %v10381_v56  ;;  %v3715_v4 = vsel %vm2847_vm1, %v3476_v13, 0.0  ;;  %v3479_v56 = vmul.f32 %v10384_v18, %v10384_v18  ;;  %v3486_v13 = vmul.f32 %v10385_v39, %v10385_v39  ;;  %v10389_v39 = vld [vmem:[#allocation78_spill] sm:$0xff] }
 0x3ff   : > { %3701 = vadd.xlane.f32.xlu0 %v3700_v40  ;;  %v8250_v5 = vpop.xlane.xlu1 %3297  ;;  %v3720_v40 = vadd.f32 %v3719_v50, %v3477_v15  ;;  %v3716_v20 = vadd.f32 %v3715_v4, %v3475_v32  ;;  %v10387_v15 = vld [vmem:[#allocation76_spill] sm:$0xff]  ;;  %v3483_v18 = vmul.f32 %v10388_v49, %v10388_v49 }
 0x400   : > { %v8257_v41 = vpop.xlane.xlu0 %3293  ;;  %v3727_v53 = vsel %vm2847_vm1, %v3482_v34, 0.0  ;;  %v3484_v50 = vmul.f32 %v10387_v15, %v10387_v15  ;;  %v3735_v4 = vsel %vm2847_vm1, %v3486_v13, 0.0  ;;  %v3487_v15 = vmul.f32 %v7868_v58, %v7868_v58 }
 0x401   : > { %10382 = vst [vmem:[#allocation10_spill] sm:$0xff] %v8257_v41  ;;  %v3728_v52 = vadd.f32 %v3727_v53, %v3481_v19  ;;  %v10390_v19 = vld [vmem:[#allocation79_spill] sm:$0xff] }
 0x402   : > { %3713 = vadd.xlane.f32.xlu1 %v3712_v59  ;;  %v3723_v59 = vsel %vm2847_vm1, %v3480_v61, 0.0  ;;  %v3490_v61 = vmul.f32 %v10389_v39, %v10389_v39  ;;  %v3488_v53 = vmul.f32 %v10390_v19, %v10390_v19 }
 0x403   : > { %3709 = vadd.xlane.f32.xlu0 %v3708_v9  ;;  %v8264_v57 = vpop.xlane.xlu1 %3305  ;;  %v3485_v9 = vmul.f32 %v7848_v22, %v7848_v22  ;;  %v3724_v34 = vadd.f32 %v3723_v59, %v3479_v56 }
 0x404   : > { %v8271_v41 = vpop.xlane.xlu0 %3301  ;;  %v3743_v59 = vsel %vm2847_vm1, %v3490_v61, 0.0 }
 0x405   : > { %10386 = vst [vmem:[#allocation11_spill] sm:$0xff] %v8271_v41  ;;  %v3736_v22 = vadd.f32 %v3735_v4, %v3485_v9 }
 0x406   : > { %3721 = vadd.xlane.f32.xlu1 %v3720_v40  ;;  %v3731_v40 = vsel %vm2847_vm1, %v3484_v50, 0.0  ;;  %v3739_v50 = vsel %vm2847_vm1, %v3488_v53, 0.0  ;;  %v8319_v53 = vmul.f32 0.0051020407, %v7949_v1 }
 0x407   : > { %3717 = vadd.xlane.f32.xlu0 %v3716_v20  ;;  %v8278_v32 = vpop.xlane.xlu1 %3313  ;;  %v3489_v20 = vmul.f32 %v7862_v54, %v7862_v54  ;;  %v3732_v13 = vadd.f32 %v3731_v40, %v3483_v18  ;;  %v3740_v9 = vadd.f32 %v3739_v50, %v3487_v15 }
 0x408   : > { %v8285_v41 = vpop.xlane.xlu0 %3309  ;;  %10398 = vst [vmem:[#allocation19_spill] sm:$0xff] %v8319_v53  ;;  %v3876_v15 = vmul.f32 %v8319_v53, %v8319_v53  ;;  %v8342_v53 = vmul.f32 0.0051020407, %v7963_v14 }
 0x409   : > { %v3744_v39 = vadd.f32 %v3743_v59, %v3489_v20  ;;  %v8324_v20 = vmul.f32 0.0051020407, %v7935_v46  ;;  %v8327_v59 = vmul.f32 0.0051020407, %v7942_v6  ;;  %v8337_v46 = vmul.f32 0.0051020407, %v7956_v16 }
 0x40a   : > { %3729 = vadd.xlane.f32.xlu1 %v3728_v52  ;;  %10404 = vst [vmem:[#allocation25_spill] sm:$0xff] %v8342_v53  ;;  %v3879_v14 = vmul.f32 %v8342_v53, %v8342_v53 }
 0x40b   : > { %3725 = vadd.xlane.f32.xlu0 %v3724_v34  ;;  %v8292_v56 = vpop.xlane.xlu1 %3321  ;;  %10400 = vst [vmem:[#allocation21_spill] sm:$0xff] %v8324_v20  ;;  %10401 = vst [vmem:[#allocation22_spill] sm:$0xff] %v8327_v59  ;;  %v3875_v1 = vmul.f32 %v8324_v20, %v8324_v20  ;;  %v3878_v6 = vmul.f32 %v8327_v59, %v8327_v59  ;;  %v3880_v16 = vmul.f32 %v8337_v46, %v8337_v46 }
 0x40c   : > { %v8297_v49 = vpop.xlane.xlu0 %3317  ;;  %10403 = vst [vmem:[#allocation24_spill] sm:$0xff] %v8337_v46 }
 0x40e   : > { %3737 = vadd.xlane.f32.xlu1 %v3736_v22 }
 0x40f   : > { %3733 = vadd.xlane.f32.xlu0 %v3732_v13  ;;  %v8300_v52 = vpop.xlane.xlu1 %3329 }
 0x410   : > { %v8302_v54 = vpop.xlane.xlu0 %3325 }
 0x412   : > { %3745 = vadd.xlane.f32.xlu1 %v3744_v39 }
 0x413   : > { %3741 = vadd.xlane.f32.xlu0 %v3740_v9  ;;  %v8304_v34 = vpop.xlane.xlu1 %3337  ;;  %v8332_v9 = vmul.f32 0.0051020407, %v7928_v8 }
 0x414   : > { %10391 = vst [vmem:[#allocation12_spill] sm:$0xff] %v8304_v34  ;;  %v8306_v4 = vpop.xlane.xlu0 %3333  ;;  %v8351_v34 = vmul.f32 0.0051020407, %v7977_v12 }
 0x415   : > { %10392 = vst [vmem:[#allocation13_spill] sm:$0xff] %v8306_v4  ;;  %10402 = vst [vmem:[#allocation23_spill] sm:$0xff] %v8332_v9 }
 0x416   : > { %10405 = vst [vmem:[#allocation26_spill] sm:$0xff] %v8351_v34 }
 0x417   : > { %v8308_v18 = vpop.xlane.xlu1 %3345 }
 0x418   : > { %10393 = vst [vmem:[#allocation14_spill] sm:$0xff] %v8308_v18  ;;  %v8310_v58 = vpop.xlane.xlu0 %3341  ;;  %v3877_v18 = vmul.f32 %v8332_v9, %v8332_v9 }
 0x419   : > { %10394 = vst [vmem:[#allocation15_spill] sm:$0xff] %v8310_v58 }
 0x41b   : > { %v8312_v61 = vpop.xlane.xlu1 %3353 }
 0x41c   : > { %10395 = vst [vmem:[#allocation16_spill] sm:$0xff] %v8312_v61  ;;  %v8314_v40 = vpop.xlane.xlu0 %3349 }
 0x41d   : > { %10396 = vst [vmem:[#allocation17_spill] sm:$0xff] %v8314_v40 }
 0x41f   : > { %v8316_v19 = vpop.xlane.xlu1 %3361 }
 0x420   : > { %10397 = vst [vmem:[#allocation18_spill] sm:$0xff] %v8316_v19  ;;  %v8321_v22 = vpop.xlane.xlu0 %3357 }
 0x421   : > { %10399 = vst [vmem:[#allocation20_spill] sm:$0xff] %v8321_v22 }
 0x423   : > { %v3498_v13 = vpop.xlane.xlu1 %3497 }
 0x424   : > { %v3812_v50 = vmul.f32 0.0051020407, %v3498_v13  ;;  %v3494_v39 = vpop.xlane.xlu0 %3493 }
 0x425   : > { %v3811_v40 = vmul.f32 0.0051020407, %v3494_v39 }
 0x426   : > { %v3940_v22 = vsub.f32 %v3812_v50, %v3876_v15 }
 0x427   : > { %v3939_v19 = vsub.f32 %v3811_v40, %v3875_v1  ;;  %v3506_v58 = vpop.xlane.xlu1 %3505 }
 0x428   : > { %v4004_v13 = vmax.f32 %v3940_v22, 0.0  ;;  %v3814_v61 = vmul.f32 0.0051020407, %v3506_v58  ;;  %v3502_v8 = vpop.xlane.xlu0 %3501 }
 0x429   : > { %v4003_v20 = vmax.f32 %v3939_v19, 0.0  ;;  %v3813_v39 = vmul.f32 0.0051020407, %v3502_v8 }
 0x42a   : > { %v4068_v15 = vadd.f32 1e-05, %v4004_v13  ;;  %v3942_v50 = vsub.f32 %v3814_v61, %v3878_v6 }
 0x42b   : > { %v4067_v40 = vadd.f32 1e-05, %v4003_v20  ;;  %v3941_v1 = vsub.f32 %v3813_v39, %v3877_v18  ;;  %v3514_v4 = vpop.xlane.xlu1 %3513  ;;  %v8354_v18 = vmul.f32 0.0051020407, %v7970_v23  ;;  %v8357_v39 = vmul.f32 0.0051020407, %v7984_v42 }
 0x42c   : > { %5774 = vrsqrt.f32 %v4068_v15  ;;  %v4006_v22 = vmax.f32 %v3942_v50, 0.0  ;;  %v3816_v58 = vmul.f32 0.0051020407, %v3514_v4  ;;  %v3510_v59 = vpop.xlane.xlu0 %3509  ;;  %v3881_v4 = vmul.f32 %v8351_v34, %v8351_v34 }
 0x42d   : > { %5776 = vrsqrt.f32 %v4067_v40  ;;  %v4005_v19 = vmax.f32 %v3941_v1, 0.0  ;;  %v3815_v13 = vmul.f32 0.0051020407, %v3510_v59  ;;  %10406 = vst [vmem:[#allocation27_spill] sm:$0xff] %v8354_v18  ;;  %10407 = vst [vmem:[#allocation28_spill] sm:$0xff] %v8357_v39  ;;  %v3882_v23 = vmul.f32 %v8354_v18, %v8354_v18 }
 0x42e   : > { %v3944_v61 = vsub.f32 %v3816_v58, %v3880_v16  ;;  %v4070_v6 = vadd.f32 1e-05, %v4006_v22  ;;  %v3884_v42 = vmul.f32 %v8357_v39, %v8357_v39  ;;  %v8366_v22 = vmul.f32 0.0051020407, %v7998_v35 }
 0x42f   : > { %v4069_v8 = vadd.f32 1e-05, %v4005_v19  ;;  %v3943_v9 = vsub.f32 %v3815_v13, %v3879_v14  ;;  %v3522_v20 = vpop.xlane.xlu1 %3521  ;;  %v8372_v13 = vmul.f32 0.0051020407, %v7991_v11 }
 0x430   : > { %v3518_v15 = vpop.xlane.xlu0 %3517  ;;  %v4008_v40 = vmax.f32 %v3944_v61, 0.0  ;;  %v3818_v59 = vmul.f32 0.0051020407, %v3522_v20  ;;  %v4195_v61 = vld [vmem:[%s10061_s3] sm:$0xff]  ;;  %v3886_v11 = vmul.f32 %v8366_v22, %v8366_v22 }
 0x431   : > { %5778 = vrsqrt.f32 %v4069_v8  ;;  %v4007_v12 = vmax.f32 %v3943_v9, 0.0  ;;  %v3817_v50 = vmul.f32 0.0051020407, %v3518_v15  ;;  %v4196_v9 = vld [vmem:[%s10061_s3 + $0x8] sm:$0xff]  ;;  %10408 = vst [vmem:[#allocation29_spill] sm:$0xff] %v8372_v13 }
 0x432   : > { %5780 = vrsqrt.f32 %v4070_v6  ;;  %v8378_v8 = vmul.f32 0.0051020407, %v8012_v44  ;;  %v4072_v20 = vadd.f32 1e-05, %v4008_v40  ;;  %v3946_v35 = vsub.f32 %v3818_v59, %v3882_v23 }
 0x433   : > { %v4071_v16 = vadd.f32 1e-05, %v4007_v12  ;;  %v3945_v1 = vsub.f32 %v3817_v50, %v3881_v4  ;;  %v3530_v14 = vpop.xlane.xlu1 %3529  ;;  %v3883_v44 = vmul.f32 %v8372_v13, %v8372_v13  ;;  %v8389_v40 = vmul.f32 0.0051020407, %v8005_v37 }
 0x434   : > { %v3820_v58 = vmul.f32 0.0051020407, %v3530_v14  ;;  %v3526_v19 = vpop.xlane.xlu0 %3525  ;;  %v8392_v59 = vmul.f32 0.0051020407, %v8026_v62  ;;  %v4010_v23 = vmax.f32 %v3946_v35, 0.0 }
 0x435   : > { %5782 = vrsqrt.f32 %v4071_v16  ;;  %v4009_v12 = vmax.f32 %v3945_v1, 0.0  ;;  %v3819_v50 = vmul.f32 0.0051020407, %v3526_v19  ;;  %10409 = vst [vmem:[#allocation30_spill] sm:$0xff] %v8389_v40  ;;  %v4197_v16 = vld [vmem:[%s10061_s3 + $0x10] sm:$0xff]  ;;  %v3888_v1 = vmul.f32 %v8378_v8, %v8378_v8 }
 0x436   : > { %v5775_v6 = vpop.eup %5774  ;;  %v3948_v15 = vsub.f32 %v3820_v58, %v3884_v42  ;;  %10410 = vst [vmem:[#allocation31_spill] sm:$0xff] %v8392_v59  ;;  %5784 = vrsqrt.f32 %v4072_v20  ;;  %v3885_v35 = vmul.f32 %v8389_v40, %v8389_v40  ;;  %v8411_v20 = vmul.f32 0.0051020407, %v8033_v38 }
 0x437   : > { %v5777_v4 = vpop.eup %5776  ;;  %v3538_v14 = vpop.xlane.xlu1 %3537  ;;  %v8380_v34 = vmul.f32 %v5775_v6, %v4196_v9  ;;  %v4073_v37 = vadd.f32 1e-05, %v4009_v12  ;;  %v3947_v9 = vsub.f32 %v3819_v50, %v3883_v44  ;;  %v8417_v12 = vmul.f32 0.0051020407, %v8040_v0 }
 0x438   : > { %v4012_v53 = vmax.f32 %v3948_v15, 0.0  ;;  %v3822_v39 = vmul.f32 0.0051020407, %v3538_v14  ;;  %v3534_v18 = vpop.xlane.xlu0 %3533  ;;  %v8384_v46 = vmul.f32 %v5777_v4, %v4195_v61  ;;  %10412 = vst [vmem:[#allocation33_spill] sm:$0xff] %v8411_v20  ;;  %v4074_v50 = vadd.f32 1e-05, %v4010_v23 }
 0x439   : > { %4522 = vperm.xlu1 %5773, %v8380_v34   ;;  %v3821_v62 = vmul.f32 0.0051020407, %v3534_v18  ;;  %v4198_v18 = vld [vmem:[%s10061_s3 + $0x18] sm:$0xff]  ;;  %v8427_v23 = vmul.f32 0.0051020407, %v8047_v31 }
 0x43a   : > { %v4076_v42 = vadd.f32 1e-05, %v4012_v53  ;;  %v3950_v58 = vsub.f32 %v3822_v39, %v3886_v11  ;;  %4517 = vperm.xlu0 %5772, %v8384_v46   ;;  %v8406_v53 = vmul.f32 0.0051020407, %v8019_v45  ;;  %v3890_v39 = vmul.f32 %v8392_v59, %v8392_v59 }
 0x43b   : > { %v5779_v19 = vpop.eup %5778  ;;  %v3546_v61 = vpop.xlane.xlu1 %3545  ;;  %v4011_v45 = vmax.f32 %v3947_v9, 0.0  ;;  %10413 = vst [vmem:[#allocation34_spill] sm:$0xff] %v8427_v23  ;;  %v4199_v9 = vld [vmem:[%s10061_s3 + $0x20] sm:$0xff] }
 0x43c   : > { %5786 = vrsqrt.f32 %v4076_v42  ;;  %v4014_v6 = vmax.f32 %v3950_v58, 0.0  ;;  %v3824_v15 = vmul.f32 0.0051020407, %v3546_v61  ;;  %v3542_v4 = vpop.xlane.xlu0 %3541  ;;  %v8401_v14 = vmul.f32 %v5779_v19, %v4197_v16  ;;  %v5781_v13 = vpop.eup %5780  ;;  %10411 = vst [vmem:[#allocation32_spill] sm:$0xff] %v8406_v53 }
 0x43d   : > { %5788 = vrsqrt.f32 %v4073_v37  ;;  %v3949_v16 = vsub.f32 %v3821_v62, %v3885_v35  ;;  %v3823_v42 = vmul.f32 0.0051020407, %v3542_v4  ;;  %v8420_v40 = vmul.f32 %v5781_v13, %v4198_v18 }
 0x43e   : > { %v4078_v11 = vadd.f32 1e-05, %v4014_v6  ;;  %v3952_v44 = vsub.f32 %v3824_v15, %v3888_v1  ;;  %4527 = vperm.xlu1 %5773, %v8401_v14   ;;  %v3887_v0 = vmul.f32 %v8406_v53, %v8406_v53  ;;  %v3889_v1 = vmul.f32 %v8411_v20, %v8411_v20  ;;  %v4204_v20 = vld [vmem:[%s10061_s3 + $0x48] sm:$0xff] }
 0x43f   : > { %v3554_v58 = vpop.xlane.xlu1 %3553  ;;  %v5783_v59 = vpop.eup %5782  ;;  %v8430_v37 = vmul.f32 0.0051020407, %v8054_v33  ;;  %v3892_v13 = vmul.f32 %v8417_v12, %v8417_v12  ;;  %v4075_v4 = vadd.f32 1e-05, %v4011_v45  ;;  %v4013_v35 = vmax.f32 %v3949_v16, 0.0 }
 0x440   : > { %5790 = vrsqrt.f32 %v4078_v11  ;;  %v4016_v38 = vmax.f32 %v3952_v44, 0.0  ;;  %v3826_v19 = vmul.f32 0.0051020407, %v3554_v58  ;;  %v3550_v61 = vpop.xlane.xlu0 %3549  ;;  %v3951_v31 = vsub.f32 %v3823_v42, %v3887_v0 }
 0x441   : > { %10414 = vst [vmem:[#allocation35_spill] sm:$0xff] %v8430_v37  ;;  %v3825_v15 = vmul.f32 0.0051020407, %v3550_v61  ;;  %5792 = vrsqrt.f32 %v4074_v50  ;;  %v8438_v58 = vmul.f32 %v5783_v59, %v4199_v9  ;;  %v3894_v50 = vmul.f32 %v8430_v37, %v8430_v37  ;;  %v4200_v59 = vld [vmem:[%s10061_s3 + $0x28] sm:$0xff] }
 0x442   : > { %v4080_v62 = vadd.f32 1e-05, %v4016_v38  ;;  %v3954_v6 = vsub.f32 %v3826_v19, %v3890_v39  ;;  %4532 = vperm.xlu1 %5773, %v8420_v40   ;;  %v5785_v38 = vpop.eup %5784  ;;  %v3891_v39 = vmul.f32 %v8427_v23, %v8427_v23  ;;  %v8448_v45 = vmul.f32 0.0051020407, %v8061_v43 }
 0x443   : > { %v3562_v18 = vpop.xlane.xlu1 %3561  ;;  %v8451_v16 = vmul.f32 0.0051020407, %v8068_v48  ;;  %v3953_v61 = vsub.f32 %v3825_v15, %v3889_v1  ;;  %v8459_v37 = vmul.f32 %v5785_v38, %v4200_v59  ;;  %v4206_v1 = vld [vmem:[%s10061_s3 + $0x58] sm:$0xff] }
 0x444   : > { %5794 = vrsqrt.f32 %v4080_v62  ;;  %v4018_v33 = vmax.f32 %v3954_v6, 0.0  ;;  %v3828_v11 = vmul.f32 0.0051020407, %v3562_v18  ;;  %v3558_v44 = vpop.xlane.xlu0 %3557  ;;  %10415 = vst [vmem:[#allocation36_spill] sm:$0xff] %v8448_v45  ;;  %v4077_v62 = vadd.f32 1e-05, %v4013_v35 }
 0x445   : > { %10416 = vst [vmem:[#allocation37_spill] sm:$0xff] %v8451_v16  ;;  %v3827_v9 = vmul.f32 0.0051020407, %v3558_v44  ;;  %5796 = vrsqrt.f32 %v4075_v4  ;;  %v4015_v6 = vmax.f32 %v3951_v31, 0.0  ;;  %v3893_v15 = vmul.f32 %v8448_v45, %v8448_v45  ;;  %v4201_v31 = vld [vmem:[%s10061_s3 + $0x30] sm:$0xff] }
 0x446   : > { %v5787_v42 = vpop.eup %5786  ;;  %v4082_v19 = vadd.f32 1e-05, %v4018_v33  ;;  %v3956_v0 = vsub.f32 %v3828_v11, %v3892_v13  ;;  %4537 = vperm.xlu1 %5773, %v8438_v58   ;;  %v3896_v4 = vmul.f32 %v8451_v16, %v8451_v16  ;;  %v8472_v35 = vmul.f32 0.0051020407, %v8082_v63 }
 0x447   : > { %v3570_v18 = vpop.xlane.xlu1 %3569  ;;  %v8457_v43 = vmul.f32 %v5787_v42, %v4204_v20  ;;  %v5789_v13 = vpop.eup %5788  ;;  %v8469_v20 = vmul.f32 0.0051020407, %v8075_v55  ;;  %v4017_v11 = vmax.f32 %v3953_v61, 0.0  ;;  %v3955_v38 = vsub.f32 %v3827_v9, %v3891_v39  ;;  %v4208_v61 = vld [vmem:[%s10061_s3 + $0x68] sm:$0xff] }
 0x448   : > { %5798 = vrsqrt.f32 %v4082_v19  ;;  %v4020_v48 = vmax.f32 %v3956_v0, 0.0  ;;  %v3830_v23 = vmul.f32 0.0051020407, %v3570_v18  ;;  %v3566_v53 = vpop.xlane.xlu0 %3565  ;;  %10418 = vst [vmem:[#allocation39_spill] sm:$0xff] %v8472_v35  ;;  %v4079_v42 = vadd.f32 1e-05, %v4015_v6 }
 0x449   : > { %10417 = vst [vmem:[#allocation38_spill] sm:$0xff] %v8469_v20  ;;  %4562 = vperm.xlu0 %5772, %v8457_v43   ;;  %5800 = vrsqrt.f32 %v4077_v62  ;;  %v3829_v55 = vmul.f32 0.0051020407, %v3566_v53  ;;  %v8481_v16 = vmul.f32 %v5789_v13, %v4201_v31  ;;  %v3898_v53 = vmul.f32 %v8472_v35, %v8472_v35  ;;  %v4202_v62 = vld [vmem:[%s10061_s3 + $0x38] sm:$0xff] }
 0x44a   : > { %v5791_v33 = vpop.eup %5790  ;;  %v4084_v44 = vadd.f32 1e-05, %v4020_v48  ;;  %v3958_v59 = vsub.f32 %v3830_v23, %v3894_v50  ;;  %4542 = vperm.xlu1 %5773, %v8459_v37   ;;  %v3895_v23 = vmul.f32 %v8469_v20, %v8469_v20  ;;  %v8491_v50 = vmul.f32 0.0051020407, %v8089_v17 }
 0x44b   : > { %v3578_v19 = vpop.xlane.xlu1 %3577  ;;  %v8479_v0 = vmul.f32 %v5791_v33, %v4206_v1  ;;  %v5793_v39 = vpop.eup %5792  ;;  %v8494_v9 = vmul.f32 0.0051020407, %v8096_v7  ;;  %v4081_v48 = vadd.f32 1e-05, %v4017_v11  ;;  %v4019_v1 = vmax.f32 %v3955_v38, 0.0  ;;  %v4210_v11 = vld [vmem:[%s10061_s3 + $0x78] sm:$0xff] }
 0x44c   : > { %5802 = vrsqrt.f32 %v4084_v44  ;;  %v4022_v63 = vmax.f32 %v3958_v59, 0.0  ;;  %v3832_v18 = vmul.f32 0.0051020407, %v3578_v19  ;;  %v3574_v45 = vpop.xlane.xlu0 %3573  ;;  %10419 = vst [vmem:[#allocation40_spill] sm:$0xff] %v8491_v50  ;;  %v3957_v33 = vsub.f32 %v3829_v55, %v3893_v15  ;;  %v4203_v55 = vld [vmem:[%s10061_s3 + $0x40] sm:$0xff] }
 0x44d   : > { %10420 = vst [vmem:[#allocation41_spill] sm:$0xff] %v8494_v9  ;;  %4572 = vperm.xlu0 %5772, %v8479_v0   ;;  %5804 = vrsqrt.f32 %v4079_v42  ;;  %v3831_v17 = vmul.f32 0.0051020407, %v3574_v45  ;;  %v8503_v35 = vmul.f32 %v5793_v39, %v4202_v62  ;;  %v3900_v45 = vmul.f32 %v8494_v9, %v8494_v9 }
 0x44e   : > { %v5795_v6 = vpop.eup %5794  ;;  %v4086_v13 = vadd.f32 1e-05, %v4022_v63  ;;  %v3960_v31 = vsub.f32 %v3832_v18, %v3896_v4  ;;  %4547 = vperm.xlu1 %5773, %v8481_v16   ;;  %v3897_v4 = vmul.f32 %v8491_v50, %v8491_v50  ;;  %v8513_v15 = vmul.f32 0.0051020407, %v8103_v26 }
 0x44f   : > { %v3586_v44 = vpop.xlane.xlu1 %3585  ;;  %v8501_v59 = vmul.f32 %v5795_v6, %v4208_v61  ;;  %v5797_v38 = vpop.eup %5796  ;;  %v8516_v42 = vmul.f32 0.0051020407, %v8110_v51  ;;  %v4083_v18 = vadd.f32 1e-05, %v4019_v1  ;;  %v4021_v62 = vmax.f32 %v3957_v33, 0.0 }
 0x450   : > { %5806 = vrsqrt.f32 %v4086_v13  ;;  %v4024_v7 = vmax.f32 %v3960_v31, 0.0  ;;  %v3834_v19 = vmul.f32 0.0051020407, %v3586_v44  ;;  %v3582_v20 = vpop.xlane.xlu0 %3581  ;;  %10421 = vst [vmem:[#allocation42_spill] sm:$0xff] %v8513_v15  ;;  %v3959_v6 = vsub.f32 %v3831_v17, %v3895_v23  ;;  %v4205_v17 = vld [vmem:[%s10061_s3 + $0x50] sm:$0xff] }
 0x451   : > { %10422 = vst [vmem:[#allocation43_spill] sm:$0xff] %v8516_v42  ;;  %4582 = vperm.xlu0 %5772, %v8501_v59   ;;  %5808 = vrsqrt.f32 %v4081_v48  ;;  %v3833_v26 = vmul.f32 0.0051020407, %v3582_v20  ;;  %v8525_v9 = vmul.f32 %v5797_v38, %v4203_v55  ;;  %v4212_v48 = vld [vmem:[%s10061_s3 + $0x88] sm:$0xff]  ;;  %v3902_v20 = vmul.f32 %v8516_v42, %v8516_v42 }
 0x452   : > { %v5799_v63 = vpop.eup %5798  ;;  %v4088_v61 = vadd.f32 1e-05, %v4024_v7  ;;  %v3962_v39 = vsub.f32 %v3834_v19, %v3898_v53  ;;  %4552 = vperm.xlu1 %5773, %v8503_v35   ;;  %v3899_v53 = vmul.f32 %v8513_v15, %v8513_v15  ;;  %v8535_v23 = vmul.f32 0.0051020407, %v8117_v21 }
 0x453   : > { %v3594_v13 = vpop.xlane.xlu1 %3593  ;;  %v8523_v31 = vmul.f32 %v5799_v63, %v4210_v11  ;;  %v5801_v1 = vpop.eup %5800  ;;  %v8538_v33 = vmul.f32 0.0051020407, %v8124_v29  ;;  %v4085_v55 = vadd.f32 1e-05, %v4021_v62  ;;  %v4023_v63 = vmax.f32 %v3959_v6, 0.0 }
 0x454   : > { %5810 = vrsqrt.f32 %v4088_v61  ;;  %v4026_v51 = vmax.f32 %v3962_v39, 0.0  ;;  %v3836_v44 = vmul.f32 0.0051020407, %v3594_v13  ;;  %v3590_v50 = vpop.xlane.xlu0 %3589  ;;  %10423 = vst [vmem:[#allocation44_spill] sm:$0xff] %v8535_v23  ;;  %v3961_v21 = vsub.f32 %v3833_v26, %v3897_v4  ;;  %v4207_v26 = vld [vmem:[%s10061_s3 + $0x60] sm:$0xff] }
 0x455   : > { %10424 = vst [vmem:[#allocation45_spill] sm:$0xff] %v8538_v33  ;;  %4592 = vperm.xlu0 %5772, %v8523_v31   ;;  %5812 = vrsqrt.f32 %v4083_v18  ;;  %v3835_v38 = vmul.f32 0.0051020407, %v3590_v50  ;;  %v8547_v42 = vmul.f32 %v5801_v1, %v4205_v17  ;;  %v4214_v18 = vld [vmem:[%s10061_s3 + $0x98] sm:$0xff]  ;;  %v3901_v50 = vmul.f32 %v8535_v23, %v8535_v23 }
 0x456   : > { %v5803_v7 = vpop.eup %5802  ;;  %v4090_v19 = vadd.f32 1e-05, %v4026_v51  ;;  %v3964_v11 = vsub.f32 %v3836_v44, %v3900_v45  ;;  %4557 = vperm.xlu1 %5773, %v8525_v9   ;;  %v3904_v4 = vmul.f32 %v8538_v33, %v8538_v33  ;;  %v8557_v62 = vmul.f32 0.0051020407, %v8131_v28 }
 0x457   : > { %v3602_v61 = vpop.xlane.xlu1 %3601  ;;  %v8545_v39 = vmul.f32 %v5803_v7, %v4212_v48  ;;  %v5805_v45 = vpop.eup %5804  ;;  %v8560_v6 = vmul.f32 0.0051020407, %v8138_v36  ;;  %v3963_v48 = vsub.f32 %v3835_v38, %v3899_v53  ;;  %v4087_v7 = vadd.f32 1e-05, %v4023_v63  ;;  %v4216_v53 = vld [vmem:[%s10061_s3 + $0xa8] sm:$0xff]  ;;  %v4209_v63 = vld [vmem:[%s10061_s3 + $0x70] sm:$0xff] }
 0x458   : > { %5814 = vrsqrt.f32 %v4090_v19  ;;  %v4028_v29 = vmax.f32 %v3964_v11, 0.0  ;;  %v3838_v13 = vmul.f32 0.0051020407, %v3602_v61  ;;  %v3598_v15 = vpop.xlane.xlu0 %3597  ;;  %10426 = vst [vmem:[#allocation47_spill] sm:$0xff] %v8557_v62  ;;  %v4025_v28 = vmax.f32 %v3961_v21, 0.0 }
 0x459   : > { %10425 = vst [vmem:[#allocation46_spill] sm:$0xff] %v8545_v39  ;;  %10427 = vst [vmem:[#allocation48_spill] sm:$0xff] %v8560_v6  ;;  %4602 = vperm.xlu0 %5772, %v8545_v39   ;;  %v3837_v17 = vmul.f32 0.0051020407, %v3598_v15  ;;  %5816 = vrsqrt.f32 %v4085_v55  ;;  %v8569_v39 = vmul.f32 %v5805_v45, %v4207_v26  ;;  %v3903_v15 = vmul.f32 %v8557_v62, %v8557_v62 }
 0x45a   : > { %v5807_v51 = vpop.eup %5806  ;;  %v4092_v44 = vadd.f32 1e-05, %v4028_v29  ;;  %v3966_v1 = vsub.f32 %v3838_v13, %v3902_v20  ;;  %4567 = vperm.xlu1 %5773, %v8547_v42   ;;  %v3906_v20 = vmul.f32 %v8560_v6, %v8560_v6  ;;  %v8579_v38 = vmul.f32 0.0051020407, %v8145_v60 }
 0x45b   : > { %v3610_v19 = vpop.xlane.xlu1 %3609  ;;  %v8567_v11 = vmul.f32 %v5807_v51, %v4214_v18  ;;  %v5809_v36 = vpop.eup %5808  ;;  %v8582_v55 = vmul.f32 0.0051020407, %v8152_v24  ;;  %v4027_v29 = vmax.f32 %v3963_v48, 0.0  ;;  %v3965_v18 = vsub.f32 %v3837_v17, %v3901_v50  ;;  %v4218_v50 = vld [vmem:[%s10061_s3 + $0xb8] sm:$0xff]  ;;  %v4211_v17 = vld [vmem:[%s10061_s3 + $0x80] sm:$0xff] }
 0x45c   : > { %5818 = vrsqrt.f32 %v4092_v44  ;;  %v4030_v61 = vmax.f32 %v3966_v1, 0.0  ;;  %v3840_v23 = vmul.f32 0.0051020407, %v3610_v19  ;;  %v3606_v33 = vpop.xlane.xlu0 %3605  ;;  %10428 = vst [vmem:[#allocation49_spill] sm:$0xff] %v8579_v38  ;;  %v4089_v26 = vadd.f32 1e-05, %v4025_v28 }
 0x45d   : > { %10429 = vst [vmem:[#allocation50_spill] sm:$0xff] %v8582_v55  ;;  %4612 = vperm.xlu0 %5772, %v8567_v11   ;;  %5820 = vrsqrt.f32 %v4087_v7  ;;  %v3839_v60 = vmul.f32 0.0051020407, %v3606_v33  ;;  %v8591_v6 = vmul.f32 %v5809_v36, %v4209_v63  ;;  %v3908_v33 = vmul.f32 %v8582_v55, %v8582_v55 }
 0x45e   : > { %v5811_v21 = vpop.eup %5810  ;;  %v4094_v13 = vadd.f32 1e-05, %v4030_v61  ;;  %v3968_v45 = vsub.f32 %v3840_v23, %v3904_v4  ;;  %4577 = vperm.xlu1 %5773, %v8569_v39   ;;  %v3905_v23 = vmul.f32 %v8579_v38, %v8579_v38  ;;  %v8601_v4 = vmul.f32 0.0051020407, %v8159_v25 }
 0x45f   : > { %v3618_v51 = vpop.xlane.xlu1 %3617  ;;  %v8589_v44 = vmul.f32 %v5811_v21, %v4216_v53  ;;  %v5813_v24 = vpop.eup %5812  ;;  %v8604_v48 = vmul.f32 0.0051020407, %v8166_v2  ;;  %v4091_v28 = vadd.f32 1e-05, %v4027_v29  ;;  %v4029_v36 = vmax.f32 %v3965_v18, 0.0  ;;  %v4220_v29 = vld [vmem:[%s10061_s3 + $0xc8] sm:$0xff] }
 0x460   : > { %5822 = vrsqrt.f32 %v4094_v13  ;;  %v4032_v1 = vmax.f32 %v3968_v45, 0.0  ;;  %v3842_v19 = vmul.f32 0.0051020407, %v3618_v51  ;;  %v3614_v62 = vpop.xlane.xlu0 %3613  ;;  %10430 = vst [vmem:[#allocation51_spill] sm:$0xff] %v8601_v4  ;;  %v3967_v63 = vsub.f32 %v3839_v60, %v3903_v15  ;;  %v4213_v60 = vld [vmem:[%s10061_s3 + $0x90] sm:$0xff] }
 0x461   : > { %10431 = vst [vmem:[#allocation52_spill] sm:$0xff] %v8604_v48  ;;  %4622 = vperm.xlu0 %5772, %v8589_v44   ;;  %5824 = vrsqrt.f32 %v4089_v26  ;;  %v3841_v25 = vmul.f32 0.0051020407, %v3614_v62  ;;  %v8613_v38 = vmul.f32 %v5813_v24, %v4211_v17  ;;  %v3910_v62 = vmul.f32 %v8604_v48, %v8604_v48 }
 0x462   : > { %v5815_v7 = vpop.eup %5814  ;;  %v4096_v61 = vadd.f32 1e-05, %v4032_v1  ;;  %v3970_v53 = vsub.f32 %v3842_v19, %v3906_v20  ;;  %4587 = vperm.xlu1 %5773, %v8591_v6   ;;  %v3907_v20 = vmul.f32 %v8601_v4, %v8601_v4  ;;  %v8623_v15 = vmul.f32 0.0051020407, %v8173_v10 }
 0x463   : > { %v3626_v21 = vpop.xlane.xlu1 %3625  ;;  %v8611_v13 = vmul.f32 %v5815_v7, %v4218_v50  ;;  %v5817_v18 = vpop.eup %5816  ;;  %v8626_v26 = vmul.f32 0.0051020407, %v8180_v27  ;;  %v4093_v1 = vadd.f32 1e-05, %v4029_v36  ;;  %v4031_v17 = vmax.f32 %v3967_v63, 0.0 }
 0x464   : > { %5826 = vrsqrt.f32 %v4096_v61  ;;  %v4034_v2 = vmax.f32 %v3970_v53, 0.0  ;;  %v3844_v45 = vmul.f32 0.0051020407, %v3626_v21  ;;  %v3622_v51 = vpop.xlane.xlu0 %3621  ;;  %10432 = vst [vmem:[#allocation53_spill] sm:$0xff] %v8623_v15  ;;  %v3969_v7 = vsub.f32 %v3841_v25, %v3905_v23 }
 0x465   : > { %10433 = vst [vmem:[#allocation54_spill] sm:$0xff] %v8626_v26  ;;  %4632 = vperm.xlu0 %5772, %v8611_v13   ;;  %5828 = vrsqrt.f32 %v4091_v28  ;;  %v3843_v10 = vmul.f32 0.0051020407, %v3622_v51  ;;  %v8635_v48 = vmul.f32 %v5817_v18, %v4213_v60  ;;  %v4222_v28 = vld [vmem:[%s10061_s3 + $0xd8] sm:$0xff]  ;;  %v3912_v23 = vmul.f32 %v8626_v26, %v8626_v26 }
 0x466   : > { %v5819_v24 = vpop.eup %5818  ;;  %v4098_v19 = vadd.f32 1e-05, %v4034_v2  ;;  %v3972_v50 = vsub.f32 %v3844_v45, %v3908_v33  ;;  %4597 = vperm.xlu1 %5773, %v8613_v38   ;;  %v3909_v33 = vmul.f32 %v8623_v15, %v8623_v15  ;;  %v8645_v63 = vmul.f32 0.0051020407, %v8187_v3  ;;  %v4215_v2 = vld [vmem:[%s10061_s3 + $0xa0] sm:$0xff] }
 0x467   : > { %v3634_v61 = vpop.xlane.xlu1 %3633  ;;  %v8633_v53 = vmul.f32 %v5819_v24, %v4220_v29  ;;  %v5821_v36 = vpop.eup %5820  ;;  %v8648_v25 = vmul.f32 0.0051020407, %v8194_v47  ;;  %v4095_v60 = vadd.f32 1e-05, %v4031_v17  ;;  %v4033_v24 = vmax.f32 %v3969_v7, 0.0  ;;  %v10439_v7 = vld [vmem:[#allocation4_spill] sm:$0xff] }
 0x468   : > { %5830 = vrsqrt.f32 %v4098_v19  ;;  %v4036_v27 = vmax.f32 %v3972_v50, 0.0  ;;  %v3846_v21 = vmul.f32 0.0051020407, %v3634_v61  ;;  %v3630_v4 = vpop.xlane.xlu0 %3629  ;;  %10434 = vst [vmem:[#allocation55_spill] sm:$0xff] %v8645_v63  ;;  %v3971_v3 = vsub.f32 %v3843_v10, %v3907_v20 }
 0x469   : > { %10435 = vst [vmem:[#allocation56_spill] sm:$0xff] %v8648_v25  ;;  %4642 = vperm.xlu0 %5772, %v8633_v53   ;;  %5832 = vrsqrt.f32 %v4093_v1  ;;  %v3845_v18 = vmul.f32 0.0051020407, %v3630_v4  ;;  %v8657_v26 = vmul.f32 %v5821_v36, %v4215_v2  ;;  %v4224_v1 = vld [vmem:[%s10061_s3 + $0xe8] sm:$0xff]  ;;  %v3911_v4 = vmul.f32 %v8645_v63, %v8645_v63 }
 0x46a   : > { %v5823_v45 = vpop.eup %5822  ;;  %v4100_v51 = vadd.f32 1e-05, %v4036_v27  ;;  %v3974_v29 = vsub.f32 %v3846_v21, %v3910_v62  ;;  %4607 = vperm.xlu1 %5773, %v8635_v48   ;;  %v3914_v20 = vmul.f32 %v8648_v25, %v8648_v25  ;;  %v8667_v17 = vmul.f32 0.0051020407, %v8201_v30  ;;  %v4217_v27 = vld [vmem:[%s10061_s3 + $0xb0] sm:$0xff] }
 0x46b   : > { %v3642_v19 = vpop.xlane.xlu1 %3641  ;;  %v8655_v50 = vmul.f32 %v5823_v45, %v4222_v28  ;;  %10437 = vst [vmem:[#allocation58_spill] sm:$0xff] %v8657_v26  ;;  %v5825_v62 = vpop.eup %5824  ;;  %v8670_v10 = vmul.f32 0.0051020407, %v10439_v7  ;;  %v3973_v36 = vsub.f32 %v3845_v18, %v3909_v33  ;;  %v4035_v30 = vmax.f32 %v3971_v3, 0.0  ;;  %v4226_v33 = vld [vmem:[%s10061_s3 + $0xf8] sm:$0xff]  ;;  %v10442_v18 = vld [vmem:[#allocation5_spill] sm:$0xff] }
 0x46c   : > { %5834 = vrsqrt.f32 %v4100_v51  ;;  %v4038_v47 = vmax.f32 %v3974_v29, 0.0  ;;  %v3848_v61 = vmul.f32 0.0051020407, %v3642_v19  ;;  %v3638_v15 = vpop.xlane.xlu0 %3637  ;;  %10438 = vst [vmem:[#allocation59_spill] sm:$0xff] %v8667_v17  ;;  %v4097_v51 = vadd.f32 1e-05, %v4033_v24 }
 0x46d   : > { %10436 = vst [vmem:[#allocation57_spill] sm:$0xff] %v8655_v50  ;;  %10440 = vst [vmem:[#allocation60_spill] sm:$0xff] %v8670_v10  ;;  %4652 = vperm.xlu0 %5772, %v8655_v50   ;;  %v3847_v45 = vmul.f32 0.0051020407, %v3638_v15  ;;  %5836 = vrsqrt.f32 %v4095_v60  ;;  %v8679_v50 = vmul.f32 %v5825_v62, %v4217_v27  ;;  %v3913_v15 = vmul.f32 %v8667_v17, %v8667_v17  ;;  %v10444_v24 = vld [vmem:[#allocation6_spill] sm:$0xff] }
 0x46e   : > { %v5827_v21 = vpop.eup %5826  ;;  %v4102_v28 = vadd.f32 1e-05, %v4038_v47  ;;  %v3976_v2 = vsub.f32 %v3848_v61, %v3912_v23  ;;  %4617 = vperm.xlu1 %5773, %v8657_v26   ;;  %v3916_v23 = vmul.f32 %v8670_v10, %v8670_v10  ;;  %v8689_v60 = vmul.f32 0.0051020407, %v10442_v18  ;;  %v4219_v47 = vld [vmem:[%s10061_s3 + $0xc0] sm:$0xff] }
 0x46f   : > { %v3650_v29 = vpop.xlane.xlu1 %3649  ;;  %v8677_v19 = vmul.f32 %v5827_v21, %v4224_v1  ;;  %v5829_v7 = vpop.eup %5828  ;;  %v8692_v3 = vmul.f32 0.0051020407, %v10444_v24  ;;  %v4037_v1 = vmax.f32 %v3973_v36, 0.0  ;;  %v3975_v27 = vsub.f32 %v3847_v45, %v3911_v4  ;;  %v10447_v4 = vld [vmem:[#allocation7_spill] sm:$0xff]  ;;  %v10449_v36 = vld [vmem:[#allocation8_spill] sm:$0xff] }
 0x470   : > { %5838 = vrsqrt.f32 %v4102_v28  ;;  %v4040_v63 = vmax.f32 %v3976_v2, 0.0  ;;  %v3850_v25 = vmul.f32 0.0051020407, %v3650_v29  ;;  %v3646_v55 = vpop.xlane.xlu0 %3645  ;;  %10443 = vst [vmem:[#allocation62_spill] sm:$0xff] %v8689_v60  ;;  %v4099_v28 = vadd.f32 1e-05, %v4035_v30 }
 0x471   : > { %10441 = vst [vmem:[#allocation61_spill] sm:$0xff] %v8677_v19  ;;  %10445 = vst [vmem:[#allocation63_spill] sm:$0xff] %v8692_v3  ;;  %4662 = vperm.xlu0 %5772, %v8677_v19   ;;  %5840 = vrsqrt.f32 %v4097_v51  ;;  %v3849_v2 = vmul.f32 0.0051020407, %v3646_v55  ;;  %v8701_v26 = vmul.f32 %v5829_v7, %v4219_v47  ;;  %v3918_v55 = vmul.f32 %v8692_v3, %v8692_v3  ;;  %v4221_v51 = vld [vmem:[%s10061_s3 + $0xd0] sm:$0xff] }
 0x472   : > { %v5831_v61 = vpop.eup %5830  ;;  %v4104_v62 = vadd.f32 1e-05, %v4040_v63  ;;  %v3978_v21 = vsub.f32 %v3850_v25, %v3914_v20  ;;  %4627 = vperm.xlu1 %5773, %v8679_v50   ;;  %v4228_v63 = vld [vmem:[%s10061_s3 + $0x108] sm:$0xff]  ;;  %v3915_v25 = vmul.f32 %v8689_v60, %v8689_v60  ;;  %v8711_v20 = vmul.f32 0.0051020407, %v10447_v4 }
 0x473   : > { %v3658_v29 = vpop.xlane.xlu1 %3657  ;;  %v8699_v18 = vmul.f32 %v5831_v61, %v4226_v33  ;;  %v5833_v24 = vpop.eup %5832  ;;  %v8714_v45 = vmul.f32 0.0051020407, %v10449_v36  ;;  %v4101_v7 = vadd.f32 1e-05, %v4037_v1  ;;  %v4039_v33 = vmax.f32 %v3975_v27, 0.0  ;;  %v4230_v1 = vld [vmem:[%s10061_s3 + $0x118] sm:$0xff] }
 0x474   : > { %5842 = vrsqrt.f32 %v4104_v62  ;;  %v4042_v17 = vmax.f32 %v3978_v21, 0.0  ;;  %v3852_v10 = vmul.f32 0.0051020407, %v3658_v29  ;;  %v3654_v19 = vpop.xlane.xlu0 %3653  ;;  %10448 = vst [vmem:[#allocation65_spill] sm:$0xff] %v8711_v20  ;;  %v3977_v62 = vsub.f32 %v3849_v2, %v3913_v15  ;;  %v10452_v15 = vld [vmem:[#allocation9_spill] sm:$0xff] }
 0x475   : > { %10446 = vst [vmem:[#allocation64_spill] sm:$0xff] %v8699_v18  ;;  %10450 = vst [vmem:[#allocation66_spill] sm:$0xff] %v8714_v45  ;;  %4672 = vperm.xlu0 %5772, %v8699_v18   ;;  %5844 = vrsqrt.f32 %v4099_v28  ;;  %v3851_v21 = vmul.f32 0.0051020407, %v3654_v19  ;;  %v8723_v18 = vmul.f32 %v5833_v24, %v4221_v51  ;;  %v3920_v19 = vmul.f32 %v8714_v45, %v8714_v45  ;;  %v4223_v28 = vld [vmem:[%s10061_s3 + $0xe0] sm:$0xff] }
 0x476   : > { %v5835_v30 = vpop.eup %5834  ;;  %v4106_v47 = vadd.f32 1e-05, %v4042_v17  ;;  %v3980_v61 = vsub.f32 %v3852_v10, %v3916_v23  ;;  %4637 = vperm.xlu1 %5773, %v8701_v26   ;;  %v3917_v10 = vmul.f32 %v8711_v20, %v8711_v20  ;;  %v8733_v23 = vmul.f32 0.0051020407, %v10452_v15 }
 0x477   : > { %v3666_v29 = vpop.xlane.xlu1 %3665  ;;  %v8721_v4 = vmul.f32 %v5835_v30, %v4228_v63  ;;  %v5837_v17 = vpop.eup %5836  ;;  %v8736_v27 = vmul.f32 0.0051020407, %v8250_v5  ;;  %v4103_v24 = vadd.f32 1e-05, %v4039_v33  ;;  %v4041_v30 = vmax.f32 %v3977_v62, 0.0 }
 0x478   : > { %5846 = vrsqrt.f32 %v4106_v47  ;;  %v4044_v36 = vmax.f32 %v3980_v61, 0.0  ;;  %v3854_v60 = vmul.f32 0.0051020407, %v3666_v29  ;;  %v3662_v3 = vpop.xlane.xlu0 %3661  ;;  %10453 = vst [vmem:[#allocation68_spill] sm:$0xff] %v8733_v23  ;;  %v3979_v47 = vsub.f32 %v3851_v21, %v3915_v25  ;;  %v10457_v25 = vld [vmem:[#allocation10_spill] sm:$0xff] }
 0x479   : > { %10451 = vst [vmem:[#allocation67_spill] sm:$0xff] %v8721_v4  ;;  %10454 = vst [vmem:[#allocation69_spill] sm:$0xff] %v8736_v27  ;;  %4682 = vperm.xlu0 %5772, %v8721_v4   ;;  %5848 = vrsqrt.f32 %v4101_v7  ;;  %v3853_v61 = vmul.f32 0.0051020407, %v3662_v3  ;;  %v8745_v4 = vmul.f32 %v5837_v17, %v4223_v28  ;;  %v4232_v7 = vld [vmem:[%s10061_s3 + $0x128] sm:$0xff]  ;;  %v3922_v3 = vmul.f32 %v8736_v27, %v8736_v27  ;;  %v4225_v21 = vld [vmem:[%s10061_s3 + $0xf0] sm:$0xff] }
 0x47a   : > { %v5839_v2 = vpop.eup %5838  ;;  %v4108_v63 = vadd.f32 1e-05, %v4044_v36  ;;  %v3982_v51 = vsub.f32 %v3854_v60, %v3918_v55  ;;  %4647 = vperm.xlu1 %5773, %v8723_v18   ;;  %v3919_v60 = vmul.f32 %v8733_v23, %v8733_v23  ;;  %v8755_v55 = vmul.f32 0.0051020407, %v10457_v25 }
 0x47b   : > { %v3674_v29 = vpop.xlane.xlu1 %3673  ;;  %v8743_v15 = vmul.f32 %v5839_v2, %v4230_v1  ;;  %10456 = vst [vmem:[#allocation71_spill] sm:$0xff] %v8745_v4  ;;  %v5841_v33 = vpop.eup %5840  ;;  %v8758_v62 = vmul.f32 0.0051020407, %v8264_v57  ;;  %v4105_v2 = vadd.f32 1e-05, %v4041_v30 }
 0x47c   : > { %5850 = vrsqrt.f32 %v4108_v63  ;;  %v4046_v5 = vmax.f32 %v3982_v51, 0.0  ;;  %v3856_v20 = vmul.f32 0.0051020407, %v3674_v29  ;;  %v3670_v45 = vpop.xlane.xlu0 %3669  ;;  %10458 = vst [vmem:[#allocation72_spill] sm:$0xff] %v8755_v55  ;;  %v4043_v63 = vmax.f32 %v3979_v47, 0.0 }
 0x47d   : > { %10455 = vst [vmem:[#allocation70_spill] sm:$0xff] %v8743_v15  ;;  %10459 = vst [vmem:[#allocation73_spill] sm:$0xff] %v8758_v62  ;;  %4692 = vperm.xlu0 %5772, %v8743_v15   ;;  %5852 = vrsqrt.f32 %v4103_v24  ;;  %v3855_v28 = vmul.f32 0.0051020407, %v3670_v45  ;;  %v3981_v51 = vsub.f32 %v3853_v61, %v3917_v10  ;;  %v8767_v15 = vmul.f32 %v5841_v33, %v4225_v21  ;;  %v4234_v24 = vld [vmem:[%s10061_s3 + $0x138] sm:$0xff]  ;;  %v4227_v61 = vld [vmem:[%s10061_s3 + $0x100] sm:$0xff] }
 0x47e   : > { %v5843_v36 = vpop.eup %5842  ;;  %v4110_v1 = vadd.f32 1e-05, %v4046_v5  ;;  %v3984_v17 = vsub.f32 %v3856_v20, %v3920_v19  ;;  %4657 = vperm.xlu1 %5773, %v8745_v4   ;;  %v3921_v45 = vmul.f32 %v8755_v55, %v8755_v55  ;;  %v3924_v10 = vmul.f32 %v8758_v62, %v8758_v62  ;;  %v10461_v19 = vld [vmem:[#allocation11_spill] sm:$0xff] }
 0x47f   : > { %v3682_v29 = vpop.xlane.xlu1 %3681  ;;  %v8765_v25 = vmul.f32 %v5843_v36, %v4232_v7  ;;  %v5845_v20 = vpop.eup %5844  ;;  %v8777_v30 = vmul.f32 0.0051020407, %v10461_v19  ;;  %v8780_v47 = vmul.f32 0.0051020407, %v8278_v32  ;;  %v3983_v33 = vsub.f32 %v3855_v28, %v3919_v60 }
 0x480   : > { %5854 = vrsqrt.f32 %v4110_v1  ;;  %v4048_v57 = vmax.f32 %v3984_v17, 0.0  ;;  %v3858_v23 = vmul.f32 0.0051020407, %v3682_v29  ;;  %v3678_v27 = vpop.xlane.xlu0 %3677  ;;  %v4107_v1 = vadd.f32 1e-05, %v4043_v63 }
 0x481   : > { %10460 = vst [vmem:[#allocation74_spill] sm:$0xff] %v8765_v25  ;;  %10462 = vst [vmem:[#allocation75_spill] sm:$0xff] %v8777_v30  ;;  %4702 = vperm.xlu0 %5772, %v8765_v25   ;;  %v3857_v36 = vmul.f32 0.0051020407, %v3678_v27  ;;  %5856 = vrsqrt.f32 %v4105_v2  ;;  %v4045_v17 = vmax.f32 %v3981_v51, 0.0  ;;  %v8789_v4 = vmul.f32 %v5845_v20, %v4227_v61  ;;  %v4229_v2 = vld [vmem:[%s10061_s3 + $0x110] sm:$0xff] }
 0x482   : > { %10463 = vst [vmem:[#allocation76_spill] sm:$0xff] %v8780_v47  ;;  %v5847_v5 = vpop.eup %5846  ;;  %v4112_v7 = vadd.f32 1e-05, %v4048_v57  ;;  %v3986_v21 = vsub.f32 %v3858_v23, %v3922_v3  ;;  %4667 = vperm.xlu1 %5773, %v8767_v15   ;;  %v4236_v23 = vld [vmem:[%s10061_s3 + $0x148] sm:$0xff]  ;;  %v3923_v27 = vmul.f32 %v8777_v30, %v8777_v30  ;;  %v3926_v60 = vmul.f32 %v8780_v47, %v8780_v47 }
 0x483   : > { %v3690_v29 = vpop.xlane.xlu1 %3689  ;;  %v8787_v19 = vmul.f32 %v5847_v5, %v4234_v24  ;;  %v5849_v32 = vpop.eup %5848  ;;  %v8799_v3 = vmul.f32 0.0051020407, %v8285_v41  ;;  %v8802_v28 = vmul.f32 0.0051020407, %v8292_v56  ;;  %v4047_v51 = vmax.f32 %v3983_v33, 0.0  ;;  %v4231_v33 = vld [vmem:[%s10061_s3 + $0x120] sm:$0xff] }
 0x484   : > { %5858 = vrsqrt.f32 %v4112_v7  ;;  %v4050_v55 = vmax.f32 %v3986_v21, 0.0  ;;  %v3860_v62 = vmul.f32 0.0051020407, %v3690_v29  ;;  %v3686_v25 = vpop.xlane.xlu0 %3685  ;;  %v3985_v24 = vsub.f32 %v3857_v36, %v3921_v45 }
 0x485   : > { %10464 = vst [vmem:[#allocation77_spill] sm:$0xff] %v8799_v3  ;;  %10465 = vst [vmem:[#allocation78_spill] sm:$0xff] %v8802_v28  ;;  %4712 = vperm.xlu0 %5772, %v8787_v19   ;;  %5860 = vrsqrt.f32 %v4107_v1  ;;  %v4109_v61 = vadd.f32 1e-05, %v4045_v17  ;;  %v3859_v41 = vmul.f32 0.0051020407, %v3686_v25  ;;  %v8811_v47 = vmul.f32 %v5849_v32, %v4229_v2 }
 0x486   : > { %v5851_v63 = vpop.eup %5850  ;;  %v4114_v57 = vadd.f32 1e-05, %v4050_v55  ;;  %v3988_v20 = vsub.f32 %v3860_v62, %v3924_v10  ;;  %4677 = vperm.xlu1 %5773, %v8789_v4   ;;  %v4238_v55 = vld [vmem:[%s10061_s3 + $0x158] sm:$0xff]  ;;  %v3925_v62 = vmul.f32 %v8799_v3, %v8799_v3  ;;  %v3928_v25 = vmul.f32 %v8802_v28, %v8802_v28 }
 0x487   : > { %v3698_v5 = vpop.xlane.xlu1 %3697  ;;  %v8809_v7 = vmul.f32 %v5851_v63, %v4236_v23  ;;  %v5853_v56 = vpop.eup %5852  ;;  %v8821_v45 = vmul.f32 0.0051020407, %v8297_v49  ;;  %v8824_v10 = vmul.f32 0.0051020407, %v8300_v52  ;;  %v4111_v1 = vadd.f32 1e-05, %v4047_v51 }
 0x488   : > { %5862 = vrsqrt.f32 %v4114_v57  ;;  %v4052_v21 = vmax.f32 %v3988_v20, 0.0  ;;  %v3862_v29 = vmul.f32 0.0051020407, %v3698_v5  ;;  %v3694_v30 = vpop.xlane.xlu0 %3693  ;;  %v4049_v17 = vmax.f32 %v3985_v24, 0.0  ;;  %v4240_v51 = vld [vmem:[%s10061_s3 + $0x168] sm:$0xff] }
 0x489   : > { %10466 = vst [vmem:[#allocation79_spill] sm:$0xff] %v8821_v45  ;;  %10467 = vst [vmem:[#allocation4_spill] sm:$0xff] %v8824_v10  ;;  %4722 = vperm.xlu0 %5772, %v8809_v7   ;;  %5864 = vrsqrt.f32 %v4109_v61  ;;  %v3987_v2 = vsub.f32 %v3859_v41, %v3923_v27  ;;  %v3861_v49 = vmul.f32 0.0051020407, %v3694_v30  ;;  %v8833_v3 = vmul.f32 %v5853_v56, %v4231_v33  ;;  %v10470_v61 = vld [vmem:[#allocation12_spill] sm:$0xff]  ;;  %v4233_v56 = vld [vmem:[%s10061_s3 + $0x130] sm:$0xff] }
 0x48a   : > { %v5855_v36 = vpop.eup %5854  ;;  %v4116_v32 = vadd.f32 1e-05, %v4052_v21  ;;  %v3990_v23 = vsub.f32 %v3862_v29, %v3926_v60  ;;  %4687 = vperm.xlu1 %5773, %v8811_v47   ;;  %v3927_v60 = vmul.f32 %v8821_v45, %v8821_v45  ;;  %v3930_v30 = vmul.f32 %v8824_v10, %v8824_v10 }
 0x48b   : > { %v3706_v63 = vpop.xlane.xlu1 %3705  ;;  %v8831_v57 = vmul.f32 %v5855_v36, %v4238_v55  ;;  %10468 = vst [vmem:[#allocation5_spill] sm:$0xff] %v8833_v3  ;;  %v5857_v24 = vpop.eup %5856  ;;  %v8843_v27 = vmul.f32 0.0051020407, %v8302_v54  ;;  %v8846_v41 = vmul.f32 0.0051020407, %v10470_v61  ;;  %v4051_v36 = vmax.f32 %v3987_v2, 0.0 }
 0x48c   : > { %5866 = vrsqrt.f32 %v4116_v32  ;;  %v4054_v52 = vmax.f32 %v3990_v23, 0.0  ;;  %v3864_v20 = vmul.f32 0.0051020407, %v3706_v63  ;;  %v3702_v5 = vpop.xlane.xlu0 %3701  ;;  %v4113_v29 = vadd.f32 1e-05, %v4049_v17  ;;  %v10474_v2 = vld [vmem:[#allocation13_spill] sm:$0xff] }
 0x48d   : > { %10469 = vst [vmem:[#allocation6_spill] sm:$0xff] %v8843_v27  ;;  %10471 = vst [vmem:[#allocation7_spill] sm:$0xff] %v8846_v41  ;;  %4732 = vperm.xlu0 %5772, %v8831_v57   ;;  %5868 = vrsqrt.f32 %v4111_v1  ;;  %v3989_v32 = vsub.f32 %v3861_v49, %v3925_v62  ;;  %v3863_v54 = vmul.f32 0.0051020407, %v3702_v5  ;;  %v8855_v28 = vmul.f32 %v5857_v24, %v4233_v56  ;;  %v4242_v1 = vld [vmem:[%s10061_s3 + $0x178] sm:$0xff]  ;;  %v4235_v5 = vld [vmem:[%s10061_s3 + $0x140] sm:$0xff] }
 0x48e   : > { %v5859_v21 = vpop.eup %5858  ;;  %v4118_v55 = vadd.f32 1e-05, %v4054_v52  ;;  %v3992_v33 = vsub.f32 %v3864_v20, %v3928_v25  ;;  %4697 = vperm.xlu1 %5773, %v8833_v3   ;;  %v3929_v25 = vmul.f32 %v8843_v27, %v8843_v27  ;;  %v3932_v62 = vmul.f32 %v8846_v41, %v8846_v41  ;;  %v10476_v52 = vld [vmem:[#allocation14_spill] sm:$0xff] }
 0x48f   : > { %v3714_v23 = vpop.xlane.xlu1 %3713  ;;  %v8853_v63 = vmul.f32 %v5859_v21, %v4240_v51  ;;  %10473 = vst [vmem:[#allocation9_spill] sm:$0xff] %v8855_v28  ;;  %v5861_v17 = vpop.eup %5860  ;;  %v8865_v49 = vmul.f32 0.0051020407, %v10474_v2  ;;  %v8868_v20 = vmul.f32 0.0051020407, %v10476_v52 }
 0x490   : > { %5870 = vrsqrt.f32 %v4118_v55  ;;  %v4056_v61 = vmax.f32 %v3992_v33, 0.0  ;;  %v3866_v45 = vmul.f32 0.0051020407, %v3714_v23  ;;  %v3710_v10 = vpop.xlane.xlu0 %3709  ;;  %v4115_v55 = vadd.f32 1e-05, %v4051_v36 }
 0x491   : > { %10472 = vst [vmem:[#allocation8_spill] sm:$0xff] %v8853_v63  ;;  %10475 = vst [vmem:[#allocation10_spill] sm:$0xff] %v8865_v49  ;;  %4742 = vperm.xlu0 %5772, %v8853_v63   ;;  %5872 = vrsqrt.f32 %v4113_v29  ;;  %v3865_v21 = vmul.f32 0.0051020407, %v3710_v10  ;;  %v4053_v33 = vmax.f32 %v3989_v32, 0.0  ;;  %v3991_v23 = vsub.f32 %v3863_v54, %v3927_v60  ;;  %v4244_v29 = vld [vmem:[%s10061_s3 + $0x188] sm:$0xff] }
 0x492   : > { %10477 = vst [vmem:[#allocation11_spill] sm:$0xff] %v8868_v20  ;;  %v5863_v51 = vpop.eup %5862  ;;  %v4120_v24 = vadd.f32 1e-05, %v4056_v61  ;;  %v3994_v56 = vsub.f32 %v3866_v45, %v3930_v30  ;;  %4707 = vperm.xlu1 %5773, %v8855_v28   ;;  %v8877_v3 = vmul.f32 %v5861_v17, %v4235_v5  ;;  %v3931_v10 = vmul.f32 %v8865_v49, %v8865_v49  ;;  %v10480_v30 = vld [vmem:[#allocation16_spill] sm:$0xff]  ;;  %v4237_v32 = vld [vmem:[%s10061_s3 + $0x150] sm:$0xff] }
 0x493   : > { %v3722_v2 = vpop.xlane.xlu1 %3721  ;;  %v8875_v27 = vmul.f32 %v5863_v51, %v4242_v1  ;;  %v5865_v45 = vpop.eup %5864  ;;  %v3934_v60 = vmul.f32 %v8868_v20, %v8868_v20  ;;  %v8887_v36 = vmul.f32 0.0051020407, %v10480_v30  ;;  %v3993_v1 = vsub.f32 %v3865_v21, %v3929_v25  ;;  %v10485_v21 = vld [vmem:[#allocation18_spill] sm:$0xff] }
 0x494   : > { %5874 = vrsqrt.f32 %v4120_v24  ;;  %v4058_v52 = vmax.f32 %v3994_v56, 0.0  ;;  %v3868_v41 = vmul.f32 0.0051020407, %v3722_v2  ;;  %v3718_v63 = vpop.xlane.xlu0 %3717  ;;  %10479 = vst [vmem:[#allocation13_spill] sm:$0xff] %v8877_v3  ;;  %v4117_v51 = vadd.f32 1e-05, %v4053_v33 }
 0x495   : > { %10478 = vst [vmem:[#allocation12_spill] sm:$0xff] %v8875_v27  ;;  %10481 = vst [vmem:[#allocation14_spill] sm:$0xff] %v8887_v36  ;;  %4752 = vperm.xlu0 %5772, %v8875_v27   ;;  %v3867_v5 = vmul.f32 0.0051020407, %v3718_v63  ;;  %5876 = vrsqrt.f32 %v4115_v55  ;;  %v4055_v24 = vmax.f32 %v3991_v23, 0.0  ;;  %v8896_v28 = vmul.f32 %v5865_v45, %v4237_v32  ;;  %v10483_v63 = vld [vmem:[#allocation15_spill] sm:$0xff] }
 0x496   : > { %v5867_v54 = vpop.eup %5866  ;;  %v4122_v61 = vadd.f32 1e-05, %v4058_v52  ;;  %v3996_v17 = vsub.f32 %v3868_v41, %v3932_v62  ;;  %4717 = vperm.xlu1 %5773, %v8877_v3   ;;  %v4246_v41 = vld [vmem:[%s10061_s3 + $0x198] sm:$0xff]  ;;  %v8902_v25 = vmul.f32 0.0051020407, %v10483_v63  ;;  %v3936_v62 = vmul.f32 %v8887_v36, %v8887_v36  ;;  %v4239_v33 = vld [vmem:[%s10061_s3 + $0x160] sm:$0xff] }
 0x497   : > { %v3730_v56 = vpop.xlane.xlu1 %3729  ;;  %v8894_v2 = vmul.f32 %v5867_v54, %v4244_v29  ;;  %v5869_v30 = vpop.eup %5868  ;;  %v8907_v55 = vmul.f32 0.0051020407, %v10485_v21  ;;  %v4057_v52 = vmax.f32 %v3993_v1, 0.0  ;;  %v3995_v45 = vsub.f32 %v3867_v5, %v3931_v10  ;;  %v10487_v10 = vld [vmem:[#allocation17_spill] sm:$0xff]  ;;  %v4241_v1 = vld [vmem:[%s10061_s3 + $0x170] sm:$0xff] }
 0x498   : > { %5878 = vrsqrt.f32 %v4122_v61  ;;  %v4060_v49 = vmax.f32 %v3996_v17, 0.0  ;;  %v3870_v20 = vmul.f32 0.0051020407, %v3730_v56  ;;  %v3726_v27 = vpop.xlane.xlu0 %3725  ;;  %10484 = vst [vmem:[#allocation15_spill] sm:$0xff] %v8902_v25  ;;  %v4119_v54 = vadd.f32 1e-05, %v4055_v24 }
 0x499   : > { %10482 = vst [vmem:[#allocation16_spill] sm:$0xff] %v8894_v2  ;;  %10486 = vst [vmem:[#allocation18_spill] sm:$0xff] %v8907_v55  ;;  %4762 = vperm.xlu0 %5772, %v8894_v2   ;;  %5880 = vrsqrt.f32 %v4117_v51  ;;  %v3869_v61 = vmul.f32 0.0051020407, %v3726_v27  ;;  %v8916_v3 = vmul.f32 %v5869_v30, %v4239_v33  ;;  %v3938_v27 = vmul.f32 %v8907_v55, %v8907_v55 }
 0x49a   : > { %v5871_v23 = vpop.eup %5870  ;;  %v4124_v29 = vadd.f32 1e-05, %v4060_v49  ;;  %v3998_v32 = vsub.f32 %v3870_v20, %v3934_v60  ;;  %4727 = vperm.xlu1 %5773, %v8896_v28   ;;  %v4248_v49 = vld [vmem:[%s10061_s3 + $0x1a8] sm:$0xff]  ;;  %v3933_v20 = vmul.f32 %v8902_v25, %v8902_v25  ;;  %v8924_v60 = vmul.f32 0.0051020407, %v10487_v10 }
 0x49b   : > { %v3738_v17 = vpop.xlane.xlu1 %3737  ;;  %v8914_v56 = vmul.f32 %v5871_v23, %v4246_v41  ;;  %v5873_v63 = vpop.eup %5872  ;;  %v4121_v51 = vadd.f32 1e-05, %v4057_v52  ;;  %v4059_v24 = vmax.f32 %v3995_v45, 0.0  ;;  %v4250_v52 = vld [vmem:[%s10061_s3 + $0x1b8] sm:$0xff] }
 0x49c   : > { %5882 = vrsqrt.f32 %v4124_v29  ;;  %v4062_v21 = vmax.f32 %v3998_v32, 0.0  ;;  %v3872_v36 = vmul.f32 0.0051020407, %v3738_v17  ;;  %v3734_v2 = vpop.xlane.xlu0 %3733  ;;  %10488 = vst [vmem:[#allocation17_spill] sm:$0xff] %v8924_v60  ;;  %v3997_v33 = vsub.f32 %v3869_v61, %v3933_v20 }
 0x49d   : > { %4772 = vperm.xlu0 %5772, %v8914_v56   ;;  %5884 = vrsqrt.f32 %v4119_v54  ;;  %v3871_v23 = vmul.f32 0.0051020407, %v3734_v2  ;;  %v8935_v55 = vmul.f32 %v5873_v63, %v4241_v1  ;;  %v4243_v2 = vld [vmem:[%s10061_s3 + $0x180] sm:$0xff]  ;;  %v4123_v63 = vadd.f32 1e-05, %v4059_v24 }
 0x49e   : > { %v5875_v5 = vpop.eup %5874  ;;  %v4126_v30 = vadd.f32 1e-05, %v4062_v21  ;;  %v4000_v41 = vsub.f32 %v3872_v36, %v3936_v62  ;;  %4737 = vperm.xlu1 %5773, %v8916_v3   ;;  %v3935_v36 = vmul.f32 %v8924_v60, %v8924_v60  ;;  %v10489_v62 = vld [vmem:[#allocation20_spill] sm:$0xff]  ;;  %v4061_v20 = vmax.f32 %v3997_v33, 0.0 }
 0x49f   : > { %v3746_v29 = vpop.xlane.xlu1 %3745  ;;  %v8933_v32 = vmul.f32 %v5875_v5, %v4248_v49  ;;  %v5877_v45 = vpop.eup %5876  ;;  %v8943_v54 = vmul.f32 0.0051020407, %v10489_v62  ;;  %v4252_v62 = vld [vmem:[%s10061_s3 + $0x1c8] sm:$0xff] }
 0x4a0   : > { %5886 = vrsqrt.f32 %v4126_v30  ;;  %v4064_v17 = vmax.f32 %v4000_v41, 0.0  ;;  %v3874_v10 = vmul.f32 0.0051020407, %v3746_v29  ;;  %v3742_v25 = vpop.xlane.xlu0 %3741  ;;  %v3999_v1 = vsub.f32 %v3871_v23, %v3935_v36 }
 0x4a1   : > { %4782 = vperm.xlu0 %5772, %v8933_v32   ;;  %5888 = vrsqrt.f32 %v4121_v51  ;;  %v3873_v5 = vmul.f32 0.0051020407, %v3742_v25  ;;  %v8952_v29 = vmul.f32 %v5877_v45, %v4243_v2  ;;  %v3937_v51 = vmul.f32 %v8943_v54, %v8943_v54  ;;  %v4245_v25 = vld [vmem:[%s10061_s3 + $0x190] sm:$0xff]  ;;  %v4254_v45 = vld [vmem:[%s10061_s3 + $0x1d8] sm:$0xff]  ;;  %v4247_v2 = vld [vmem:[%s10061_s3 + $0x1a0] sm:$0xff] }
 0x4a2   : > { %v5879_v61 = vpop.eup %5878  ;;  %v4128_v21 = vadd.f32 1e-05, %v4064_v17  ;;  %v4002_v49 = vsub.f32 %v3874_v10, %v3938_v27  ;;  %4747 = vperm.xlu1 %5773, %v8935_v55   ;;  %v4125_v33 = vadd.f32 1e-05, %v4061_v20  ;;  %v4063_v23 = vmax.f32 %v3999_v1, 0.0  ;;  %v4256_v1 = vld [vmem:[%s10061_s3 + $0x1e8] sm:$0xff] }
 0x4a3   : > { %v8950_v30 = vmul.f32 %v5879_v61, %v4250_v52  ;;  %v5881_v60 = vpop.eup %5880  ;;  %v4001_v17 = vsub.f32 %v3873_v5, %v3937_v51  ;;  %v4249_v5 = vld [vmem:[%s10061_s3 + $0x1b0] sm:$0xff] }
 0x4a4   : > { %5890 = vrsqrt.f32 %v4128_v21  ;;  %v4066_v41 = vmax.f32 %v4002_v49, 0.0  ;;  %v8966_v52 = vmul.f32 %v5881_v60, %v4245_v25 }
 0x4a5   : > { %4792 = vperm.xlu0 %5772, %v8950_v30   ;;  %5892 = vrsqrt.f32 %v4123_v63  ;;  %v4127_v63 = vadd.f32 1e-05, %v4063_v23  ;;  %v4065_v21 = vmax.f32 %v4001_v17, 0.0 }
 0x4a6   : > { %v5883_v27 = vpop.eup %5882  ;;  %v4130_v24 = vadd.f32 1e-05, %v4066_v41  ;;  %4757 = vperm.xlu1 %5773, %v8952_v29  }
 0x4a7   : > { %v8964_v10 = vmul.f32 %v5883_v27, %v4252_v62  ;;  %v5885_v36 = vpop.eup %5884  ;;  %v4129_v62 = vadd.f32 1e-05, %v4065_v21  ;;  %v4253_v21 = vld [vmem:[%s10061_s3 + $0x1d0] sm:$0xff] }
 0x4a8   : > { %5894 = vrsqrt.f32 %v4130_v24  ;;  %v8978_v20 = vmul.f32 %v5885_v36, %v4247_v2  ;;  %v4258_v24 = vld [vmem:[%s10061_s3 + $0x1f8] sm:$0xff] }
 0x4a9   : > { %4802 = vperm.xlu0 %5772, %v8964_v10   ;;  %5896 = vrsqrt.f32 %v4125_v33  ;;  %v4251_v33 = vld [vmem:[%s10061_s3 + $0x1c0] sm:$0xff] }
 0x4aa   : > { %v5887_v61 = vpop.eup %5886  ;;  %4767 = vperm.xlu1 %5773, %v8966_v52   ;;  %5898 = vrsqrt.f32 %v4127_v63 }
 0x4ab   : > { %v8976_v49 = vmul.f32 %v5887_v61, %v4254_v45  ;;  %v5889_v60 = vpop.eup %5888  ;;  %5900 = vrsqrt.f32 %v4129_v62  ;;  %v10490_v45 = vld [vmem:[#allocation19_spill] sm:$0xff]  ;;  %v4324_v61 = vld [vmem:[%s10062_s4 + $0x8] sm:$0xff] }
 0x4ac   : > { %v8990_v27 = vmul.f32 %v5889_v60, %v4249_v5  ;;  %v4388_v36 = vmul.f32 %v8380_v34, %v10490_v45  ;;  %v4326_v62 = vld [vmem:[%s10062_s4 + $0x18] sm:$0xff] }
 0x4ad   : > { %4812 = vperm.xlu0 %5772, %v8976_v49  }
 0x4ae   : > { %v5891_v41 = vpop.eup %5890  ;;  %4777 = vperm.xlu1 %5773, %v8978_v20   ;;  %v4452_v60 = vsub.f32 %v4324_v61, %v4388_v36  ;;  %v4328_v36 = vld [vmem:[%s10062_s4 + $0x28] sm:$0xff] }
 0x4af   : > { %v8988_v51 = vmul.f32 %v5891_v41, %v4256_v1  ;;  %v5893_v25 = vpop.eup %5892  ;;  %v10491_v1 = vld [vmem:[#allocation22_spill] sm:$0xff] }
 0x4b0   : > { %v9004_v2 = vmul.f32 %v5893_v25, %v4251_v33  ;;  %v4390_v5 = vmul.f32 %v8420_v40, %v10491_v1  ;;  %v10493_v1 = vld [vmem:[#allocation27_spill] sm:$0xff] }
 0x4b1   : > { %4822 = vperm.xlu0 %5772, %v8988_v51  }
 0x4b2   : > { %v5895_v23 = vpop.eup %5894  ;;  %4787 = vperm.xlu1 %5773, %v8990_v27   ;;  %v4454_v33 = vsub.f32 %v4326_v62, %v4390_v5  ;;  %v4330_v62 = vld [vmem:[%s10062_s4 + $0x38] sm:$0xff] }
 0x4b3   : > { %v9000_v17 = vmul.f32 %v5895_v23, %v4258_v24  ;;  %v5897_v63 = vpop.eup %5896  ;;  %v4255_v24 = vld [vmem:[%s10061_s3 + $0x1e0] sm:$0xff] }
 0x4b4   : > { %v9018_v41 = vmul.f32 %v5897_v63, %v4253_v21  ;;  %v5899_v25 = vpop.eup %5898  ;;  %v10492_v23 = vld [vmem:[#allocation24_spill] sm:$0xff]  ;;  %v4257_v21 = vld [vmem:[%s10061_s3 + $0x1f0] sm:$0xff] }
 0x4b5   : > { %4832 = vperm.xlu0 %5772, %v9000_v17   ;;  %v4392_v40 = vmul.f32 %v8459_v37, %v10492_v23  ;;  %v9029_v45 = vmul.f32 %v5899_v25, %v4255_v24  ;;  %v5901_v61 = vpop.eup %5900  ;;  %v4394_v37 = vmul.f32 %v8503_v35, %v10493_v1  ;;  %v10494_v25 = vld [vmem:[#allocation21_spill] sm:$0xff]  ;;  %v4323_v23 = vld [vmem:[%s10062_s4] sm:$0xff]  ;;  %v10496_v1 = vld [vmem:[#allocation23_spill] sm:$0xff] }
 0x4b6   : > { %4797 = vperm.xlu1 %5773, %v9004_v2   ;;  %v9042_v5 = vmul.f32 %v5901_v61, %v4257_v21  ;;  %v4387_v24 = vmul.f32 %v8384_v46, %v10494_v25  ;;  %v10495_v35 = vld [vmem:[#allocation28_spill] sm:$0xff]  ;;  %v4332_v46 = vld [vmem:[%s10062_s4 + $0x48] sm:$0xff] }
 0x4b8   : > { %v9016_v34 = vpop.permute.xlu1 %4522  ;;  %v4451_v21 = vsub.f32 %v4323_v23, %v4387_v24 }
 0x4b9   : > { %4970 = vperm.xlu0 %5772, %v4452_v60   ;;  %v4456_v60 = vsub.f32 %v4328_v36, %v4392_v40  ;;  %v4458_v40 = vsub.f32 %v4330_v62, %v4394_v37  ;;  %v4396_v36 = vmul.f32 %v8457_v43, %v10495_v35  ;;  %v9057_v61 = vpop.permute.xlu0 %4517  ;;  %v4325_v37 = vld [vmem:[%s10062_s4 + $0x10] sm:$0xff]  ;;  %v4398_v43 = vmul.f32 %v8479_v0, %v8366_v22  ;;  %v4334_v35 = vld [vmem:[%s10062_s4 + $0x58] sm:$0xff] }
 0x4ba   : > { %4807 = vperm.xlu1 %5773, %v9018_v41   ;;  %v4400_v22 = vmul.f32 %v8501_v59, %v8378_v8  ;;  %v10499_v8 = vld [vmem:[#allocation31_spill] sm:$0xff] }
 0x4bb   : > { %v4460_v62 = vsub.f32 %v4332_v46, %v4396_v36  ;;  %v4327_v36 = vld [vmem:[%s10062_s4 + $0x20] sm:$0xff]  ;;  %v4402_v59 = vmul.f32 %v8523_v31, %v10499_v8  ;;  %v10501_v31 = vld [vmem:[#allocation46_spill] sm:$0xff] }
 0x4bd   : > { %v9034_v63 = vpop.permute.xlu1 %4527  ;;  %4980 = vperm.xlu0 %5772, %v4454_v33  }
 0x4be   : > { %4817 = vperm.xlu1 %5773, %v9029_v45  }
 0x4c1   : > { %v9049_v33 = vpop.permute.xlu1 %4532  ;;  %4990 = vperm.xlu0 %5772, %v4456_v60   ;;  %v4389_v60 = vmul.f32 %v8401_v14, %v10496_v1  ;;  %v10497_v14 = vld [vmem:[#allocation25_spill] sm:$0xff] }
 0x4c2   : > { %4827 = vperm.xlu1 %5773, %v9042_v5   ;;  %v4391_v1 = vmul.f32 %v8438_v58, %v10497_v14  ;;  %v10498_v58 = vld [vmem:[#allocation26_spill] sm:$0xff] }
 0x4c3   : > { %v4453_v23 = vsub.f32 %v4325_v37, %v4389_v60  ;;  %v4336_v60 = vld [vmem:[%s10062_s4 + $0x68] sm:$0xff]  ;;  %v4393_v37 = vmul.f32 %v8481_v16, %v10498_v58 }
 0x4c4   : > { %v4455_v46 = vsub.f32 %v4327_v36, %v4391_v1  ;;  %v4338_v1 = vld [vmem:[%s10062_s4 + $0x78] sm:$0xff]  ;;  %v10500_v16 = vld [vmem:[#allocation29_spill] sm:$0xff] }
 0x4c5   : > { %v9064_v25 = vpop.permute.xlu1 %4537  ;;  %5000 = vperm.xlu0 %5772, %v4458_v40   ;;  %v4395_v36 = vmul.f32 %v8525_v9, %v10500_v16  ;;  %v10502_v9 = vld [vmem:[#allocation30_spill] sm:$0xff] }
 0x4c6   : > { %4965 = vperm.xlu1 %5773, %v4451_v21   ;;  %v4462_v21 = vsub.f32 %v4334_v35, %v4398_v43  ;;  %v4329_v43 = vld [vmem:[%s10062_s4 + $0x30] sm:$0xff]  ;;  %v4397_v8 = vmul.f32 %v8547_v42, %v10502_v9  ;;  %v10504_v42 = vld [vmem:[#allocation32_spill] sm:$0xff] }
 0x4c7   : > { %v4457_v14 = vsub.f32 %v4329_v43, %v4393_v37  ;;  %v4340_v43 = vld [vmem:[%s10062_s4 + $0x88] sm:$0xff] }
 0x4c8   : > { %v9071_v24 = vpop.permute.xlu0 %4562 }
 0x4c9   : > { %v9078_v40 = vpop.permute.xlu1 %4542  ;;  %5010 = vperm.xlu0 %5772, %v4460_v62  }
 0x4ca   : > { %4975 = vperm.xlu1 %5773, %v4453_v23   ;;  %v4464_v23 = vsub.f32 %v4336_v60, %v4400_v22  ;;  %v4331_v22 = vld [vmem:[%s10062_s4 + $0x40] sm:$0xff]  ;;  %v4404_v60 = vmul.f32 %v10501_v31, %v8417_v12  ;;  %v10503_v12 = vld [vmem:[#allocation35_spill] sm:$0xff]  ;;  %v4399_v31 = vmul.f32 %v8569_v39, %v10504_v42  ;;  %v10506_v39 = vld [vmem:[#allocation33_spill] sm:$0xff] }
 0x4cb   : > { %v4459_v37 = vsub.f32 %v4331_v22, %v4395_v36  ;;  %v4342_v22 = vld [vmem:[%s10062_s4 + $0x98] sm:$0xff] }
 0x4cc   : > { %v9085_v0 = vpop.permute.xlu0 %4572 }
 0x4cd   : > { %v9092_v62 = vpop.permute.xlu1 %4547  ;;  %5020 = vperm.xlu0 %5772, %v4462_v21  }
 0x4ce   : > { %4985 = vperm.xlu1 %5773, %v4455_v46   ;;  %v4466_v46 = vsub.f32 %v4338_v1, %v4402_v59  ;;  %v4333_v59 = vld [vmem:[%s10062_s4 + $0x50] sm:$0xff]  ;;  %v4406_v1 = vmul.f32 %v8567_v11, %v10503_v12  ;;  %v10505_v11 = vld [vmem:[#allocation37_spill] sm:$0xff]  ;;  %v4401_v12 = vmul.f32 %v8591_v6, %v10506_v39 }
 0x4cf   : > { %v4461_v36 = vsub.f32 %v4333_v59, %v4397_v8  ;;  %v4344_v59 = vld [vmem:[%s10062_s4 + $0xa8] sm:$0xff]  ;;  %v10508_v6 = vld [vmem:[#allocation34_spill] sm:$0xff] }
 0x4d0   : > { %v9099_v35 = vpop.permute.xlu0 %4582 }
 0x4d1   : > { %v9106_v21 = vpop.permute.xlu1 %4552  ;;  %5030 = vperm.xlu0 %5772, %v4464_v23  }
 0x4d2   : > { %4995 = vperm.xlu1 %5773, %v4457_v14   ;;  %v4468_v14 = vsub.f32 %v4340_v43, %v4404_v60  ;;  %v4335_v60 = vld [vmem:[%s10062_s4 + $0x60] sm:$0xff]  ;;  %v4408_v43 = vmul.f32 %v8589_v44, %v10505_v11  ;;  %v10507_v44 = vld [vmem:[#allocation39_spill] sm:$0xff]  ;;  %v4403_v11 = vmul.f32 %v8613_v38, %v10508_v6 }
 0x4d3   : > { %v4463_v8 = vsub.f32 %v4335_v60, %v4399_v31  ;;  %v4346_v60 = vld [vmem:[%s10062_s4 + $0xb8] sm:$0xff]  ;;  %v10510_v38 = vld [vmem:[#allocation36_spill] sm:$0xff] }
 0x4d4   : > { %v9113_v58 = vpop.permute.xlu0 %4592 }
 0x4d5   : > { %v9120_v23 = vpop.permute.xlu1 %4557  ;;  %5040 = vperm.xlu0 %5772, %v4466_v46  }
 0x4d6   : > { %5005 = vperm.xlu1 %5773, %v4459_v37   ;;  %v4470_v37 = vsub.f32 %v4342_v22, %v4406_v1  ;;  %v4337_v1 = vld [vmem:[%s10062_s4 + $0x70] sm:$0xff]  ;;  %v4410_v22 = vmul.f32 %v8611_v13, %v10507_v44  ;;  %v10509_v13 = vld [vmem:[#allocation41_spill] sm:$0xff]  ;;  %v4405_v44 = vmul.f32 %v8635_v48, %v10510_v38 }
 0x4d7   : > { %v4465_v31 = vsub.f32 %v4337_v1, %v4401_v12  ;;  %v4348_v1 = vld [vmem:[%s10062_s4 + $0xc8] sm:$0xff]  ;;  %v10515_v48 = vld [vmem:[#allocation38_spill] sm:$0xff] }
 0x4d8   : > { %v9127_v16 = vpop.permute.xlu0 %4602  ;;  %v10516_v38 = vld [vmem:[#allocation58_spill] sm:$0xff] }
 0x4d9   : > { %v9134_v46 = vpop.permute.xlu1 %4567  ;;  %5050 = vperm.xlu0 %5772, %v4468_v14  }
 0x4da   : > { %5015 = vperm.xlu1 %5773, %v4461_v36   ;;  %v4472_v36 = vsub.f32 %v4344_v59, %v4408_v43  ;;  %v4339_v43 = vld [vmem:[%s10062_s4 + $0x80] sm:$0xff]  ;;  %v4412_v59 = vmul.f32 %v8633_v53, %v10509_v13  ;;  %v10512_v53 = vld [vmem:[#allocation43_spill] sm:$0xff] }
 0x4db   : > { %v4467_v12 = vsub.f32 %v4339_v43, %v4403_v11  ;;  %v4350_v13 = vld [vmem:[%s10062_s4 + $0xd8] sm:$0xff] }
 0x4dc   : > { %v9141_v9 = vpop.permute.xlu0 %4612 }
 0x4dd   : > { %v9148_v14 = vpop.permute.xlu1 %4577  ;;  %5060 = vperm.xlu0 %5772, %v4470_v37  }
 0x4de   : > { %5025 = vperm.xlu1 %5773, %v4463_v8   ;;  %v4474_v8 = vsub.f32 %v4346_v60, %v4410_v22  ;;  %v4341_v22 = vld [vmem:[%s10062_s4 + $0x90] sm:$0xff]  ;;  %v10513_v60 = vld [vmem:[#allocation57_spill] sm:$0xff] }
 0x4df   : > { %v4414_v6 = vmul.f32 %v10513_v60, %v10512_v53  ;;  %v4469_v43 = vsub.f32 %v4341_v22, %v4405_v44  ;;  %v10518_v53 = vld [vmem:[#allocation61_spill] sm:$0xff] }
 0x4e0   : > { %v9155_v42 = vpop.permute.xlu0 %4622 }
 0x4e1   : > { %v9162_v37 = vpop.permute.xlu1 %4587  ;;  %5070 = vperm.xlu0 %5772, %v4472_v36  }
 0x4e2   : > { %5035 = vperm.xlu1 %5773, %v4465_v31   ;;  %v4476_v31 = vsub.f32 %v4348_v1, %v4412_v59  ;;  %v4343_v59 = vld [vmem:[%s10062_s4 + $0xa0] sm:$0xff]  ;;  %v10517_v1 = vld [vmem:[#allocation45_spill] sm:$0xff] }
 0x4e3   : > { %v4416_v60 = vmul.f32 %v10518_v53, %v10517_v1  ;;  %v10522_v1 = vld [vmem:[#allocation64_spill] sm:$0xff] }
 0x4e4   : > { %v9169_v39 = vpop.permute.xlu0 %4632 }
 0x4e5   : > { %v9176_v36 = vpop.permute.xlu1 %4597  ;;  %5080 = vperm.xlu0 %5772, %v4474_v8  }
 0x4e6   : > { %10511 = vst [vmem:[#allocation20_spill] sm:$0xff] %v9176_v36  ;;  %5045 = vperm.xlu1 %5773, %v4467_v12   ;;  %v4407_v36 = vmul.f32 %v10516_v38, %v10515_v48  ;;  %v4478_v12 = vsub.f32 %v4350_v13, %v4414_v6  ;;  %v10520_v48 = vld [vmem:[#allocation40_spill] sm:$0xff]  ;;  %v4345_v6 = vld [vmem:[%s10062_s4 + $0xb0] sm:$0xff] }
 0x4e7   : > { %v4409_v38 = vmul.f32 %v8679_v50, %v10520_v48  ;;  %v10521_v13 = vld [vmem:[#allocation48_spill] sm:$0xff]  ;;  %v10524_v50 = vld [vmem:[#allocation42_spill] sm:$0xff] }
 0x4e8   : > { %v9183_v11 = vpop.permute.xlu0 %4642  ;;  %v4471_v22 = vsub.f32 %v4343_v59, %v4407_v36  ;;  %v4418_v53 = vmul.f32 %v10522_v1, %v10521_v13  ;;  %v4411_v48 = vmul.f32 %v8701_v26, %v10524_v50  ;;  %v10526_v13 = vld [vmem:[#allocation67_spill] sm:$0xff]  ;;  %v10528_v26 = vld [vmem:[#allocation44_spill] sm:$0xff] }
 0x4e9   : > { %10514 = vst [vmem:[#allocation19_spill] sm:$0xff] %v9183_v11  ;;  %v9190_v8 = vpop.permute.xlu1 %4607  ;;  %5090 = vperm.xlu0 %5772, %v4476_v31   ;;  %v4352_v11 = vld [vmem:[%s10062_s4 + $0xe8] sm:$0xff]  ;;  %v4473_v59 = vsub.f32 %v4345_v6, %v4409_v38  ;;  %v4413_v50 = vmul.f32 %v8723_v18, %v10528_v26  ;;  %v10533_v18 = vld [vmem:[#allocation47_spill] sm:$0xff] }
 0x4ea   : > { %5055 = vperm.xlu1 %5773, %v4469_v43   ;;  %v4480_v43 = vsub.f32 %v4352_v11, %v4416_v60  ;;  %v4347_v11 = vld [vmem:[%s10062_s4 + $0xc0] sm:$0xff]  ;;  %v10534_v26 = vld [vmem:[#allocation71_spill] sm:$0xff] }
 0x4eb   : > { %v4475_v6 = vsub.f32 %v4347_v11, %v4411_v48 }
 0x4ec   : > { %v9197_v44 = vpop.permute.xlu0 %4652 }
 0x4ed   : > { %10519 = vst [vmem:[#allocation22_spill] sm:$0xff] %v9197_v44  ;;  %v9204_v31 = vpop.permute.xlu1 %4617  ;;  %5100 = vperm.xlu0 %5772, %v4478_v12   ;;  %v4354_v44 = vld [vmem:[%s10062_s4 + $0xf8] sm:$0xff] }
 0x4ee   : > { %5065 = vperm.xlu1 %5773, %v4471_v22   ;;  %v4482_v60 = vsub.f32 %v4354_v44, %v4418_v53  ;;  %v10525_v22 = vld [vmem:[#allocation50_spill] sm:$0xff] }
 0x4ef   : > { %v4420_v1 = vmul.f32 %v10526_v13, %v10525_v22  ;;  %v4349_v44 = vld [vmem:[%s10062_s4 + $0xd0] sm:$0xff] }
 0x4f0   : > { %v9211_v36 = vpop.permute.xlu0 %4662  ;;  %v10531_v22 = vld [vmem:[#allocation70_spill] sm:$0xff]  ;;  %v4477_v11 = vsub.f32 %v4349_v44, %v4413_v50 }
 0x4f1   : > { %10523 = vst [vmem:[#allocation24_spill] sm:$0xff] %v9211_v36  ;;  %v9218_v12 = vpop.permute.xlu1 %4627  ;;  %5110 = vperm.xlu0 %5772, %v4480_v43   ;;  %v4356_v36 = vld [vmem:[%s10062_s4 + $0x108] sm:$0xff] }
 0x4f2   : > { %5075 = vperm.xlu1 %5773, %v4473_v59   ;;  %v4484_v53 = vsub.f32 %v4356_v36, %v4420_v1  ;;  %v10530_v59 = vld [vmem:[#allocation52_spill] sm:$0xff] }
 0x4f3   : > { %v4422_v13 = vmul.f32 %v10531_v22, %v10530_v59  ;;  %v4351_v36 = vld [vmem:[%s10062_s4 + $0xe0] sm:$0xff]  ;;  %v10536_v59 = vld [vmem:[#allocation74_spill] sm:$0xff] }
 0x4f4   : > { %v9225_v38 = vpop.permute.xlu0 %4672 }
 0x4f5   : > { %10527 = vst [vmem:[#allocation27_spill] sm:$0xff] %v9225_v38  ;;  %v9232_v43 = vpop.permute.xlu1 %4637  ;;  %5120 = vperm.xlu0 %5772, %v4482_v60   ;;  %v4358_v38 = vld [vmem:[%s10062_s4 + $0x118] sm:$0xff] }
 0x4f6   : > { %10529 = vst [vmem:[#allocation21_spill] sm:$0xff] %v9232_v43  ;;  %5085 = vperm.xlu1 %5773, %v4475_v6   ;;  %v4415_v43 = vmul.f32 %v10534_v26, %v10533_v18  ;;  %v4486_v1 = vsub.f32 %v4358_v38, %v4422_v13  ;;  %v10535_v6 = vld [vmem:[#allocation54_spill] sm:$0xff]  ;;  %v10538_v18 = vld [vmem:[#allocation49_spill] sm:$0xff] }
 0x4f7   : > { %v4424_v22 = vmul.f32 %v10536_v59, %v10535_v6  ;;  %v4417_v26 = vmul.f32 %v8767_v15, %v10538_v18  ;;  %v4353_v38 = vld [vmem:[%s10062_s4 + $0xf0] sm:$0xff]  ;;  %v10540_v59 = vld [vmem:[#allocation51_spill] sm:$0xff] }
 0x4f8   : > { %v9239_v48 = vpop.permute.xlu0 %4682  ;;  %v4479_v44 = vsub.f32 %v4351_v36, %v4415_v43  ;;  %v4362_v15 = vld [vmem:[%s10062_s4 + $0x138] sm:$0xff] }
 0x4f9   : > { %10532 = vst [vmem:[#allocation28_spill] sm:$0xff] %v9239_v48  ;;  %v9246_v60 = vpop.permute.xlu1 %4647  ;;  %5130 = vperm.xlu0 %5772, %v4484_v53   ;;  %v4360_v48 = vld [vmem:[%s10062_s4 + $0x128] sm:$0xff]  ;;  %v4481_v36 = vsub.f32 %v4353_v38, %v4417_v26 }
 0x4fa   : > { %5095 = vperm.xlu1 %5773, %v4477_v11   ;;  %v4488_v13 = vsub.f32 %v4360_v48, %v4424_v22  ;;  %v10539_v11 = vld [vmem:[#allocation56_spill] sm:$0xff] }
 0x4fb   : > { %v4426_v6 = vmul.f32 %v8787_v19, %v10539_v11  ;;  %v4355_v48 = vld [vmem:[%s10062_s4 + $0x100] sm:$0xff]  ;;  %v4364_v11 = vld [vmem:[%s10062_s4 + $0x148] sm:$0xff] }
 0x4fc   : > { %v9253_v50 = vpop.permute.xlu0 %4692  ;;  %v10541_v19 = vld [vmem:[#allocation60_spill] sm:$0xff] }
 0x4fd   : > { %10537 = vst [vmem:[#allocation23_spill] sm:$0xff] %v9253_v50  ;;  %v9260_v53 = vpop.permute.xlu1 %4657  ;;  %5140 = vperm.xlu0 %5772, %v4486_v1   ;;  %v4419_v50 = vmul.f32 %v8789_v4, %v10540_v59  ;;  %v4490_v22 = vsub.f32 %v4362_v15, %v4426_v6  ;;  %v10542_v4 = vld [vmem:[#allocation53_spill] sm:$0xff]  ;;  %v4357_v6 = vld [vmem:[%s10062_s4 + $0x110] sm:$0xff] }
 0x4fe   : > { %5105 = vperm.xlu1 %5773, %v4479_v44   ;;  %v4428_v44 = vmul.f32 %v8809_v7, %v10541_v19  ;;  %v4421_v38 = vmul.f32 %v8811_v47, %v10542_v4  ;;  %v10543_v7 = vld [vmem:[#allocation63_spill] sm:$0xff] }
 0x4ff   : > { %v4483_v26 = vsub.f32 %v4355_v48, %v4419_v50  ;;  %v4430_v59 = vmul.f32 %v8831_v57, %v10543_v7  ;;  %v10545_v47 = vld [vmem:[#allocation55_spill] sm:$0xff]  ;;  %v10546_v48 = vld [vmem:[#allocation5_spill] sm:$0xff]  ;;  %v10548_v57 = vld [vmem:[#allocation66_spill] sm:$0xff] }
 0x500   : > { %v9267_v43 = vpop.permute.xlu0 %4702  ;;  %v4485_v15 = vsub.f32 %v4357_v6, %v4421_v38  ;;  %v4423_v19 = vmul.f32 %v10546_v48, %v10545_v47  ;;  %v4366_v4 = vld [vmem:[%s10062_s4 + $0x158] sm:$0xff]  ;;  %v10552_v48 = vld [vmem:[#allocation9_spill] sm:$0xff] }
 0x501   : > { %v9274_v1 = vpop.permute.xlu1 %4667  ;;  %5150 = vperm.xlu0 %5772, %v4488_v13   ;;  %v10551_v47 = vld [vmem:[#allocation59_spill] sm:$0xff] }
 0x502   : > { %5115 = vperm.xlu1 %5773, %v4481_v36   ;;  %v4492_v36 = vsub.f32 %v4364_v11, %v4428_v44  ;;  %v4359_v44 = vld [vmem:[%s10062_s4 + $0x120] sm:$0xff] }
 0x503   : > { %v10549_v11 = vld [vmem:[#allocation8_spill] sm:$0xff]  ;;  %v4487_v6 = vsub.f32 %v4359_v44, %v4423_v19 }
 0x504   : > { %v9281_v18 = vpop.permute.xlu0 %4712  ;;  %v4432_v7 = vmul.f32 %v10549_v11, %v10548_v57  ;;  %v10555_v57 = vld [vmem:[#allocation12_spill] sm:$0xff] }
 0x505   : > { %v9288_v13 = vpop.permute.xlu1 %4677  ;;  %5160 = vperm.xlu0 %5772, %v4490_v22  }
 0x506   : > { %5125 = vperm.xlu1 %5773, %v4483_v26   ;;  %v4494_v26 = vsub.f32 %v4366_v4, %v4430_v59  ;;  %v4361_v59 = vld [vmem:[%s10062_s4 + $0x130] sm:$0xff]  ;;  %v10554_v4 = vld [vmem:[#allocation69_spill] sm:$0xff] }
 0x507   : > { %v4434_v11 = vmul.f32 %v10555_v57, %v10554_v4  ;;  %v10560_v4 = vld [vmem:[#allocation16_spill] sm:$0xff] }
 0x508   : > { %v9295_v50 = vpop.permute.xlu0 %4722 }
 0x509   : > { %10544 = vst [vmem:[#allocation25_spill] sm:$0xff] %v9295_v50  ;;  %v9302_v22 = vpop.permute.xlu1 %4687  ;;  %5170 = vperm.xlu0 %5772, %v4492_v36   ;;  %v4425_v50 = vmul.f32 %v10552_v48, %v10551_v47  ;;  %v10556_v47 = vld [vmem:[#allocation62_spill] sm:$0xff]  ;;  %v10557_v48 = vld [vmem:[#allocation13_spill] sm:$0xff] }
 0x50a   : > { %10547 = vst [vmem:[#allocation26_spill] sm:$0xff] %v9302_v22  ;;  %5135 = vperm.xlu1 %5773, %v4485_v15   ;;  %v4368_v22 = vld [vmem:[%s10062_s4 + $0x168] sm:$0xff] }
 0x50b   : > { %v4496_v15 = vsub.f32 %v4368_v22, %v4432_v7  ;;  %v4489_v44 = vsub.f32 %v4361_v59, %v4425_v50  ;;  %v4363_v22 = vld [vmem:[%s10062_s4 + $0x140] sm:$0xff] }
 0x50c   : > { %v9309_v38 = vpop.permute.xlu0 %4732 }
 0x50d   : > { %10550 = vst [vmem:[#allocation31_spill] sm:$0xff] %v9309_v38  ;;  %v9316_v36 = vpop.permute.xlu1 %4697  ;;  %5180 = vperm.xlu0 %5772, %v4494_v26   ;;  %v4427_v38 = vmul.f32 %v10557_v48, %v10556_v47  ;;  %v10561_v47 = vld [vmem:[#allocation65_spill] sm:$0xff] }
 0x50e   : > { %10553 = vst [vmem:[#allocation29_spill] sm:$0xff] %v9316_v36  ;;  %5145 = vperm.xlu1 %5773, %v4487_v6   ;;  %v4370_v36 = vld [vmem:[%s10062_s4 + $0x178] sm:$0xff]  ;;  %v10559_v6 = vld [vmem:[#allocation73_spill] sm:$0xff]  ;;  %v4429_v48 = vmul.f32 %v8896_v28, %v10561_v47  ;;  %v10563_v28 = vld [vmem:[#allocation68_spill] sm:$0xff] }
 0x50f   : > { %v4498_v7 = vsub.f32 %v4370_v36, %v4434_v11  ;;  %v4436_v57 = vmul.f32 %v10560_v4, %v10559_v6  ;;  %v4491_v59 = vsub.f32 %v4363_v22, %v4427_v38  ;;  %v4365_v36 = vld [vmem:[%s10062_s4 + $0x150] sm:$0xff]  ;;  %v4431_v4 = vmul.f32 %v8916_v3, %v10563_v28  ;;  %v4374_v47 = vld [vmem:[%s10062_s4 + $0x198] sm:$0xff]  ;;  %v10565_v3 = vld [vmem:[#allocation72_spill] sm:$0xff] }
 0x510   : > { %v9323_v19 = vpop.permute.xlu0 %4742  ;;  %v4493_v22 = vsub.f32 %v4365_v36, %v4429_v48  ;;  %v4376_v28 = vld [vmem:[%s10062_s4 + $0x1a8] sm:$0xff] }
 0x511   : > { %v9330_v26 = vpop.permute.xlu1 %4707  ;;  %5190 = vperm.xlu0 %5772, %v4496_v15  }
 0x512   : > { %10558 = vst [vmem:[#allocation46_spill] sm:$0xff] %v9330_v26  ;;  %5155 = vperm.xlu1 %5773, %v4489_v44   ;;  %v4372_v26 = vld [vmem:[%s10062_s4 + $0x188] sm:$0xff]  ;;  %v10562_v44 = vld [vmem:[#allocation76_spill] sm:$0xff] }
 0x513   : > { %v4500_v11 = vsub.f32 %v4372_v26, %v4436_v57  ;;  %v4438_v6 = vmul.f32 %v8914_v56, %v10562_v44  ;;  %v4367_v26 = vld [vmem:[%s10062_s4 + $0x160] sm:$0xff]  ;;  %v10564_v56 = vld [vmem:[#allocation78_spill] sm:$0xff]  ;;  %v4433_v44 = vmul.f32 %v8935_v55, %v10565_v3  ;;  %v10567_v55 = vld [vmem:[#allocation75_spill] sm:$0xff] }
 0x514   : > { %v9337_v50 = vpop.permute.xlu0 %4752  ;;  %v4495_v36 = vsub.f32 %v4367_v26, %v4431_v4  ;;  %v4378_v3 = vld [vmem:[%s10062_s4 + $0x1b8] sm:$0xff] }
 0x515   : > { %v9344_v15 = vpop.permute.xlu1 %4717  ;;  %5200 = vperm.xlu0 %5772, %v4498_v7   ;;  %v4502_v57 = vsub.f32 %v4374_v47, %v4438_v6  ;;  %v4369_v6 = vld [vmem:[%s10062_s4 + $0x170] sm:$0xff] }
 0x516   : > { %5165 = vperm.xlu1 %5773, %v4491_v59   ;;  %v4440_v59 = vmul.f32 %v8933_v32, %v10564_v56  ;;  %v10566_v32 = vld [vmem:[#allocation4_spill] sm:$0xff]  ;;  %v4497_v26 = vsub.f32 %v4369_v6, %v4433_v44  ;;  %v4435_v56 = vmul.f32 %v8952_v29, %v10567_v55  ;;  %v10569_v29 = vld [vmem:[#allocation77_spill] sm:$0xff] }
 0x517   : > { %v4442_v47 = vmul.f32 %v8950_v30, %v10566_v32  ;;  %v10568_v30 = vld [vmem:[#allocation7_spill] sm:$0xff]  ;;  %v4437_v32 = vmul.f32 %v8966_v52, %v10569_v29  ;;  %v4380_v55 = vld [vmem:[%s10062_s4 + $0x1c8] sm:$0xff] }
 0x518   : > { %v9351_v38 = vpop.permute.xlu0 %4762  ;;  %v10571_v52 = vld [vmem:[#allocation79_spill] sm:$0xff] }
 0x519   : > { %v9358_v7 = vpop.permute.xlu1 %4727  ;;  %5210 = vperm.xlu0 %5772, %v4500_v11   ;;  %v4382_v29 = vld [vmem:[%s10062_s4 + $0x1d8] sm:$0xff] }
 0x51a   : > { %5175 = vperm.xlu1 %5773, %v4493_v22   ;;  %v4504_v22 = vsub.f32 %v4376_v28, %v4440_v59  ;;  %v4371_v59 = vld [vmem:[%s10062_s4 + $0x180] sm:$0xff]  ;;  %v4444_v28 = vmul.f32 %v8964_v10, %v10568_v30  ;;  %v10570_v10 = vld [vmem:[#allocation11_spill] sm:$0xff]  ;;  %v4439_v30 = vmul.f32 %v8978_v20, %v10571_v52  ;;  %v10573_v20 = vld [vmem:[#allocation6_spill] sm:$0xff] }
 0x51b   : > { %v4499_v6 = vsub.f32 %v4371_v59, %v4435_v56  ;;  %v4384_v52 = vld [vmem:[%s10062_s4 + $0x1e8] sm:$0xff] }
 0x51c   : > { %v9365_v48 = vpop.permute.xlu0 %4772 }
 0x51d   : > { %v9372_v11 = vpop.permute.xlu1 %4737  ;;  %5220 = vperm.xlu0 %5772, %v4502_v57  }
 0x51e   : > { %5185 = vperm.xlu1 %5773, %v4495_v36   ;;  %v4506_v36 = vsub.f32 %v4378_v3, %v4442_v47  ;;  %v4373_v47 = vld [vmem:[%s10062_s4 + $0x190] sm:$0xff]  ;;  %v4446_v3 = vmul.f32 %v8976_v49, %v10570_v10  ;;  %v4441_v10 = vmul.f32 %v8990_v27, %v10573_v20  ;;  %v4386_v20 = vld [vmem:[%s10062_s4 + $0x1f8] sm:$0xff] }
 0x51f   : > { %v4501_v59 = vsub.f32 %v4373_v47, %v4437_v32  ;;  %v10572_v49 = vld [vmem:[#allocation14_spill] sm:$0xff] }
 0x520   : > { %v9379_v4 = vpop.permute.xlu0 %4782  ;;  %v10575_v27 = vld [vmem:[#allocation10_spill] sm:$0xff] }
 0x521   : > { %v9386_v57 = vpop.permute.xlu1 %4747  ;;  %5230 = vperm.xlu0 %5772, %v4504_v22  }
 0x522   : > { %5195 = vperm.xlu1 %5773, %v4497_v26   ;;  %v4508_v26 = vsub.f32 %v4380_v55, %v4444_v28  ;;  %v4375_v28 = vld [vmem:[%s10062_s4 + $0x1a0] sm:$0xff]  ;;  %v4448_v55 = vmul.f32 %v8988_v51, %v10572_v49  ;;  %v10574_v51 = vld [vmem:[#allocation18_spill] sm:$0xff]  ;;  %v4443_v49 = vmul.f32 %v9004_v2, %v10575_v27 }
 0x523   : > { %v4503_v47 = vsub.f32 %v4375_v28, %v4439_v30 }
 0x524   : > { %v9393_v44 = vpop.permute.xlu0 %4792 }
 0x525   : > { %v9400_v22 = vpop.permute.xlu1 %4757  ;;  %5240 = vperm.xlu0 %5772, %v4506_v36  }
 0x526   : > { %5205 = vperm.xlu1 %5773, %v4499_v6   ;;  %v4510_v6 = vsub.f32 %v4382_v29, %v4446_v3  ;;  %v4377_v3 = vld [vmem:[%s10062_s4 + $0x1b0] sm:$0xff]  ;;  %v4450_v29 = vmul.f32 %v9000_v17, %v10574_v51 }
 0x527   : > { %v4505_v28 = vsub.f32 %v4377_v3, %v4441_v10  ;;  %v10578_v10 = vld [vmem:[#allocation15_spill] sm:$0xff]  ;;  %v4381_v51 = vld [vmem:[%s10062_s4 + $0x1d0] sm:$0xff] }
 0x528   : > { %v9407_v56 = vpop.permute.xlu0 %4802  ;;  %v4445_v3 = vmul.f32 %v9018_v41, %v10578_v10 }
 0x529   : > { %v9414_v36 = vpop.permute.xlu1 %4767  ;;  %5250 = vperm.xlu0 %5772, %v4508_v26  }
 0x52a   : > { %5215 = vperm.xlu1 %5773, %v4501_v59   ;;  %v4512_v59 = vsub.f32 %v4384_v52, %v4448_v55  ;;  %v4379_v55 = vld [vmem:[%s10062_s4 + $0x1c0] sm:$0xff] }
 0x52b   : > { %v4507_v52 = vsub.f32 %v4379_v55, %v4443_v49  ;;  %v10580_v49 = vld [vmem:[#allocation17_spill] sm:$0xff] }
 0x52c   : > { %v9421_v32 = vpop.permute.xlu0 %4812  ;;  %v4447_v55 = vmul.f32 %v9029_v45, %v10580_v49 }
 0x52d   : > { %v9428_v26 = vpop.permute.xlu1 %4777  ;;  %5260 = vperm.xlu0 %5772, %v4510_v6  }
 0x52e   : > { %5225 = vperm.xlu1 %5773, %v4503_v47   ;;  %v4514_v47 = vsub.f32 %v4386_v20, %v4450_v29  ;;  %v4509_v20 = vsub.f32 %v4381_v51, %v4445_v3  ;;  %v4449_v3 = vmul.f32 %v9042_v5, %v8943_v54 }
 0x530   : > { %v9435_v30 = vpop.permute.xlu0 %4822 }
 0x531   : > { %v9442_v6 = vpop.permute.xlu1 %4787  ;;  %5270 = vperm.xlu0 %5772, %v4512_v59   ;;  %v5902_v59 = vld [vmem:[#allocation2 + $0x10] sm:$0xff] }
 0x532   : > { %10576 = vst [vmem:[#allocation30_spill] sm:$0xff] %v9442_v6  ;;  %5235 = vperm.xlu1 %5773, %v4505_v28   ;;  %v4837_v27 = vmul.f32 %v5902_v59, %v9016_v34  ;;  %v5903_v6 = vld [vmem:[#allocation2 + $0x18] sm:$0xff] }
 0x533   : > { %v4838_v29 = vmul.f32 %v5903_v6, %v9016_v34 }
 0x534   : > { %v9447_v17 = vpop.permute.xlu0 %4832 }
 0x535   : > { %10577 = vst [vmem:[#allocation35_spill] sm:$0xff] %v9447_v17  ;;  %v9451_v2 = vpop.permute.xlu1 %4797  ;;  %5280 = vperm.xlu0 %5772, %v4514_v47   ;;  %v5905_v17 = vld [vmem:[#allocation2 + $0x38] sm:$0xff] }
 0x536   : > { %10579 = vst [vmem:[#allocation32_spill] sm:$0xff] %v9451_v2  ;;  %5245 = vperm.xlu1 %5773, %v4507_v52   ;;  %v4383_v2 = vld [vmem:[%s10062_s4 + $0x1e0] sm:$0xff]  ;;  %v5904_v52 = vld [vmem:[#allocation2 + $0x30] sm:$0xff]  ;;  %v4842_v34 = vmul.f32 %v5905_v17, %v9049_v33 }
 0x537   : > { %v4841_v59 = vmul.f32 %v5904_v52, %v9049_v33  ;;  %v4511_v6 = vsub.f32 %v4383_v2, %v4447_v55  ;;  %v4385_v33 = vld [vmem:[%s10062_s4 + $0x1f0] sm:$0xff] }
 0x538   : > { %v4971_v28 = vpop.permute.xlu0 %4970  ;;  %v5906_v17 = vld [vmem:[#allocation2 + $0x50] sm:$0xff]  ;;  %v4513_v5 = vsub.f32 %v4385_v33, %v4449_v3 }
 0x539   : > { %v9460_v41 = vpop.permute.xlu1 %4807  ;;  %v5285_v10 = vadd.f32 %v4971_v28, %v4837_v27  ;;  %v5286_v47 = vadd.f32 %v4971_v28, %v4838_v29  ;;  %v4845_v28 = vmul.f32 %v5906_v17, %v9078_v40 }
 0x53a   : > { %5255 = vperm.xlu1 %5773, %v4509_v20   ;;  %v5907_v20 = vld [vmem:[#allocation2 + $0x58] sm:$0xff] }
 0x53b   : > { %5413 = vst [vmem:[%s10063_s5 + $0x10] sm:$0xff] %v5285_v10  ;;  %5414 = vst.msk [vmem:[%s10063_s5 + $0x18] sm:$0xff] %vm2847_vm1, %v5286_v47  ;;  %v4846_v49 = vmul.f32 %v5907_v20, %v9078_v40  ;;  %v5908_v47 = vld [vmem:[#allocation2 + $0x70] sm:$0xff]  ;;  %v5909_v40 = vld [vmem:[#allocation2 + $0x78] sm:$0xff] }
 0x53c   : > { %v4981_v45 = vpop.permute.xlu0 %4980  ;;  %v4849_v52 = vmul.f32 %v5908_v47, %v9106_v21  ;;  %v5912_v20 = vld [vmem:[#allocation2 + $0x90] sm:$0xff] }
 0x53d   : > { %v9476_v51 = vpop.permute.xlu1 %4817  ;;  %v5289_v27 = vadd.f32 %v4981_v45, %v4841_v59  ;;  %v5290_v29 = vadd.f32 %v4981_v45, %v4842_v34  ;;  %v4850_v59 = vmul.f32 %v5909_v40, %v9106_v21  ;;  %v5910_v34 = vld [vmem:[#allocation2] sm:$0xff] }
 0x53e   : > { %5265 = vperm.xlu1 %5773, %v4511_v6   ;;  %v4835_v45 = vmul.f32 %v5910_v34, %v9057_v61  ;;  %v5911_v6 = vld [vmem:[#allocation2 + $0x8] sm:$0xff] }
 0x53f   : > { %5417 = vst [vmem:[%s10063_s5 + $0x30] sm:$0xff] %v5289_v27  ;;  %5418 = vst.msk [vmem:[%s10063_s5 + $0x38] sm:$0xff] %vm2847_vm1, %v5290_v29  ;;  %v4836_v3 = vmul.f32 %v5911_v6, %v9057_v61  ;;  %v5914_v61 = vld [vmem:[#allocation2 + $0x20] sm:$0xff]  ;;  %v5916_v6 = vld [vmem:[#allocation2 + $0xb0] sm:$0xff] }
 0x540   : > { %v4991_v54 = vpop.permute.xlu0 %4990 }
 0x541   : > { %v9490_v2 = vpop.permute.xlu1 %4827  ;;  %v5293_v55 = vadd.f32 %v4991_v54, %v4845_v28  ;;  %v5294_v10 = vadd.f32 %v4991_v54, %v4846_v49  ;;  %v4853_v49 = vmul.f32 %v5912_v20, %v9071_v24  ;;  %v5913_v54 = vld [vmem:[#allocation2 + $0x98] sm:$0xff] }
 0x542   : > { %5275 = vperm.xlu1 %5773, %v4513_v5   ;;  %v4854_v5 = vmul.f32 %v5913_v54, %v9071_v24 }
 0x543   : > { %5421 = vst [vmem:[%s10063_s5 + $0x50] sm:$0xff] %v5293_v55  ;;  %5422 = vst.msk [vmem:[%s10063_s5 + $0x58] sm:$0xff] %vm2847_vm1, %v5294_v10  ;;  %v4839_v55 = vmul.f32 %v5914_v61, %v9034_v63  ;;  %v5915_v10 = vld [vmem:[#allocation2 + $0x28] sm:$0xff]  ;;  %v5920_v61 = vld [vmem:[#allocation2 + $0xd0] sm:$0xff] }
 0x544   : > { %v5001_v27 = vpop.permute.xlu0 %5000  ;;  %v4840_v47 = vmul.f32 %v5915_v10, %v9034_v63  ;;  %v5921_v10 = vld [vmem:[#allocation2 + $0xd8] sm:$0xff] }
 0x545   : > { %v4966_v29 = vpop.permute.xlu1 %4965  ;;  %v5297_v33 = vadd.f32 %v5001_v27, %v4849_v52  ;;  %v5298_v17 = vadd.f32 %v5001_v27, %v4850_v59  ;;  %v5917_v27 = vld [vmem:[#allocation2 + $0xb8] sm:$0xff] }
 0x546   : > { %v5283_v21 = vadd.f32 %v4966_v29, %v4835_v45  ;;  %v5284_v28 = vadd.f32 %v4966_v29, %v4836_v3  ;;  %v4857_v3 = vmul.f32 %v5916_v6, %v9085_v0  ;;  %v4858_v63 = vmul.f32 %v5917_v27, %v9085_v0  ;;  %v5918_v29 = vld [vmem:[#allocation2 + $0x40] sm:$0xff]  ;;  %v5924_v27 = vld [vmem:[#allocation2 + $0xf0] sm:$0xff] }
 0x547   : > { %5425 = vst [vmem:[%s10063_s5 + $0x70] sm:$0xff] %v5297_v33  ;;  %5426 = vst.msk [vmem:[%s10063_s5 + $0x78] sm:$0xff] %vm2847_vm1, %v5298_v17  ;;  %v4843_v33 = vmul.f32 %v5918_v29, %v9064_v25  ;;  %v5919_v17 = vld [vmem:[#allocation2 + $0x48] sm:$0xff]  ;;  %v5925_v29 = vld [vmem:[#allocation2 + $0xf8] sm:$0xff] }
 0x548   : > { %5411 = vst [vmem:[%s10063_s5] sm:$0xff] %v5283_v21  ;;  %5412 = vst.msk [vmem:[%s10063_s5 + $0x8] sm:$0xff] %vm2847_vm1, %v5284_v28  ;;  %v5011_v24 = vpop.permute.xlu0 %5010  ;;  %v4844_v21 = vmul.f32 %v5919_v17, %v9064_v25  ;;  %v4862_v25 = vmul.f32 %v5921_v10, %v9099_v35  ;;  %v5929_v10 = vld [vmem:[#allocation2 + $0x118] sm:$0xff] }
 0x549   : > { %v4976_v52 = vpop.permute.xlu1 %4975  ;;  %v5301_v40 = vadd.f32 %v5011_v24, %v4853_v49  ;;  %v5302_v59 = vadd.f32 %v5011_v24, %v4854_v5 }
 0x54a   : > { %v5287_v34 = vadd.f32 %v4976_v52, %v4839_v55  ;;  %v5288_v45 = vadd.f32 %v4976_v52, %v4840_v47  ;;  %v4861_v55 = vmul.f32 %v5920_v61, %v9099_v35  ;;  %v5922_v47 = vld [vmem:[#allocation2 + $0x60] sm:$0xff]  ;;  %v5923_v52 = vld [vmem:[#allocation2 + $0x68] sm:$0xff]  ;;  %v5928_v61 = vld [vmem:[#allocation2 + $0x110] sm:$0xff] }
 0x54b   : > { %5429 = vst [vmem:[%s10063_s5 + $0x90] sm:$0xff] %v5301_v40  ;;  %5430 = vst.msk [vmem:[%s10063_s5 + $0x98] sm:$0xff] %vm2847_vm1, %v5302_v59  ;;  %v4847_v24 = vmul.f32 %v5922_v47, %v9092_v62  ;;  %v4848_v40 = vmul.f32 %v5923_v52, %v9092_v62  ;;  %v4866_v62 = vmul.f32 %v5925_v29, %v9113_v58 }
 0x54c   : > { %5415 = vst [vmem:[%s10063_s5 + $0x20] sm:$0xff] %v5287_v34  ;;  %5416 = vst.msk [vmem:[%s10063_s5 + $0x28] sm:$0xff] %vm2847_vm1, %v5288_v45  ;;  %v5021_v0 = vpop.permute.xlu0 %5020 }
 0x54d   : > { %v4986_v28 = vpop.permute.xlu1 %4985  ;;  %v5305_v20 = vadd.f32 %v5021_v0, %v4857_v3  ;;  %v5306_v49 = vadd.f32 %v5021_v0, %v4858_v63  ;;  %v4865_v63 = vmul.f32 %v5924_v27, %v9113_v58  ;;  %v5933_v27 = vld [vmem:[#allocation2 + $0x138] sm:$0xff] }
 0x54e   : > { %v5291_v54 = vadd.f32 %v4986_v28, %v4843_v33  ;;  %v5292_v5 = vadd.f32 %v4986_v28, %v4844_v21  ;;  %v5926_v33 = vld [vmem:[#allocation2 + $0x80] sm:$0xff]  ;;  %v5927_v21 = vld [vmem:[#allocation2 + $0x88] sm:$0xff] }
 0x54f   : > { %5433 = vst [vmem:[%s10063_s5 + $0xb0] sm:$0xff] %v5305_v20  ;;  %5434 = vst.msk [vmem:[%s10063_s5 + $0xb8] sm:$0xff] %vm2847_vm1, %v5306_v49  ;;  %v4851_v17 = vmul.f32 %v5926_v33, %v9120_v23  ;;  %v4852_v0 = vmul.f32 %v5927_v21, %v9120_v23  ;;  %v4870_v23 = vmul.f32 %v5929_v10, %v9127_v16 }
 0x550   : > { %5419 = vst [vmem:[%s10063_s5 + $0x40] sm:$0xff] %v5291_v54  ;;  %5420 = vst.msk [vmem:[%s10063_s5 + $0x48] sm:$0xff] %vm2847_vm1, %v5292_v5  ;;  %v5031_v35 = vpop.permute.xlu0 %5030 }
 0x551   : > { %v4996_v59 = vpop.permute.xlu1 %4995  ;;  %v5309_v34 = vadd.f32 %v5031_v35, %v4861_v55  ;;  %v5310_v45 = vadd.f32 %v5031_v35, %v4862_v25  ;;  %v4869_v55 = vmul.f32 %v5928_v61, %v9127_v16  ;;  %v5930_v25 = vld [vmem:[#allocation2 + $0xa0] sm:$0xff] }
 0x552   : > { %v5295_v6 = vadd.f32 %v4996_v59, %v4847_v24  ;;  %v5296_v3 = vadd.f32 %v4996_v59, %v4848_v40  ;;  %v4855_v47 = vmul.f32 %v5930_v25, %v9134_v46  ;;  %v5931_v24 = vld [vmem:[#allocation2 + $0xa8] sm:$0xff] }
 0x553   : > { %5437 = vst [vmem:[%s10063_s5 + $0xd0] sm:$0xff] %v5309_v34  ;;  %5438 = vst.msk [vmem:[%s10063_s5 + $0xd8] sm:$0xff] %vm2847_vm1, %v5310_v45  ;;  %v4856_v52 = vmul.f32 %v5931_v24, %v9134_v46  ;;  %v4874_v46 = vmul.f32 %v5933_v27, %v9141_v9 }
 0x554   : > { %5423 = vst [vmem:[%s10063_s5 + $0x60] sm:$0xff] %v5295_v6  ;;  %5424 = vst.msk [vmem:[%s10063_s5 + $0x68] sm:$0xff] %vm2847_vm1, %v5296_v3  ;;  %v5041_v58 = vpop.permute.xlu0 %5040  ;;  %v5932_v6 = vld [vmem:[#allocation2 + $0x130] sm:$0xff] }
 0x555   : > { %v5006_v28 = vpop.permute.xlu1 %5005  ;;  %v5313_v20 = vadd.f32 %v5041_v58, %v4865_v63  ;;  %v5314_v49 = vadd.f32 %v5041_v58, %v4866_v62  ;;  %v4873_v3 = vmul.f32 %v5932_v6, %v9141_v9  ;;  %v5934_v63 = vld [vmem:[#allocation2 + $0xc0] sm:$0xff]  ;;  %v5935_v62 = vld [vmem:[#allocation2 + $0xc8] sm:$0xff] }
 0x556   : > { %v5299_v54 = vadd.f32 %v5006_v28, %v4851_v17  ;;  %v5300_v5 = vadd.f32 %v5006_v28, %v4852_v0  ;;  %v4859_v29 = vmul.f32 %v5934_v63, %v9148_v14  ;;  %v4860_v33 = vmul.f32 %v5935_v62, %v9148_v14  ;;  %v5943_v6 = vld [vmem:[#allocation2 + $0x108] sm:$0xff] }
 0x557   : > { %5441 = vst [vmem:[%s10063_s5 + $0xf0] sm:$0xff] %v5313_v20  ;;  %5442 = vst.msk [vmem:[%s10063_s5 + $0xf8] sm:$0xff] %vm2847_vm1, %v5314_v49  ;;  %v5936_v20 = vld [vmem:[#allocation2 + $0x150] sm:$0xff] }
 0x558   : > { %5427 = vst [vmem:[%s10063_s5 + $0x80] sm:$0xff] %v5299_v54  ;;  %5428 = vst.msk [vmem:[%s10063_s5 + $0x88] sm:$0xff] %vm2847_vm1, %v5300_v5  ;;  %v5051_v16 = vpop.permute.xlu0 %5050  ;;  %v4877_v49 = vmul.f32 %v5936_v20, %v9155_v42  ;;  %v5937_v54 = vld [vmem:[#allocation2 + $0x158] sm:$0xff]  ;;  %v5938_v5 = vld [vmem:[#allocation2 + $0xe0] sm:$0xff] }
 0x559   : > { %v5016_v40 = vpop.permute.xlu1 %5015  ;;  %v5317_v35 = vadd.f32 %v5051_v16, %v4869_v55  ;;  %v5318_v59 = vadd.f32 %v5051_v16, %v4870_v23  ;;  %v4878_v14 = vmul.f32 %v5937_v54, %v9155_v42  ;;  %v4863_v61 = vmul.f32 %v5938_v5, %v9162_v37  ;;  %v5939_v55 = vld [vmem:[#allocation2 + $0xe8] sm:$0xff]  ;;  %v5940_v16 = vld [vmem:[#allocation2 + $0x170] sm:$0xff] }
 0x55a   : > { %v5303_v34 = vadd.f32 %v5016_v40, %v4855_v47  ;;  %v5304_v45 = vadd.f32 %v5016_v40, %v4856_v52  ;;  %v4864_v10 = vmul.f32 %v5939_v55, %v9162_v37  ;;  %v4881_v40 = vmul.f32 %v5940_v16, %v9169_v39  ;;  %v5947_v20 = vld [vmem:[#allocation2 + $0x128] sm:$0xff] }
 0x55b   : > { %5445 = vst [vmem:[%s10063_s5 + $0x110] sm:$0xff] %v5317_v35  ;;  %5446 = vst.msk [vmem:[%s10063_s5 + $0x118] sm:$0xff] %vm2847_vm1, %v5318_v59  ;;  %v5941_v35 = vld [vmem:[#allocation2 + $0x178] sm:$0xff]  ;;  %v5942_v59 = vld [vmem:[#allocation2 + $0x100] sm:$0xff] }
 0x55c   : > { %5431 = vst [vmem:[%s10063_s5 + $0xa0] sm:$0xff] %v5303_v34  ;;  %5432 = vst.msk [vmem:[%s10063_s5 + $0xa8] sm:$0xff] %vm2847_vm1, %v5304_v45  ;;  %v5061_v9 = vpop.permute.xlu0 %5060  ;;  %v4882_v37 = vmul.f32 %v5941_v35, %v9169_v39  ;;  %v10581_v34 = vld [vmem:[#allocation20_spill] sm:$0xff]  ;;  %v5951_v16 = vld [vmem:[#allocation2 + $0x148] sm:$0xff] }
 0x55d   : > { %v5026_v17 = vpop.permute.xlu1 %5025  ;;  %v5321_v21 = vadd.f32 %v5061_v9, %v4873_v3  ;;  %v5322_v0 = vadd.f32 %v5061_v9, %v4874_v46  ;;  %v4867_v45 = vmul.f32 %v5942_v59, %v10581_v34  ;;  %v4868_v3 = vmul.f32 %v5943_v6, %v10581_v34  ;;  %v10582_v9 = vld [vmem:[#allocation19_spill] sm:$0xff] }
 0x55e   : > { %v5307_v58 = vadd.f32 %v5026_v17, %v4859_v29  ;;  %v5308_v28 = vadd.f32 %v5026_v17, %v4860_v33  ;;  %v5944_v33 = vld [vmem:[#allocation2 + $0x190] sm:$0xff] }
 0x55f   : > { %5449 = vst [vmem:[%s10063_s5 + $0x130] sm:$0xff] %v5321_v21  ;;  %5450 = vst.msk [vmem:[%s10063_s5 + $0x138] sm:$0xff] %vm2847_vm1, %v5322_v0  ;;  %v4885_v17 = vmul.f32 %v5944_v33, %v10582_v9  ;;  %v5945_v21 = vld [vmem:[#allocation2 + $0x198] sm:$0xff] }
 0x560   : > { %5435 = vst [vmem:[%s10063_s5 + $0xc0] sm:$0xff] %v5307_v58  ;;  %5436 = vst.msk [vmem:[%s10063_s5 + $0xc8] sm:$0xff] %vm2847_vm1, %v5308_v28  ;;  %v5071_v42 = vpop.permute.xlu0 %5070  ;;  %v4886_v0 = vmul.f32 %v5945_v21, %v10582_v9  ;;  %v5946_v58 = vld [vmem:[#allocation2 + $0x120] sm:$0xff] }
 0x561   : > { %v5036_v23 = vpop.permute.xlu1 %5035  ;;  %v5325_v25 = vadd.f32 %v5071_v42, %v4877_v49  ;;  %v5326_v47 = vadd.f32 %v5071_v42, %v4878_v14  ;;  %v4871_v28 = vmul.f32 %v5946_v58, %v9190_v8  ;;  %v4872_v49 = vmul.f32 %v5947_v20, %v9190_v8  ;;  %v5948_v42 = vld [vmem:[#allocation2 + $0x1b0] sm:$0xff] }
 0x562   : > { %v5311_v24 = vadd.f32 %v5036_v23, %v4863_v61  ;;  %v5312_v52 = vadd.f32 %v5036_v23, %v4864_v10  ;;  %v10583_v23 = vld [vmem:[#allocation22_spill] sm:$0xff] }
 0x563   : > { %5453 = vst [vmem:[%s10063_s5 + $0x150] sm:$0xff] %v5325_v25  ;;  %5454 = vst.msk [vmem:[%s10063_s5 + $0x158] sm:$0xff] %vm2847_vm1, %v5326_v47  ;;  %v4889_v25 = vmul.f32 %v5948_v42, %v10583_v23  ;;  %v5949_v47 = vld [vmem:[#allocation2 + $0x1b8] sm:$0xff]  ;;  %v5956_v20 = vld [vmem:[#allocation2 + $0x1f0] sm:$0xff] }
 0x564   : > { %5439 = vst [vmem:[%s10063_s5 + $0xe0] sm:$0xff] %v5311_v24  ;;  %5440 = vst.msk [vmem:[%s10063_s5 + $0xe8] sm:$0xff] %vm2847_vm1, %v5312_v52  ;;  %v5081_v39 = vpop.permute.xlu0 %5080  ;;  %v4890_v8 = vmul.f32 %v5949_v47, %v10583_v23  ;;  %v5950_v24 = vld [vmem:[#allocation2 + $0x140] sm:$0xff] }
 0x565   : > { %v5046_v27 = vpop.permute.xlu1 %5045  ;;  %v5329_v46 = vadd.f32 %v5081_v39, %v4881_v40  ;;  %v5330_v63 = vadd.f32 %v5081_v39, %v4882_v37  ;;  %v4875_v52 = vmul.f32 %v5950_v24, %v9204_v31  ;;  %v4876_v40 = vmul.f32 %v5951_v16, %v9204_v31  ;;  %v10584_v39 = vld [vmem:[#allocation24_spill] sm:$0xff]  ;;  %v5960_v16 = vld [vmem:[#allocation2 + $0x210] sm:$0xff] }
 0x566   : > { %v5315_v29 = vadd.f32 %v5046_v27, %v4867_v45  ;;  %v5316_v62 = vadd.f32 %v5046_v27, %v4868_v3  ;;  %v5952_v3 = vld [vmem:[#allocation2 + $0x1d0] sm:$0xff] }
 0x567   : > { %5457 = vst [vmem:[%s10063_s5 + $0x170] sm:$0xff] %v5329_v46  ;;  %5458 = vst.msk [vmem:[%s10063_s5 + $0x178] sm:$0xff] %vm2847_vm1, %v5330_v63  ;;  %v4893_v27 = vmul.f32 %v5952_v3, %v10584_v39  ;;  %v5953_v46 = vld [vmem:[#allocation2 + $0x1d8] sm:$0xff]  ;;  %v5954_v63 = vld [vmem:[#allocation2 + $0x160] sm:$0xff] }
 0x568   : > { %5443 = vst [vmem:[%s10063_s5 + $0x100] sm:$0xff] %v5315_v29  ;;  %5444 = vst.msk [vmem:[%s10063_s5 + $0x108] sm:$0xff] %vm2847_vm1, %v5316_v62  ;;  %v5091_v54 = vpop.permute.xlu0 %5090  ;;  %v4894_v31 = vmul.f32 %v5953_v46, %v10584_v39  ;;  %v4879_v29 = vmul.f32 %v5954_v63, %v9218_v12  ;;  %v5955_v62 = vld [vmem:[#allocation2 + $0x168] sm:$0xff] }
 0x569   : > { %v5056_v14 = vpop.permute.xlu1 %5055  ;;  %v5333_v5 = vadd.f32 %v5091_v54, %v4885_v17  ;;  %v5334_v61 = vadd.f32 %v5091_v54, %v4886_v0  ;;  %v4880_v33 = vmul.f32 %v5955_v62, %v9218_v12  ;;  %v5964_v62 = vld [vmem:[#allocation2 + $0x230] sm:$0xff] }
 0x56a   : > { %v5319_v55 = vadd.f32 %v5056_v14, %v4871_v28  ;;  %v5320_v10 = vadd.f32 %v5056_v14, %v4872_v49  ;;  %v10585_v49 = vld [vmem:[#allocation27_spill] sm:$0xff] }
 0x56b   : > { %5461 = vst [vmem:[%s10063_s5 + $0x190] sm:$0xff] %v5333_v5  ;;  %5462 = vst.msk [vmem:[%s10063_s5 + $0x198] sm:$0xff] %vm2847_vm1, %v5334_v61  ;;  %v4897_v54 = vmul.f32 %v5956_v20, %v10585_v49  ;;  %v5957_v14 = vld [vmem:[#allocation2 + $0x1f8] sm:$0xff]  ;;  %v5958_v5 = vld [vmem:[#allocation2 + $0x180] sm:$0xff] }
 0x56c   : > { %5447 = vst [vmem:[%s10063_s5 + $0x120] sm:$0xff] %v5319_v55  ;;  %5448 = vst.msk [vmem:[%s10063_s5 + $0x128] sm:$0xff] %vm2847_vm1, %v5320_v10  ;;  %v5101_v35 = vpop.permute.xlu0 %5100  ;;  %v4898_v12 = vmul.f32 %v5957_v14, %v10585_v49  ;;  %v10586_v61 = vld [vmem:[#allocation21_spill] sm:$0xff] }
 0x56d   : > { %v5066_v37 = vpop.permute.xlu1 %5065  ;;  %v5337_v59 = vadd.f32 %v5101_v35, %v4889_v25  ;;  %v5338_v34 = vadd.f32 %v5101_v35, %v4890_v8  ;;  %v4883_v55 = vmul.f32 %v5958_v5, %v10586_v61  ;;  %v5959_v10 = vld [vmem:[#allocation2 + $0x188] sm:$0xff] }
 0x56e   : > { %v5323_v45 = vadd.f32 %v5066_v37, %v4875_v52  ;;  %v5324_v6 = vadd.f32 %v5066_v37, %v4876_v40  ;;  %v4884_v42 = vmul.f32 %v5959_v10, %v10586_v61  ;;  %v10587_v40 = vld [vmem:[#allocation28_spill] sm:$0xff]  ;;  %v5961_v37 = vld [vmem:[#allocation2 + $0x218] sm:$0xff]  ;;  %v5968_v61 = vld [vmem:[#allocation2 + $0x250] sm:$0xff] }
 0x56f   : > { %5465 = vst [vmem:[%s10063_s5 + $0x1b0] sm:$0xff] %v5337_v59  ;;  %5466 = vst.msk [vmem:[%s10063_s5 + $0x1b8] sm:$0xff] %vm2847_vm1, %v5338_v34  ;;  %v4901_v35 = vmul.f32 %v5960_v16, %v10587_v40  ;;  %v4902_v59 = vmul.f32 %v5961_v37, %v10587_v40  ;;  %v5962_v34 = vld [vmem:[#allocation2 + $0x1a0] sm:$0xff]  ;;  %v5969_v10 = vld [vmem:[#allocation2 + $0x258] sm:$0xff] }
 0x570   : > { %5451 = vst [vmem:[%s10063_s5 + $0x140] sm:$0xff] %v5323_v45  ;;  %5452 = vst.msk [vmem:[%s10063_s5 + $0x148] sm:$0xff] %vm2847_vm1, %v5324_v6  ;;  %v5111_v9 = vpop.permute.xlu0 %5110  ;;  %v4887_v45 = vmul.f32 %v5962_v34, %v9246_v60  ;;  %v5963_v6 = vld [vmem:[#allocation2 + $0x1a8] sm:$0xff]  ;;  %v5974_v34 = vld [vmem:[#allocation2 + $0x200] sm:$0xff] }
 0x571   : > { %v5076_v17 = vpop.permute.xlu1 %5075  ;;  %v5341_v21 = vadd.f32 %v5111_v9, %v4893_v27  ;;  %v5342_v0 = vadd.f32 %v5111_v9, %v4894_v31  ;;  %v4888_v3 = vmul.f32 %v5963_v6, %v9246_v60  ;;  %v5975_v6 = vld [vmem:[#allocation2 + $0x208] sm:$0xff] }
 0x572   : > { %v5327_v58 = vadd.f32 %v5076_v17, %v4879_v29  ;;  %v5328_v28 = vadd.f32 %v5076_v17, %v4880_v33  ;;  %v10588_v33 = vld [vmem:[#allocation23_spill] sm:$0xff] }
 0x573   : > { %5469 = vst [vmem:[%s10063_s5 + $0x1d0] sm:$0xff] %v5341_v21  ;;  %5470 = vst.msk [vmem:[%s10063_s5 + $0x1d8] sm:$0xff] %vm2847_vm1, %v5342_v0  ;;  %v4905_v9 = vmul.f32 %v5964_v62, %v10588_v33  ;;  %v5965_v17 = vld [vmem:[#allocation2 + $0x238] sm:$0xff]  ;;  %v5966_v21 = vld [vmem:[#allocation2 + $0x1c0] sm:$0xff] }
 0x574   : > { %5455 = vst [vmem:[%s10063_s5 + $0x160] sm:$0xff] %v5327_v58  ;;  %5456 = vst.msk [vmem:[%s10063_s5 + $0x168] sm:$0xff] %vm2847_vm1, %v5328_v28  ;;  %v5121_v23 = vpop.permute.xlu0 %5120  ;;  %v4906_v60 = vmul.f32 %v5965_v17, %v10588_v33  ;;  %v4891_v0 = vmul.f32 %v5966_v21, %v9260_v53  ;;  %v5967_v58 = vld [vmem:[#allocation2 + $0x1c8] sm:$0xff]  ;;  %v5978_v17 = vld [vmem:[#allocation2 + $0x220] sm:$0xff] }
 0x575   : > { %v5086_v25 = vpop.permute.xlu1 %5085  ;;  %v5345_v47 = vadd.f32 %v5121_v23, %v4897_v54  ;;  %v5346_v8 = vadd.f32 %v5121_v23, %v4898_v12  ;;  %v4892_v28 = vmul.f32 %v5967_v58, %v9260_v53  ;;  %v4910_v53 = vmul.f32 %v5969_v10, %v9267_v43  ;;  %v10589_v62 = vld [vmem:[#allocation25_spill] sm:$0xff]  ;;  %v5981_v10 = vld [vmem:[#allocation2 + $0x2b8] sm:$0xff] }
 0x576   : > { %v5331_v24 = vadd.f32 %v5086_v25, %v4883_v55  ;;  %v5332_v52 = vadd.f32 %v5086_v25, %v4884_v42  ;;  %v4909_v55 = vmul.f32 %v5968_v61, %v9267_v43  ;;  %v5970_v42 = vld [vmem:[#allocation2 + $0x1e0] sm:$0xff]  ;;  %v5971_v25 = vld [vmem:[#allocation2 + $0x1e8] sm:$0xff]  ;;  %v10591_v61 = vld [vmem:[#allocation31_spill] sm:$0xff] }
 0x577   : > { %5473 = vst [vmem:[%s10063_s5 + $0x1f0] sm:$0xff] %v5345_v47  ;;  %5474 = vst.msk [vmem:[%s10063_s5 + $0x1f8] sm:$0xff] %vm2847_vm1, %v5346_v8  ;;  %v4895_v23 = vmul.f32 %v5970_v42, %v9274_v1  ;;  %v4896_v47 = vmul.f32 %v5971_v25, %v9274_v1  ;;  %v5982_v42 = vld [vmem:[#allocation2 + $0x240] sm:$0xff] }
 0x578   : > { %5459 = vst [vmem:[%s10063_s5 + $0x180] sm:$0xff] %v5331_v24  ;;  %5460 = vst.msk [vmem:[%s10063_s5 + $0x188] sm:$0xff] %vm2847_vm1, %v5332_v52  ;;  %v5131_v39 = vpop.permute.xlu0 %5130 }
 0x579   : > { %v5096_v27 = vpop.permute.xlu1 %5095  ;;  %v5349_v46 = vadd.f32 %v5131_v39, %v4901_v35  ;;  %v5350_v31 = vadd.f32 %v5131_v39, %v4902_v59  ;;  %v5972_v35 = vld [vmem:[#allocation2 + $0x270] sm:$0xff]  ;;  %v5973_v59 = vld [vmem:[#allocation2 + $0x278] sm:$0xff] }
 0x57a   : > { %v5335_v63 = vadd.f32 %v5096_v27, %v4887_v45  ;;  %v5336_v29 = vadd.f32 %v5096_v27, %v4888_v3  ;;  %v4913_v37 = vmul.f32 %v5972_v35, %v9281_v18  ;;  %v4914_v1 = vmul.f32 %v5973_v59, %v9281_v18 }
 0x57b   : > { %5477 = vst [vmem:[%s10063_s5 + $0x210] sm:$0xff] %v5349_v46  ;;  %5478 = vst.msk [vmem:[%s10063_s5 + $0x218] sm:$0xff] %vm2847_vm1, %v5350_v31  ;;  %v4899_v45 = vmul.f32 %v5974_v34, %v9288_v13  ;;  %v4900_v3 = vmul.f32 %v5975_v6, %v9288_v13  ;;  %v10593_v6 = vld [vmem:[#allocation46_spill] sm:$0xff] }
 0x57c   : > { %5463 = vst [vmem:[%s10063_s5 + $0x1a0] sm:$0xff] %v5335_v63  ;;  %5464 = vst.msk [vmem:[%s10063_s5 + $0x1a8] sm:$0xff] %vm2847_vm1, %v5336_v29  ;;  %v5141_v20 = vpop.permute.xlu0 %5140  ;;  %v5976_v29 = vld [vmem:[#allocation2 + $0x290] sm:$0xff] }
 0x57d   : > { %v5106_v49 = vpop.permute.xlu1 %5105  ;;  %v5353_v54 = vadd.f32 %v5141_v20, %v4905_v9  ;;  %v5354_v14 = vadd.f32 %v5141_v20, %v4906_v60  ;;  %v4917_v33 = vmul.f32 %v5976_v29, %v10589_v62  ;;  %v5977_v9 = vld [vmem:[#allocation2 + $0x298] sm:$0xff]  ;;  %v10590_v60 = vld [vmem:[#allocation26_spill] sm:$0xff] }
 0x57e   : > { %v5339_v12 = vadd.f32 %v5106_v49, %v4891_v0  ;;  %v5340_v5 = vadd.f32 %v5106_v49, %v4892_v28  ;;  %v4918_v13 = vmul.f32 %v5977_v9, %v10589_v62  ;;  %v4903_v21 = vmul.f32 %v5978_v17, %v10590_v60  ;;  %v5979_v0 = vld [vmem:[#allocation2 + $0x228] sm:$0xff]  ;;  %v5988_v62 = vld [vmem:[#allocation2 + $0x2f0] sm:$0xff]  ;;  %v5989_v9 = vld [vmem:[#allocation2 + $0x2f8] sm:$0xff] }
 0x57f   : > { %5481 = vst [vmem:[%s10063_s5 + $0x230] sm:$0xff] %v5353_v54  ;;  %5482 = vst.msk [vmem:[%s10063_s5 + $0x238] sm:$0xff] %vm2847_vm1, %v5354_v14  ;;  %v4904_v58 = vmul.f32 %v5979_v0, %v10590_v60  ;;  %v5990_v17 = vld [vmem:[#allocation2 + $0x280] sm:$0xff] }
 0x580   : > { %5467 = vst [vmem:[%s10063_s5 + $0x1c0] sm:$0xff] %v5339_v12  ;;  %5468 = vst.msk [vmem:[%s10063_s5 + $0x1c8] sm:$0xff] %vm2847_vm1, %v5340_v5  ;;  %v5151_v43 = vpop.permute.xlu0 %5150  ;;  %v5980_v5 = vld [vmem:[#allocation2 + $0x2b0] sm:$0xff]  ;;  %v4915_v60 = vmul.f32 %v5990_v17, %v9344_v15 }
 0x581   : > { %v5116_v8 = vpop.permute.xlu1 %5115  ;;  %v5357_v24 = vadd.f32 %v5151_v43, %v4909_v55  ;;  %v5358_v52 = vadd.f32 %v5151_v43, %v4910_v53  ;;  %v4921_v55 = vmul.f32 %v5980_v5, %v10591_v61  ;;  %v4922_v53 = vmul.f32 %v5981_v10, %v10591_v61  ;;  %v5993_v5 = vld [vmem:[#allocation2 + $0x318] sm:$0xff]  ;;  %v5994_v61 = vld [vmem:[#allocation2 + $0x2a0] sm:$0xff]  ;;  %v5995_v10 = vld [vmem:[#allocation2 + $0x2a8] sm:$0xff] }
 0x582   : > { %v5343_v16 = vadd.f32 %v5116_v8, %v4895_v23  ;;  %v5344_v40 = vadd.f32 %v5116_v8, %v4896_v47  ;;  %v10592_v23 = vld [vmem:[#allocation29_spill] sm:$0xff] }
 0x583   : > { %5485 = vst [vmem:[%s10063_s5 + $0x250] sm:$0xff] %v5357_v24  ;;  %5486 = vst.msk [vmem:[%s10063_s5 + $0x258] sm:$0xff] %vm2847_vm1, %v5358_v52  ;;  %v4907_v25 = vmul.f32 %v5982_v42, %v10592_v23  ;;  %v5983_v47 = vld [vmem:[#allocation2 + $0x248] sm:$0xff] }
 0x584   : > { %5471 = vst [vmem:[%s10063_s5 + $0x1e0] sm:$0xff] %v5343_v16  ;;  %5472 = vst.msk [vmem:[%s10063_s5 + $0x1e8] sm:$0xff] %vm2847_vm1, %v5344_v40  ;;  %v5161_v18 = vpop.permute.xlu0 %5160  ;;  %v4908_v43 = vmul.f32 %v5983_v47, %v10592_v23 }
 0x585   : > { %v5126_v39 = vpop.permute.xlu1 %5125  ;;  %v5361_v27 = vadd.f32 %v5161_v18, %v4913_v37  ;;  %v5362_v46 = vadd.f32 %v5161_v18, %v4914_v1  ;;  %v5984_v37 = vld [vmem:[#allocation2 + $0x2d0] sm:$0xff]  ;;  %v5985_v1 = vld [vmem:[#allocation2 + $0x2d8] sm:$0xff]  ;;  %v5987_v18 = vld [vmem:[#allocation2 + $0x268] sm:$0xff] }
 0x586   : > { %v5347_v31 = vadd.f32 %v5126_v39, %v4899_v45  ;;  %v5348_v63 = vadd.f32 %v5126_v39, %v4900_v3  ;;  %v4925_v59 = vmul.f32 %v5984_v37, %v9323_v19  ;;  %v4926_v34 = vmul.f32 %v5985_v1, %v9323_v19  ;;  %v5986_v45 = vld [vmem:[#allocation2 + $0x260] sm:$0xff] }
 0x587   : > { %5489 = vst [vmem:[%s10063_s5 + $0x270] sm:$0xff] %v5361_v27  ;;  %5490 = vst.msk [vmem:[%s10063_s5 + $0x278] sm:$0xff] %vm2847_vm1, %v5362_v46  ;;  %v4911_v3 = vmul.f32 %v5986_v45, %v10593_v6  ;;  %v4912_v39 = vmul.f32 %v5987_v18, %v10593_v6 }
 0x588   : > { %5475 = vst [vmem:[%s10063_s5 + $0x200] sm:$0xff] %v5347_v31  ;;  %5476 = vst.msk [vmem:[%s10063_s5 + $0x208] sm:$0xff] %vm2847_vm1, %v5348_v63  ;;  %v5171_v28 = vpop.permute.xlu0 %5170 }
 0x589   : > { %v5136_v20 = vpop.permute.xlu1 %5135  ;;  %v5365_v49 = vadd.f32 %v5171_v28, %v4917_v33  ;;  %v5366_v54 = vadd.f32 %v5171_v28, %v4918_v13  ;;  %v4929_v33 = vmul.f32 %v5988_v62, %v9337_v50  ;;  %v4930_v13 = vmul.f32 %v5989_v9, %v9337_v50 }
 0x58a   : > { %v5351_v14 = vadd.f32 %v5136_v20, %v4903_v21  ;;  %v5352_v12 = vadd.f32 %v5136_v20, %v4904_v58  ;;  %v5991_v21 = vld [vmem:[#allocation2 + $0x288] sm:$0xff] }
 0x58b   : > { %5493 = vst [vmem:[%s10063_s5 + $0x290] sm:$0xff] %v5365_v49  ;;  %5494 = vst.msk [vmem:[%s10063_s5 + $0x298] sm:$0xff] %vm2847_vm1, %v5366_v54  ;;  %v4916_v0 = vmul.f32 %v5991_v21, %v9344_v15  ;;  %v4934_v15 = vmul.f32 %v5993_v5, %v9351_v38  ;;  %v6006_v21 = vld [vmem:[#allocation2 + $0x300] sm:$0xff] }
 0x58c   : > { %5479 = vst [vmem:[%s10063_s5 + $0x220] sm:$0xff] %v5351_v14  ;;  %5480 = vst.msk [vmem:[%s10063_s5 + $0x228] sm:$0xff] %vm2847_vm1, %v5352_v12  ;;  %v5181_v8 = vpop.permute.xlu0 %5180  ;;  %v5992_v14 = vld [vmem:[#allocation2 + $0x310] sm:$0xff] }
 0x58d   : > { %v5146_v24 = vpop.permute.xlu1 %5145  ;;  %v5369_v52 = vadd.f32 %v5181_v8, %v4921_v55  ;;  %v5370_v16 = vadd.f32 %v5181_v8, %v4922_v53  ;;  %v4933_v12 = vmul.f32 %v5992_v14, %v9351_v38  ;;  %v4919_v55 = vmul.f32 %v5994_v61, %v9358_v7  ;;  %v5996_v8 = vld [vmem:[#allocation2 + $0x330] sm:$0xff]  ;;  %v6010_v61 = vld [vmem:[#allocation2 + $0x320] sm:$0xff] }
 0x58e   : > { %v5355_v40 = vadd.f32 %v5146_v24, %v4907_v25  ;;  %v5356_v35 = vadd.f32 %v5146_v24, %v4908_v43  ;;  %v4920_v53 = vmul.f32 %v5995_v10, %v9358_v7  ;;  %v4937_v24 = vmul.f32 %v5996_v8, %v9365_v48  ;;  %v6011_v10 = vld [vmem:[#allocation2 + $0x328] sm:$0xff] }
 0x58f   : > { %5497 = vst [vmem:[%s10063_s5 + $0x2b0] sm:$0xff] %v5369_v52  ;;  %5498 = vst.msk [vmem:[%s10063_s5 + $0x2b8] sm:$0xff] %vm2847_vm1, %v5370_v16  ;;  %v5997_v52 = vld [vmem:[#allocation2 + $0x338] sm:$0xff]  ;;  %v5998_v16 = vld [vmem:[#allocation2 + $0x2c0] sm:$0xff] }
 0x590   : > { %5483 = vst [vmem:[%s10063_s5 + $0x240] sm:$0xff] %v5355_v40  ;;  %5484 = vst.msk [vmem:[%s10063_s5 + $0x248] sm:$0xff] %vm2847_vm1, %v5356_v35  ;;  %v5191_v19 = vpop.permute.xlu0 %5190  ;;  %v4938_v7 = vmul.f32 %v5997_v52, %v9365_v48  ;;  %v4923_v40 = vmul.f32 %v5998_v16, %v9372_v11  ;;  %v5999_v35 = vld [vmem:[#allocation2 + $0x2c8] sm:$0xff]  ;;  %v6014_v52 = vld [vmem:[#allocation2 + $0x340] sm:$0xff] }
 0x591   : > { %v5156_v27 = vpop.permute.xlu1 %5155  ;;  %v5373_v46 = vadd.f32 %v5191_v19, %v4925_v59  ;;  %v5374_v31 = vadd.f32 %v5191_v19, %v4926_v34  ;;  %v4924_v37 = vmul.f32 %v5999_v35, %v9372_v11  ;;  %v6002_v19 = vld [vmem:[#allocation2 + $0x2e0] sm:$0xff]  ;;  %v6015_v16 = vld [vmem:[#allocation2 + $0x348] sm:$0xff] }
 0x592   : > { %v5359_v63 = vadd.f32 %v5156_v27, %v4911_v3  ;;  %v5360_v29 = vadd.f32 %v5156_v27, %v4912_v39  ;;  %v6000_v3 = vld [vmem:[#allocation2 + $0x350] sm:$0xff]  ;;  %v6001_v39 = vld [vmem:[#allocation2 + $0x358] sm:$0xff]  ;;  %v4927_v27 = vmul.f32 %v6002_v19, %v9386_v57 }
 0x593   : > { %5501 = vst [vmem:[%s10063_s5 + $0x2d0] sm:$0xff] %v5373_v46  ;;  %5502 = vst.msk [vmem:[%s10063_s5 + $0x2d8] sm:$0xff] %vm2847_vm1, %v5374_v31  ;;  %v4941_v18 = vmul.f32 %v6000_v3, %v9379_v4  ;;  %v4942_v11 = vmul.f32 %v6001_v39, %v9379_v4  ;;  %v6003_v46 = vld [vmem:[#allocation2 + $0x2e8] sm:$0xff]  ;;  %v6018_v3 = vld [vmem:[#allocation2 + $0x360] sm:$0xff] }
 0x594   : > { %5487 = vst [vmem:[%s10063_s5 + $0x260] sm:$0xff] %v5359_v63  ;;  %5488 = vst.msk [vmem:[%s10063_s5 + $0x268] sm:$0xff] %vm2847_vm1, %v5360_v29  ;;  %v5201_v50 = vpop.permute.xlu0 %5200  ;;  %v4928_v31 = vmul.f32 %v6003_v46, %v9386_v57 }
 0x595   : > { %v5166_v58 = vpop.permute.xlu1 %5165  ;;  %v5377_v28 = vadd.f32 %v5201_v50, %v4929_v33  ;;  %v5378_v20 = vadd.f32 %v5201_v50, %v4930_v13  ;;  %v6004_v13 = vld [vmem:[#allocation2 + $0x370] sm:$0xff]  ;;  %v6007_v50 = vld [vmem:[#allocation2 + $0x308] sm:$0xff] }
 0x596   : > { %v5363_v49 = vadd.f32 %v5166_v58, %v4915_v60  ;;  %v5364_v54 = vadd.f32 %v5166_v58, %v4916_v0  ;;  %v4945_v17 = vmul.f32 %v6004_v13, %v9393_v44  ;;  %v6005_v60 = vld [vmem:[#allocation2 + $0x378] sm:$0xff]  ;;  %v4931_v0 = vmul.f32 %v6006_v21, %v9400_v22  ;;  %v6023_v21 = vld [vmem:[#allocation2 + $0x388] sm:$0xff] }
 0x597   : > { %5505 = vst [vmem:[%s10063_s5 + $0x2f0] sm:$0xff] %v5377_v28  ;;  %5506 = vst.msk [vmem:[%s10063_s5 + $0x2f8] sm:$0xff] %vm2847_vm1, %v5378_v20  ;;  %v4946_v57 = vmul.f32 %v6005_v60, %v9393_v44  ;;  %v4932_v58 = vmul.f32 %v6007_v50, %v9400_v22  ;;  %v10596_v60 = vld [vmem:[#allocation32_spill] sm:$0xff] }
 0x598   : > { %5491 = vst [vmem:[%s10063_s5 + $0x280] sm:$0xff] %v5363_v49  ;;  %5492 = vst.msk [vmem:[%s10063_s5 + $0x288] sm:$0xff] %vm2847_vm1, %v5364_v54  ;;  %v5211_v38 = vpop.permute.xlu0 %5210 }
 0x599   : > { %v5176_v42 = vpop.permute.xlu1 %5175  ;;  %v5381_v23 = vadd.f32 %v5211_v38, %v4933_v12  ;;  %v5382_v25 = vadd.f32 %v5211_v38, %v4934_v15  ;;  %v6008_v12 = vld [vmem:[#allocation2 + $0x390] sm:$0xff]  ;;  %v6009_v15 = vld [vmem:[#allocation2 + $0x398] sm:$0xff] }
 0x59a   : > { %v5367_v47 = vadd.f32 %v5176_v42, %v4919_v55  ;;  %v5368_v43 = vadd.f32 %v5176_v42, %v4920_v53  ;;  %v4949_v5 = vmul.f32 %v6008_v12, %v9407_v56  ;;  %v4950_v22 = vmul.f32 %v6009_v15, %v9407_v56  ;;  %v6025_v12 = vld [vmem:[#allocation2 + $0x3a8] sm:$0xff] }
 0x59b   : > { %5509 = vst [vmem:[%s10063_s5 + $0x310] sm:$0xff] %v5381_v23  ;;  %5510 = vst.msk [vmem:[%s10063_s5 + $0x318] sm:$0xff] %vm2847_vm1, %v5382_v25  ;;  %v4935_v55 = vmul.f32 %v6010_v61, %v9414_v36  ;;  %v4936_v53 = vmul.f32 %v6011_v10, %v9414_v36 }
 0x59c   : > { %5495 = vst [vmem:[%s10063_s5 + $0x2a0] sm:$0xff] %v5367_v47  ;;  %5496 = vst.msk [vmem:[%s10063_s5 + $0x2a8] sm:$0xff] %vm2847_vm1, %v5368_v43  ;;  %v5221_v48 = vpop.permute.xlu0 %5220  ;;  %v6012_v43 = vld [vmem:[#allocation2 + $0x3b0] sm:$0xff] }
 0x59d   : > { %v5186_v59 = vpop.permute.xlu1 %5185  ;;  %v5385_v1 = vadd.f32 %v5221_v48, %v4937_v24  ;;  %v5386_v34 = vadd.f32 %v5221_v48, %v4938_v7  ;;  %v4953_v8 = vmul.f32 %v6012_v43, %v9421_v32  ;;  %v6013_v24 = vld [vmem:[#allocation2 + $0x3b8] sm:$0xff]  ;;  %v4939_v7 = vmul.f32 %v6014_v52, %v9428_v26 }
 0x59e   : > { %v5371_v45 = vadd.f32 %v5186_v59, %v4923_v40  ;;  %v5372_v6 = vadd.f32 %v5186_v59, %v4924_v37  ;;  %v4954_v36 = vmul.f32 %v6013_v24, %v9421_v32  ;;  %v4940_v40 = vmul.f32 %v6015_v16, %v9428_v26 }
 0x59f   : > { %5513 = vst [vmem:[%s10063_s5 + $0x330] sm:$0xff] %v5385_v1  ;;  %5514 = vst.msk [vmem:[%s10063_s5 + $0x338] sm:$0xff] %vm2847_vm1, %v5386_v34  ;;  %v6016_v34 = vld [vmem:[#allocation2 + $0x3d0] sm:$0xff] }
 0x5a0   : > { %5499 = vst [vmem:[%s10063_s5 + $0x2c0] sm:$0xff] %v5371_v45  ;;  %5500 = vst.msk [vmem:[%s10063_s5 + $0x2c8] sm:$0xff] %vm2847_vm1, %v5372_v6  ;;  %v5231_v4 = vpop.permute.xlu0 %5230  ;;  %v4957_v45 = vmul.f32 %v6016_v34, %v9435_v30  ;;  %v6017_v6 = vld [vmem:[#allocation2 + $0x3d8] sm:$0xff] }
 0x5a1   : > { %v5196_v63 = vpop.permute.xlu1 %5195  ;;  %v5389_v29 = vadd.f32 %v5231_v4, %v4941_v18  ;;  %v5390_v62 = vadd.f32 %v5231_v4, %v4942_v11  ;;  %v4958_v26 = vmul.f32 %v6017_v6, %v9435_v30  ;;  %v10594_v18 = vld [vmem:[#allocation30_spill] sm:$0xff]  ;;  %v6019_v11 = vld [vmem:[#allocation2 + $0x368] sm:$0xff] }
 0x5a2   : > { %v5375_v33 = vadd.f32 %v5196_v63, %v4927_v27  ;;  %v5376_v9 = vadd.f32 %v5196_v63, %v4928_v31  ;;  %v4943_v39 = vmul.f32 %v6018_v3, %v10594_v18  ;;  %v4944_v19 = vmul.f32 %v6019_v11, %v10594_v18 }
 0x5a3   : > { %5517 = vst [vmem:[%s10063_s5 + $0x350] sm:$0xff] %v5389_v29  ;;  %5518 = vst.msk [vmem:[%s10063_s5 + $0x358] sm:$0xff] %vm2847_vm1, %v5390_v62  ;;  %v6020_v29 = vld [vmem:[#allocation2 + $0x3f0] sm:$0xff]  ;;  %v10595_v62 = vld [vmem:[#allocation35_spill] sm:$0xff] }
 0x5a4   : > { %5503 = vst [vmem:[%s10063_s5 + $0x2e0] sm:$0xff] %v5375_v33  ;;  %5504 = vst.msk [vmem:[%s10063_s5 + $0x2e8] sm:$0xff] %vm2847_vm1, %v5376_v9  ;;  %v5241_v44 = vpop.permute.xlu0 %5240  ;;  %v4961_v33 = vmul.f32 %v6020_v29, %v10595_v62  ;;  %v6021_v9 = vld [vmem:[#allocation2 + $0x3f8] sm:$0xff] }
 0x5a5   : > { %v5206_v28 = vpop.permute.xlu1 %5205  ;;  %v5393_v20 = vadd.f32 %v5241_v44, %v4945_v17  ;;  %v5394_v49 = vadd.f32 %v5241_v44, %v4946_v57  ;;  %v4962_v13 = vmul.f32 %v6021_v9, %v10595_v62  ;;  %v6022_v17 = vld [vmem:[#allocation2 + $0x380] sm:$0xff] }
 0x5a6   : > { %v5379_v54 = vadd.f32 %v5206_v28, %v4931_v0  ;;  %v5380_v14 = vadd.f32 %v5206_v28, %v4932_v58  ;;  %v4947_v57 = vmul.f32 %v6022_v17, %v10596_v60  ;;  %v4948_v0 = vmul.f32 %v6023_v21, %v10596_v60 }
 0x5a7   : > { %5521 = vst [vmem:[%s10063_s5 + $0x370] sm:$0xff] %v5393_v20  ;;  %5522 = vst.msk [vmem:[%s10063_s5 + $0x378] sm:$0xff] %vm2847_vm1, %v5394_v49 }
 0x5a8   : > { %5507 = vst [vmem:[%s10063_s5 + $0x300] sm:$0xff] %v5379_v54  ;;  %5508 = vst.msk [vmem:[%s10063_s5 + $0x308] sm:$0xff] %vm2847_vm1, %v5380_v14  ;;  %v5251_v56 = vpop.permute.xlu0 %5250  ;;  %v6024_v54 = vld [vmem:[#allocation2 + $0x3a0] sm:$0xff] }
 0x5a9   : > { %v5216_v38 = vpop.permute.xlu1 %5215  ;;  %v5397_v42 = vadd.f32 %v5251_v56, %v4949_v5  ;;  %v5398_v23 = vadd.f32 %v5251_v56, %v4950_v22  ;;  %v4951_v14 = vmul.f32 %v6024_v54, %v9460_v41  ;;  %v4952_v5 = vmul.f32 %v6025_v12, %v9460_v41 }
 0x5aa   : > { %v5383_v25 = vadd.f32 %v5216_v38, %v4935_v55  ;;  %v5384_v47 = vadd.f32 %v5216_v38, %v4936_v53  ;;  %v6026_v55 = vld [vmem:[#allocation2 + $0x3c0] sm:$0xff]  ;;  %v6027_v53 = vld [vmem:[#allocation2 + $0x3c8] sm:$0xff] }
 0x5ab   : > { %5525 = vst [vmem:[%s10063_s5 + $0x390] sm:$0xff] %v5397_v42  ;;  %5526 = vst.msk [vmem:[%s10063_s5 + $0x398] sm:$0xff] %vm2847_vm1, %v5398_v23  ;;  %v4955_v10 = vmul.f32 %v6026_v55, %v9476_v51  ;;  %v4956_v56 = vmul.f32 %v6027_v53, %v9476_v51  ;;  %v6028_v23 = vld [vmem:[#allocation2 + $0x3e0] sm:$0xff] }
 0x5ac   : > { %5511 = vst [vmem:[%s10063_s5 + $0x320] sm:$0xff] %v5383_v25  ;;  %5512 = vst.msk [vmem:[%s10063_s5 + $0x328] sm:$0xff] %vm2847_vm1, %v5384_v47  ;;  %v5261_v32 = vpop.permute.xlu0 %5260  ;;  %v4959_v25 = vmul.f32 %v6028_v23, %v9490_v2  ;;  %v6029_v47 = vld [vmem:[#allocation2 + $0x3e8] sm:$0xff] }
 0x5ad   : > { %v5226_v35 = vpop.permute.xlu1 %5225  ;;  %v5401_v37 = vadd.f32 %v5261_v32, %v4953_v8  ;;  %v5402_v48 = vadd.f32 %v5261_v32, %v4954_v36  ;;  %v4960_v43 = vmul.f32 %v6029_v47, %v9490_v2 }
 0x5ae   : > { %v5387_v59 = vadd.f32 %v5226_v35, %v4939_v7  ;;  %v5388_v1 = vadd.f32 %v5226_v35, %v4940_v40 }
 0x5af   : > { %5529 = vst [vmem:[%s10063_s5 + $0x3b0] sm:$0xff] %v5401_v37  ;;  %5530 = vst.msk [vmem:[%s10063_s5 + $0x3b8] sm:$0xff] %vm2847_vm1, %v5402_v48 }
 0x5b0   : > { %5515 = vst [vmem:[%s10063_s5 + $0x340] sm:$0xff] %v5387_v59  ;;  %5516 = vst.msk [vmem:[%s10063_s5 + $0x348] sm:$0xff] %vm2847_vm1, %v5388_v1  ;;  %v5271_v30 = vpop.permute.xlu0 %5270 }
 0x5b1   : > { %v5236_v27 = vpop.permute.xlu1 %5235  ;;  %v5405_v46 = vadd.f32 %v5271_v30, %v4957_v45  ;;  %v5406_v31 = vadd.f32 %v5271_v30, %v4958_v26 }
 0x5b2   : > { %v5391_v4 = vadd.f32 %v5236_v27, %v4943_v39  ;;  %v5392_v63 = vadd.f32 %v5236_v27, %v4944_v19 }
 0x5b3   : > { %5533 = vst [vmem:[%s10063_s5 + $0x3d0] sm:$0xff] %v5405_v46  ;;  %5534 = vst.msk [vmem:[%s10063_s5 + $0x3d8] sm:$0xff] %vm2847_vm1, %v5406_v31 }
 0x5b4   : > { %5519 = vst [vmem:[%s10063_s5 + $0x360] sm:$0xff] %v5391_v4  ;;  %5520 = vst.msk [vmem:[%s10063_s5 + $0x368] sm:$0xff] %vm2847_vm1, %v5392_v63  ;;  %v5281_v50 = vpop.permute.xlu0 %5280 }
 0x5b5   : > { %v5246_v58 = vpop.permute.xlu1 %5245  ;;  %v5409_v44 = vadd.f32 %v5281_v50, %v4961_v33  ;;  %v5410_v28 = vadd.f32 %v5281_v50, %v4962_v13 }
 0x5b6   : > { %v5395_v20 = vadd.f32 %v5246_v58, %v4947_v57  ;;  %v5396_v49 = vadd.f32 %v5246_v58, %v4948_v0 }
 0x5b7   : > { %5537 = vst [vmem:[%s10063_s5 + $0x3f0] sm:$0xff] %v5409_v44  ;;  %5538 = vst.msk [vmem:[%s10063_s5 + $0x3f8] sm:$0xff] %vm2847_vm1, %v5410_v28 }
 0x5b8   : > { %5523 = vst [vmem:[%s10063_s5 + $0x380] sm:$0xff] %v5395_v20  ;;  %5524 = vst.msk [vmem:[%s10063_s5 + $0x388] sm:$0xff] %vm2847_vm1, %v5396_v49 }
 0x5b9   : > { %v5256_v15 = vpop.permute.xlu1 %5255 }
 0x5ba   : > { %v5399_v22 = vadd.f32 %v5256_v15, %v4951_v14  ;;  %v5400_v61 = vadd.f32 %v5256_v15, %v4952_v5 }
 0x5bc   : > { %5527 = vst [vmem:[%s10063_s5 + $0x3a0] sm:$0xff] %v5399_v22  ;;  %5528 = vst.msk [vmem:[%s10063_s5 + $0x3a8] sm:$0xff] %vm2847_vm1, %v5400_v61 }
 0x5bd   : > { %v5266_v41 = vpop.permute.xlu1 %5265 }
 0x5be   : > { %v5403_v38 = vadd.f32 %v5266_v41, %v4955_v10  ;;  %v5404_v42 = vadd.f32 %v5266_v41, %v4956_v56 }
 0x5c0   : > { %5531 = vst [vmem:[%s10063_s5 + $0x3c0] sm:$0xff] %v5403_v38  ;;  %5532 = vst.msk [vmem:[%s10063_s5 + $0x3c8] sm:$0xff] %vm2847_vm1, %v5404_v42 }
 0x5c1   : > { %v5276_v51 = vpop.permute.xlu1 %5275 }
 0x5c2   : > { %v5407_v8 = vadd.f32 %v5276_v51, %v4959_v25  ;;  %v5408_v24 = vadd.f32 %v5276_v51, %v4960_v43 }
 0x5c4   : > { %5535 = vst [vmem:[%s10063_s5 + $0x3e0] sm:$0xff] %v5407_v8  ;;  %5536 = vst.msk [vmem:[%s10063_s5 + $0x3e8] sm:$0xff] %vm2847_vm1, %v5408_v24 }
 0x5c5 PF: > { %p12_p11 = scmp.ge.s32.totalorder %s6105_s22, 4   ;;  %s10597_s18 = smov %s6048_s19 }
 0x5c6   : > { %s10598_s19 = smov %s6114_s25  ;;  %s10599_s20 = smov %s6105_s22 }
 0x5c7   :  { %14 = sbr.rel (!%p12_p11) target bundleno = 2 (0x2), region = 108 }

</bundles_post_ra>
